<compile_context>
chip_gen: v6e
topology: v6e:2x2x1
jax: 0.10.0
libtpu: 0.0.40
codegen_flags: <defaults>
</compile_context>

<pallas_src>
import functools

import numpy as np
import jax
import jax.numpy as jnp
from jax.experimental import pallas as pl
from jax.experimental.pallas import tpu as pltpu

BN_EPS = 1e-5
LANE = 128           # lane width; only the two *output* N dims are padded to it
NEG_BIG = -1e30      # masked-lane fill for log_softmax (kept in f32 on purpose)


def _vmem():
    return pl.BlockSpec(memory_space=pltpu.MemorySpace.VMEM)


def _round_up(n, m):
    return ((n + m - 1) // m) * m


# ----------------------------------------------------------------------------
# Pallas kernels
# ----------------------------------------------------------------------------

def _stn_mlp_kernel(x_ref, w1_ref, s1_ref, w2_ref, s2_ref, w3_ref, s3_ref, o_ref):
    """fc_stn: 3 fused linears + LeakyReLU(0.2); bias/BN folded; bf16 matmuls,
    f32 accumulation and elementwise math."""
    f32, bf16 = jnp.float32, jnp.bfloat16
    h = jnp.dot(x_ref[...], w1_ref[...], preferred_element_type=f32) + s1_ref[...]
    h = jnp.where(h > 0.0, h, 0.2 * h)
    h = jnp.dot(h.astype(bf16), w2_ref[...], preferred_element_type=f32) + s2_ref[...]
    h = jnp.where(h > 0.0, h, 0.2 * h)
    o_ref[...] = jnp.dot(h.astype(bf16), w3_ref[...], preferred_element_type=f32) + s3_ref[...]


def stn_mlp(xp, w1, s1, w2, s2, w3, s3):
    M = xp.shape[0]
    N = w3.shape[1]
    flops = 2 * M * (w1.shape[0] * w1.shape[1]
                     + w2.shape[0] * w2.shape[1]
                     + w3.shape[0] * w3.shape[1])
    nbytes = sum(int(a.size) * a.dtype.itemsize
                 for a in (xp, w1, s1, w2, s2, w3, s3)) + M * N * 4
    return pl.pallas_call(
        _stn_mlp_kernel,
        out_shape=jax.ShapeDtypeStruct((M, N), jnp.float32),
        in_specs=[_vmem()] * 7,
        out_specs=_vmem(),
        cost_estimate=pl.CostEstimate(flops=flops, transcendentals=0,
                                      bytes_accessed=nbytes),
    )(xp, w1, s1, w2, s2, w3, s3)


def _conv_head_kernel(pc_ref, g2_ref, g3_ref,
                      c1w_ref, c1s_ref, c2w_ref, c2s_ref, c3w_ref, c3s_ref,
                      c4w_ref, c4s_ref, d1w_ref, d1s_ref, d2w_ref, d2s_ref,
                      d3w_ref, d3s_ref,
                      logp_ref, z_ref, h3_scr, *, n_cls, batch):
    """Entire post-STN network in one VMEM-resident kernel.

    Activations use row order (spatial, batch) with batch fastest; the 0/1
    selection matrices g2/g3 (one per 3x3 tap, batch-block structure baked in)
    perform the stride-2 / pad-1 im2col gather on the MXU, so the whole conv
    stack is matmuls + adds + ReLU only."""
    f32, bf16 = jnp.float32, jnp.bfloat16

    # conv1 (3x3 s2 p1): im2col patches were built in the wrapper.
    h1 = jnp.dot(pc_ref[...], c1w_ref[...], preferred_element_type=f32) + c1s_ref[...]
    h1 = jnp.maximum(h1, 0.0).astype(bf16)                       # (196*B, nh)

    # conv2 (3x3 s2 p1): 9 in-kernel gather matmuls + per-tap channel matmuls.
    n_taps = g2_ref.shape[0]
    acc = None
    for t in range(n_taps):
        tap = jnp.dot(g2_ref[t], h1, preferred_element_type=f32).astype(bf16)   # exact select
        c = jnp.dot(tap, c2w_ref[t], preferred_element_type=f32)
        acc = c if acc is None else acc + c
    h2 = jnp.maximum(acc + c2s_ref[...], 0.0).astype(bf16)       # (49*B, nh)

    # conv3 (3x3 s2 p1)
    acc = None
    for t in range(n_taps):
        tap = jnp.dot(g3_ref[t], h2, preferred_element_type=f32).astype(bf16)
        c = jnp.dot(tap, c3w_ref[t], preferred_element_type=f32)
        acc = c if acc is None else acc + c
    h3_scr[...] = jnp.maximum(acc + c3s_ref[...], 0.0)           # (16*B, nh) f32 scratch

    # conv4 (4x4 valid -> 1x1): sum over the 16 spatial positions with M=B rows.
    n_pos = c4w_ref.shape[0]
    zacc = None
    for sp in range(n_pos):
        rows = h3_scr[pl.ds(sp * batch, batch), :].astype(bf16)  # (B, nh)
        c = jnp.dot(rows, c4w_ref[sp], preferred_element_type=f32)
        zacc = c if zacc is None else zacc + c
    z = jnp.maximum(zacc + c4s_ref[...], 0.0)                    # (B, nz) f32
    z_ref[...] = z

    # fc_pred head: (1x1 conv + BN + ReLU) x2, Linear(nh, 10), log_softmax.
    h = jnp.dot(z.astype(bf16), d1w_ref[...], preferred_element_type=f32) + d1s_ref[...]
    h = jnp.maximum(h, 0.0)
    h = jnp.dot(h.astype(bf16), d2w_ref[...], preferred_element_type=f32) + d2s_ref[...]
    h = jnp.maximum(h, 0.0)
    y = jnp.dot(h.astype(bf16), d3w_ref[...], preferred_element_type=f32) + d3s_ref[...]

    lane = jax.lax.broadcasted_iota(jnp.int32, y.shape, 1)
    valid = lane < n_cls
    y = jnp.where(valid, y, NEG_BIG)                             # f32 masking (bf16-unsafe)
    m = jnp.max(y, axis=-1, keepdims=True)
    e = jnp.where(valid, jnp.exp(y - m), 0.0)
    lse = m + jnp.log(jnp.sum(e, axis=-1, keepdims=True))
    logp_ref[...] = jnp.where(valid, y - lse, 0.0)


def conv_head(prep, patches, *, batch, n_cls):
    nh = prep["c1_w"].shape[1]
    nz = prep["c4_w"].shape[2]
    n_logit = prep["p3_w"].shape[1]
    n_pos = prep["c4_w"].shape[0]
    p2, s2 = prep["g2"].shape[1], prep["g2"].shape[2]
    p3, s3 = prep["g3"].shape[1], prep["g3"].shape[2]

    flops = 2 * (patches.shape[0] * patches.shape[1] * nh
                 + 9 * (p2 * s2 * nh + p2 * nh * nh)
                 + 9 * (p3 * s3 * nh + p3 * nh * nh)
                 + n_pos * batch * nh * nz
                 + batch * (nz * nh + nh * nh + nh * n_logit))
    args = (patches, prep["g2"], prep["g3"],
            prep["c1_w"], prep["c1_s"], prep["c2_w"], prep["c2_s"],
            prep["c3_w"], prep["c3_s"], prep["c4_w"], prep["c4_s"],
            prep["p1_w"], prep["p1_s"], prep["p2_w"], prep["p2_s"],
            prep["p3_w"], prep["p3_s"])
    nbytes = sum(int(a.size) * a.dtype.itemsize for a in args) \
        + batch * (n_logit + nz) * 4

    kernel = functools.partial(_conv_head_kernel, n_cls=n_cls, batch=batch)
    return pl.pallas_call(
        kernel,
        out_shape=(jax.ShapeDtypeStruct((batch, n_logit), jnp.float32),
                   jax.ShapeDtypeStruct((batch, nz), jnp.float32)),
        in_specs=[_vmem()] * len(args),
        out_specs=(_vmem(), _vmem()),
        scratch_shapes=[pltpu.VMEM((n_pos * batch, nh), jnp.float32)],
        cost_estimate=pl.CostEstimate(flops=flops,
                                      transcendentals=batch * n_logit,
                                      bytes_accessed=nbytes),
    )(*args)


# ----------------------------------------------------------------------------
# One-time parameter prep: fold BN/bias, per-tap weights, bf16, selection mats
# ----------------------------------------------------------------------------

def bn_affine(bn, eps=BN_EPS):
    gamma, beta, rm, rv = bn
    scale = gamma / jnp.sqrt(rv + eps)
    shift = beta - rm * scale
    return scale, shift


def _fold_linear(w, b, bn, k_pad=None, n_pad=None):
    """(K,N) linear (+ optional following BN(eval)) -> bf16 (k_pad,n_pad), f32 (1,n_pad)."""
    w = w.astype(jnp.float32)
    s = b.astype(jnp.float32)
    if bn is not None:
        scale, shift = bn_affine(bn)
        w = w * scale
        s = s * scale + shift
    K, N = w.shape
    kp = k_pad or K
    npd = n_pad or N
    wp = jnp.zeros((kp, npd), jnp.float32).at[:K, :N].set(w)
    sp = jnp.zeros((1, npd), jnp.float32).at[0, :N].set(s)
    return wp.astype(jnp.bfloat16), sp


def _fold_conv_taps(w_torch, b, bn):
    """torch (Cout,Cin,kh,kw) conv (+ optional BN(eval)) ->
    per-tap weights (kh*kw, Cin, Cout) f32 + shift (1, Cout) f32."""
    Cout, Cin, kh, kw = w_torch.shape
    w = jnp.transpose(w_torch, (2, 3, 1, 0)).astype(jnp.float32)   # (kh,kw,Cin,Cout)
    s = b.astype(jnp.float32)
    if bn is not None:
        scale, shift = bn_affine(bn)
        w = w * scale
        s = s * scale + shift
    return w.reshape(kh * kw, Cin, Cout), s.reshape(1, Cout)


def _make_sel(hin, win, ho, wo, batch, ksize=3, stride=2, pad=1):
    """0/1 selection matrices for an in-kernel stride-2/pad-1 im2col gather.
    g[t, p*B+b, s*B+b] = 1 iff output position p reads input position s at tap t
    (zero rows encode the zero padding border).  Built once at prep time."""
    g = np.zeros((ksize * ksize, ho * wo * batch, hin * win * batch), np.float32)
    for di in range(ksize):
        for dj in range(ksize):
            t = di * ksize + dj
            for oi in range(ho):
                ii = stride * oi + di - pad
                if ii < 0 or ii >= hin:
                    continue
                for oj in range(wo):
                    jj = stride * oj + dj - pad
                    if jj < 0 or jj >= win:
                        continue
                    p = oi * wo + oj
                    s = ii * win + jj
                    for b in range(batch):
                        g[t, p * batch + b, s * batch + b] = 1.0
    return jnp.asarray(g, dtype=jnp.bfloat16)


def prepare_params(p, batch):
    """Fold bias/BN into weights, build per-tap conv weights at the real channel
    width (no 128-lane K padding), cast matmul operands to bf16, and bake the
    in-kernel im2col selection matrices.  Done once."""
    prep = {}
    # fc_stn: Linear(785,nh)+Leaky, Linear(nh,nh)+BN+Leaky, Linear(nh,3)
    k0 = _round_up(1 + 28 * 28, LANE)                              # 785 -> 896
    prep["stn_w1"], prep["stn_s1"] = _fold_linear(p["stn_w1"], p["stn_b1"], None, k_pad=k0)
    prep["stn_w2"], prep["stn_s2"] = _fold_linear(p["stn_w2"], p["stn_b2"], p["stn_bn"])
    prep["stn_w3"], prep["stn_s3"] = _fold_linear(p["stn_w3"], p["stn_b3"], None, n_pad=LANE)

    # conv stack: per-tap (Cin, Cout) weights at real nh channels
    c1w, prep["c1_s"] = _fold_conv_taps(p["c1_w"], p["c1_b"], p["c1_bn"])   # (9,1,nh)
    nh = c1w.shape[-1]
    c1w2d = c1w.reshape(9, nh)
    prep["c1_w"] = (jnp.zeros((16, nh), jnp.float32).at[:9].set(c1w2d)      # pad K 9->16
                    .astype(jnp.bfloat16))
    c2w, prep["c2_s"] = _fold_conv_taps(p["c2_w"], p["c2_b"], p["c2_bn"])   # (9,nh,nh)
    prep["c2_w"] = c2w.astype(jnp.bfloat16)
    c3w, prep["c3_s"] = _fold_conv_taps(p["c3_w"], p["c3_b"], p["c3_bn"])
    prep["c3_w"] = c3w.astype(jnp.bfloat16)
    c4w, prep["c4_s"] = _fold_conv_taps(p["c4_w"], p["c4_b"], None)         # (16,nh,nz)
    prep["c4_w"] = c4w.astype(jnp.bfloat16)

    # fc_pred 1x1 convs (== linears) + final Linear(nh, 10) (N padded to 128)
    prep["p1_w"], prep["p1_s"] = _fold_linear(p["p1_w"], p["p1_b"], p["p1_bn"])
    prep["p2_w"], prep["p2_s"] = _fold_linear(p["p2_w"], p["p2_b"], p["p2_bn"])
    prep["p3_w"], prep["p3_s"] = _fold_linear(p["p3_w"], p["p3_b"], None, n_pad=LANE)

    # in-kernel im2col selection matrices (conv2: 14x14 -> 7x7, conv3: 7x7 -> 4x4)
    prep["g2"] = _make_sel(14, 14, 7, 7, batch)
    prep["g3"] = _make_sel(7, 7, 4, 4, batch)
    return prep


# ----------------------------------------------------------------------------
# JAX glue: conv1 im2col, STN geometry (symeig + affine_grid + grid_sample)
# ----------------------------------------------------------------------------

def im2col_nhwc(x, kh, kw, stride, pad):
    """x: (B,H,W,C) -> ((B, Ho*Wo, kh*kw*C), Ho, Wo); tap order (di, dj, c)."""
    B, H, W, C = x.shape
    xp = jnp.pad(x, ((0, 0), (pad, pad), (pad, pad), (0, 0)))
    Ho = (H + 2 * pad - kh) // stride + 1
    Wo = (W + 2 * pad - kw) // stride + 1
    cols = []
    for di in range(kh):
        for dj in range(kw):
            cols.append(xp[:, di:di + stride * (Ho - 1) + 1:stride,
                           dj:dj + stride * (Wo - 1) + 1:stride, :])
    patches = jnp.concatenate(cols, axis=-1)
    return patches.reshape(B, Ho * Wo, kh * kw * C), Ho, Wo


def affine_grid_sample_1ch(img, theta):
    """F.affine_grid + F.grid_sample (bilinear, zeros, align_corners=False) on a
    single-channel image; all 4 bilinear corners fetched with ONE gather."""
    # TODO(synk): data-dependent bilinear gather kept in plain JAX (28x28 images;
    #             no clean Pallas TPU gather win at this size).
    B, H, W = img.shape
    xs = 2.0 * (jnp.arange(W, dtype=jnp.float32) + 0.5) / W - 1.0
    ys = 2.0 * (jnp.arange(H, dtype=jnp.float32) + 0.5) / H - 1.0
    gx, gy = jnp.meshgrid(xs, ys)                              # (H, W)
    base = jnp.stack([gx, gy, jnp.ones_like(gx)], axis=-1)     # (H, W, 3)
    grid = jnp.einsum("bij,hwj->bhwi", theta, base)            # (B, H, W, 2)
    ix = ((grid[..., 0] + 1.0) * W - 1.0) * 0.5
    iy = ((grid[..., 1] + 1.0) * H - 1.0) * 0.5
    x0 = jnp.floor(ix); x1 = x0 + 1.0
    y0 = jnp.floor(iy); y1 = y0 + 1.0
    wx1 = ix - x0; wx0 = 1.0 - wx1
    wy1 = iy - y0; wy0 = 1.0 - wy1

    cx = jnp.stack([x0, x1, x0, x1], axis=1)                   # (B, 4, H, W)
    cy = jnp.stack([y0, y0, y1, y1], axis=1)
    cw = jnp.stack([wx0 * wy0, wx1 * wy0, wx0 * wy1, wx1 * wy1], axis=1)
    valid = (cx >= 0) & (cx <= W - 1) & (cy >= 0) & (cy <= H - 1)
    xi = jnp.clip(cx, 0, W - 1).astype(jnp.int32)
    yi = jnp.clip(cy, 0, H - 1).astype(jnp.int32)
    idx = (yi * W + xi).reshape(B, 4 * H * W)
    flat = img.reshape(B, H * W)
    vals = jnp.take_along_axis(flat, idx, axis=1).reshape(B, 4, H, W)
    vals = vals * valid.astype(img.dtype) * cw
    return jnp.sum(vals, axis=1)


def symeig_2x2_min_eigvec(A_vec):
    """Closed-form replacement for torch.symeig on the 2x2 symmetric matrix built
    by convert_Avec_to_A; returns (cos, sin) of the smallest-eigenvalue vector."""
    # TODO(synk): eigenvector sign convention may differ from LAPACK/torch.symeig
    #             (eigenvectors are only defined up to sign).
    a, b, c = A_vec[:, 0], A_vec[:, 1], A_vec[:, 2]
    half = 0.5 * (a + c)
    disc = jnp.sqrt((0.5 * (a - c)) ** 2 + b * b)
    lam = half - disc
    use_b = jnp.abs(b) > 1e-12
    v0 = jnp.where(use_b, b, jnp.where(a <= c, 1.0, 0.0))
    v1 = jnp.where(use_b, lam - a, jnp.where(a <= c, 0.0, 1.0))
    nrm = jnp.sqrt(v0 * v0 + v1 * v1)
    return v0 / nrm, v1 / nrm


# ----------------------------------------------------------------------------
# ADDA forward (EncoderSTN forward + argmax; netD is not used in forward())
# ----------------------------------------------------------------------------

def adda_forward(prep, x, u, *, n_cls=10):
    """x: (B,1,28,28) NCHW (torch layout), u: (B,).
    Returns (log_softmax(y), x_aligned, z, argmax) matching ADDA.forward()."""
    B = x.shape[0]
    img = x.reshape(B, 28, 28).astype(jnp.float32)

    # ---- fc_stn: one fused Pallas MLP kernel ----
    k0 = prep["stn_w1"].shape[0]
    stn_in = jnp.concatenate(
        [u[:, None].astype(jnp.float32), img.reshape(B, 28 * 28),
         jnp.zeros((B, k0 - (1 + 28 * 28)), jnp.float32)], axis=1).astype(jnp.bfloat16)
    a_pad = stn_mlp(stn_in, prep["stn_w1"], prep["stn_s1"],
                    prep["stn_w2"], prep["stn_s2"],
                    prep["stn_w3"], prep["stn_s3"])
    A_vec = a_pad[:, :3]

    # ---- STN geometry: convert_Avec_to_A + symeig + affine_grid + grid_sample
    tcos, tsin = symeig_2x2_min_eigvec(A_vec)
    zero = jnp.zeros_like(tcos)
    theta = jnp.stack([jnp.stack([tcos, tsin, zero], axis=1),
                       jnp.stack([-tsin, tcos, zero], axis=1)], axis=1)   # (B,2,3)
    img_a = affine_grid_sample_1ch(img, theta)                            # (B,28,28)

    # ---- conv1 im2col (the only patch build outside the fused kernel) ----
    # Row order (spatial, batch) so the in-kernel selection matrices line up.
    patches, Ho, Wo = im2col_nhwc(img_a[..., None], 3, 3, 2, 1)   # (B, 196, 9)
    patches = jnp.transpose(patches, (1, 0, 2)).reshape(Ho * Wo * B, 9)
    k1 = prep["c1_w"].shape[0]
    patches = jnp.pad(patches, ((0, 0), (0, k1 - 9))).astype(jnp.bfloat16)

    # ---- the whole conv stack + head in ONE fused Pallas kernel ----
    logp_pad, z = conv_head(prep, patches, batch=B, n_cls=n_cls)

    nz = z.shape[1]
    logp = logp_pad[:, :n_cls]                                    # (B, 10)
    g = jnp.argmax(logp, axis=1)                                  # argmax on tiny slab
    x_align = img_a.reshape(B, 1, 28, 28)
    return logp, x_align, z.reshape(B, nz, 1, 1), g


# ----------------------------------------------------------------------------
# Deterministic parameter init (shapes from EncoderSTN.__init__ + init_weight_STN)
# ----------------------------------------------------------------------------

def init_params(key, nh=32, nz=16):
    keys = iter(jax.random.split(key, 64))

    def nrm(shape, std=0.05):
        return (std * jax.random.normal(next(keys), shape)).astype(jnp.float32)

    def bn(n):
        gamma = 1.0 + nrm((n,), 0.1)
        beta = nrm((n,), 0.1)
        rm = nrm((n,), 0.1)
        rv = 1.0 + jnp.abs(nrm((n,), 0.1))
        return gamma, beta, rm, rv

    p = {}
    # fc_stn: Linear(1+784, nh), LeakyReLU(0.2), Dropout, Linear(nh, nh),
    #         BatchNorm1d(nh), LeakyReLU(0.2), Dropout, Linear(nh, 3)
    p["stn_w1"] = nrm((1 + 28 * 28, nh)); p["stn_b1"] = nrm((nh,))
    # init_weight_STN: zero second Linear weight/bias, zero last Linear weight,
    # last bias = [1-0.01, 0.01, 1-0.01].
    p["stn_w2"] = jnp.zeros((nh, nh), jnp.float32)
    p["stn_b2"] = jnp.zeros((nh,), jnp.float32)
    p["stn_bn"] = bn(nh)
    p["stn_w3"] = jnp.zeros((nh, 3), jnp.float32)
    p["stn_b3"] = jnp.array([1 - 0.01, 0.01, 1 - 0.01], jnp.float32)
    # conv stack (torch Conv2d weight layout (Cout, Cin, kh, kw))
    p["c1_w"] = nrm((nh, 1, 3, 3));  p["c1_b"] = nrm((nh,)); p["c1_bn"] = bn(nh)
    p["c2_w"] = nrm((nh, nh, 3, 3)); p["c2_b"] = nrm((nh,)); p["c2_bn"] = bn(nh)
    p["c3_w"] = nrm((nh, nh, 3, 3)); p["c3_b"] = nrm((nh,)); p["c3_bn"] = bn(nh)
    p["c4_w"] = nrm((nz, nh, 4, 4)); p["c4_b"] = nrm((nz,))
    # fc_pred: Conv(nz,nh,1)+BN+ReLU, Conv(nh,nh,1)+BN+ReLU, Squeeze, Linear(nh,10)
    p["p1_w"] = nrm((nz, nh)); p["p1_b"] = nrm((nh,)); p["p1_bn"] = bn(nh)
    p["p2_w"] = nrm((nh, nh)); p["p2_b"] = nrm((nh,)); p["p2_bn"] = bn(nh)
    p["p3_w"] = nrm((nh, 10)); p["p3_b"] = nrm((10,))
    return p


if __name__ == "__main__":
    key = jax.random.PRNGKey(0)
    kp, kx, ku = jax.random.split(key, 3)
    # Small shapes consistent with the module: B=2, 1x28x28 images, u in [0,1).
    # (28x28 is required by the architecture: fc_stn's 784-dim input and the
    #  final 4x4 valid conv; hidden widths shrunk to nh=32, nz=16.)
    B, nh, nz = 2, 32, 16
    params = init_params(kp, nh=nh, nz=nz)
    prep = prepare_params(params, batch=B)       # fold/pad/bf16 weights + sel mats once
    x = jax.random.normal(kx, (B, 1, 28, 28), jnp.float32)
    u = jax.random.uniform(ku, (B,), jnp.float32)

    fwd = jax.jit(adda_forward)
    f, x_align, e, g = fwd(prep, x, u)
    jax.block_until_ready((f, x_align, e, g))

    assert f.shape == (B, 10) and f.dtype == jnp.float32
    assert x_align.shape == (B, 1, 28, 28)
    assert e.shape == (B, nz, 1, 1)
    assert g.shape == (B,)
    # log_softmax rows must sum to ~1 in prob space
    assert jnp.allclose(jnp.sum(jnp.exp(f), axis=1), 1.0, atol=1e-3)
    print("KERNEL_OK")
</pallas_src>

<mosaic_0001>
module attributes {stable_mosaic.version = 11 : i64} {
  func.func @_stn_mlp_kernel(%arg0: memref<2x896xbf16, #tpu.memory_space<vmem>>, %arg1: memref<896x32xbf16, #tpu.memory_space<vmem>>, %arg2: memref<1x32xf32, #tpu.memory_space<vmem>>, %arg3: memref<32x32xbf16, #tpu.memory_space<vmem>>, %arg4: memref<1x32xf32, #tpu.memory_space<vmem>>, %arg5: memref<32x128xbf16, #tpu.memory_space<vmem>>, %arg6: memref<1x128xf32, #tpu.memory_space<vmem>>, %arg7: memref<2x128xf32, #tpu.memory_space<vmem>>) attributes {dimension_semantics = [], scalar_prefetch = 0 : i64, scratch_operands = 0 : i64, tpu.core_type = #tpu.core_type<tc>} {
    %c0 = arith.constant 0 : index
    %c0_0 = arith.constant 0 : index
    %0 = vector.load %arg0[%c0, %c0_0] : memref<2x896xbf16, #tpu.memory_space<vmem>>, vector<2x896xbf16>
    %c0_1 = arith.constant 0 : index
    %c0_2 = arith.constant 0 : index
    %1 = vector.load %arg1[%c0_1, %c0_2] : memref<896x32xbf16, #tpu.memory_space<vmem>>, vector<896x32xbf16>
    %cst = arith.constant dense<0.000000e+00> : vector<2x32xf32>
    %2 = tpu.matmul %0, %1, %cst {dimension_numbers = #tpu.dot_dimension_numbers<[1], [0], [0], [1], [0, 0, 1, 1], [], []>} : vector<2x896xbf16>, vector<896x32xbf16>, vector<2x32xf32> -> vector<2x32xf32>
    %c0_3 = arith.constant 0 : index
    %c0_4 = arith.constant 0 : index
    %3 = vector.load %arg2[%c0_3, %c0_4] : memref<1x32xf32, #tpu.memory_space<vmem>>, vector<1x32xf32>
    %4 = vector.broadcast %3 : vector<1x32xf32> to vector<2x32xf32>
    %5 = arith.addf %2, %4 : vector<2x32xf32>
    %cst_5 = arith.constant 0.000000e+00 : f32
    %6 = vector.broadcast %cst_5 : f32 to vector<2x32xf32>
    %7 = arith.cmpf ogt, %5, %6 : vector<2x32xf32>
    %cst_6 = arith.constant 2.000000e-01 : f32
    %8 = vector.broadcast %cst_6 : f32 to vector<2x32xf32>
    %9 = arith.mulf %8, %5 : vector<2x32xf32>
    %10 = arith.select %7, %5, %9 : vector<2x32xi1>, vector<2x32xf32>
    %11 = arith.truncf %10 : vector<2x32xf32> to vector<2x32xbf16>
    %c0_7 = arith.constant 0 : index
    %c0_8 = arith.constant 0 : index
    %12 = vector.load %arg3[%c0_7, %c0_8] : memref<32x32xbf16, #tpu.memory_space<vmem>>, vector<32x32xbf16>
    %cst_9 = arith.constant dense<0.000000e+00> : vector<2x32xf32>
    %13 = tpu.matmul %11, %12, %cst_9 {dimension_numbers = #tpu.dot_dimension_numbers<[1], [0], [0], [1], [0, 0, 1, 1], [], []>} : vector<2x32xbf16>, vector<32x32xbf16>, vector<2x32xf32> -> vector<2x32xf32>
    %c0_10 = arith.constant 0 : index
    %c0_11 = arith.constant 0 : index
    %14 = vector.load %arg4[%c0_10, %c0_11] : memref<1x32xf32, #tpu.memory_space<vmem>>, vector<1x32xf32>
    %15 = vector.broadcast %14 : vector<1x32xf32> to vector<2x32xf32>
    %16 = arith.addf %13, %15 : vector<2x32xf32>
    %cst_12 = arith.constant 0.000000e+00 : f32
    %17 = vector.broadcast %cst_12 : f32 to vector<2x32xf32>
    %18 = arith.cmpf ogt, %16, %17 : vector<2x32xf32>
    %cst_13 = arith.constant 2.000000e-01 : f32
    %19 = vector.broadcast %cst_13 : f32 to vector<2x32xf32>
    %20 = arith.mulf %19, %16 : vector<2x32xf32>
    %21 = arith.select %18, %16, %20 : vector<2x32xi1>, vector<2x32xf32>
    %22 = arith.truncf %21 : vector<2x32xf32> to vector<2x32xbf16>
    %c0_14 = arith.constant 0 : index
    %c0_15 = arith.constant 0 : index
    %23 = vector.load %arg5[%c0_14, %c0_15] : memref<32x128xbf16, #tpu.memory_space<vmem>>, vector<32x128xbf16>
    %cst_16 = arith.constant dense<0.000000e+00> : vector<2x128xf32>
    %24 = tpu.matmul %22, %23, %cst_16 {dimension_numbers = #tpu.dot_dimension_numbers<[1], [0], [0], [1], [0, 0, 1, 1], [], []>} : vector<2x32xbf16>, vector<32x128xbf16>, vector<2x128xf32> -> vector<2x128xf32>
    %c0_17 = arith.constant 0 : index
    %c0_18 = arith.constant 0 : index
    %25 = vector.load %arg6[%c0_17, %c0_18] : memref<1x128xf32, #tpu.memory_space<vmem>>, vector<1x128xf32>
    %26 = vector.broadcast %25 : vector<1x128xf32> to vector<2x128xf32>
    %27 = arith.addf %24, %26 : vector<2x128xf32>
    %c0_19 = arith.constant 0 : index
    %c0_20 = arith.constant 0 : index
    %28 = vector.load %arg7[%c0_19, %c0_20] : memref<2x128xf32, #tpu.memory_space<vmem>>, vector<2x128xf32>
    tpu.vector_store %arg7[%c0_19, %c0_20], %27 {strides = array<i32>} : memref<2x128xf32, #tpu.memory_space<vmem>>, vector<2x128xf32>,
    return
  }
}

module attributes {stable_mosaic.version = 11 : i64} {
  func.func @_conv_head_kernel(%arg0: memref<392x16xbf16, #tpu.memory_space<vmem>>, %arg1: memref<9x98x392xbf16, #tpu.memory_space<vmem>>, %arg2: memref<9x32x98xbf16, #tpu.memory_space<vmem>>, %arg3: memref<16x32xbf16, #tpu.memory_space<vmem>>, %arg4: memref<1x32xf32, #tpu.memory_space<vmem>>, %arg5: memref<9x32x32xbf16, #tpu.memory_space<vmem>>, %arg6: memref<1x32xf32, #tpu.memory_space<vmem>>, %arg7: memref<9x32x32xbf16, #tpu.memory_space<vmem>>, %arg8: memref<1x32xf32, #tpu.memory_space<vmem>>, %arg9: memref<16x32x16xbf16, #tpu.memory_space<vmem>>, %arg10: memref<1x16xf32, #tpu.memory_space<vmem>>, %arg11: memref<16x32xbf16, #tpu.memory_space<vmem>>, %arg12: memref<1x32xf32, #tpu.memory_space<vmem>>, %arg13: memref<32x32xbf16, #tpu.memory_space<vmem>>, %arg14: memref<1x32xf32, #tpu.memory_space<vmem>>, %arg15: memref<32x128xbf16, #tpu.memory_space<vmem>>, %arg16: memref<1x128xf32, #tpu.memory_space<vmem>>, %arg17: memref<2x128xf32, #tpu.memory_space<vmem>>, %arg18: memref<2x16xf32, #tpu.memory_space<vmem>>, %arg19: memref<32x32xf32, #tpu.memory_space<vmem>>) attributes {dimension_semantics = [], scalar_prefetch = 0 : i64, scratch_operands = 1 : i64, tpu.core_type = #tpu.core_type<tc>} {
    %c0 = arith.constant 0 : index
    %c0_0 = arith.constant 0 : index
    %0 = vector.load %arg0[%c0, %c0_0] : memref<392x16xbf16, #tpu.memory_space<vmem>>, vector<392x16xbf16>
    %c0_1 = arith.constant 0 : index
    %c0_2 = arith.constant 0 : index
    %1 = vector.load %arg3[%c0_1, %c0_2] : memref<16x32xbf16, #tpu.memory_space<vmem>>, vector<16x32xbf16>
    %cst = arith.constant dense<0.000000e+00> : vector<392x32xf32>
    %2 = tpu.matmul %0, %1, %cst {dimension_numbers = #tpu.dot_dimension_numbers<[1], [0], [0], [1], [0, 0, 1, 1], [], []>} : vector<392x16xbf16>, vector<16x32xbf16>, vector<392x32xf32> -> vector<392x32xf32>
    %c0_3 = arith.constant 0 : index
    %c0_4 = arith.constant 0 : index
    %3 = vector.load %arg4[%c0_3, %c0_4] : memref<1x32xf32, #tpu.memory_space<vmem>>, vector<1x32xf32>
    %4 = vector.broadcast %3 : vector<1x32xf32> to vector<392x32xf32>
    %5 = arith.addf %2, %4 : vector<392x32xf32>
    %cst_5 = arith.constant 0.000000e+00 : f32
    %6 = vector.broadcast %cst_5 : f32 to vector<392x32xf32>
    %7 = arith.maximumf %5, %6 : vector<392x32xf32>
    %8 = arith.truncf %7 : vector<392x32xf32> to vector<392x32xbf16>
    %c0_6 = arith.constant 0 : index
    %c0_7 = arith.constant 0 : index
    %c0_8 = arith.constant 0 : index
    %9 = vector.load %arg1[%c0_6, %c0_7, %c0_8] : memref<9x98x392xbf16, #tpu.memory_space<vmem>>, vector<1x98x392xbf16>
    %10 = vector.shape_cast %9 : vector<1x98x392xbf16> to vector<98x392xbf16>
    %cst_9 = arith.constant dense<0.000000e+00> : vector<98x32xf32>
    %11 = tpu.matmul %10, %8, %cst_9 {dimension_numbers = #tpu.dot_dimension_numbers<[1], [0], [0], [1], [0, 0, 1, 1], [], []>} : vector<98x392xbf16>, vector<392x32xbf16>, vector<98x32xf32> -> vector<98x32xf32>
    %12 = arith.truncf %11 : vector<98x32xf32> to vector<98x32xbf16>
    %c0_10 = arith.constant 0 : index
    %c0_11 = arith.constant 0 : index
    %c0_12 = arith.constant 0 : index
    %13 = vector.load %arg5[%c0_10, %c0_11, %c0_12] : memref<9x32x32xbf16, #tpu.memory_space<vmem>>, vector<1x32x32xbf16>
    %14 = vector.shape_cast %13 : vector<1x32x32xbf16> to vector<32x32xbf16>
    %cst_13 = arith.constant dense<0.000000e+00> : vector<98x32xf32>
    %15 = tpu.matmul %12, %14, %cst_13 {dimension_numbers = #tpu.dot_dimension_numbers<[1], [0], [0], [1], [0, 0, 1, 1], [], []>} : vector<98x32xbf16>, vector<32x32xbf16>, vector<98x32xf32> -> vector<98x32xf32>
    %c1 = arith.constant 1 : index
    %c0_14 = arith.constant 0 : index
    %c0_15 = arith.constant 0 : index
    %16 = vector.load %arg1[%c1, %c0_14, %c0_15] : memref<9x98x392xbf16, #tpu.memory_space<vmem>>, vector<1x98x392xbf16>
    %17 = vector.shape_cast %16 : vector<1x98x392xbf16> to vector<98x392xbf16>
    %cst_16 = arith.constant dense<0.000000e+00> : vector<98x32xf32>
    %18 = tpu.matmul %17, %8, %cst_16 {dimension_numbers = #tpu.dot_dimension_numbers<[1], [0], [0], [1], [0, 0, 1, 1], [], []>} : vector<98x392xbf16>, vector<392x32xbf16>, vector<98x32xf32> -> vector<98x32xf32>
    %19 = arith.truncf %18 : vector<98x32xf32> to vector<98x32xbf16>
    %c1_17 = arith.constant 1 : index
    %c0_18 = arith.constant 0 : index
    %c0_19 = arith.constant 0 : index
    %20 = vector.load %arg5[%c1_17, %c0_18, %c0_19] : memref<9x32x32xbf16, #tpu.memory_space<vmem>>, vector<1x32x32xbf16>
    %21 = vector.shape_cast %20 : vector<1x32x32xbf16> to vector<32x32xbf16>
    %cst_20 = arith.constant dense<0.000000e+00> : vector<98x32xf32>
    %22 = tpu.matmul %19, %21, %cst_20 {dimension_numbers = #tpu.dot_dimension_numbers<[1], [0], [0], [1], [0, 0, 1, 1], [], []>} : vector<98x32xbf16>, vector<32x32xbf16>, vector<98x32xf32> -> vector<98x32xf32>
    %23 = arith.addf %15, %22 : vector<98x32xf32>
    %c2 = arith.constant 2 : index
    %c0_21 = arith.constant 0 : index
    %c0_22 = arith.constant 0 : index
    %24 = vector.load %arg1[%c2, %c0_21, %c0_22] : memref<9x98x392xbf16, #tpu.memory_space<vmem>>, vector<1x98x392xbf16>
    %25 = vector.shape_cast %24 : vector<1x98x392xbf16> to vector<98x392xbf16>
    %cst_23 = arith.constant dense<0.000000e+00> : vector<98x32xf32>
    %26 = tpu.matmul %25, %8, %cst_23 {dimension_numbers = #tpu.dot_dimension_numbers<[1], [0], [0], [1], [0, 0, 1, 1], [], []>} : vector<98x392xbf16>, vector<392x32xbf16>, vector<98x32xf32> -> vector<98x32xf32>
    %27 = arith.truncf %26 : vector<98x32xf32> to vector<98x32xbf16>
    %c2_24 = arith.constant 2 : index
    %c0_25 = arith.constant 0 : index
    %c0_26 = arith.constant 0 : index
    %28 = vector.load %arg5[%c2_24, %c0_25, %c0_26] : memref<9x32x32xbf16, #tpu.memory_space<vmem>>, vector<1x32x32xbf16>
    %29 = vector.shape_cast %28 : vector<1x32x32xbf16> to vector<32x32xbf16>
    %cst_27 = arith.constant dense<0.000000e+00> : vector<98x32xf32>
    %30 = tpu.matmul %27, %29, %cst_27 {dimension_numbers = #tpu.dot_dimension_numbers<[1], [0], [0], [1], [0, 0, 1, 1], [], []>} : vector<98x32xbf16>, vector<32x32xbf16>, vector<98x32xf32> -> vector<98x32xf32>
    %31 = arith.addf %23, %30 : vector<98x32xf32>
    %c3 = arith.constant 3 : index
    %c0_28 = arith.constant 0 : index
    %c0_29 = arith.constant 0 : index
    %32 = vector.load %arg1[%c3, %c0_28, %c0_29] : memref<9x98x392xbf16, #tpu.memory_space<vmem>>, vector<1x98x392xbf16>
    %33 = vector.shape_cast %32 : vector<1x98x392xbf16> to vector<98x392xbf16>
    %cst_30 = arith.constant dense<0.000000e+00> : vector<98x32xf32>
    %34 = tpu.matmul %33, %8, %cst_30 {dimension_numbers = #tpu.dot_dimension_numbers<[1], [0], [0], [1], [0, 0, 1, 1], [], []>} : vector<98x392xbf16>, vector<392x32xbf16>, vector<98x32xf32> -> vector<98x32xf32>
    %35 = arith.truncf %34 : vector<98x32xf32> to vector<98x32xbf16>
    %c3_31 = arith.constant 3 : index
    %c0_32 = arith.constant 0 : index
    %c0_33 = arith.constant 0 : index
    %36 = vector.load %arg5[%c3_31, %c0_32, %c0_33] : memref<9x32x32xbf16, #tpu.memory_space<vmem>>, vector<1x32x32xbf16>
    %37 = vector.shape_cast %36 : vector<1x32x32xbf16> to vector<32x32xbf16>
    %cst_34 = arith.constant dense<0.000000e+00> : vector<98x32xf32>
    %38 = tpu.matmul %35, %37, %cst_34 {dimension_numbers = #tpu.dot_dimension_numbers<[1], [0], [0], [1], [0, 0, 1, 1], [], []>} : vector<98x32xbf16>, vector<32x32xbf16>, vector<98x32xf32> -> vector<98x32xf32>
    %39 = arith.addf %31, %38 : vector<98x32xf32>
    %c4 = arith.constant 4 : index
    %c0_35 = arith.constant 0 : index
    %c0_36 = arith.constant 0 : index
    %40 = vector.load %arg1[%c4, %c0_35, %c0_36] : memref<9x98x392xbf16, #tpu.memory_space<vmem>>, vector<1x98x392xbf16>
    %41 = vector.shape_cast %40 : vector<1x98x392xbf16> to vector<98x392xbf16>
    %cst_37 = arith.constant dense<0.000000e+00> : vector<98x32xf32>
    %42 = tpu.matmul %41, %8, %cst_37 {dimension_numbers = #tpu.dot_dimension_numbers<[1], [0], [0], [1], [0, 0, 1, 1], [], []>} : vector<98x392xbf16>, vector<392x32xbf16>, vector<98x32xf32> -> vector<98x32xf32>
    %43 = arith.truncf %42 : vector<98x32xf32> to vector<98x32xbf16>
    %c4_38 = arith.constant 4 : index
    %c0_39 = arith.constant 0 : index
    %c0_40 = arith.constant 0 : index
    %44 = vector.load %arg5[%c4_38, %c0_39, %c0_40] : memref<9x32x32xbf16, #tpu.memory_space<vmem>>, vector<1x32x32xbf16>
    %45 = vector.shape_cast %44 : vector<1x32x32xbf16> to vector<32x32xbf16>
    %cst_41 = arith.constant dense<0.000000e+00> : vector<98x32xf32>
    %46 = tpu.matmul %43, %45, %cst_41 {dimension_numbers = #tpu.dot_dimension_numbers<[1], [0], [0], [1], [0, 0, 1, 1], [], []>} : vector<98x32xbf16>, vector<32x32xbf16>, vector<98x32xf32> -> vector<98x32xf32>
    %47 = arith.addf %39, %46 : vector<98x32xf32>
    %c5 = arith.constant 5 : index
    %c0_42 = arith.constant 0 : index
    %c0_43 = arith.constant 0 : index
    %48 = vector.load %arg1[%c5, %c0_42, %c0_43] : memref<9x98x392xbf16, #tpu.memory_space<vmem>>, vector<1x98x392xbf16>
    %49 = vector.shape_cast %48 : vector<1x98x392xbf16> to vector<98x392xbf16>
    %cst_44 = arith.constant dense<0.000000e+00> : vector<98x32xf32>
    %50 = tpu.matmul %49, %8, %cst_44 {dimension_numbers = #tpu.dot_dimension_numbers<[1], [0], [0], [1], [0, 0, 1, 1], [], []>} : vector<98x392xbf16>, vector<392x32xbf16>, vector<98x32xf32> -> vector<98x32xf32>
    %51 = arith.truncf %50 : vector<98x32xf32> to vector<98x32xbf16>
    %c5_45 = arith.constant 5 : index
    %c0_46 = arith.constant 0 : index
    %c0_47 = arith.constant 0 : index
    %52 = vector.load %arg5[%c5_45, %c0_46, %c0_47] : memref<9x32x32xbf16, #tpu.memory_space<vmem>>, vector<1x32x32xbf16>
    %53 = vector.shape_cast %52 : vector<1x32x32xbf16> to vector<32x32xbf16>
    %cst_48 = arith.constant dense<0.000000e+00> : vector<98x32xf32>
    %54 = tpu.matmul %51, %53, %cst_48 {dimension_numbers = #tpu.dot_dimension_numbers<[1], [0], [0], [1], [0, 0, 1, 1], [], []>} : vector<98x32xbf16>, vector<32x32xbf16>, vector<98x32xf32> -> vector<98x32xf32>
    %55 = arith.addf %47, %54 : vector<98x32xf32>
    %c6 = arith.constant 6 : index
    %c0_49 = arith.constant 0 : index
    %c0_50 = arith.constant 0 : index
    %56 = vector.load %arg1[%c6, %c0_49, %c0_50] : memref<9x98x392xbf16, #tpu.memory_space<vmem>>, vector<1x98x392xbf16>
    %57 = vector.shape_cast %56 : vector<1x98x392xbf16> to vector<98x392xbf16>
    %cst_51 = arith.constant dense<0.000000e+00> : vector<98x32xf32>
    %58 = tpu.matmul %57, %8, %cst_51 {dimension_numbers = #tpu.dot_dimension_numbers<[1], [0], [0], [1], [0, 0, 1, 1], [], []>} : vector<98x392xbf16>, vector<392x32xbf16>, vector<98x32xf32> -> vector<98x32xf32>
    %59 = arith.truncf %58 : vector<98x32xf32> to vector<98x32xbf16>
    %c6_52 = arith.constant 6 : index
    %c0_53 = arith.constant 0 : index
    %c0_54 = arith.constant 0 : index
    %60 = vector.load %arg5[%c6_52, %c0_53, %c0_54] : memref<9x32x32xbf16, #tpu.memory_space<vmem>>, vector<1x32x32xbf16>
    %61 = vector.shape_cast %60 : vector<1x32x32xbf16> to vector<32x32xbf16>
    %cst_55 = arith.constant dense<0.000000e+00> : vector<98x32xf32>
    %62 = tpu.matmul %59, %61, %cst_55 {dimension_numbers = #tpu.dot_dimension_numbers<[1], [0], [0], [1], [0, 0, 1, 1], [], []>} : vector<98x32xbf16>, vector<32x32xbf16>, vector<98x32xf32> -> vector<98x32xf32>
    %63 = arith.addf %55, %62 : vector<98x32xf32>
    %c7 = arith.constant 7 : index
    %c0_56 = arith.constant 0 : index
    %c0_57 = arith.constant 0 : index
    %64 = vector.load %arg1[%c7, %c0_56, %c0_57] : memref<9x98x392xbf16, #tpu.memory_space<vmem>>, vector<1x98x392xbf16>
    %65 = vector.shape_cast %64 : vector<1x98x392xbf16> to vector<98x392xbf16>
    %cst_58 = arith.constant dense<0.000000e+00> : vector<98x32xf32>
    %66 = tpu.matmul %65, %8, %cst_58 {dimension_numbers = #tpu.dot_dimension_numbers<[1], [0], [0], [1], [0, 0, 1, 1], [], []>} : vector<98x392xbf16>, vector<392x32xbf16>, vector<98x32xf32> -> vector<98x32xf32>
    %67 = arith.truncf %66 : vector<98x32xf32> to vector<98x32xbf16>
    %c7_59 = arith.constant 7 : index
    %c0_60 = arith.constant 0 : index
    %c0_61 = arith.constant 0 : index
    %68 = vector.load %arg5[%c7_59, %c0_60, %c0_61] : memref<9x32x32xbf16, #tpu.memory_space<vmem>>, vector<1x32x32xbf16>
    %69 = vector.shape_cast %68 : vector<1x32x32xbf16> to vector<32x32xbf16>
    %cst_62 = arith.constant dense<0.000000e+00> : vector<98x32xf32>
    %70 = tpu.matmul %67, %69, %cst_62 {dimension_numbers = #tpu.dot_dimension_numbers<[1], [0], [0], [1], [0, 0, 1, 1], [], []>} : vector<98x32xbf16>, vector<32x32xbf16>, vector<98x32xf32> -> vector<98x32xf32>
    %71 = arith.addf %63, %70 : vector<98x32xf32>
    %c8 = arith.constant 8 : index
    %c0_63 = arith.constant 0 : index
    %c0_64 = arith.constant 0 : index
    %72 = vector.load %arg1[%c8, %c0_63, %c0_64] : memref<9x98x392xbf16, #tpu.memory_space<vmem>>, vector<1x98x392xbf16>
    %73 = vector.shape_cast %72 : vector<1x98x392xbf16> to vector<98x392xbf16>
    %cst_65 = arith.constant dense<0.000000e+00> : vector<98x32xf32>
    %74 = tpu.matmul %73, %8, %cst_65 {dimension_numbers = #tpu.dot_dimension_numbers<[1], [0], [0], [1], [0, 0, 1, 1], [], []>} : vector<98x392xbf16>, vector<392x32xbf16>, vector<98x32xf32> -> vector<98x32xf32>
    %75 = arith.truncf %74 : vector<98x32xf32> to vector<98x32xbf16>
    %c8_66 = arith.constant 8 : index
    %c0_67 = arith.constant 0 : index
    %c0_68 = arith.constant 0 : index
    %76 = vector.load %arg5[%c8_66, %c0_67, %c0_68] : memref<9x32x32xbf16, #tpu.memory_space<vmem>>, vector<1x32x32xbf16>
    %77 = vector.shape_cast %76 : vector<1x32x32xbf16> to vector<32x32xbf16>
    %cst_69 = arith.constant dense<0.000000e+00> : vector<98x32xf32>
    %78 = tpu.matmul %75, %77, %cst_69 {dimension_numbers = #tpu.dot_dimension_numbers<[1], [0], [0], [1], [0, 0, 1, 1], [], []>} : vector<98x32xbf16>, vector<32x32xbf16>, vector<98x32xf32> -> vector<98x32xf32>
    %79 = arith.addf %71, %78 : vector<98x32xf32>
    %c0_70 = arith.constant 0 : index
    %c0_71 = arith.constant 0 : index
    %80 = vector.load %arg6[%c0_70, %c0_71] : memref<1x32xf32, #tpu.memory_space<vmem>>, vector<1x32xf32>
    %81 = vector.broadcast %80 : vector<1x32xf32> to vector<98x32xf32>
    %82 = arith.addf %79, %81 : vector<98x32xf32>
    %cst_72 = arith.constant 0.000000e+00 : f32
    %83 = vector.broadcast %cst_72 : f32 to vector<98x32xf32>
    %84 = arith.maximumf %82, %83 : vector<98x32xf32>
    %85 = arith.truncf %84 : vector<98x32xf32> to vector<98x32xbf16>
    %c0_73 = arith.constant 0 : index
    %c0_74 = arith.constant 0 : index
    %c0_75 = arith.constant 0 : index
    %86 = vector.load %arg2[%c0_73, %c0_74, %c0_75] : memref<9x32x98xbf16, #tpu.memory_space<vmem>>, vector<1x32x98xbf16>
    %87 = vector.shape_cast %86 : vector<1x32x98xbf16> to vector<32x98xbf16>
    %cst_76 = arith.constant dense<0.000000e+00> : vector<32x32xf32>
    %88 = tpu.matmul %87, %85, %cst_76 {dimension_numbers = #tpu.dot_dimension_numbers<[1], [0], [0], [1], [0, 0, 1, 1], [], []>} : vector<32x98xbf16>, vector<98x32xbf16>, vector<32x32xf32> -> vector<32x32xf32>
    %89 = arith.truncf %88 : vector<32x32xf32> to vector<32x32xbf16>
    %c0_77 = arith.constant 0 : index
    %c0_78 = arith.constant 0 : index
    %c0_79 = arith.constant 0 : index
    %90 = vector.load %arg7[%c0_77, %c0_78, %c0_79] : memref<9x32x32xbf16, #tpu.memory_space<vmem>>, vector<1x32x32xbf16>
    %91 = vector.shape_cast %90 : vector<1x32x32xbf16> to vector<32x32xbf16>
    %cst_80 = arith.constant dense<0.000000e+00> : vector<32x32xf32>
    %92 = tpu.matmul %89, %91, %cst_80 {dimension_numbers = #tpu.dot_dimension_numbers<[1], [0], [0], [1], [0, 0, 1, 1], [], []>} : vector<32x32xbf16>, vector<32x32xbf16>, vector<32x32xf32> -> vector<32x32xf32>
    %c1_81 = arith.constant 1 : index
    %c0_82 = arith.constant 0 : index
    %c0_83 = arith.constant 0 : index
    %93 = vector.load %arg2[%c1_81, %c0_82, %c0_83] : memref<9x32x98xbf16, #tpu.memory_space<vmem>>, vector<1x32x98xbf16>
    %94 = vector.shape_cast %93 : vector<1x32x98xbf16> to vector<32x98xbf16>
    %cst_84 = arith.constant dense<0.000000e+00> : vector<32x32xf32>
    %95 = tpu.matmul %94, %85, %cst_84 {dimension_numbers = #tpu.dot_dimension_numbers<[1], [0], [0], [1], [0, 0, 1, 1], [], []>} : vector<32x98xbf16>, vector<98x32xbf16>, vector<32x32xf32> -> vector<32x32xf32>
    %96 = arith.truncf %95 : vector<32x32xf32> to vector<32x32xbf16>
    %c1_85 = arith.constant 1 : index
    %c0_86 = arith.constant 0 : index
    %c0_87 = arith.constant 0 : index
    %97 = vector.load %arg7[%c1_85, %c0_86, %c0_87] : memref<9x32x32xbf16, #tpu.memory_space<vmem>>, vector<1x32x32xbf16>
    %98 = vector.shape_cast %97 : vector<1x32x32xbf16> to vector<32x32xbf16>
    %cst_88 = arith.constant dense<0.000000e+00> : vector<32x32xf32>
    %99 = tpu.matmul %96, %98, %cst_88 {dimension_numbers = #tpu.dot_dimension_numbers<[1], [0], [0], [1], [0, 0, 1, 1], [], []>} : vector<32x32xbf16>, vector<32x32xbf16>, vector<32x32xf32> -> vector<32x32xf32>
    %100 = arith.addf %92, %99 : vector<32x32xf32>
    %c2_89 = arith.constant 2 : index
    %c0_90 = arith.constant 0 : index
    %c0_91 = arith.constant 0 : index
    %101 = vector.load %arg2[%c2_89, %c0_90, %c0_91] : memref<9x32x98xbf16, #tpu.memory_space<vmem>>, vector<1x32x98xbf16>
    %102 = vector.shape_cast %101 : vector<1x32x98xbf16> to vector<32x98xbf16>
    %cst_92 = arith.constant dense<0.000000e+00> : vector<32x32xf32>
    %103 = tpu.matmul %102, %85, %cst_92 {dimension_numbers = #tpu.dot_dimension_numbers<[1], [0], [0], [1], [0, 0, 1, 1], [], []>} : vector<32x98xbf16>, vector<98x32xbf16>, vector<32x32xf32> -> vector<32x32xf32>
    %104 = arith.truncf %103 : vector<32x32xf32> to vector<32x32xbf16>
    %c2_93 = arith.constant 2 : index
    %c0_94 = arith.constant 0 : index
    %c0_95 = arith.constant 0 : index
    %105 = vector.load %arg7[%c2_93, %c0_94, %c0_95] : memref<9x32x32xbf16, #tpu.memory_space<vmem>>, vector<1x32x32xbf16>
    %106 = vector.shape_cast %105 : vector<1x32x32xbf16> to vector<32x32xbf16>
    %cst_96 = arith.constant dense<0.000000e+00> : vector<32x32xf32>
    %107 = tpu.matmul %104, %106, %cst_96 {dimension_numbers = #tpu.dot_dimension_numbers<[1], [0], [0], [1], [0, 0, 1, 1], [], []>} : vector<32x32xbf16>, vector<32x32xbf16>, vector<32x32xf32> -> vector<32x32xf32>
    %108 = arith.addf %100, %107 : vector<32x32xf32>
    %c3_97 = arith.constant 3 : index
    %c0_98 = arith.constant 0 : index
    %c0_99 = arith.constant 0 : index
    %109 = vector.load %arg2[%c3_97, %c0_98, %c0_99] : memref<9x32x98xbf16, #tpu.memory_space<vmem>>, vector<1x32x98xbf16>
    %110 = vector.shape_cast %109 : vector<1x32x98xbf16> to vector<32x98xbf16>
    %cst_100 = arith.constant dense<0.000000e+00> : vector<32x32xf32>
    %111 = tpu.matmul %110, %85, %cst_100 {dimension_numbers = #tpu.dot_dimension_numbers<[1], [0], [0], [1], [0, 0, 1, 1], [], []>} : vector<32x98xbf16>, vector<98x32xbf16>, vector<32x32xf32> -> vector<32x32xf32>
    %112 = arith.truncf %111 : vector<32x32xf32> to vector<32x32xbf16>
    %c3_101 = arith.constant 3 : index
    %c0_102 = arith.constant 0 : index
    %c0_103 = arith.constant 0 : index
    %113 = vector.load %arg7[%c3_101, %c0_102, %c0_103] : memref<9x32x32xbf16, #tpu.memory_space<vmem>>, vector<1x32x32xbf16>
    %114 = vector.shape_cast %113 : vector<1x32x32xbf16> to vector<32x32xbf16>
    %cst_104 = arith.constant dense<0.000000e+00> : vector<32x32xf32>
    %115 = tpu.matmul %112, %114, %cst_104 {dimension_numbers = #tpu.dot_dimension_numbers<[1], [0], [0], [1], [0, 0, 1, 1], [], []>} : vector<32x32xbf16>, vector<32x32xbf16>, vector<32x32xf32> -> vector<32x32xf32>
    %116 = arith.addf %108, %115 : vector<32x32xf32>
    %c4_105 = arith.constant 4 : index
    %c0_106 = arith.constant 0 : index
    %c0_107 = arith.constant 0 : index
    %117 = vector.load %arg2[%c4_105, %c0_106, %c0_107] : memref<9x32x98xbf16, #tpu.memory_space<vmem>>, vector<1x32x98xbf16>
    %118 = vector.shape_cast %117 : vector<1x32x98xbf16> to vector<32x98xbf16>
    %cst_108 = arith.constant dense<0.000000e+00> : vector<32x32xf32>
    %119 = tpu.matmul %118, %85, %cst_108 {dimension_numbers = #tpu.dot_dimension_numbers<[1], [0], [0], [1], [0, 0, 1, 1], [], []>} : vector<32x98xbf16>, vector<98x32xbf16>, vector<32x32xf32> -> vector<32x32xf32>
    %120 = arith.truncf %119 : vector<32x32xf32> to vector<32x32xbf16>
    %c4_109 = arith.constant 4 : index
    %c0_110 = arith.constant 0 : index
    %c0_111 = arith.constant 0 : index
    %121 = vector.load %arg7[%c4_109, %c0_110, %c0_111] : memref<9x32x32xbf16, #tpu.memory_space<vmem>>, vector<1x32x32xbf16>
    %122 = vector.shape_cast %121 : vector<1x32x32xbf16> to vector<32x32xbf16>
    %cst_112 = arith.constant dense<0.000000e+00> : vector<32x32xf32>
    %123 = tpu.matmul %120, %122, %cst_112 {dimension_numbers = #tpu.dot_dimension_numbers<[1], [0], [0], [1], [0, 0, 1, 1], [], []>} : vector<32x32xbf16>, vector<32x32xbf16>, vector<32x32xf32> -> vector<32x32xf32>
    %124 = arith.addf %116, %123 : vector<32x32xf32>
    %c5_113 = arith.constant 5 : index
    %c0_114 = arith.constant 0 : index
    %c0_115 = arith.constant 0 : index
    %125 = vector.load %arg2[%c5_113, %c0_114, %c0_115] : memref<9x32x98xbf16, #tpu.memory_space<vmem>>, vector<1x32x98xbf16>
    %126 = vector.shape_cast %125 : vector<1x32x98xbf16> to vector<32x98xbf16>
    %cst_116 = arith.constant dense<0.000000e+00> : vector<32x32xf32>
    %127 = tpu.matmul %126, %85, %cst_116 {dimension_numbers = #tpu.dot_dimension_numbers<[1], [0], [0], [1], [0, 0, 1, 1], [], []>} : vector<32x98xbf16>, vector<98x32xbf16>, vector<32x32xf32> -> vector<32x32xf32>
    %128 = arith.truncf %127 : vector<32x32xf32> to vector<32x32xbf16>
    %c5_117 = arith.constant 5 : index
    %c0_118 = arith.constant 0 : index
    %c0_119 = arith.constant 0 : index
    %129 = vector.load %arg7[%c5_117, %c0_118, %c0_119] : memref<9x32x32xbf16, #tpu.memory_space<vmem>>, vector<1x32x32xbf16>
    %130 = vector.shape_cast %129 : vector<1x32x32xbf16> to vector<32x32xbf16>
    %cst_120 = arith.constant dense<0.000000e+00> : vector<32x32xf32>
    %131 = tpu.matmul %128, %130, %cst_120 {dimension_numbers = #tpu.dot_dimension_numbers<[1], [0], [0], [1], [0, 0, 1, 1], [], []>} : vector<32x32xbf16>, vector<32x32xbf16>, vector<32x32xf32> -> vector<32x32xf32>
    %132 = arith.addf %124, %131 : vector<32x32xf32>
    %c6_121 = arith.constant 6 : index
    %c0_122 = arith.constant 0 : index
    %c0_123 = arith.constant 0 : index
    %133 = vector.load %arg2[%c6_121, %c0_122, %c0_123] : memref<9x32x98xbf16, #tpu.memory_space<vmem>>, vector<1x32x98xbf16>
    %134 = vector.shape_cast %133 : vector<1x32x98xbf16> to vector<32x98xbf16>
    %cst_124 = arith.constant dense<0.000000e+00> : vector<32x32xf32>
    %135 = tpu.matmul %134, %85, %cst_124 {dimension_numbers = #tpu.dot_dimension_numbers<[1], [0], [0], [1], [0, 0, 1, 1], [], []>} : vector<32x98xbf16>, vector<98x32xbf16>, vector<32x32xf32> -> vector<32x32xf32>
    %136 = arith.truncf %135 : vector<32x32xf32> to vector<32x32xbf16>
    %c6_125 = arith.constant 6 : index
    %c0_126 = arith.constant 0 : index
    %c0_127 = arith.constant 0 : index
    %137 = vector.load %arg7[%c6_125, %c0_126, %c0_127] : memref<9x32x32xbf16, #tpu.memory_space<vmem>>, vector<1x32x32xbf16>
    %138 = vector.shape_cast %137 : vector<1x32x32xbf16> to vector<32x32xbf16>
    %cst_128 = arith.constant dense<0.000000e+00> : vector<32x32xf32>
    %139 = tpu.matmul %136, %138, %cst_128 {dimension_numbers = #tpu.dot_dimension_numbers<[1], [0], [0], [1], [0, 0, 1, 1], [], []>} : vector<32x32xbf16>, vector<32x32xbf16>, vector<32x32xf32> -> vector<32x32xf32>
    %140 = arith.addf %132, %139 : vector<32x32xf32>
    %c7_129 = arith.constant 7 : index
    %c0_130 = arith.constant 0 : index
    %c0_131 = arith.constant 0 : index
    %141 = vector.load %arg2[%c7_129, %c0_130, %c0_131] : memref<9x32x98xbf16, #tpu.memory_space<vmem>>, vector<1x32x98xbf16>
    %142 = vector.shape_cast %141 : vector<1x32x98xbf16> to vector<32x98xbf16>
    %cst_132 = arith.constant dense<0.000000e+00> : vector<32x32xf32>
    %143 = tpu.matmul %142, %85, %cst_132 {dimension_numbers = #tpu.dot_dimension_numbers<[1], [0], [0], [1], [0, 0, 1, 1], [], []>} : vector<32x98xbf16>, vector<98x32xbf16>, vector<32x32xf32> -> vector<32x32xf32>
    %144 = arith.truncf %143 : vector<32x32xf32> to vector<32x32xbf16>
    %c7_133 = arith.constant 7 : index
    %c0_134 = arith.constant 0 : index
    %c0_135 = arith.constant 0 : index
    %145 = vector.load %arg7[%c7_133, %c0_134, %c0_135] : memref<9x32x32xbf16, #tpu.memory_space<vmem>>, vector<1x32x32xbf16>
    %146 = vector.shape_cast %145 : vector<1x32x32xbf16> to vector<32x32xbf16>
    %cst_136 = arith.constant dense<0.000000e+00> : vector<32x32xf32>
    %147 = tpu.matmul %144, %146, %cst_136 {dimension_numbers = #tpu.dot_dimension_numbers<[1], [0], [0], [1], [0, 0, 1, 1], [], []>} : vector<32x32xbf16>, vector<32x32xbf16>, vector<32x32xf32> -> vector<32x32xf32>
    %148 = arith.addf %140, %147 : vector<32x32xf32>
    %c8_137 = arith.constant 8 : index
    %c0_138 = arith.constant 0 : index
    %c0_139 = arith.constant 0 : index
    %149 = vector.load %arg2[%c8_137, %c0_138, %c0_139] : memref<9x32x98xbf16, #tpu.memory_space<vmem>>, vector<1x32x98xbf16>
    %150 = vector.shape_cast %149 : vector<1x32x98xbf16> to vector<32x98xbf16>
    %cst_140 = arith.constant dense<0.000000e+00> : vector<32x32xf32>
    %151 = tpu.matmul %150, %85, %cst_140 {dimension_numbers = #tpu.dot_dimension_numbers<[1], [0], [0], [1], [0, 0, 1, 1], [], []>} : vector<32x98xbf16>, vector<98x32xbf16>, vector<32x32xf32> -> vector<32x32xf32>
    %152 = arith.truncf %151 : vector<32x32xf32> to vector<32x32xbf16>
    %c8_141 = arith.constant 8 : index
    %c0_142 = arith.constant 0 : index
    %c0_143 = arith.constant 0 : index
    %153 = vector.load %arg7[%c8_141, %c0_142, %c0_143] : memref<9x32x32xbf16, #tpu.memory_space<vmem>>, vector<1x32x32xbf16>
    %154 = vector.shape_cast %153 : vector<1x32x32xbf16> to vector<32x32xbf16>
    %cst_144 = arith.constant dense<0.000000e+00> : vector<32x32xf32>
    %155 = tpu.matmul %152, %154, %cst_144 {dimension_numbers = #tpu.dot_dimension_numbers<[1], [0], [0], [1], [0, 0, 1, 1], [], []>} : vector<32x32xbf16>, vector<32x32xbf16>, vector<32x32xf32> -> vector<32x32xf32>
    %156 = arith.addf %148, %155 : vector<32x32xf32>
    %c0_145 = arith.constant 0 : index
    %c0_146 = arith.constant 0 : index
    %157 = vector.load %arg8[%c0_145, %c0_146] : memref<1x32xf32, #tpu.memory_space<vmem>>, vector<1x32xf32>
    %158 = vector.broadcast %157 : vector<1x32xf32> to vector<32x32xf32>
    %159 = arith.addf %156, %158 : vector<32x32xf32>
    %cst_147 = arith.constant 0.000000e+00 : f32
    %160 = vector.broadcast %cst_147 : f32 to vector<32x32xf32>
    %161 = arith.maximumf %159, %160 : vector<32x32xf32>
    %c0_148 = arith.constant 0 : index
    %c0_149 = arith.constant 0 : index
    %162 = vector.load %arg19[%c0_148, %c0_149] : memref<32x32xf32, #tpu.memory_space<vmem>>, vector<32x32xf32>
    tpu.vector_store %arg19[%c0_148, %c0_149], %161 {strides = array<i32>} : memref<32x32xf32, #tpu.memory_space<vmem>>, vector<32x32xf32>,
    %c0_150 = arith.constant 0 : index
    %c0_151 = arith.constant 0 : index
    %163 = vector.load %arg19[%c0_150, %c0_151] : memref<32x32xf32, #tpu.memory_space<vmem>>, vector<2x32xf32>
    %164 = arith.truncf %163 : vector<2x32xf32> to vector<2x32xbf16>
    %c0_152 = arith.constant 0 : index
    %c0_153 = arith.constant 0 : index
    %c0_154 = arith.constant 0 : index
    %165 = vector.load %arg9[%c0_152, %c0_153, %c0_154] : memref<16x32x16xbf16, #tpu.memory_space<vmem>>, vector<1x32x16xbf16>
    %166 = vector.shape_cast %165 : vector<1x32x16xbf16> to vector<32x16xbf16>
    %cst_155 = arith.constant dense<0.000000e+00> : vector<2x16xf32>
    %167 = tpu.matmul %164, %166, %cst_155 {dimension_numbers = #tpu.dot_dimension_numbers<[1], [0], [0], [1], [0, 0, 1, 1], [], []>} : vector<2x32xbf16>, vector<32x16xbf16>, vector<2x16xf32> -> vector<2x16xf32>
    %c2_156 = arith.constant 2 : index
    %c0_157 = arith.constant 0 : index
    %168 = vector.load %arg19[%c2_156, %c0_157] : memref<32x32xf32, #tpu.memory_space<vmem>>, vector<2x32xf32>
    %169 = arith.truncf %168 : vector<2x32xf32> to vector<2x32xbf16>
    %c1_158 = arith.constant 1 : index
    %c0_159 = arith.constant 0 : index
    %c0_160 = arith.constant 0 : index
    %170 = vector.load %arg9[%c1_158, %c0_159, %c0_160] : memref<16x32x16xbf16, #tpu.memory_space<vmem>>, vector<1x32x16xbf16>
    %171 = vector.shape_cast %170 : vector<1x32x16xbf16> to vector<32x16xbf16>
    %cst_161 = arith.constant dense<0.000000e+00> : vector<2x16xf32>
    %172 = tpu.matmul %169, %171, %cst_161 {dimension_numbers = #tpu.dot_dimension_numbers<[1], [0], [0], [1], [0, 0, 1, 1], [], []>} : vector<2x32xbf16>, vector<32x16xbf16>, vector<2x16xf32> -> vector<2x16xf32>
    %173 = arith.addf %167, %172 : vector<2x16xf32>
    %c4_162 = arith.constant 4 : index
    %c0_163 = arith.constant 0 : index
    %174 = vector.load %arg19[%c4_162, %c0_163] : memref<32x32xf32, #tpu.memory_space<vmem>>, vector<2x32xf32>
    %175 = arith.truncf %174 : vector<2x32xf32> to vector<2x32xbf16>
    %c2_164 = arith.constant 2 : index
    %c0_165 = arith.constant 0 : index
    %c0_166 = arith.constant 0 : index
    %176 = vector.load %arg9[%c2_164, %c0_165, %c0_166] : memref<16x32x16xbf16, #tpu.memory_space<vmem>>, vector<1x32x16xbf16>
    %177 = vector.shape_cast %176 : vector<1x32x16xbf16> to vector<32x16xbf16>
    %cst_167 = arith.constant dense<0.000000e+00> : vector<2x16xf32>
    %178 = tpu.matmul %175, %177, %cst_167 {dimension_numbers = #tpu.dot_dimension_numbers<[1], [0], [0], [1], [0, 0, 1, 1], [], []>} : vector<2x32xbf16>, vector<32x16xbf16>, vector<2x16xf32> -> vector<2x16xf32>
    %179 = arith.addf %173, %178 : vector<2x16xf32>
    %c6_168 = arith.constant 6 : index
    %c0_169 = arith.constant 0 : index
    %180 = vector.load %arg19[%c6_168, %c0_169] : memref<32x32xf32, #tpu.memory_space<vmem>>, vector<2x32xf32>
    %181 = arith.truncf %180 : vector<2x32xf32> to vector<2x32xbf16>
    %c3_170 = arith.constant 3 : index
    %c0_171 = arith.constant 0 : index
    %c0_172 = arith.constant 0 : index
    %182 = vector.load %arg9[%c3_170, %c0_171, %c0_172] : memref<16x32x16xbf16, #tpu.memory_space<vmem>>, vector<1x32x16xbf16>
    %183 = vector.shape_cast %182 : vector<1x32x16xbf16> to vector<32x16xbf16>
    %cst_173 = arith.constant dense<0.000000e+00> : vector<2x16xf32>
    %184 = tpu.matmul %181, %183, %cst_173 {dimension_numbers = #tpu.dot_dimension_numbers<[1], [0], [0], [1], [0, 0, 1, 1], [], []>} : vector<2x32xbf16>, vector<32x16xbf16>, vector<2x16xf32> -> vector<2x16xf32>
    %185 = arith.addf %179, %184 : vector<2x16xf32>
    %c8_174 = arith.constant 8 : index
    %c0_175 = arith.constant 0 : index
    %186 = vector.load %arg19[%c8_174, %c0_175] : memref<32x32xf32, #tpu.memory_space<vmem>>, vector<2x32xf32>
    %187 = arith.truncf %186 : vector<2x32xf32> to vector<2x32xbf16>
    %c4_176 = arith.constant 4 : index
    %c0_177 = arith.constant 0 : index
    %c0_178 = arith.constant 0 : index
    %188 = vector.load %arg9[%c4_176, %c0_177, %c0_178] : memref<16x32x16xbf16, #tpu.memory_space<vmem>>, vector<1x32x16xbf16>
    %189 = vector.shape_cast %188 : vector<1x32x16xbf16> to vector<32x16xbf16>
    %cst_179 = arith.constant dense<0.000000e+00> : vector<2x16xf32>
    %190 = tpu.matmul %187, %189, %cst_179 {dimension_numbers = #tpu.dot_dimension_numbers<[1], [0], [0], [1], [0, 0, 1, 1], [], []>} : vector<2x32xbf16>, vector<32x16xbf16>, vector<2x16xf32> -> vector<2x16xf32>
    %191 = arith.addf %185, %190 : vector<2x16xf32>
    %c10 = arith.constant 10 : index
    %c0_180 = arith.constant 0 : index
    %192 = vector.load %arg19[%c10, %c0_180] : memref<32x32xf32, #tpu.memory_space<vmem>>, vector<2x32xf32>
    %193 = arith.truncf %192 : vector<2x32xf32> to vector<2x32xbf16>
    %c5_181 = arith.constant 5 : index
    %c0_182 = arith.constant 0 : index
    %c0_183 = arith.constant 0 : index
    %194 = vector.load %arg9[%c5_181, %c0_182, %c0_183] : memref<16x32x16xbf16, #tpu.memory_space<vmem>>, vector<1x32x16xbf16>
    %195 = vector.shape_cast %194 : vector<1x32x16xbf16> to vector<32x16xbf16>
    %cst_184 = arith.constant dense<0.000000e+00> : vector<2x16xf32>
    %196 = tpu.matmul %193, %195, %cst_184 {dimension_numbers = #tpu.dot_dimension_numbers<[1], [0], [0], [1], [0, 0, 1, 1], [], []>} : vector<2x32xbf16>, vector<32x16xbf16>, vector<2x16xf32> -> vector<2x16xf32>
    %197 = arith.addf %191, %196 : vector<2x16xf32>
    %c12 = arith.constant 12 : index
    %c0_185 = arith.constant 0 : index
    %198 = vector.load %arg19[%c12, %c0_185] : memref<32x32xf32, #tpu.memory_space<vmem>>, vector<2x32xf32>
    %199 = arith.truncf %198 : vector<2x32xf32> to vector<2x32xbf16>
    %c6_186 = arith.constant 6 : index
    %c0_187 = arith.constant 0 : index
    %c0_188 = arith.constant 0 : index
    %200 = vector.load %arg9[%c6_186, %c0_187, %c0_188] : memref<16x32x16xbf16, #tpu.memory_space<vmem>>, vector<1x32x16xbf16>
    %201 = vector.shape_cast %200 : vector<1x32x16xbf16> to vector<32x16xbf16>
    %cst_189 = arith.constant dense<0.000000e+00> : vector<2x16xf32>
    %202 = tpu.matmul %199, %201, %cst_189 {dimension_numbers = #tpu.dot_dimension_numbers<[1], [0], [0], [1], [0, 0, 1, 1], [], []>} : vector<2x32xbf16>, vector<32x16xbf16>, vector<2x16xf32> -> vector<2x16xf32>
    %203 = arith.addf %197, %202 : vector<2x16xf32>
    %c14 = arith.constant 14 : index
    %c0_190 = arith.constant 0 : index
    %204 = vector.load %arg19[%c14, %c0_190] : memref<32x32xf32, #tpu.memory_space<vmem>>, vector<2x32xf32>
    %205 = arith.truncf %204 : vector<2x32xf32> to vector<2x32xbf16>
    %c7_191 = arith.constant 7 : index
    %c0_192 = arith.constant 0 : index
    %c0_193 = arith.constant 0 : index
    %206 = vector.load %arg9[%c7_191, %c0_192, %c0_193] : memref<16x32x16xbf16, #tpu.memory_space<vmem>>, vector<1x32x16xbf16>
    %207 = vector.shape_cast %206 : vector<1x32x16xbf16> to vector<32x16xbf16>
    %cst_194 = arith.constant dense<0.000000e+00> : vector<2x16xf32>
    %208 = tpu.matmul %205, %207, %cst_194 {dimension_numbers = #tpu.dot_dimension_numbers<[1], [0], [0], [1], [0, 0, 1, 1], [], []>} : vector<2x32xbf16>, vector<32x16xbf16>, vector<2x16xf32> -> vector<2x16xf32>
    %209 = arith.addf %203, %208 : vector<2x16xf32>
    %c16 = arith.constant 16 : index
    %c0_195 = arith.constant 0 : index
    %210 = vector.load %arg19[%c16, %c0_195] : memref<32x32xf32, #tpu.memory_space<vmem>>, vector<2x32xf32>
    %211 = arith.truncf %210 : vector<2x32xf32> to vector<2x32xbf16>
    %c8_196 = arith.constant 8 : index
    %c0_197 = arith.constant 0 : index
    %c0_198 = arith.constant 0 : index
    %212 = vector.load %arg9[%c8_196, %c0_197, %c0_198] : memref<16x32x16xbf16, #tpu.memory_space<vmem>>, vector<1x32x16xbf16>
    %213 = vector.shape_cast %212 : vector<1x32x16xbf16> to vector<32x16xbf16>
    %cst_199 = arith.constant dense<0.000000e+00> : vector<2x16xf32>
    %214 = tpu.matmul %211, %213, %cst_199 {dimension_numbers = #tpu.dot_dimension_numbers<[1], [0], [0], [1], [0, 0, 1, 1], [], []>} : vector<2x32xbf16>, vector<32x16xbf16>, vector<2x16xf32> -> vector<2x16xf32>
    %215 = arith.addf %209, %214 : vector<2x16xf32>
    %c18 = arith.constant 18 : index
    %c0_200 = arith.constant 0 : index
    %216 = vector.load %arg19[%c18, %c0_200] : memref<32x32xf32, #tpu.memory_space<vmem>>, vector<2x32xf32>
    %217 = arith.truncf %216 : vector<2x32xf32> to vector<2x32xbf16>
    %c9 = arith.constant 9 : index
    %c0_201 = arith.constant 0 : index
    %c0_202 = arith.constant 0 : index
    %218 = vector.load %arg9[%c9, %c0_201, %c0_202] : memref<16x32x16xbf16, #tpu.memory_space<vmem>>, vector<1x32x16xbf16>
    %219 = vector.shape_cast %218 : vector<1x32x16xbf16> to vector<32x16xbf16>
    %cst_203 = arith.constant dense<0.000000e+00> : vector<2x16xf32>
    %220 = tpu.matmul %217, %219, %cst_203 {dimension_numbers = #tpu.dot_dimension_numbers<[1], [0], [0], [1], [0, 0, 1, 1], [], []>} : vector<2x32xbf16>, vector<32x16xbf16>, vector<2x16xf32> -> vector<2x16xf32>
    %221 = arith.addf %215, %220 : vector<2x16xf32>
    %c20 = arith.constant 20 : index
    %c0_204 = arith.constant 0 : index
    %222 = vector.load %arg19[%c20, %c0_204] : memref<32x32xf32, #tpu.memory_space<vmem>>, vector<2x32xf32>
    %223 = arith.truncf %222 : vector<2x32xf32> to vector<2x32xbf16>
    %c10_205 = arith.constant 10 : index
    %c0_206 = arith.constant 0 : index
    %c0_207 = arith.constant 0 : index
    %224 = vector.load %arg9[%c10_205, %c0_206, %c0_207] : memref<16x32x16xbf16, #tpu.memory_space<vmem>>, vector<1x32x16xbf16>
    %225 = vector.shape_cast %224 : vector<1x32x16xbf16> to vector<32x16xbf16>
    %cst_208 = arith.constant dense<0.000000e+00> : vector<2x16xf32>
    %226 = tpu.matmul %223, %225, %cst_208 {dimension_numbers = #tpu.dot_dimension_numbers<[1], [0], [0], [1], [0, 0, 1, 1], [], []>} : vector<2x32xbf16>, vector<32x16xbf16>, vector<2x16xf32> -> vector<2x16xf32>
    %227 = arith.addf %221, %226 : vector<2x16xf32>
    %c22 = arith.constant 22 : index
    %c0_209 = arith.constant 0 : index
    %228 = vector.load %arg19[%c22, %c0_209] : memref<32x32xf32, #tpu.memory_space<vmem>>, vector<2x32xf32>
    %229 = arith.truncf %228 : vector<2x32xf32> to vector<2x32xbf16>
    %c11 = arith.constant 11 : index
    %c0_210 = arith.constant 0 : index
    %c0_211 = arith.constant 0 : index
    %230 = vector.load %arg9[%c11, %c0_210, %c0_211] : memref<16x32x16xbf16, #tpu.memory_space<vmem>>, vector<1x32x16xbf16>
    %231 = vector.shape_cast %230 : vector<1x32x16xbf16> to vector<32x16xbf16>
    %cst_212 = arith.constant dense<0.000000e+00> : vector<2x16xf32>
    %232 = tpu.matmul %229, %231, %cst_212 {dimension_numbers = #tpu.dot_dimension_numbers<[1], [0], [0], [1], [0, 0, 1, 1], [], []>} : vector<2x32xbf16>, vector<32x16xbf16>, vector<2x16xf32> -> vector<2x16xf32>
    %233 = arith.addf %227, %232 : vector<2x16xf32>
    %c24 = arith.constant 24 : index
    %c0_213 = arith.constant 0 : index
    %234 = vector.load %arg19[%c24, %c0_213] : memref<32x32xf32, #tpu.memory_space<vmem>>, vector<2x32xf32>
    %235 = arith.truncf %234 : vector<2x32xf32> to vector<2x32xbf16>
    %c12_214 = arith.constant 12 : index
    %c0_215 = arith.constant 0 : index
    %c0_216 = arith.constant 0 : index
    %236 = vector.load %arg9[%c12_214, %c0_215, %c0_216] : memref<16x32x16xbf16, #tpu.memory_space<vmem>>, vector<1x32x16xbf16>
    %237 = vector.shape_cast %236 : vector<1x32x16xbf16> to vector<32x16xbf16>
    %cst_217 = arith.constant dense<0.000000e+00> : vector<2x16xf32>
    %238 = tpu.matmul %235, %237, %cst_217 {dimension_numbers = #tpu.dot_dimension_numbers<[1], [0], [0], [1], [0, 0, 1, 1], [], []>} : vector<2x32xbf16>, vector<32x16xbf16>, vector<2x16xf32> -> vector<2x16xf32>
    %239 = arith.addf %233, %238 : vector<2x16xf32>
    %c26 = arith.constant 26 : index
    %c0_218 = arith.constant 0 : index
    %240 = vector.load %arg19[%c26, %c0_218] : memref<32x32xf32, #tpu.memory_space<vmem>>, vector<2x32xf32>
    %241 = arith.truncf %240 : vector<2x32xf32> to vector<2x32xbf16>
    %c13 = arith.constant 13 : index
    %c0_219 = arith.constant 0 : index
    %c0_220 = arith.constant 0 : index
    %242 = vector.load %arg9[%c13, %c0_219, %c0_220] : memref<16x32x16xbf16, #tpu.memory_space<vmem>>, vector<1x32x16xbf16>
    %243 = vector.shape_cast %242 : vector<1x32x16xbf16> to vector<32x16xbf16>
    %cst_221 = arith.constant dense<0.000000e+00> : vector<2x16xf32>
    %244 = tpu.matmul %241, %243, %cst_221 {dimension_numbers = #tpu.dot_dimension_numbers<[1], [0], [0], [1], [0, 0, 1, 1], [], []>} : vector<2x32xbf16>, vector<32x16xbf16>, vector<2x16xf32> -> vector<2x16xf32>
    %245 = arith.addf %239, %244 : vector<2x16xf32>
    %c28 = arith.constant 28 : index
    %c0_222 = arith.constant 0 : index
    %246 = vector.load %arg19[%c28, %c0_222] : memref<32x32xf32, #tpu.memory_space<vmem>>, vector<2x32xf32>
    %247 = arith.truncf %246 : vector<2x32xf32> to vector<2x32xbf16>
    %c14_223 = arith.constant 14 : index
    %c0_224 = arith.constant 0 : index
    %c0_225 = arith.constant 0 : index
    %248 = vector.load %arg9[%c14_223, %c0_224, %c0_225] : memref<16x32x16xbf16, #tpu.memory_space<vmem>>, vector<1x32x16xbf16>
    %249 = vector.shape_cast %248 : vector<1x32x16xbf16> to vector<32x16xbf16>
    %cst_226 = arith.constant dense<0.000000e+00> : vector<2x16xf32>
    %250 = tpu.matmul %247, %249, %cst_226 {dimension_numbers = #tpu.dot_dimension_numbers<[1], [0], [0], [1], [0, 0, 1, 1], [], []>} : vector<2x32xbf16>, vector<32x16xbf16>, vector<2x16xf32> -> vector<2x16xf32>
    %251 = arith.addf %245, %250 : vector<2x16xf32>
    %c30 = arith.constant 30 : index
    %c0_227 = arith.constant 0 : index
    %252 = vector.load %arg19[%c30, %c0_227] : memref<32x32xf32, #tpu.memory_space<vmem>>, vector<2x32xf32>
    %253 = arith.truncf %252 : vector<2x32xf32> to vector<2x32xbf16>
    %c15 = arith.constant 15 : index
    %c0_228 = arith.constant 0 : index
    %c0_229 = arith.constant 0 : index
    %254 = vector.load %arg9[%c15, %c0_228, %c0_229] : memref<16x32x16xbf16, #tpu.memory_space<vmem>>, vector<1x32x16xbf16>
    %255 = vector.shape_cast %254 : vector<1x32x16xbf16> to vector<32x16xbf16>
    %cst_230 = arith.constant dense<0.000000e+00> : vector<2x16xf32>
    %256 = tpu.matmul %253, %255, %cst_230 {dimension_numbers = #tpu.dot_dimension_numbers<[1], [0], [0], [1], [0, 0, 1, 1], [], []>} : vector<2x32xbf16>, vector<32x16xbf16>, vector<2x16xf32> -> vector<2x16xf32>
    %257 = arith.addf %251, %256 : vector<2x16xf32>
    %c0_231 = arith.constant 0 : index
    %c0_232 = arith.constant 0 : index
    %258 = vector.load %arg10[%c0_231, %c0_232] : memref<1x16xf32, #tpu.memory_space<vmem>>, vector<1x16xf32>
    %259 = vector.broadcast %258 : vector<1x16xf32> to vector<2x16xf32>
    %260 = arith.addf %257, %259 : vector<2x16xf32>
    %cst_233 = arith.constant 0.000000e+00 : f32
    %261 = vector.broadcast %cst_233 : f32 to vector<2x16xf32>
    %262 = arith.maximumf %260, %261 : vector<2x16xf32>
    %c0_234 = arith.constant 0 : index
    %c0_235 = arith.constant 0 : index
    %263 = vector.load %arg18[%c0_234, %c0_235] : memref<2x16xf32, #tpu.memory_space<vmem>>, vector<2x16xf32>
    tpu.vector_store %arg18[%c0_234, %c0_235], %262 {strides = array<i32>} : memref<2x16xf32, #tpu.memory_space<vmem>>, vector<2x16xf32>,
    %264 = arith.truncf %262 : vector<2x16xf32> to vector<2x16xbf16>
    %c0_236 = arith.constant 0 : index
    %c0_237 = arith.constant 0 : index
    %265 = vector.load %arg11[%c0_236, %c0_237] : memref<16x32xbf16, #tpu.memory_space<vmem>>, vector<16x32xbf16>
    %cst_238 = arith.constant dense<0.000000e+00> : vector<2x32xf32>
    %266 = tpu.matmul %264, %265, %cst_238 {dimension_numbers = #tpu.dot_dimension_numbers<[1], [0], [0], [1], [0, 0, 1, 1], [], []>} : vector<2x16xbf16>, vector<16x32xbf16>, vector<2x32xf32> -> vector<2x32xf32>
    %c0_239 = arith.constant 0 : index
    %c0_240 = arith.constant 0 : index
    %267 = vector.load %arg12[%c0_239, %c0_240] : memref<1x32xf32, #tpu.memory_space<vmem>>, vector<1x32xf32>
    %268 = vector.broadcast %267 : vector<1x32xf32> to vector<2x32xf32>
    %269 = arith.addf %266, %268 : vector<2x32xf32>
    %cst_241 = arith.constant 0.000000e+00 : f32
    %270 = vector.broadcast %cst_241 : f32 to vector<2x32xf32>
    %271 = arith.maximumf %269, %270 : vector<2x32xf32>
    %272 = arith.truncf %271 : vector<2x32xf32> to vector<2x32xbf16>
    %c0_242 = arith.constant 0 : index
    %c0_243 = arith.constant 0 : index
    %273 = vector.load %arg13[%c0_242, %c0_243] : memref<32x32xbf16, #tpu.memory_space<vmem>>, vector<32x32xbf16>
    %cst_244 = arith.constant dense<0.000000e+00> : vector<2x32xf32>
    %274 = tpu.matmul %272, %273, %cst_244 {dimension_numbers = #tpu.dot_dimension_numbers<[1], [0], [0], [1], [0, 0, 1, 1], [], []>} : vector<2x32xbf16>, vector<32x32xbf16>, vector<2x32xf32> -> vector<2x32xf32>
    %c0_245 = arith.constant 0 : index
    %c0_246 = arith.constant 0 : index
    %275 = vector.load %arg14[%c0_245, %c0_246] : memref<1x32xf32, #tpu.memory_space<vmem>>, vector<1x32xf32>
    %276 = vector.broadcast %275 : vector<1x32xf32> to vector<2x32xf32>
    %277 = arith.addf %274, %276 : vector<2x32xf32>
    %cst_247 = arith.constant 0.000000e+00 : f32
    %278 = vector.broadcast %cst_247 : f32 to vector<2x32xf32>
    %279 = arith.maximumf %277, %278 : vector<2x32xf32>
    %280 = arith.truncf %279 : vector<2x32xf32> to vector<2x32xbf16>
    %c0_248 = arith.constant 0 : index
    %c0_249 = arith.constant 0 : index
    %281 = vector.load %arg15[%c0_248, %c0_249] : memref<32x128xbf16, #tpu.memory_space<vmem>>, vector<32x128xbf16>
    %cst_250 = arith.constant dense<0.000000e+00> : vector<2x128xf32>
    %282 = tpu.matmul %280, %281, %cst_250 {dimension_numbers = #tpu.dot_dimension_numbers<[1], [0], [0], [1], [0, 0, 1, 1], [], []>} : vector<2x32xbf16>, vector<32x128xbf16>, vector<2x128xf32> -> vector<2x128xf32>
    %c0_251 = arith.constant 0 : index
    %c0_252 = arith.constant 0 : index
    %283 = vector.load %arg16[%c0_251, %c0_252] : memref<1x128xf32, #tpu.memory_space<vmem>>, vector<1x128xf32>
    %284 = vector.broadcast %283 : vector<1x128xf32> to vector<2x128xf32>
    %285 = arith.addf %282, %284 : vector<2x128xf32>
    %286 = tpu.iota {dimensions = array<i32: 1>} : vector<2x128xi32>
    %c10_i32 = arith.constant 10 : i32
    %287 = vector.broadcast %c10_i32 : i32 to vector<2x128xi32>
    %288 = arith.cmpi slt, %286, %287 : vector<2x128xi32>
    %cst_253 = arith.constant -1.000000e+30 : f32
    %289 = vector.broadcast %cst_253 : f32 to vector<2x128xf32>
    %290 = arith.select %288, %285, %289 : vector<2x128xi1>, vector<2x128xf32>
    %cst_254 = arith.constant dense<0xFF800000> : vector<2xf32>
    %291 = vector.multi_reduction <maximumf>, %290, %cst_254 [1] : vector<2x128xf32> to vector<2xf32>
    %292 = vector.shape_cast %291 : vector<2xf32> to vector<2x1xf32>
    %293 = vector.broadcast %292 : vector<2x1xf32> to vector<2x128xf32>
    %294 = arith.subf %290, %293 : vector<2x128xf32>
    %295 = math.exp %294 : vector<2x128xf32>
    %cst_255 = arith.constant 0.000000e+00 : f32
    %296 = vector.broadcast %cst_255 : f32 to vector<2x128xf32>
    %297 = arith.select %288, %295, %296 : vector<2x128xi1>, vector<2x128xf32>
    %cst_256 = arith.constant dense<0.000000e+00> : vector<2xf32>
    %298 = vector.multi_reduction <add>, %297, %cst_256 [1] : vector<2x128xf32> to vector<2xf32>
    %299 = vector.shape_cast %298 : vector<2xf32> to vector<2x1xf32>
    %300 = math.log %299 : vector<2x1xf32>
    %301 = arith.addf %292, %300 : vector<2x1xf32>
    %302 = vector.broadcast %301 : vector<2x1xf32> to vector<2x128xf32>
    %303 = arith.subf %290, %302 : vector<2x128xf32>
    %cst_257 = arith.constant 0.000000e+00 : f32
    %304 = vector.broadcast %cst_257 : f32 to vector<2x128xf32>
    %305 = arith.select %288, %303, %304 : vector<2x128xi1>, vector<2x128xf32>
    %c0_258 = arith.constant 0 : index
    %c0_259 = arith.constant 0 : index
    %306 = vector.load %arg17[%c0_258, %c0_259] : memref<2x128xf32, #tpu.memory_space<vmem>>, vector<2x128xf32>
    tpu.vector_store %arg17[%c0_258, %c0_259], %305 {strides = array<i32>} : memref<2x128xf32, #tpu.memory_space<vmem>>, vector<2x128xf32>,
    return
  }
}

</mosaic_0001>

<bundles_post_ra>
// kernel: adda_forward.2
= control target key start
LH: loop header
LB: loop body
LE: loop exit
PB: predicated region body
PF: predicated region fallthrough
CT: control target
= control target key end

     0   :  { %12 = vsyncpa [#allocation3], 0  ;;  %s1536_s0 = inlined_call_operand.vmem [shape: bf16[2,896], index: 0, kind: input, shape index: {}]   ;;  %s1537_s1 = inlined_call_operand.vmem [shape: bf16[896,32], index: 1, kind: input, shape index: {}]   ;;  %s1538_s2 = inlined_call_operand.hbm [shape: f32[1,32], index: 2, kind: input, shape index: {}]   ;;  %s1539_s3 = inlined_call_operand.hbm [shape: bf16[32,32], index: 3, kind: input, shape index: {}]   ;;  %s1540_s4 = inlined_call_operand.hbm [shape: f32[1,32], index: 4, kind: input, shape index: {}]   ;;  %s1541_s5 = inlined_call_operand.hbm [shape: bf16[32,128], index: 5, kind: input, shape index: {}]   ;;  %s1542_s6 = inlined_call_operand.hbm [shape: f32[1,128], index: 6, kind: input, shape index: {}]   ;;  %s1543_s7 = inlined_call_operand.vmem [shape: f32[2,128], index: 7, kind: output, shape index: {}]  }
   0x1   :  { %13 = vsyncpa [#allocation5], 0 }
   0x2   :  { %14 = vsyncpa [#allocation8], 0  ;;  %s1269_s24 = smov [#allocation4]  }
   0x3   :  { %s34_s25 = sshll.u32 %s1269_s24, 4  ;;  %s35_s25 = int_to_ptr.vmem [resolvable:$true] %s34_s25 }
   0x4   :  { %s1171_s26 = scalar_lea.vmem %s35_s25, 256  ;;  %p1176_p1 = scmp.lt.s32.totalorder %s35_s25, %s35_s25 }
   0x5   :  { %p1172_p0 = scmp.ne.s32.totalorder %s35_s25, %s1171_s26  ;;  %p1177_p2 = scmp.lt.s32.totalorder %s1171_s26, %s1171_s26 }
   0x7   :  { %p1178_p3 = por %p1177_p2, %p1176_p1 }
   0x9   :  { %p1179_p4 = pnand %p1178_p3, %p1172_p0 }
   0xb   :  { %1182 = shalt.err (!%p1179_p4)
}
   0xc   :  { %s1270_s27 = smov 64   ;;  %s1271_s28 = smov 4  }
   0xd   :  { %40 = dma.hbm_to_vmem [thread:$0]  %s1539_s3, 256, %s35_s25, [#allocation5], %s1270_s27, %s1270_s27, %s1271_s28  }
   0xe   :  { %s1272_s8 = smov [#allocation7]   ;;  %s1273_s10 = smov [#allocation2]  }
   0xf   :  { %s56_s9 = sshll.u32 %s1272_s8, 4  ;;  %s25_s11 = sshll.u32 %s1273_s10, 4  ;;  %s57_s9 = int_to_ptr.vmem [resolvable:$true] %s56_s9  ;;  %s26_s11 = int_to_ptr.vmem [resolvable:$true] %s25_s11 }
  0x10   :  { %s1191_s12 = scalar_lea.vmem %s57_s9, 256  ;;  %p1196_p6 = scmp.lt.s32.totalorder %s57_s9, %s57_s9 }
  0x11   :  { %p1192_p5 = scmp.ne.s32.totalorder %s57_s9, %s1191_s12  ;;  %p1197_p7 = scmp.lt.s32.totalorder %s1191_s12, %s1191_s12 }
  0x13   :  { %p1198_p8 = por %p1197_p7, %p1196_p6 }
  0x15   :  { %p1199_p9 = pnand %p1198_p8, %p1192_p5 }
  0x17   :  { %1202 = shalt.err (!%p1199_p9)
}
  0x18   :  { %62 = dma.hbm_to_vmem [thread:$0]  %s1541_s5, 256, %s57_s9, [#allocation8], %s1270_s27, %s1270_s27, %s1271_s28  }
  0x19   :  { %s1211_s15 = scalar_lea.vmem %s26_s11, 16  ;;  %s1215_s3 = scalar_lea.vmem %s26_s11, 32 }
  0x1a   :  { %p1212_p10 = scmp.ne.s32.totalorder %s26_s11, %s1211_s15  ;;  %p1216_p11 = scmp.lt.s32.totalorder %s26_s11, %s26_s11 }
  0x1b   :  { %p1217_p12 = scmp.lt.s32.totalorder %s1215_s3, %s1211_s15 }
  0x1d   :  { %p1218_p13 = por %p1217_p12, %p1216_p11 }
  0x1f   :  { %p1219_p0 = pnand %p1218_p13, %p1212_p10 }
  0x21   :  { %1222 = shalt.err (!%p1219_p0)
}
  0x22   :  { %28 = dma.hbm_to_vmem [thread:$0]  %s1538_s2, 16, %s26_s11, [#allocation3]  }
  0x23   :  { %s1274_s18 = smov [#allocation6]   ;;  %s1275_s20 = smov [#allocation9]  }
  0x24   :  { %s47_s19 = sshll.u32 %s1274_s18, 4  ;;  %s69_s21 = sshll.u32 %s1275_s20, 4  ;;  %s48_s19 = int_to_ptr.vmem [resolvable:$true] %s47_s19  ;;  %s70_s21 = int_to_ptr.vmem [resolvable:$true] %s69_s21 }
  0x25   :  { %s1231_s22 = scalar_lea.vmem %s48_s19, 16  ;;  %s1235_s5 = scalar_lea.vmem %s48_s19, 32 }
  0x26   :  { %p1232_p1 = scmp.ne.s32.totalorder %s48_s19, %s1231_s22  ;;  %p1236_p2 = scmp.lt.s32.totalorder %s48_s19, %s48_s19 }
  0x27   :  { %p1237_p3 = scmp.lt.s32.totalorder %s1235_s5, %s1231_s22 }
  0x29   :  { %p1238_p4 = por %p1237_p3, %p1236_p2 }
  0x2b   :  { %p1239_p5 = pnand %p1238_p4, %p1232_p1 }
  0x2d   :  { %1242 = shalt.err (!%p1239_p5)
}
  0x2e   :  { %50 = dma.hbm_to_vmem [thread:$0]  %s1540_s4, 16, %s48_s19, [#allocation5]  }
  0x2f   :  { %s1251_s25 = scalar_lea.vmem %s70_s21, 16  ;;  %s1255_s2 = scalar_lea.vmem %s70_s21, 32 }
  0x30   :  { %p1252_p6 = scmp.ne.s32.totalorder %s70_s21, %s1251_s25  ;;  %p1256_p7 = scmp.lt.s32.totalorder %s70_s21, %s70_s21 }
  0x31   :  { %p1257_p8 = scmp.lt.s32.totalorder %s1255_s2, %s1251_s25 }
  0x33   :  { %p1258_p9 = por %p1257_p8, %p1256_p7 }
  0x35   :  { %p1259_p10 = pnand %p1258_p9, %p1252_p6 }
  0x37   :  { %1262 = shalt.err (!%p1259_p10)
}
  0x38   :  { %72 = dma.hbm_to_vmem [thread:$0]  %s1542_s6, 16, %s70_s21, [#allocation8]  }
  0x39   :  { %1263 = dma.done.wait [#allocation3], 16  }
  0x3a   :  { %1264 = vsyncadd [#allocation3], 4294967280 }
  0x3b   :  { %1265 = dma.done.wait [#allocation5], 272  }
  0x3c   :  { %1266 = vsyncadd [#allocation5], 4294967024 }
  0x3d   :  { %1267 = dma.done.wait [#allocation8], 272  }
  0x3e   :  { %1268 = vsyncadd [#allocation8], 4294967024  ;;  %v1102_v0 = vld [vmem:[%s1537_s1 + $0x78] sm:$0xff]   ;;  %v1106_v4 = vld [vmem:[%s1537_s1 + $0x70] sm:$0xff]   ;;  %v1276_v22 = vmov 1966171168   ;;  %v214_v24 = vlaneseq }
  0x3f   :  { %v1103_v1 = vld [vmem:[%s1537_s1 + $0xf8] sm:$0xff]   ;;  %975 = vmatprep.subr.bf16.mxu0 %v1102_v0  ;;  %v1107_v5 = vld [vmem:[%s1537_s1 + $0xf0] sm:$0xff]   ;;  %v1110_v8 = vld [vmem:[%s1537_s1 + $0x68] sm:$0xff]   ;;  %v212_v23 = vunpack.c.l.s4 %v1276_v22  ;;  %v1277_v42 = vmov 0.0   ;;  %vm1278_vm0 = vmmov 0   ;;  %vm788_vm2 = vcmask 261120  }
  0x40   :  { %v1104_v2 = vld [vmem:[%s1537_s1 + $0x38] sm:$0xff]   ;;  %997 = vmatprep.subr.bf16.mxu1 %v1103_v1  ;;  %v1108_v6 = vld [vmem:[%s1537_s1 + $0x30] sm:$0xff]   ;;  %v1111_v9 = vld [vmem:[%s1537_s1 + $0xe8] sm:$0xff]   ;;  %v215_v30 = vshrl.u32 %v214_v24, 7 }
  0x41   :  { %v1105_v3 = vld [vmem:[%s1537_s1 + $0xb8] sm:$0xff]   ;;  %976 = vmatpush3.bf16.msra.mxu0 %v1104_v2  ;;  %v1109_v7 = vld [vmem:[%s1537_s1 + $0xb0] sm:$0xff]   ;;  %v1112_v10 = vld [vmem:[%s1537_s1 + $0x28] sm:$0xff]   ;;  %v213_v29 = vunpack.c.0.s8 %v212_v23 }
  0x42   :  { %998 = vmatpush3.bf16.msra.mxu1 %v1105_v3  ;;  %977 = vmatprep.subr.bf16.mxu0 %v1106_v4  ;;  %v1113_v11 = vld [vmem:[%s1537_s1 + $0xa8] sm:$0xff]   ;;  %v1114_v12 = vld [vmem:[%s1537_s1 + $0x60] sm:$0xff]   ;;  %v1118_v16 = vld [vmem:[%s1537_s1 + $0x58] sm:$0xff]  }
  0x43   :  { %999 = vmatprep.subr.bf16.mxu1 %v1107_v5  ;;  %v1115_v13 = vld [vmem:[%s1537_s1 + $0xe0] sm:$0xff]   ;;  %v1119_v17 = vld [vmem:[%s1537_s1 + $0xd8] sm:$0xff]   ;;  %v1122_v20 = vld [vmem:[%s1537_s1 + $0x50] sm:$0xff]   ;;  %v1424_v35 = vsub.s32 %v213_v29, %v215_v30 }
  0x44   :  { %v1116_v14 = vld [vmem:[%s1537_s1 + $0x20] sm:$0xff]   ;;  %v1120_v18 = vld [vmem:[%s1537_s1 + $0x18] sm:$0xff]   ;;  %v1123_v21 = vld [vmem:[%s1537_s1 + $0xd0] sm:$0xff]  }
  0x45   :  { %978 = vmatpush3.bf16.msra.mxu0 %v1108_v6  ;;  %v1117_v15 = vld [vmem:[%s1537_s1 + $0xa0] sm:$0xff]   ;;  %v1121_v19 = vld [vmem:[%s1537_s1 + $0x98] sm:$0xff]   ;;  %v1124_v25 = vld [vmem:[%s1537_s1 + $0x10] sm:$0xff]  }
  0x46   :  { %1000 = vmatpush3.bf16.msra.mxu1 %v1109_v7  ;;  %979 = vmatprep.subr.bf16.mxu0 %v1110_v8  ;;  %v1125_v26 = vld [vmem:[%s1537_s1 + $0x90] sm:$0xff]   ;;  %v1126_v27 = vld [vmem:[%s1537_s1 + $0x48] sm:$0xff]   ;;  %v1130_v33 = vld [vmem:[%s1537_s1 + $0x40] sm:$0xff]  }
  0x47   :  { %1001 = vmatprep.subr.bf16.mxu1 %v1111_v9  ;;  %v1127_v28 = vld [vmem:[%s1537_s1 + $0xc8] sm:$0xff]   ;;  %v1131_v34 = vld [vmem:[%s1537_s1 + $0xc0] sm:$0xff]   ;;  %v1135_v41 = vld [vmem:[%s1537_s1 + $0x178] sm:$0xff]  }
  0x48   :  { %v1128_v31 = vld [vmem:[%s1537_s1 + $0x8] sm:$0xff]   ;;  %v1132_v36 = vld [vmem:[%s1537_s1] sm:$0xff]   ;;  %v1136_v47 = vld [vmem:[%s1537_s1 + $0x138] sm:$0xff]  }
  0x49   :  { %980 = vmatpush3.bf16.msra.mxu0 %v1112_v10  ;;  %v1129_v32 = vld [vmem:[%s1537_s1 + $0x88] sm:$0xff]   ;;  %v1133_v37 = vld [vmem:[%s1537_s1 + $0x80] sm:$0xff]   ;;  %v1138_v50 = vld [vmem:[%s1537_s1 + $0x170] sm:$0xff]  }
  0x4a   :  { %1002 = vmatpush3.bf16.msra.mxu1 %v1113_v11  ;;  %981 = vmatprep.subr.bf16.mxu0 %v1114_v12  ;;  %v89_v38 = vld [vmem:[%s1536_s0] sm:$0x7f]  ;;  %v1137_v52 = vld [vmem:[%s1537_s1 + $0x1b8] sm:$0xff]   ;;  %v1139_v54 = vld [vmem:[%s1537_s1 + $0x130] sm:$0xff]  }
  0x4b   :  { %1003 = vmatprep.subr.bf16.mxu1 %v1115_v13  ;;  %v210_v39 = vcombine.high %v89_v38, %v89_v38  ;;  %v217_v40 = vrot.slane %v89_v38, %v1424_v35  ;;  %v1141_v55 = vld [vmem:[%s1537_s1 + $0x168] sm:$0xff]   ;;  %v1140_v56 = vld [vmem:[%s1537_s1 + $0x1b0] sm:$0xff]   ;;  %v1144_v58 = vld [vmem:[%s1537_s1 + $0x160] sm:$0xff]  }
  0x4c   :  { %v1142_v57 = vld [vmem:[%s1537_s1 + $0x128] sm:$0xff]   ;;  %v1145_v60 = vld [vmem:[%s1537_s1 + $0x120] sm:$0xff]   ;;  %v1147_v61 = vld [vmem:[%s1537_s1 + $0x158] sm:$0xff]  }
  0x4d   :  { %982 = vmatpush3.bf16.msra.mxu0 %v1116_v14  ;;  %v225_v43 = vcombine.high %v217_v40, %v217_v40  ;;  %v233_v44 = vrot.slane %v217_v40, %v1424_v35  ;;  %v224_v45 = vrot.slane %v210_v39, %v1424_v35  ;;  %v1143_v59 = vld [vmem:[%s1537_s1 + $0x1a8] sm:$0xff]   ;;  %v1146_v62 = vld [vmem:[%s1537_s1 + $0x1a0] sm:$0xff]   ;;  %v1148_v63 = vld [vmem:[%s1537_s1 + $0x118] sm:$0xff]  }
  0x4e   :  { %1004 = vmatpush3.bf16.msra.mxu1 %v1117_v15  ;;  %983 = vmatprep.subr.bf16.mxu0 %v1118_v16  ;;  %v1149_v0 = vld [vmem:[%s1537_s1 + $0x198] sm:$0xff]   ;;  %v1150_v1 = vld [vmem:[%s1537_s1 + $0x150] sm:$0xff]   ;;  %v1153_v3 = vld [vmem:[%s1537_s1 + $0x148] sm:$0xff]  }
  0x4f   :  { %1005 = vmatprep.subr.bf16.mxu1 %v1119_v17  ;;  %v247_v46 = vrot.slane %v225_v43, %v1424_v35  ;;  %v226_v48 = vcombine.high %v224_v45, %v224_v45  ;;  %v255_v49 = vcombine.high %v233_v44, %v233_v44  ;;  %v1151_v2 = vld [vmem:[%s1537_s1 + $0x110] sm:$0xff]   ;;  %v1154_v5 = vld [vmem:[%s1537_s1 + $0x108] sm:$0xff]   ;;  %v1156_v6 = vld [vmem:[%s1537_s1 + $0x140] sm:$0xff]   ;;  %v240_v9 = vrot.slane %v224_v45, %v1424_v35 }
  0x50   :  { %v1152_v4 = vld [vmem:[%s1537_s1 + $0x190] sm:$0xff]   ;;  %v1155_v7 = vld [vmem:[%s1537_s1 + $0x188] sm:$0xff]   ;;  %v1157_v8 = vld [vmem:[%s1537_s1 + $0x100] sm:$0xff]  }
  0x51   :  { %984 = vmatpush3.bf16.msra.mxu0 %v1120_v18  ;;  %633 = vmatprep.mubr.bf16.mxu0 %v247_v46  ;;  %v257_v51 = vcombine.high %v247_v46, %v247_v46  ;;  %v254_v53 = vrot.slane %v226_v48, %v1424_v35  ;;  %v1158_v10 = vld [vmem:[%s1537_s1 + $0x180] sm:$0xff]   ;;  %v256_v11 = vcombine.high %v240_v9, %v240_v9  ;;  %v1159_v12 = vld [vmem:[#allocation4 + $0x8] sm:$0xff]   ;;  %v1162_v43 = vld [vmem:[#allocation7] sm:$0xff]  }
  0x52   :  { %1006 = vmatpush3.bf16.msra.mxu1 %v1121_v19  ;;  %985 = vmatprep.subr.bf16.mxu0 %v1122_v20  ;;  %v1160_v13 = vld [vmem:[#allocation4] sm:$0xff]   ;;  %v910_v23 = vld [vmem:[#allocation2] ss:$0 sm:$0xff] }
  0x53   :  { %1007 = vmatprep.subr.bf16.mxu1 %v1123_v21  ;;  %673 = vmatprep.mubr.bf16.mxu1 %v257_v51 }
  0x55   :  { %986 = vmatpush3.bf16.msra.mxu0 %v1124_v25 }
  0x56   :  { %1008 = vmatpush3.bf16.msra.mxu1 %v1125_v26  ;;  %987 = vmatprep.subr.bf16.mxu0 %v1126_v27 }
  0x57   :  { %1009 = vmatprep.subr.bf16.mxu1 %v1127_v28 }
  0x59   :  { %988 = vmatpush3.bf16.msra.mxu0 %v1128_v31 }
  0x5a   :  { %1010 = vmatpush3.bf16.msra.mxu1 %v1129_v32  ;;  %989 = vmatprep.subr.bf16.mxu0 %v1130_v33 }
  0x5b   :  { %1011 = vmatprep.subr.bf16.mxu1 %v1131_v34 }
  0x5d   :  { %990 = vmatpush3.bf16.msra.mxu0 %v1132_v36 }
  0x5e   :  { %1012 = vmatpush3.bf16.msra.mxu1 %v1133_v37  ;;  %1019 = vmatprep.subr.bf16.mxu0 %v1135_v41  ;;  %v1161_v41 = vld [vmem:[#allocation7 + $0x8] sm:$0xff]  }
  0x5f   :  { %1056 = vmatprep.subr.bf16.mxu1 %v1277_v42 }
  0x60   :  { %634 = vmatmul.mubr.bf16.vlgmr.msra.gmra.mxu0 %v233_v44  ;;  %v967_v44 = vld [vmem:[#allocation6] ss:$0 sm:$0xff] }
  0x61   :  { %1020 = vmatpush3.bf16.msra.mxu0 %v1136_v47  ;;  %674 = vmatmul.mubr.bf16.vlgmr.msra.gmra.mxu1 %v255_v49 }
  0x62   :  { %1021 = vmatprep.subr.bf16.mxu0 %v1138_v50  ;;  %1057 = vmatpush3.bf16.msra.mxu1 %v1137_v52 }
  0x63   :  { %713 = vmatprep.mubr.bf16.mxu0 %v254_v53  ;;  %1058 = vmatprep.subr.bf16.mxu1 %v1277_v42  ;;  %v971_v53 = vld [vmem:[#allocation9] ss:$0 sm:$0xff] }
  0x64   :  { %1072 = vmatprep.mubr.msk.bf16.mxu1 %vm1278_vm0, %v1277_v42 }
  0x65   :  { %1022 = vmatpush3.bf16.msra.mxu0 %v1139_v54 }
  0x66   :  { %1023 = vmatprep.subr.bf16.mxu0 %v1141_v55  ;;  %1059 = vmatpush3.bf16.msra.mxu1 %v1140_v56 }
  0x67   :  { %1060 = vmatprep.subr.bf16.mxu1 %v1277_v42 }
  0x69   :  { %1024 = vmatpush3.bf16.msra.mxu0 %v1142_v57 }
  0x6a   :  { %1025 = vmatprep.subr.bf16.mxu0 %v1144_v58  ;;  %1061 = vmatpush3.bf16.msra.mxu1 %v1143_v59 }
  0x6b   :  { %1062 = vmatprep.subr.bf16.mxu1 %v1277_v42 }
  0x6d   :  { %1026 = vmatpush3.bf16.msra.mxu0 %v1145_v60 }
  0x6e   :  { %1027 = vmatprep.subr.bf16.mxu0 %v1147_v61  ;;  %1063 = vmatpush3.bf16.msra.mxu1 %v1146_v62 }
  0x6f   :  { %1064 = vmatprep.subr.bf16.mxu1 %v1277_v42 }
  0x71   :  { %1028 = vmatpush3.bf16.msra.mxu0 %v1148_v63 }
  0x72   :  { %1029 = vmatprep.subr.bf16.mxu0 %v1150_v1  ;;  %1065 = vmatpush3.bf16.msra.mxu1 %v1149_v0 }
  0x73   :  { %1066 = vmatprep.subr.bf16.mxu1 %v1277_v42 }
  0x75   :  { %1030 = vmatpush3.bf16.msra.mxu0 %v1151_v2 }
  0x76   :  { %1031 = vmatprep.subr.bf16.mxu0 %v1153_v3  ;;  %1067 = vmatpush3.bf16.msra.mxu1 %v1152_v4 }
  0x77   :  { %1068 = vmatprep.subr.bf16.mxu1 %v1277_v42 }
  0x79   :  { %1032 = vmatpush3.bf16.msra.mxu0 %v1154_v5 }
  0x7a   :  { %1033 = vmatprep.subr.bf16.mxu0 %v1156_v6  ;;  %1069 = vmatpush3.bf16.msra.mxu1 %v1155_v7 }
  0x7b   :  { %1070 = vmatprep.subr.bf16.mxu1 %v1277_v42 }
  0x7d   :  { %1034 = vmatpush3.bf16.msra.mxu0 %v1157_v8 }
  0x7e   :  { %1076 = vmatprep.subr.bf16.mxu0 %v1277_v42  ;;  %1071 = vmatpush3.bf16.msra.mxu1 %v1158_v10 }
  0x7f   :  { %1084 = vmatprep.subr.bf16.mxu1 %v1277_v42 }
  0x80   :  { %714 = vmatmul.mubr.bf16.vlgmr.msra.gmra.mxu0 %v240_v9 }
  0x81   :  { %1080 = vmatprep.mubr.msk.bf16.mxu0 %vm1278_vm0, %v1277_v42  ;;  %1073 = vmatmul.mubr.bf16.vlgmr.msra.gmra.mxu1 %v256_v11 }
  0x82   :  { %1088 = vmatprep.mubr.msk.bf16.mxu1 %vm1278_vm0, %v1277_v42  ;;  %1077 = vmatpush3.bf16.msra.mxu0 %v1159_v12 }
  0x83   :  { %1078 = vmatprep.subr.bf16.mxu0 %v1277_v42  ;;  %1085 = vmatpush3.bf16.msra.mxu1 %v1161_v41 }
  0x84   :  { %1086 = vmatprep.subr.bf16.mxu1 %v1277_v42 }
  0x86   :  { %1079 = vmatpush3.bf16.msra.mxu0 %v1160_v13 }
  0x87   :  { %1087 = vmatpush3.bf16.msra.mxu1 %v1162_v43 }
 0x120   :  { %v991_v14 = vpop.f32.mrf.mxu0 }
 0x121   :  { %v1013_v15 = vpop.f32.mrf.mxu1 }
 0x122   :  { %v992_v16 = vpop.f32.mrf.mxu0 }
 0x123   :  { %v1014_v17 = vpop.f32.mrf.mxu1  ;;  %v993_v22 = vadd.f32 %v992_v16, %v991_v14 }
 0x124   :  { %v994_v18 = vpop.f32.mrf.mxu0  ;;  %v1015_v25 = vadd.f32 %v1014_v17, %v1013_v15 }
 0x125   :  { %v1016_v19 = vpop.f32.mrf.mxu1  ;;  %v636_v24 = vadd.f32 %v993_v22, %v910_v23 }
 0x126   :  { %v995_v20 = vpop.f32.mrf.mxu0 }
 0x127   :  { %v1017_v21 = vpop.f32.mrf.mxu1  ;;  %v676_v29 = vadd.f32 %v1015_v25, %v636_v24 }
 0x140   :  { %v1035_v26 = vpop.f32.mrf.mxu0 }
 0x141   :  { %v755_v27 = vpop.f32.mrf.mxu1 }
 0x142   :  { %v1036_v28 = vpop.f32.mrf.mxu0 }
 0x143   :  { %v1037_v30 = vadd.f32 %v1036_v28, %v1035_v26  ;;  %v1074_v31 = vpop.f32.mrf.mxu1 }
 0x144   :  { %v1038_v32 = vpop.f32.mrf.mxu0 }
 0x145   :  { %v716_v33 = vadd.f32 %v1037_v30, %v676_v29  ;;  %v758_v34 = vpop.f32.mrf.mxu1 }
 0x146   :  { %v1039_v35 = vpop.f32.mrf.mxu0 }
 0x147   :  { %v756_v36 = vadd.f32 %v755_v27, %v716_v33  ;;  %v1075_v37 = vpop.f32.mrf.mxu1 }
 0x149   :  { %vm761_vm1 = vcmp.gt.f32.partialorder %v756_v36, 0.0  ;;  %v762_v38 = vmul.f32 0.2, %v756_v36 }
 0x14b   :  { %v763_v39 = vsel %vm761_vm1, %v756_v36, %v762_v38 }
 0x14c   :  { %v764_v40 = vpack.c.bf16 %v763_v39, %v763_v39 }
 0x14e   :  { %1081 = vmatmul.mubr.msk.bf16.vlgmr.msra.gmra.mxu0 %vm788_vm2, %v764_v40 }
 0x20e   :  { %v826_v45 = vpop.f32.mrf.mxu0 }
 0x20f   :  { %v827_v46 = vadd.f32 %v967_v44, %v826_v45 }
 0x210   :  { %v1082_v47 = vpop.f32.mrf.mxu0 }
 0x211   :  { %vm832_vm3 = vcmp.gt.f32.partialorder %v827_v46, 0.0  ;;  %v833_v48 = vmul.f32 0.2, %v827_v46 }
 0x212   :  { %v829_v49 = vpop.f32.mrf.mxu0 }
 0x213   :  { %v834_v50 = vsel %vm832_vm3, %v827_v46, %v833_v48 }
 0x214   :  { %v835_v51 = vpack.c.bf16 %v834_v50, %v834_v50  ;;  %v1083_v52 = vpop.f32.mrf.mxu0 }
 0x216   :  { %1089 = vmatmul.mubr.msk.bf16.vlgmr.msra.gmra.mxu1 %vm788_vm2, %v835_v51 }
 0x2d6   :  { %v896_v54 = vpop.f32.mrf.mxu1 }
 0x2d7   :  { %v897_v55 = vadd.f32 %v971_v53, %v896_v54 }
 0x2d8   :  { %v1090_v56 = vpop.f32.mrf.mxu1 }
 0x2d9   :  { %902 = vst [vmem:[%s1543_s7] sm:$0x3] %v897_v55 }
 0x2da   :  { %v899_v42 = vpop.f32.mrf.mxu1 }
 0x2dc   :  { %v1091_v57 = vpop.f32.mrf.mxu1 }
 0x2dd   :  { %907 = vsyncpa [#allocation3], 1 }
 0x2de   :  { %908 = vsyncpa [#allocation5], 1 }
 0x2df   :  { %909 = vsyncpa [#allocation8], 1 }

// kernel: adda_forward.3
= control target key start
LH: loop header
LB: loop body
LE: loop exit
PB: predicated region body
PF: predicated region fallthrough
CT: control target
= control target key end

     0   :  { %s13807_s0 = inlined_call_operand.vmem [shape: bf16[392,16], index: 0, kind: input, shape index: {}]   ;;  %s13808_s1 = inlined_call_operand.vmem [shape: bf16[9,98,392], index: 1, kind: input, shape index: {}]   ;;  %s13809_s2 = inlined_call_operand.vmem [shape: bf16[9,32,98], index: 2, kind: input, shape index: {}]   ;;  %s13810_s3 = inlined_call_operand.vmem [shape: bf16[16,32], index: 3, kind: input, shape index: {}]   ;;  %s13811_s4 = inlined_call_operand.vmem [shape: f32[1,32], index: 4, kind: input, shape index: {}]   ;;  %s13812_s5 = inlined_call_operand.vmem [shape: bf16[9,32,32], index: 5, kind: input, shape index: {}]   ;;  %s13813_s6 = inlined_call_operand.vmem [shape: f32[1,32], index: 6, kind: input, shape index: {}]   ;;  %s13814_s7 = inlined_call_operand.vmem [shape: bf16[9,32,32], index: 7, kind: input, shape index: {}]   ;;  %s13815_s8 = inlined_call_operand.vmem [shape: f32[1,32], index: 8, kind: input, shape index: {}]   ;;  %s13816_s9 = inlined_call_operand.vmem [shape: bf16[16,32,16], index: 9, kind: input, shape index: {}]   ;;  %s13817_s10 = inlined_call_operand.vmem [shape: f32[1,16], index: 10, kind: input, shape index: {}]   ;;  %s13818_s11 = inlined_call_operand.vmem [shape: bf16[16,32], index: 11, kind: input, shape index: {}]   ;;  %s13819_s12 = inlined_call_operand.vmem [shape: f32[1,32], index: 12, kind: input, shape index: {}]   ;;  %s13820_s13 = inlined_call_operand.vmem [shape: bf16[32,32], index: 13, kind: input, shape index: {}]   ;;  %s13821_s14 = inlined_call_operand.vmem [shape: f32[1,32], index: 14, kind: input, shape index: {}]   ;;  %s13822_s15 = inlined_call_operand.vmem [shape: bf16[32,128], index: 15, kind: input, shape index: {}]   ;;  %s13823_s16 = inlined_call_operand.vmem [shape: f32[1,128], index: 16, kind: input, shape index: {}]   ;;  %s13824_s17 = inlined_call_operand.vmem [shape: f32[2,128], index: 17, kind: output, shape index: {0}]   ;;  %s13825_s18 = inlined_call_operand.hbm [shape: f32[2,16], index: 18, kind: output, shape index: {1}]  }
   0x1   :  { %13843 = sst [smem:[#allocation27_spill]] %s13807_s0 }
   0x2   :  { %13844 = sst [smem:[#allocation28_spill]] %s13808_s1 }
   0x3   :  { %13845 = sst [smem:[#allocation29_spill]] %s13809_s2 }
   0x4   :  { %v10251_v0 = vld [vmem:[%s13810_s3] sm:$0xff]   ;;  %v13831_v1 = vmov 0.0   ;;  %s13846_s0 = sld [smem:[#allocation27_spill]]  ;;  %vm10755_vm0 = vmmov 0   ;;  %vm247_vm1 = vcmask 130048  }
   0x5   :  { %9464 = vmatprep.subr.bf16.mxu0 %v13831_v1  ;;  %9466 = vmatprep.mubr.msk.bf16.mxu0 %vm10755_vm0, %v13831_v1 }
   0x6   :  { %9465 = vmatpush3.bf16.msra.mxu0 %v10251_v0 }
   0x7   :  { %9566 = vmatprep.subr.bf16.mxu0 %v13831_v1 }
   0xa   :  { %v10252_v2 = vld [vmem:[%s13846_s0] sm:$0xff]   ;;  %v10253_v3 = vld [vmem:[%s13846_s0 + $0x8] sm:$0xff]   ;;  %v10254_v4 = vld [vmem:[%s13846_s0 + $0x10] sm:$0xff]  }
   0xb   :  { %9467 = vmatmul.mubr.msk.bf16.vlgmr.msra.gmra.mxu0 %vm247_vm1, %v10252_v2  ;;  %v10255_v5 = vld [vmem:[%s13846_s0 + $0x18] sm:$0xff]   ;;  %v10256_v6 = vld [vmem:[%s13846_s0 + $0x20] sm:$0xff]   ;;  %v10257_v7 = vld [vmem:[%s13846_s0 + $0x28] sm:$0xff]  }
   0xc   :  { %9470 = vmatprep.mubr.msk.bf16.mxu0 %vm10755_vm0, %v13831_v1  ;;  %v10258_v8 = vld [vmem:[%s13846_s0 + $0x30] sm:$0xff]   ;;  %v10259_v9 = vld [vmem:[%s13846_s0 + $0x38] sm:$0xff]   ;;  %v10260_v10 = vld [vmem:[%s13846_s0 + $0x40] sm:$0xff]  }
   0xd   :  { %v10261_v11 = vld [vmem:[%s13846_s0 + $0x48] sm:$0xff]   ;;  %v10262_v12 = vld [vmem:[%s13846_s0 + $0x50] sm:$0xff]   ;;  %v10263_v13 = vld [vmem:[%s13846_s0 + $0x58] sm:$0xff]  }
   0xe   :  { %v10264_v14 = vld [vmem:[%s13846_s0 + $0x60] sm:$0xff]   ;;  %v10265_v15 = vld [vmem:[%s13846_s0 + $0x68] sm:$0xff]   ;;  %v10266_v16 = vld [vmem:[%s13846_s0 + $0x70] sm:$0xff]  }
   0xf   :  { %v10267_v17 = vld [vmem:[%s13846_s0 + $0x78] sm:$0xff]   ;;  %v10268_v18 = vld [vmem:[%s13846_s0 + $0x80] sm:$0xff]   ;;  %v10269_v19 = vld [vmem:[%s13846_s0 + $0x88] sm:$0xff]  }
  0x10   :  { %v10270_v20 = vld [vmem:[%s13846_s0 + $0x90] sm:$0xff]   ;;  %v10271_v21 = vld [vmem:[%s13846_s0 + $0x98] sm:$0xff]  }
  0x13   :  { %9471 = vmatmul.mubr.msk.bf16.gmra.mxu0 %vm247_vm1, %v10253_v3 }
  0x14   :  { %9474 = vmatprep.mubr.msk.bf16.mxu0 %vm10755_vm0, %v13831_v1 }
  0x1b   :  { %9475 = vmatmul.mubr.msk.bf16.gmra.mxu0 %vm247_vm1, %v10254_v4 }
  0x1c   :  { %9478 = vmatprep.mubr.msk.bf16.mxu0 %vm10755_vm0, %v13831_v1 }
  0x23   :  { %9479 = vmatmul.mubr.msk.bf16.gmra.mxu0 %vm247_vm1, %v10255_v5 }
  0x24   :  { %9482 = vmatprep.mubr.msk.bf16.mxu0 %vm10755_vm0, %v13831_v1 }
  0x2b   :  { %9483 = vmatmul.mubr.msk.bf16.gmra.mxu0 %vm247_vm1, %v10256_v6 }
  0x2c   :  { %9486 = vmatprep.mubr.msk.bf16.mxu0 %vm10755_vm0, %v13831_v1 }
  0x33   :  { %9487 = vmatmul.mubr.msk.bf16.gmra.mxu0 %vm247_vm1, %v10257_v7 }
  0x34   :  { %9490 = vmatprep.mubr.msk.bf16.mxu0 %vm10755_vm0, %v13831_v1 }
  0x3b   :  { %9491 = vmatmul.mubr.msk.bf16.gmra.mxu0 %vm247_vm1, %v10258_v8 }
  0x3c   :  { %9494 = vmatprep.mubr.msk.bf16.mxu0 %vm10755_vm0, %v13831_v1 }
  0x43   :  { %9495 = vmatmul.mubr.msk.bf16.gmra.mxu0 %vm247_vm1, %v10259_v9 }
  0x44   :  { %9498 = vmatprep.mubr.msk.bf16.mxu0 %vm10755_vm0, %v13831_v1 }
  0x4b   :  { %9499 = vmatmul.mubr.msk.bf16.gmra.mxu0 %vm247_vm1, %v10260_v10 }
  0x4c   :  { %9502 = vmatprep.mubr.msk.bf16.mxu0 %vm10755_vm0, %v13831_v1 }
  0x53   :  { %9503 = vmatmul.mubr.msk.bf16.gmra.mxu0 %vm247_vm1, %v10261_v11 }
  0x54   :  { %9506 = vmatprep.mubr.msk.bf16.mxu0 %vm10755_vm0, %v13831_v1 }
  0x5b   :  { %9507 = vmatmul.mubr.msk.bf16.gmra.mxu0 %vm247_vm1, %v10262_v12 }
  0x5c   :  { %9510 = vmatprep.mubr.msk.bf16.mxu0 %vm10755_vm0, %v13831_v1 }
  0x63   :  { %9511 = vmatmul.mubr.msk.bf16.gmra.mxu0 %vm247_vm1, %v10263_v13 }
  0x64   :  { %9514 = vmatprep.mubr.msk.bf16.mxu0 %vm10755_vm0, %v13831_v1 }
  0x6b   :  { %9515 = vmatmul.mubr.msk.bf16.gmra.mxu0 %vm247_vm1, %v10264_v14 }
  0x6c   :  { %9518 = vmatprep.mubr.msk.bf16.mxu0 %vm10755_vm0, %v13831_v1 }
  0x73   :  { %9519 = vmatmul.mubr.msk.bf16.gmra.mxu0 %vm247_vm1, %v10265_v15 }
  0x74   :  { %9522 = vmatprep.mubr.msk.bf16.mxu0 %vm10755_vm0, %v13831_v1 }
  0x7b   :  { %9523 = vmatmul.mubr.msk.bf16.gmra.mxu0 %vm247_vm1, %v10266_v16 }
  0x7c   :  { %9526 = vmatprep.mubr.msk.bf16.mxu0 %vm10755_vm0, %v13831_v1 }
  0x83   :  { %9527 = vmatmul.mubr.msk.bf16.gmra.mxu0 %vm247_vm1, %v10267_v17 }
  0x84   :  { %9530 = vmatprep.mubr.msk.bf16.mxu0 %vm10755_vm0, %v13831_v1 }
  0x8b   :  { %9531 = vmatmul.mubr.msk.bf16.gmra.mxu0 %vm247_vm1, %v10268_v18 }
  0x8c   :  { %9534 = vmatprep.mubr.msk.bf16.mxu0 %vm10755_vm0, %v13831_v1 }
  0x93   :  { %9535 = vmatmul.mubr.msk.bf16.gmra.mxu0 %vm247_vm1, %v10269_v19 }
  0x94   :  { %9538 = vmatprep.mubr.msk.bf16.mxu0 %vm10755_vm0, %v13831_v1 }
  0x9b   :  { %9539 = vmatmul.mubr.msk.bf16.gmra.mxu0 %vm247_vm1, %v10270_v20 }
  0x9c   :  { %9542 = vmatprep.mubr.msk.bf16.mxu0 %vm10755_vm0, %v13831_v1 }
  0xa3   :  { %9543 = vmatmul.mubr.msk.bf16.gmra.mxu0 %vm247_vm1, %v10271_v21 }
  0xa4   :  { %9546 = vmatprep.mubr.msk.bf16.mxu0 %vm10755_vm0, %v13831_v1 }
  0xa5   :  { %24 = vsyncpa [#allocation4], 0  ;;  %v10272_v22 = vld [vmem:[%s13846_s0 + $0xa0] sm:$0xff]   ;;  %v10273_v23 = vld [vmem:[%s13846_s0 + $0xa8] sm:$0xff]   ;;  %s13849_s25 = sld [smem:[#allocation28_spill]]  ;;  %vm782_vm2 = vcmask 64512  }
  0xa6   :  { %v10274_v24 = vld [vmem:[%s13846_s0 + $0xb0] sm:$0xff]   ;;  %v10275_v25 = vld [vmem:[%s13846_s0 + $0xb8] sm:$0xff]   ;;  %v10276_v26 = vld [vmem:[%s13846_s0 + $0xc0] ss:$0 sps:$4 sm:$0xff]   ;;  %vm804_vm3 = vcmask 1043456   ;;  %vm1370_vm4 = vcmask 261120  }
  0xa7   :  { %v10277_v27 = vld [vmem:[%s13812_s5 + $0x18] sm:$0xff]   ;;  %v11014_v28 = vld [vmem:[%s13811_s4] ss:$0 sm:$0xff]  ;;  %v10278_v30 = vld [vmem:[%s13812_s5 + $0x10] sm:$0xff]   ;;  %s13968_s28 = sld [smem:[#allocation29_spill]]  ;;  %vm5134_vm5 = vcmask 801792  }
  0xa8   :  { %9567 = vmatpush3.bf16.msra.mxu0 %v10277_v27  ;;  %vm5141_vm6 = vcmask 1040384   ;;  %vm7480_vm7 = vcmask 123904   ;;  %vm7681_vm9 = vcmask 1041408  }
  0xa9   :  { %9568 = vmatprep.subr.bf16.mxu0 %v13831_v1 }
  0xab   :  { %9547 = vmatmul.mubr.msk.bf16.gmra.mxu0 %vm247_vm1, %v10272_v22  ;;  %v10281_v8 = vld [vmem:[%s13849_s25 + $0x4] ss:$16 sps:$4 sm:$0xff]  }
  0xac   :  { %9550 = vmatprep.mubr.msk.bf16.mxu0 %vm10755_vm0, %v13831_v1  ;;  %9569 = vmatpush3.bf16.msra.mxu0 %v10278_v30 }
  0xad   :  { %840 = vmatprep.mubr.bf16.mxu1 %v10281_v8 }
  0xb3   :  { %9551 = vmatmul.mubr.msk.bf16.gmra.mxu0 %vm247_vm1, %v10273_v23 }
  0xb4   :  { %9554 = vmatprep.mubr.msk.bf16.mxu0 %vm10755_vm0, %v13831_v1 }
  0xbb   :  { %9555 = vmatmul.mubr.msk.bf16.gmra.mxu0 %vm247_vm1, %v10274_v24 }
  0xbc   :  { %9558 = vmatprep.mubr.msk.bf16.mxu0 %vm10755_vm0, %v13831_v1 }
  0xc3   :  { %9559 = vmatmul.mubr.msk.bf16.gmra.mxu0 %vm247_vm1, %v10275_v25 }
  0xc4   :  { %9562 = vmatprep.mubr.msk.bf16.mxu0 %vm10755_vm0, %v13831_v1 }
  0xcb   :  { %v357_v29 = vpop.f32.mrf.mxu0  ;;  %9563 = vmatmul.mubr.msk.bf16.gmra.mxu0 %vm247_vm1, %v10276_v26 }
  0xcc   :  { %9570 = vmatprep.mubr.msk.bf16.mxu0 %vm10755_vm0, %v13831_v1  ;;  %v358_v32 = vadd.f32 %v11014_v28, %v357_v29 }
  0xcd   :  { %v9468_v31 = vpop.f32.mrf.mxu0 }
  0xce   :  { %v555_v36 = vmax.f32 %v358_v32, 0.0 }
  0xcf   :  { %v360_v33 = vpop.f32.mrf.mxu0 }
  0xd0   :  { %v361_v34 = vadd.f32 %v11014_v28, %v360_v33 }
  0xd1   :  { %v9469_v35 = vpop.f32.mrf.mxu0 }
  0xd2   :  { %v556_v37 = vmax.f32 %v361_v34, 0.0 }
  0xd3   :  { %v365_v38 = vpop.f32.mrf.mxu0 }
  0xd4   :  { %v11024_v39 = vpack.c.bf16 %v556_v37, %v555_v36  ;;  %v366_v41 = vadd.f32 %v11014_v28, %v365_v38 }
  0xd5   :  { %v9472_v40 = vpop.f32.mrf.mxu0 }
  0xd6   :  { %13847 = vst [vmem:[#allocation6_spill] sm:$0xff] %v11024_v39  ;;  %v557_v45 = vmax.f32 %v366_v41, 0.0 }
  0xd7   :  { %v368_v42 = vpop.f32.mrf.mxu0 }
  0xd8   :  { %v369_v43 = vadd.f32 %v11014_v28, %v368_v42 }
  0xd9   :  { %v9473_v44 = vpop.f32.mrf.mxu0 }
  0xda   :  { %v558_v46 = vmax.f32 %v369_v43, 0.0 }
  0xdb   :  { %v373_v47 = vpop.f32.mrf.mxu0 }
  0xdc   :  { %v11028_v48 = vpack.c.bf16 %v558_v46, %v557_v45  ;;  %v374_v50 = vadd.f32 %v11014_v28, %v373_v47 }
  0xdd   :  { %v9476_v49 = vpop.f32.mrf.mxu0 }
  0xde   :  { %13848 = vst [vmem:[#allocation7_spill] sm:$0xff] %v11028_v48  ;;  %v559_v54 = vmax.f32 %v374_v50, 0.0 }
  0xdf   :  { %v376_v51 = vpop.f32.mrf.mxu0 }
  0xe0   :  { %v377_v52 = vadd.f32 %v11014_v28, %v376_v51 }
  0xe1   :  { %v9477_v53 = vpop.f32.mrf.mxu0 }
  0xe2   :  { %v560_v55 = vmax.f32 %v377_v52, 0.0 }
  0xe3   :  { %v381_v56 = vpop.f32.mrf.mxu0 }
  0xe4   :  { %v11032_v57 = vpack.c.bf16 %v560_v55, %v559_v54  ;;  %v382_v59 = vadd.f32 %v11014_v28, %v381_v56 }
  0xe5   :  { %v9480_v58 = vpop.f32.mrf.mxu0 }
  0xe6   :  { %v561_v63 = vmax.f32 %v382_v59, 0.0 }
  0xe7   :  { %v384_v60 = vpop.f32.mrf.mxu0 }
  0xe8   :  { %v385_v61 = vadd.f32 %v11014_v28, %v384_v60 }
  0xe9   :  { %v9481_v62 = vpop.f32.mrf.mxu0 }
  0xea   :  { %v562_v0 = vmax.f32 %v385_v61, 0.0 }
  0xeb   :  { %v389_v2 = vpop.f32.mrf.mxu0 }
  0xec   :  { %v11036_v3 = vpack.c.bf16 %v562_v0, %v561_v63  ;;  %v390_v5 = vadd.f32 %v11014_v28, %v389_v2 }
  0xed   :  { %v9484_v4 = vpop.f32.mrf.mxu0 }
  0xee   :  { %v563_v10 = vmax.f32 %v390_v5, 0.0 }
  0xef   :  { %v392_v6 = vpop.f32.mrf.mxu0 }
  0xf0   :  { %v393_v7 = vadd.f32 %v11014_v28, %v392_v6 }
  0xf1   :  { %v9485_v9 = vpop.f32.mrf.mxu0 }
  0xf2   :  { %v564_v11 = vmax.f32 %v393_v7, 0.0 }
  0xf3   :  { %v397_v12 = vpop.f32.mrf.mxu0 }
  0xf4   :  { %v11043_v13 = vpack.c.bf16 %v564_v11, %v563_v10  ;;  %v398_v15 = vadd.f32 %v11014_v28, %v397_v12 }
  0xf5   :  { %v9488_v14 = vpop.f32.mrf.mxu0 }
  0xf6   :  { %v565_v19 = vmax.f32 %v398_v15, 0.0 }
  0xf7   :  { %v400_v16 = vpop.f32.mrf.mxu0 }
  0xf8   :  { %v401_v17 = vadd.f32 %v11014_v28, %v400_v16 }
  0xf9   :  { %v9489_v18 = vpop.f32.mrf.mxu0 }
  0xfa   :  { %v566_v20 = vmax.f32 %v401_v17, 0.0 }
  0xfb   :  { %v405_v21 = vpop.f32.mrf.mxu0 }
  0xfc   :  { %v11047_v22 = vpack.c.bf16 %v566_v20, %v565_v19  ;;  %v406_v24 = vadd.f32 %v11014_v28, %v405_v21 }
  0xfd   :  { %v9492_v23 = vpop.f32.mrf.mxu0 }
  0xfe   :  { %v567_v29 = vmax.f32 %v406_v24, 0.0 }
  0xff   :  { %v408_v25 = vpop.f32.mrf.mxu0 }
 0x100   :  { %v409_v26 = vadd.f32 %v11014_v28, %v408_v25 }
 0x101   :  { %v9493_v27 = vpop.f32.mrf.mxu0 }
 0x102   :  { %v568_v30 = vmax.f32 %v409_v26, 0.0 }
 0x103   :  { %v413_v31 = vpop.f32.mrf.mxu0 }
 0x104   :  { %v11051_v32 = vpack.c.bf16 %v568_v30, %v567_v29  ;;  %v414_v34 = vadd.f32 %v11014_v28, %v413_v31 }
 0x105   :  { %v9496_v33 = vpop.f32.mrf.mxu0 }
 0x106   :  { %v569_v38 = vmax.f32 %v414_v34, 0.0 }
 0x107   :  { %v416_v35 = vpop.f32.mrf.mxu0 }
 0x108   :  { %v417_v36 = vadd.f32 %v11014_v28, %v416_v35 }
 0x109   :  { %v9497_v37 = vpop.f32.mrf.mxu0 }
 0x10a   :  { %v570_v40 = vmax.f32 %v417_v36, 0.0 }
 0x10b   :  { %v421_v41 = vpop.f32.mrf.mxu0 }
 0x10c   :  { %v11055_v42 = vpack.c.bf16 %v570_v40, %v569_v38  ;;  %v422_v44 = vadd.f32 %v11014_v28, %v421_v41 }
 0x10d   :  { %v9500_v43 = vpop.f32.mrf.mxu0 }
 0x10e   :  { %v571_v49 = vmax.f32 %v422_v44, 0.0 }
 0x10f   :  { %v424_v45 = vpop.f32.mrf.mxu0 }
 0x110   :  { %v425_v46 = vadd.f32 %v11014_v28, %v424_v45 }
 0x111   :  { %v9501_v47 = vpop.f32.mrf.mxu0 }
 0x112   :  { %v572_v50 = vmax.f32 %v425_v46, 0.0 }
 0x113   :  { %v429_v51 = vpop.f32.mrf.mxu0 }
 0x114   :  { %v11059_v52 = vpack.c.bf16 %v572_v50, %v571_v49  ;;  %v430_v54 = vadd.f32 %v11014_v28, %v429_v51 }
 0x115   :  { %v9504_v53 = vpop.f32.mrf.mxu0 }
 0x116   :  { %13850 = vst [vmem:[#allocation8_spill] sm:$0xff] %v11059_v52  ;;  %v573_v59 = vmax.f32 %v430_v54, 0.0 }
 0x117   :  { %v432_v55 = vpop.f32.mrf.mxu0 }
 0x118   :  { %v433_v56 = vadd.f32 %v11014_v28, %v432_v55 }
 0x119   :  { %v9505_v58 = vpop.f32.mrf.mxu0 }
 0x11a   :  { %v574_v60 = vmax.f32 %v433_v56, 0.0 }
 0x11b   :  { %v11063_v61 = vpop.f32.mrf.mxu0 }
 0x11c   :  { %v11065_v62 = vpack.c.bf16 %v574_v60, %v573_v59 }
 0x11d   :  { %v9508_v63 = vpop.f32.mrf.mxu0 }
 0x11f   :  { %v440_v0 = vpop.f32.mrf.mxu0 }
 0x121   :  { %v9509_v2 = vpop.f32.mrf.mxu0 }
 0x123   :  { %v445_v4 = vpop.f32.mrf.mxu0 }
 0x124   :  { %v446_v63 = vadd.f32 %v11014_v28, %v445_v4 }
 0x125   :  { %v9512_v5 = vpop.f32.mrf.mxu0 }
 0x126   :  { %v577_v4 = vmax.f32 %v446_v63, 0.0  ;;  %v10291_v63 = vld [vmem:[%s13849_s25 + $0x84] ss:$16 sps:$4 sm:$0xff]  }
 0x127   :  { %v448_v6 = vpop.f32.mrf.mxu0 }
 0x128   :  { %v449_v53 = vadd.f32 %v11014_v28, %v448_v6 }
 0x129   :  { %v9513_v7 = vpop.f32.mrf.mxu0 }
 0x12a   :  { %v578_v6 = vmax.f32 %v449_v53, 0.0  ;;  %v10288_v53 = vld [vmem:[%s13849_s25 + $0x64] ss:$16 sps:$4 sm:$0xff]  }
 0x12b   :  { %v453_v8 = vpop.f32.mrf.mxu0 }
 0x12c   :  { %v454_v49 = vadd.f32 %v11014_v28, %v453_v8  ;;  %v441_v8 = vadd.f32 %v11014_v28, %v440_v0 }
 0x12d   :  { %v9516_v9 = vpop.f32.mrf.mxu0 }
 0x12e   :  { %v579_v2 = vmax.f32 %v454_v49, 0.0 }
 0x12f   :  { %v456_v10 = vpop.f32.mrf.mxu0 }
 0x130   :  { %v457_v43 = vadd.f32 %v11014_v28, %v456_v10 }
 0x131   :  { %v9517_v11 = vpop.f32.mrf.mxu0 }
 0x132   :  { %v580_v55 = vmax.f32 %v457_v43, 0.0 }
 0x133   :  { %v461_v12 = vpop.f32.mrf.mxu0 }
 0x134   :  { %v462_v37 = vadd.f32 %v11014_v28, %v461_v12  ;;  %v11094_v9 = vpack.c.bf16 %v580_v55, %v579_v2  ;;  %v438_v12 = vadd.f32 %v11014_v28, %v11063_v61 }
 0x135   :  { %v9520_v14 = vpop.f32.mrf.mxu0 }
 0x136   :  { %v581_v50 = vmax.f32 %v462_v37, 0.0 }
 0x137   :  { %v464_v15 = vpop.f32.mrf.mxu0 }
 0x138   :  { %v465_v31 = vadd.f32 %v11014_v28, %v464_v15 }
 0x139   :  { %v9521_v16 = vpop.f32.mrf.mxu0 }
 0x13a   :  { %v582_v44 = vmax.f32 %v465_v31, 0.0  ;;  %v576_v16 = vmax.f32 %v441_v8, 0.0  ;;  %v10279_v31 = vld [vmem:[%s13849_s25] ss:$16 sps:$4 sm:$0xff]  }
 0x13b   :  { %v469_v17 = vpop.f32.mrf.mxu0 }
 0x13c   :  { %v470_v27 = vadd.f32 %v11014_v28, %v469_v17  ;;  %v11086_v56 = vpack.c.bf16 %v582_v44, %v581_v50  ;;  %v11102_v17 = vpack.c.bf16 %v578_v6, %v577_v4  ;;  %v10285_v44 = vld [vmem:[%s13849_s25 + $0x44] ss:$16 sps:$4 sm:$0xff]   ;;  %v10287_v50 = vld [vmem:[%s13849_s25 + $0x40] ss:$16 sps:$4 sm:$0xff]  }
 0x13d   :  { %v9524_v18 = vpop.f32.mrf.mxu0 }
 0x13e   :  { %v583_v38 = vmax.f32 %v470_v27, 0.0 }
 0x13f   :  { %v472_v19 = vpop.f32.mrf.mxu0 }
 0x140   :  { %v473_v24 = vadd.f32 %v11014_v28, %v472_v19 }
 0x141   :  { %v9525_v20 = vpop.f32.mrf.mxu0 }
 0x142   :  { %v584_v33 = vmax.f32 %v473_v24, 0.0  ;;  %v575_v20 = vmax.f32 %v438_v12, 0.0 }
 0x143   :  { %v477_v21 = vpop.f32.mrf.mxu0 }
 0x144   :  { %v478_v25 = vadd.f32 %v11014_v28, %v477_v21  ;;  %v11076_v45 = vpack.c.bf16 %v584_v33, %v583_v38 }
 0x145   :  { %v9528_v23 = vpop.f32.mrf.mxu0 }
 0x146   :  { %v585_v34 = vmax.f32 %v478_v25, 0.0  ;;  %v11110_v23 = vpack.c.bf16 %v576_v16, %v575_v20 }
 0x147   :  { %v480_v26 = vpop.f32.mrf.mxu0 }
 0x148   :  { %v481_v29 = vadd.f32 %v11014_v28, %v480_v26 }
 0x149   :  { %v9529_v30 = vpop.f32.mrf.mxu0 }
 0x14a   :  { %v586_v35 = vmax.f32 %v481_v29, 0.0 }
 0x14b   :  { %v485_v36 = vpop.f32.mrf.mxu0 }
 0x14c   :  { %v11073_v40 = vpack.c.bf16 %v586_v35, %v585_v34  ;;  %v486_v46 = vadd.f32 %v11014_v28, %v485_v36  ;;  %v10282_v34 = vld [vmem:[%s13849_s25 + $0x24] ss:$16 sps:$4 sm:$0xff]   ;;  %v13829_v35 = vmov 0  }
 0x14d   :  { %v9532_v41 = vpop.f32.mrf.mxu0 }
 0x14e   :  { %13851 = vst [vmem:[#allocation9_spill] sm:$0xff] %v11073_v40  ;;  %8688 = vmatprep.subr.bf16.mxu1 %v11073_v40  ;;  %8822 = vmatprep.subr.bf16.mxu0 %v11073_v40  ;;  %v587_v58 = vmax.f32 %v486_v46, 0.0  ;;  %v10284_v41 = vld [vmem:[%s13849_s25 + $0x20] ss:$16 sps:$4 sm:$0xff]  }
 0x14f   :  { %v488_v47 = vpop.f32.mrf.mxu0  ;;  %8689 = vmatpush3.bf16.msra.mxu1 %v11055_v42 }
 0x150   :  { %v489_v51 = vadd.f32 %v11014_v28, %v488_v47  ;;  %8690 = vmatprep.subr.bf16.mxu1 %v11076_v45 }
 0x151   :  { %v9533_v54 = vpop.f32.mrf.mxu0 }
 0x152   :  { %v588_v59 = vmax.f32 %v489_v51, 0.0 }
 0x153   :  { %v493_v60 = vpop.f32.mrf.mxu0  ;;  %8691 = vmatpush3.bf16.msra.mxu1 %v11051_v32 }
 0x154   :  { %v11090_v5 = vpack.c.bf16 %v588_v59, %v587_v58  ;;  %8692 = vmatprep.subr.bf16.mxu1 %v11086_v56  ;;  %v494_v10 = vadd.f32 %v11014_v28, %v493_v60  ;;  %v10290_v59 = vld [vmem:[%s13849_s25 + $0x60] ss:$16 sps:$4 sm:$0xff]  }
 0x155   :  { %v9536_v7 = vpop.f32.mrf.mxu0 }
 0x156   :  { %v589_v0 = vmax.f32 %v494_v10, 0.0 }
 0x157   :  { %v496_v11 = vpop.f32.mrf.mxu0  ;;  %8693 = vmatpush3.bf16.msra.mxu1 %v11047_v22 }
 0x158   :  { %v497_v14 = vadd.f32 %v11014_v28, %v496_v11  ;;  %8694 = vmatprep.subr.bf16.mxu1 %v11094_v9 }
 0x159   :  { %v9537_v15 = vpop.f32.mrf.mxu0 }
 0x15a   :  { %v590_v18 = vmax.f32 %v497_v14, 0.0  ;;  %v10293_v15 = vld [vmem:[%s13849_s25 + $0x80] ss:$16 sps:$4 sm:$0xff]  }
 0x15b   :  { %v11104_v19 = vpop.f32.mrf.mxu0  ;;  %8695 = vmatpush3.bf16.msra.mxu1 %v11043_v13 }
 0x15c   :  { %v11107_v21 = vpack.c.bf16 %v590_v18, %v589_v0  ;;  %8696 = vmatprep.subr.bf16.mxu1 %v11102_v17 }
 0x15d   :  { %v9540_v61 = vpop.f32.mrf.mxu0 }
 0x15e   :  { %v10294_v61 = vld [vmem:[%s13849_s25 + $0xa4] ss:$16 sps:$4 sm:$0xff]  }
 0x15f   :  { %v11112_v24 = vpop.f32.mrf.mxu0  ;;  %8697 = vmatpush3.bf16.msra.mxu1 %v11036_v3 }
 0x160   :  { %8698 = vmatprep.subr.bf16.mxu1 %v11110_v23 }
 0x161   :  { %v9541_v25 = vpop.f32.mrf.mxu0 }
 0x163   :  { %v11116_v26 = vpop.f32.mrf.mxu0  ;;  %8699 = vmatpush3.bf16.msra.mxu1 %v11032_v57 }
 0x164   :  { %8700 = vmatprep.subr.bf16.mxu1 %v11065_v62 }
 0x165   :  { %v9544_v27 = vpop.f32.mrf.mxu0 }
 0x167   :  { %v11120_v29 = vpop.f32.mrf.mxu0  ;;  %8701 = vmatpush3.bf16.msra.mxu1 %v11028_v48 }
 0x168   :  { %8702 = vmatprep.subr.bf16.mxu1 %v11059_v52 }
 0x169   :  { %v9545_v30 = vpop.f32.mrf.mxu0 }
 0x16b   :  { %v517_v33 = vpop.f32.mrf.mxu0  ;;  %8703 = vmatpush3.bf16.msra.mxu1 %v11024_v39 }
 0x16c   :  { %896 = vmatprep.subr.bf16.mxu1 %v13829_v35 }
 0x16d   :  { %v9548_v36 = vpop.f32.mrf.mxu0 }
 0x16e   :  { %841 = vmatmul.mubr.bf16.vlgmr.msra.gmra.mxu1 %v10279_v31 }
 0x16f   :  { %v520_v37 = vpop.f32.mrf.mxu0  ;;  %848 = vmatprep.mubr.bf16.mxu1 %v10282_v34 }
 0x170   :  { %v521_v34 = vadd.f32 %v11014_v28, %v520_v37  ;;  %v10296_v37 = vld [vmem:[%s13849_s25 + $0xa0] ss:$16 sps:$4 sm:$0xff]  }
 0x171   :  { %v9549_v38 = vpop.f32.mrf.mxu0 }
 0x173   :  { %v525_v43 = vpop.f32.mrf.mxu0 }
 0x174   :  { %v526_v27 = vadd.f32 %v11014_v28, %v525_v43  ;;  %v518_v43 = vadd.f32 %v11014_v28, %v517_v33 }
 0x175   :  { %v9552_v46 = vpop.f32.mrf.mxu0 }
 0x176   :  { %849 = vmatmul.mubr.bf16.gmra.mxu1 %v10284_v41  ;;  %v653_v41 = vld [vmem:[%s13849_s25 + $0xc0] sm:$0x11]  ;;  %v597_v46 = vmax.f32 %v526_v27, 0.0  ;;  %v595_v33 = vmax.f32 %v518_v43, 0.0  ;;  %v10316_v27 = vld [vmem:[%s13849_s25 + $0xa8] ss:$16 sps:$4 sm:$0xff]  }
 0x177   :  { %v528_v47 = vpop.f32.mrf.mxu0  ;;  %856 = vmatprep.mubr.bf16.mxu1 %v10285_v44  ;;  %v10325_v43 = vld [vmem:[%s13849_s25 + $0x114] ss:$16 sps:$4 sm:$0xff]  }
 0x178   :  { %v529_v0 = vadd.f32 %v11014_v28, %v528_v47  ;;  %v513_v47 = vadd.f32 %v11014_v28, %v11120_v29  ;;  %v502_v29 = vadd.f32 %v11014_v28, %v11104_v19 }
 0x179   :  { %v9553_v49 = vpop.f32.mrf.mxu0 }
 0x17a   :  { %v598_v36 = vmax.f32 %v529_v0, 0.0  ;;  %v596_v49 = vmax.f32 %v521_v34, 0.0  ;;  %v10311_v0 = vld [vmem:[%s13849_s25 + $0x8c] ss:$16 sps:$4 sm:$0xff]   ;;  %v10321_v34 = vld [vmem:[%s13849_s25 + $0xd4] ss:$16 sps:$4 sm:$0xff]  }
 0x17b   :  { %v533_v51 = vpop.f32.mrf.mxu0 }
 0x17c   :  { %v534_v12 = vadd.f32 %v11014_v28, %v533_v51  ;;  %v7793_v51 = vcombine.high %v653_v41, %v653_v41 }
 0x17d   :  { %v9556_v54 = vpop.f32.mrf.mxu0 }
 0x17e   :  { %857 = vmatmul.mubr.bf16.gmra.mxu1 %v10287_v50  ;;  %v599_v30 = vmax.f32 %v534_v12, 0.0  ;;  %v11180_v50 = vpack.c.bf16 %v598_v36, %v597_v46  ;;  %v505_v54 = vadd.f32 %v11014_v28, %v11112_v24  ;;  %v10301_v24 = vld [vmem:[%s13849_s25 + $0xc] ss:$16 sps:$4 sm:$0xff]   ;;  %v10304_v12 = vld [vmem:[%s13849_s25 + $0x28] ss:$16 sps:$4 sm:$0xff]  }
 0x17f   :  { %v536_v55 = vpop.f32.mrf.mxu0  ;;  %864 = vmatprep.mubr.bf16.mxu1 %v10288_v53  ;;  %v510_v53 = vadd.f32 %v11014_v28, %v11116_v26  ;;  %v7792_v26 = vcombine.low %v653_v41, %v653_v41  ;;  %v10319_v36 = vld [vmem:[%s13849_s25 + $0xd0] ss:$16 sps:$4 sm:$0xff]   ;;  %v10322_v41 = vld [vmem:[%s13849_s25 + $0xf4] ss:$16 sps:$4 sm:$0xff]  }
 0x180   :  { %v537_v6 = vadd.f32 %v11014_v28, %v536_v55  ;;  %v594_v55 = vmax.f32 %v513_v47, 0.0  ;;  %v10327_v46 = vld [vmem:[%s13849_s25 + $0x110] ss:$16 sps:$4 sm:$0xff]  }
 0x181   :  { %v9557_v58 = vpop.f32.mrf.mxu0  ;;  %v10330_v47 = vld [vmem:[%s13849_s25 + $0x130] ss:$16 sps:$4 sm:$0xff]  }
 0x182   :  { %v600_v18 = vmax.f32 %v537_v6, 0.0  ;;  %v11188_v58 = vpack.c.bf16 %v596_v49, %v595_v33  ;;  %v10331_v49 = vld [vmem:[%s13849_s25 + $0x154] ss:$16 sps:$4 sm:$0xff]  }
 0x183   :  { %v541_v60 = vpop.f32.mrf.mxu0  ;;  %v7827_v33 = vld [vmem:[%s13849_s25 + $0x190] sm:$0x11] }
 0x184   :  { %v542_v7 = vadd.f32 %v11014_v28, %v541_v60  ;;  %v11167_v38 = vpack.c.bf16 %v600_v18, %v599_v30  ;;  %v592_v60 = vmax.f32 %v505_v54, 0.0  ;;  %v10313_v18 = vld [vmem:[%s13849_s25 + $0x88] ss:$16 sps:$4 sm:$0xff]   ;;  %v10336_v54 = vld [vmem:[%s13849_s25 + $0x170] ss:$16 sps:$4 sm:$0xff]  }
 0x185   :  { %v9560_v2 = vpop.f32.mrf.mxu0 }
 0x186   :  { %865 = vmatmul.mubr.bf16.gmra.mxu1 %v10290_v59  ;;  %v601_v4 = vmax.f32 %v542_v7, 0.0  ;;  %v593_v59 = vmax.f32 %v510_v53, 0.0  ;;  %v591_v2 = vmax.f32 %v502_v29, 0.0  ;;  %v10334_v53 = vld [vmem:[%s13849_s25 + $0x174] ss:$16 sps:$4 sm:$0xff]   ;;  %v7853_v29 = vcombine.low %v7827_v33, %v7827_v33 }
 0x187   :  { %v544_v8 = vpop.f32.mrf.mxu0  ;;  %872 = vmatprep.mubr.bf16.mxu1 %v10291_v63 }
 0x188   :  { %v545_v10 = vadd.f32 %v11014_v28, %v544_v8  ;;  %v11194_v63 = vpack.c.bf16 %v594_v55, %v593_v59  ;;  %v11202_v19 = vpack.c.bf16 %v592_v60, %v591_v2  ;;  %v7854_v55 = vcombine.high %v7827_v33, %v7827_v33  ;;  %v10341_v59 = vld [vmem:[%s13849_s25 + $0xdc] ss:$16 sps:$4 sm:$0xff]   ;;  %v10360_v2 = vld [vmem:[%s13812_s5] sm:$0xff]  }
 0x189   :  { %v9561_v11 = vpop.f32.mrf.mxu0  ;;  %v10342_v60 = vld [vmem:[%s13849_s25 + $0xfc] ss:$16 sps:$4 sm:$0xff]  }
 0x18a   :  { %v602_v14 = vmax.f32 %v545_v10, 0.0  ;;  %v10299_v10 = vld [vmem:[%s13849_s25 + $0x8] ss:$16 sps:$4 sm:$0xff]   ;;  %v10302_v11 = vld [vmem:[%s13849_s25 + $0x2c] ss:$16 sps:$4 sm:$0xff]  }
 0x18b   :  { %v549_v16 = vpop.f32.mrf.mxu0 }
 0x18c   :  { %v11158_v20 = vpack.c.bf16 %v602_v14, %v601_v4  ;;  %v550_v7 = vadd.f32 %v11014_v28, %v549_v16  ;;  %v10305_v4 = vld [vmem:[%s13849_s25 + $0x4c] ss:$16 sps:$4 sm:$0xff]   ;;  %v10307_v14 = vld [vmem:[%s13849_s25 + $0x48] ss:$16 sps:$4 sm:$0xff]  }
 0x18d   :  { %v9564_v25 = vpop.f32.mrf.mxu0  ;;  %v10310_v16 = vld [vmem:[%s13849_s25 + $0x68] ss:$16 sps:$4 sm:$0xff]  }
 0x18e   :  { %897 = vmatpush1.bf16.msra.mxu1 %v11158_v20  ;;  %v603_v8 = vmax.f32 %v550_v7, 0.0  ;;  %v654_v25 = vld [vmem:[%s13849_s25 + $0xc8] sm:$0x11] }
 0x18f   :  { %898 = vmatprep.subr.bf16.mxu1 %v13829_v35  ;;  %873 = vmatmul.mubr.bf16.gmra.mxu1 %v10293_v15  ;;  %v552_v31 = vpop.f32.mrf.mxu0  ;;  %v10308_v15 = vld [vmem:[%s13849_s25 + $0x6c] ss:$16 sps:$4 sm:$0xff]   ;;  %v7795_v30 = vcombine.high %v654_v25, %v654_v25  ;;  %v10344_v7 = vld [vmem:[%s13849_s25 + $0xf8] ss:$16 sps:$4 sm:$0xff]  }
 0x190   :  { %880 = vmatprep.mubr.bf16.mxu1 %v10294_v61  ;;  %v628_v6 = vpack.c.bf16 %v603_v8, %v603_v8  ;;  %v10314_v61 = vld [vmem:[%s13849_s25 + $0xac] ss:$16 sps:$4 sm:$0xff]   ;;  %v7794_v31 = vcombine.low %v654_v25, %v654_v25 }
 0x191   :  { %v9565_v44 = vpop.f32.mrf.mxu0  ;;  %v10345_v8 = vld [vmem:[%s13849_s25 + $0x11c] ss:$16 sps:$4 sm:$0xff]  }
 0x192   :  { %899 = vmatpush1.bf16.msra.mxu1 %v11167_v38  ;;  %v11210_v28 = vsel %vm804_vm3, %v628_v6, 0  ;;  %v10324_v44 = vld [vmem:[%s13849_s25 + $0xf0] ss:$16 sps:$4 sm:$0xff]   ;;  %v10347_v6 = vld [vmem:[%s13849_s25 + $0x118] ss:$16 sps:$4 sm:$0xff]  }
 0x193   :  { %900 = vmatprep.subr.bf16.mxu1 %v13829_v35  ;;  %13852 = vst [vmem:[#allocation10_spill] sm:$0xff] %v11210_v28 }
 0x196   :  { %901 = vmatpush1.bf16.msra.mxu1 %v11180_v50 }
 0x197   :  { %902 = vmatprep.subr.bf16.mxu1 %v13829_v35  ;;  %881 = vmatmul.mubr.bf16.gmra.mxu1 %v10296_v37  ;;  %v10328_v37 = vld [vmem:[%s13849_s25 + $0x134] ss:$16 sps:$4 sm:$0xff]  }
 0x198   :  { %888 = vmatprep.mubr.bf16.mxu1 %v7793_v51  ;;  %v10333_v51 = vld [vmem:[%s13849_s25 + $0x150] ss:$16 sps:$4 sm:$0xff]  }
 0x19a   :  { %903 = vmatpush1.bf16.msra.mxu1 %v11188_v58 }
 0x19b   :  { %904 = vmatprep.subr.bf16.mxu1 %v13829_v35 }
 0x19e   :  { %905 = vmatpush1.bf16.msra.mxu1 %v11194_v63 }
 0x19f   :  { %906 = vmatprep.subr.bf16.mxu1 %v13829_v35  ;;  %889 = vmatmul.mubr.bf16.gmra.mxu1 %v7792_v26  ;;  %v10339_v26 = vld [vmem:[%s13849_s25 + $0xd8] ss:$16 sps:$4 sm:$0xff]  }
 0x1a0   :  { %7796 = vmatprep.mubr.msk.bf16.mxu1 %vm782_vm2, %v10301_v24  ;;  %v10359_v24 = vld [vmem:[%s13812_s5 + $0x8] sm:$0xff]  }
 0x1a2   :  { %907 = vmatpush1.bf16.msra.mxu1 %v11202_v19 }
 0x1a3   :  { %908 = vmatprep.subr.bf16.mxu1 %v13829_v35 }
 0x1a6   :  { %909 = vmatpush1.bf16.msra.mxu1 %v11107_v21 }
 0x1a7   :  { %910 = vmatprep.subr.bf16.mxu1 %v13829_v35 }
 0x1aa   :  { %911 = vmatpush1.bf16.msra.mxu1 %v11090_v5 }
 0x1ab   :  { %926 = vmatprep.subr.bf16.mxu1 %v13829_v35 }
 0x1ae   :  { %927 = vmatpush2.bf16.msra.mxu1 %v11210_v28 }
 0x1af   :  { %8746 = vmatprep.subr.bf16.mxu1 %v11073_v40 }
 0x1b1   :  { %929 = vmatmul.mubr.bf16.vlgmr.msra.gmra.mxu1 %v10299_v10 }
 0x1b2   :  { %8747 = vmatpush3.bf16.msra.mxu1 %v11055_v42  ;;  %7797 = vmatprep.mubr.msk.bf16.mxu1 %vm782_vm2, %v10302_v11  ;;  %v10348_v11 = vld [vmem:[%s13849_s25 + $0x13c] ss:$16 sps:$4 sm:$0xff]  }
 0x1b3   :  { %8748 = vmatprep.subr.bf16.mxu1 %v11076_v45 }
 0x1b6   :  { %8749 = vmatpush3.bf16.msra.mxu1 %v11051_v32 }
 0x1b7   :  { %8750 = vmatprep.subr.bf16.mxu1 %v11086_v56 }
 0x1b9   :  { %937 = vmatmul.mubr.bf16.gmra.mxu1 %v10304_v12 }
 0x1ba   :  { %8751 = vmatpush3.bf16.msra.mxu1 %v11047_v22  ;;  %7798 = vmatprep.mubr.msk.bf16.mxu1 %vm782_vm2, %v10305_v4 }
 0x1bb   :  { %8752 = vmatprep.subr.bf16.mxu1 %v11094_v9 }
 0x1be   :  { %8753 = vmatpush3.bf16.msra.mxu1 %v11043_v13 }
 0x1bf   :  { %8754 = vmatprep.subr.bf16.mxu1 %v11102_v17 }
 0x1c1   :  { %945 = vmatmul.mubr.bf16.gmra.mxu1 %v10307_v14 }
 0x1c2   :  { %8755 = vmatpush3.bf16.msra.mxu1 %v11036_v3  ;;  %7799 = vmatprep.mubr.msk.bf16.mxu1 %vm782_vm2, %v10308_v15 }
 0x1c3   :  { %8756 = vmatprep.subr.bf16.mxu1 %v11110_v23 }
 0x1c6   :  { %8757 = vmatpush3.bf16.msra.mxu1 %v11032_v57 }
 0x1c7   :  { %8758 = vmatprep.subr.bf16.mxu1 %v11065_v62 }
 0x1c9   :  { %953 = vmatmul.mubr.bf16.gmra.mxu1 %v10310_v16  ;;  %v10350_v16 = vld [vmem:[%s13849_s25 + $0x138] ss:$16 sps:$4 sm:$0xff]  }
 0x1ca   :  { %8759 = vmatpush3.bf16.msra.mxu1 %v11028_v48  ;;  %7800 = vmatprep.mubr.msk.bf16.mxu1 %vm782_vm2, %v10311_v0 }
 0x1cb   :  { %8760 = vmatprep.subr.bf16.mxu1 %v11059_v52 }
 0x1ce   :  { %8761 = vmatpush3.bf16.msra.mxu1 %v11024_v39 }
 0x1cf   :  { %1258 = vmatprep.subr.bf16.mxu1 %v13829_v35 }
 0x1d1   :  { %961 = vmatmul.mubr.bf16.gmra.mxu1 %v10313_v18  ;;  %v10351_v18 = vld [vmem:[%s13849_s25 + $0x15c] ss:$16 sps:$4 sm:$0xff]  }
 0x1d2   :  { %7801 = vmatprep.mubr.msk.bf16.mxu1 %vm782_vm2, %v10314_v61 }
 0x1d9   :  { %969 = vmatmul.mubr.bf16.gmra.mxu1 %v10316_v27 }
 0x1da   :  { %7802 = vmatprep.mubr.msk.bf16.mxu1 %vm782_vm2, %v7795_v30 }
 0x1e1   :  { %977 = vmatmul.mubr.bf16.gmra.mxu1 %v7794_v31  ;;  %v10353_v31 = vld [vmem:[%s13849_s25 + $0x158] ss:$16 sps:$4 sm:$0xff]  }
 0x1e2   :  { %1202 = vmatprep.mubr.bf16.mxu1 %v10321_v34 }
 0x1e9   :  { %1203 = vmatmul.mubr.bf16.vlgmr.msra.gmra.mxu1 %v10319_v36  ;;  %v10354_v36 = vld [vmem:[%s13849_s25 + $0x17c] ss:$16 sps:$4 sm:$0xff]  }
 0x1ea   :  { %1259 = vmatpush1.bf16.msra.mxu1 %v11158_v20  ;;  %1210 = vmatprep.mubr.bf16.mxu1 %v10322_v41 }
 0x1eb   :  { %1260 = vmatprep.subr.bf16.mxu1 %v13829_v35 }
 0x1ee   :  { %1261 = vmatpush1.bf16.msra.mxu1 %v11167_v38 }
 0x1ef   :  { %1262 = vmatprep.subr.bf16.mxu1 %v13829_v35 }
 0x1f1   :  { %1211 = vmatmul.mubr.bf16.gmra.mxu1 %v10324_v44 }
 0x1f2   :  { %1263 = vmatpush1.bf16.msra.mxu1 %v11180_v50  ;;  %1218 = vmatprep.mubr.bf16.mxu1 %v10325_v43 }
 0x1f3   :  { %1264 = vmatprep.subr.bf16.mxu1 %v13829_v35 }
 0x1f6   :  { %1265 = vmatpush1.bf16.msra.mxu1 %v11188_v58 }
 0x1f7   :  { %1266 = vmatprep.subr.bf16.mxu1 %v13829_v35 }
 0x1f9   :  { %1219 = vmatmul.mubr.bf16.gmra.mxu1 %v10327_v46  ;;  %v7828_v46 = vld [vmem:[%s13849_s25 + $0x198] sm:$0x11] }
 0x1fa   :  { %1267 = vmatpush1.bf16.msra.mxu1 %v11194_v63  ;;  %1226 = vmatprep.mubr.bf16.mxu1 %v10328_v37 }
 0x1fb   :  { %1268 = vmatprep.subr.bf16.mxu1 %v13829_v35 }
 0x1fe   :  { %1269 = vmatpush1.bf16.msra.mxu1 %v11202_v19 }
 0x1ff   :  { %1270 = vmatprep.subr.bf16.mxu1 %v13829_v35 }
 0x201   :  { %1227 = vmatmul.mubr.bf16.gmra.mxu1 %v10330_v47  ;;  %v10356_v47 = vld [vmem:[%s13849_s25 + $0x178] ss:$16 sps:$4 sm:$0xff]  }
 0x202   :  { %1271 = vmatpush1.bf16.msra.mxu1 %v11107_v21  ;;  %1234 = vmatprep.mubr.bf16.mxu1 %v10331_v49 }
 0x203   :  { %1272 = vmatprep.subr.bf16.mxu1 %v13829_v35 }
 0x206   :  { %1273 = vmatpush1.bf16.msra.mxu1 %v11090_v5 }
 0x207   :  { %1288 = vmatprep.subr.bf16.mxu1 %v13829_v35 }
 0x209   :  { %1235 = vmatmul.mubr.bf16.gmra.mxu1 %v10333_v51  ;;  %v7856_v51 = vcombine.high %v7828_v46, %v7828_v46 }
 0x20a   :  { %1289 = vmatpush2.bf16.msra.mxu1 %v11210_v28  ;;  %1242 = vmatprep.mubr.bf16.mxu1 %v10334_v53 }
 0x20b   :  { %9598 = vmatprep.subr.bf16.mxu1 %v13831_v1 }
 0x211   :  { %1243 = vmatmul.mubr.bf16.gmra.mxu1 %v10336_v54 }
 0x212   :  { %1250 = vmatprep.mubr.bf16.mxu1 %v7854_v55 }
 0x219   :  { %1251 = vmatmul.mubr.bf16.gmra.mxu1 %v7853_v29  ;;  %v7855_v29 = vcombine.low %v7828_v46, %v7828_v46 }
 0x21a   :  { %7857 = vmatprep.mubr.msk.bf16.mxu1 %vm782_vm2, %v10341_v59 }
 0x221   :  { %1291 = vmatmul.mubr.bf16.vlgmr.msra.gmra.mxu1 %v10339_v26 }
 0x222   :  { %7858 = vmatprep.mubr.msk.bf16.mxu1 %vm782_vm2, %v10342_v60  ;;  %9599 = vmatpush3.bf16.msra.mxu1 %v10359_v24 }
 0x223   :  { %9600 = vmatprep.subr.bf16.mxu1 %v13831_v1 }
 0x226   :  { %9601 = vmatpush3.bf16.msra.mxu1 %v10360_v2 }
 0x227   :  { %1864 = vmatprep.subr.bf16.mxu1 %v13829_v35 }
 0x229   :  { %1299 = vmatmul.mubr.bf16.gmra.mxu1 %v10344_v7 }
 0x22a   :  { %7859 = vmatprep.mubr.msk.bf16.mxu1 %vm782_vm2, %v10345_v8 }
 0x22e   :  { %v8704_v10 = vpop.f32.mrf.mxu1 }
 0x230   :  { %v8705_v12 = vpop.f32.mrf.mxu1 }
 0x231   :  { %1307 = vmatmul.mubr.bf16.gmra.mxu1 %v10347_v6  ;;  %v8706_v4 = vadd.f32 %v8705_v12, %v8704_v10 }
 0x232   :  { %v8707_v14 = vpop.f32.mrf.mxu1  ;;  %7860 = vmatprep.mubr.msk.bf16.mxu1 %vm782_vm2, %v10348_v11 }
 0x234   :  { %v8708_v15 = vpop.f32.mrf.mxu1 }
 0x236   :  { %v8710_v0 = vpop.f32.mrf.mxu1 }
 0x238   :  { %v8711_v61 = vpop.f32.mrf.mxu1 }
 0x239   :  { %1315 = vmatmul.mubr.bf16.gmra.mxu1 %v10350_v16  ;;  %v8712_v25 = vadd.f32 %v8711_v61, %v8710_v0 }
 0x23a   :  { %v8713_v27 = vpop.f32.mrf.mxu1  ;;  %7861 = vmatprep.mubr.msk.bf16.mxu1 %vm782_vm2, %v10351_v18 }
 0x23c   :  { %v8714_v30 = vpop.f32.mrf.mxu1 }
 0x23e   :  { %v8716_v34 = vpop.f32.mrf.mxu1 }
 0x240   :  { %v8717_v41 = vpop.f32.mrf.mxu1 }
 0x241   :  { %1323 = vmatmul.mubr.bf16.gmra.mxu1 %v10353_v31  ;;  %v11376_v44 = vadd.f32 %v8717_v41, %v8716_v34 }
 0x242   :  { %v8719_v43 = vpop.f32.mrf.mxu1  ;;  %7862 = vmatprep.mubr.msk.bf16.mxu1 %vm782_vm2, %v10354_v36  ;;  %v8709_v36 = vadd.f32 %v8708_v15, %v8707_v14 }
 0x244   :  { %v8720_v37 = vpop.f32.mrf.mxu1 }
 0x246   :  { %v8722_v49 = vpop.f32.mrf.mxu1 }
 0x248   :  { %v8723_v53 = vpop.f32.mrf.mxu1 }
 0x249   :  { %1331 = vmatmul.mubr.bf16.gmra.mxu1 %v10356_v47  ;;  %v11385_v33 = vadd.f32 %v8723_v53, %v8722_v49 }
 0x24a   :  { %v11387_v54 = vpop.f32.mrf.mxu1  ;;  %7863 = vmatprep.mubr.msk.bf16.mxu1 %vm782_vm2, %v7856_v51 }
 0x24c   :  { %v8726_v55 = vpop.f32.mrf.mxu1 }
 0x24f   :  { %v8728_v59 = vpop.f32.mrf.mxu1 }
 0x251   :  { %1339 = vmatmul.mubr.bf16.gmra.mxu1 %v7855_v29  ;;  %v8729_v26 = vpop.f32.mrf.mxu1 }
 0x252   :  { %v11390_v60 = vadd.f32 %v8729_v26, %v8728_v59  ;;  %9602 = vmatprep.mubr.msk.bf16.mxu1 %vm10755_vm0, %v13831_v1  ;;  %v8715_v59 = vadd.f32 %v8714_v30, %v8713_v27  ;;  %v8721_v27 = vadd.f32 %v8720_v37, %v8719_v43  ;;  %v8727_v43 = vadd.f32 %v8726_v55, %v11387_v54 }
 0x253   :  { %v11394_v24 = vpop.f32.mrf.mxu1 }
 0x255   :  { %v11396_v2 = vpop.f32.mrf.mxu1 }
 0x256   :  { %v8733_v54 = vadd.f32 %v11396_v2, %v11394_v24 }
 0x257   :  { %v8734_v7 = vpop.f32.mrf.mxu1 }
 0x259   :  { %v8735_v8 = vpop.f32.mrf.mxu1 }
 0x25a   :  { %v11398_v6 = vadd.f32 %v8735_v8, %v8734_v7 }
 0x25b   :  { %v11400_v10 = vpop.f32.mrf.mxu1 }
 0x25d   :  { %v11402_v11 = vpop.f32.mrf.mxu1 }
 0x25e   :  { %v8739_v24 = vadd.f32 %v11402_v11, %v11400_v10  ;;  %v10363_v10 = vld [vmem:[%s13849_s25 + $0x1ac] ss:$16 sps:$4 sm:$0xff]  }
 0x25f   :  { %v8740_v12 = vpop.f32.mrf.mxu1 }
 0x261   :  { %v8741_v16 = vpop.f32.mrf.mxu1 }
 0x262   :  { %v11404_v0 = vadd.f32 %v8741_v16, %v8740_v12 }
 0x263   :  { %v8743_v18 = vpop.f32.mrf.mxu1 }
 0x265   :  { %v8744_v61 = vpop.f32.mrf.mxu1 }
 0x271   :  { %v930_v31 = vpop.f32.mrf.mxu1 }
 0x272   :  { %v931_v46 = vadd.f32 %v8706_v4, %v930_v31 }
 0x273   :  { %v932_v34 = vpop.f32.mrf.mxu1 }
 0x275   :  { %v933_v41 = vpop.f32.mrf.mxu1 }
 0x276   :  { %v934_v47 = vadd.f32 %v8709_v36, %v933_v41 }
 0x277   :  { %v935_v49 = vpop.f32.mrf.mxu1 }
 0x278   :  { %v984_v51 = vpack.c.bf16 %v934_v47, %v931_v46 }
 0x279   :  { %v938_v53 = vpop.f32.mrf.mxu1 }
 0x27a   :  { %9603 = vmatmul.mubr.msk.bf16.vlgmr.msra.gmra.mxu1 %vm1370_vm4, %v984_v51  ;;  %v939_v14 = vadd.f32 %v8712_v25, %v938_v53 }
 0x27b   :  { %1865 = vmatpush1.bf16.msra.mxu1 %v11158_v20  ;;  %v940_v29 = vpop.f32.mrf.mxu1  ;;  %9606 = vmatprep.mubr.msk.bf16.mxu1 %vm10755_vm0, %v13831_v1 }
 0x27c   :  { %1866 = vmatprep.subr.bf16.mxu1 %v13829_v35 }
 0x27d   :  { %v941_v26 = vpop.f32.mrf.mxu1 }
 0x27e   :  { %v942_v15 = vadd.f32 %v8715_v59, %v941_v26 }
 0x27f   :  { %1867 = vmatpush1.bf16.msra.mxu1 %v11167_v38  ;;  %v943_v4 = vpop.f32.mrf.mxu1 }
 0x280   :  { %v985_v7 = vpack.c.bf16 %v942_v15, %v939_v14  ;;  %1868 = vmatprep.subr.bf16.mxu1 %v13829_v35 }
 0x281   :  { %v946_v8 = vpop.f32.mrf.mxu1 }
 0x282   :  { %9607 = vmatmul.mubr.msk.bf16.gmra.mxu1 %vm1370_vm4, %v985_v7  ;;  %v947_v30 = vadd.f32 %v11376_v44, %v946_v8 }
 0x283   :  { %1869 = vmatpush1.bf16.msra.mxu1 %v11180_v50  ;;  %v948_v12 = vpop.f32.mrf.mxu1  ;;  %9610 = vmatprep.mubr.msk.bf16.mxu1 %vm10755_vm0, %v13831_v1 }
 0x284   :  { %1870 = vmatprep.subr.bf16.mxu1 %v13829_v35 }
 0x285   :  { %v949_v25 = vpop.f32.mrf.mxu1 }
 0x286   :  { %v950_v16 = vadd.f32 %v8721_v27, %v949_v25 }
 0x287   :  { %1871 = vmatpush1.bf16.msra.mxu1 %v11188_v58  ;;  %v951_v18 = vpop.f32.mrf.mxu1 }
 0x288   :  { %v986_v61 = vpack.c.bf16 %v950_v16, %v947_v30  ;;  %1872 = vmatprep.subr.bf16.mxu1 %v13829_v35 }
 0x289   :  { %v954_v31 = vpop.f32.mrf.mxu1 }
 0x28a   :  { %9611 = vmatmul.mubr.msk.bf16.gmra.mxu1 %vm1370_vm4, %v986_v61  ;;  %v955_v37 = vadd.f32 %v11385_v33, %v954_v31  ;;  %v10367_v61 = vld [vmem:[%s13849_s25 + $0x1cc] ss:$16 sps:$4 sm:$0xff]  }
 0x28b   :  { %1873 = vmatpush1.bf16.msra.mxu1 %v11194_v63  ;;  %v956_v34 = vpop.f32.mrf.mxu1  ;;  %9614 = vmatprep.mubr.msk.bf16.mxu1 %vm10755_vm0, %v13831_v1 }
 0x28c   :  { %1874 = vmatprep.subr.bf16.mxu1 %v13829_v35 }
 0x28d   :  { %v957_v44 = vpop.f32.mrf.mxu1 }
 0x28e   :  { %v958_v36 = vadd.f32 %v8727_v43, %v957_v44  ;;  %v10369_v44 = vld [vmem:[%s13849_s25 + $0x1c8] ss:$16 sps:$4 sm:$0xff]  }
 0x28f   :  { %1875 = vmatpush1.bf16.msra.mxu1 %v11202_v19  ;;  %v959_v41 = vpop.f32.mrf.mxu1 }
 0x290   :  { %v987_v46 = vpack.c.bf16 %v958_v36, %v955_v37  ;;  %1876 = vmatprep.subr.bf16.mxu1 %v13829_v35  ;;  %v10373_v36 = vld [vmem:[%s13849_s25 + $0x1ec] ss:$16 sps:$4 sm:$0xff]  }
 0x291   :  { %v962_v47 = vpop.f32.mrf.mxu1 }
 0x292   :  { %9615 = vmatmul.mubr.msk.bf16.gmra.mxu1 %vm1370_vm4, %v987_v46  ;;  %v963_v55 = vadd.f32 %v11390_v60, %v962_v47 }
 0x293   :  { %1877 = vmatpush1.bf16.msra.mxu1 %v11107_v21  ;;  %v964_v49 = vpop.f32.mrf.mxu1  ;;  %9618 = vmatprep.mubr.msk.bf16.mxu1 %vm10755_vm0, %v13831_v1 }
 0x294   :  { %1878 = vmatprep.subr.bf16.mxu1 %v13829_v35  ;;  %v10375_v49 = vld [vmem:[%s13849_s25 + $0x1e8] ss:$16 sps:$4 sm:$0xff]  }
 0x295   :  { %v965_v33 = vpop.f32.mrf.mxu1 }
 0x296   :  { %v966_v51 = vadd.f32 %v8733_v54, %v965_v33  ;;  %v10379_v33 = vld [vmem:[%s13849_s25 + $0x20c] ss:$16 sps:$4 sm:$0xff]  }
 0x297   :  { %1879 = vmatpush1.bf16.msra.mxu1 %v11090_v5  ;;  %v967_v53 = vpop.f32.mrf.mxu1 }
 0x298   :  { %v988_v29 = vpack.c.bf16 %v966_v51, %v963_v55  ;;  %1894 = vmatprep.subr.bf16.mxu1 %v13829_v35 }
 0x299   :  { %v970_v59 = vpop.f32.mrf.mxu1 }
 0x29a   :  { %9619 = vmatmul.mubr.msk.bf16.gmra.mxu1 %vm1370_vm4, %v988_v29  ;;  %v971_v2 = vadd.f32 %v11398_v6, %v970_v59  ;;  %v10381_v29 = vld [vmem:[%s13849_s25 + $0x208] ss:$16 sps:$4 sm:$0xff]  }
 0x29b   :  { %1895 = vmatpush2.bf16.msra.mxu1 %v11210_v28  ;;  %v972_v26 = vpop.f32.mrf.mxu1  ;;  %9622 = vmatprep.mubr.msk.bf16.mxu1 %vm10755_vm0, %v13831_v1 }
 0x29c   :  { %8889 = vmatprep.subr.bf16.mxu1 %v11073_v40  ;;  %v10385_v26 = vld [vmem:[%s13849_s25 + $0x22c] ss:$16 sps:$4 sm:$0xff]  }
 0x29d   :  { %v973_v60 = vpop.f32.mrf.mxu1 }
 0x29e   :  { %v974_v14 = vadd.f32 %v8739_v24, %v973_v60 }
 0x29f   :  { %v975_v15 = vpop.f32.mrf.mxu1 }
 0x2a0   :  { %v989_v4 = vpack.c.bf16 %v974_v14, %v971_v2  ;;  %v10387_v14 = vld [vmem:[%s13849_s25 + $0x228] ss:$16 sps:$4 sm:$0xff]  }
 0x2a1   :  { %v978_v7 = vpop.f32.mrf.mxu1 }
 0x2a2   :  { %9623 = vmatmul.mubr.msk.bf16.gmra.mxu1 %vm1370_vm4, %v989_v4  ;;  %v979_v12 = vadd.f32 %v11404_v0, %v978_v7  ;;  %v10361_v0 = vld [vmem:[%s13849_s25 + $0x1a8] ss:$16 sps:$4 sm:$0xff]   ;;  %v10391_v4 = vld [vmem:[%s13849_s25 + $0x24c] ss:$16 sps:$4 sm:$0xff]  }
 0x2a3   :  { %v980_v8 = vpop.f32.mrf.mxu1  ;;  %9626 = vmatprep.mubr.msk.bf16.mxu1 %vm10755_vm0, %v13831_v1 }
 0x2a4   :  { %v990_v11 = vpack.c.bf16 %v979_v12, %v979_v12  ;;  %v7911_v12 = vld [vmem:[%s13849_s25 + $0x268] sm:$0x11] }
 0x2a5   :  { %v981_v27 = vpop.f32.mrf.mxu1 }
 0x2a7   :  { %v982_v25 = vpop.f32.mrf.mxu1 }
 0x2a8   :  { %v10393_v25 = vld [vmem:[%s13849_s25 + $0x248] ss:$16 sps:$4 sm:$0xff]  }
 0x2a9   :  { %v11455_v6 = vpop.f32.mrf.mxu1 }
 0x2aa   :  { %9627 = vmatmul.mubr.msk.bf16.gmra.mxu1 %vm1370_vm4, %v990_v11  ;;  %v7939_v11 = vcombine.high %v7911_v12, %v7911_v12 }
 0x2ab   :  { %v11458_v30 = vpop.f32.mrf.mxu1  ;;  %7940 = vmatprep.mubr.msk.bf16.mxu1 %vm782_vm2, %v10363_v10 }
 0x2ad   :  { %v11461_v16 = vpop.f32.mrf.mxu1 }
 0x2af   :  { %v11466_v18 = vpop.f32.mrf.mxu1 }
 0x2b1   :  { %v11471_v31 = vpop.f32.mrf.mxu1 }
 0x2b2   :  { %1897 = vmatmul.mubr.bf16.vlgmr.msra.gmra.mxu1 %v10361_v0 }
 0x2b3   :  { %8890 = vmatpush3.bf16.msra.mxu1 %v11055_v42  ;;  %v11474_v34 = vpop.f32.mrf.mxu1  ;;  %7941 = vmatprep.mubr.msk.bf16.mxu1 %vm782_vm2, %v10367_v61 }
 0x2b4   :  { %8891 = vmatprep.subr.bf16.mxu1 %v11076_v45 }
 0x2b5   :  { %v11478_v43 = vpop.f32.mrf.mxu1 }
 0x2b7   :  { %8892 = vmatpush3.bf16.msra.mxu1 %v11051_v32  ;;  %v11484_v37 = vpop.f32.mrf.mxu1 }
 0x2b8   :  { %8893 = vmatprep.subr.bf16.mxu1 %v11086_v56 }
 0x2b9   :  { %v11490_v41 = vpop.f32.mrf.mxu1 }
 0x2ba   :  { %1905 = vmatmul.mubr.bf16.gmra.mxu1 %v10369_v44 }
 0x2bb   :  { %8894 = vmatpush3.bf16.msra.mxu1 %v11047_v22  ;;  %v11493_v46 = vpop.f32.mrf.mxu1  ;;  %7942 = vmatprep.mubr.msk.bf16.mxu1 %vm782_vm2, %v10373_v36  ;;  %v7938_v36 = vcombine.low %v7911_v12, %v7911_v12 }
 0x2bc   :  { %8895 = vmatprep.subr.bf16.mxu1 %v11094_v9 }
 0x2bd   :  { %v11497_v47 = vpop.f32.mrf.mxu1 }
 0x2bf   :  { %8896 = vmatpush3.bf16.msra.mxu1 %v11043_v13  ;;  %v11503_v54 = vpop.f32.mrf.mxu1 }
 0x2c0   :  { %8897 = vmatprep.subr.bf16.mxu1 %v11102_v17 }
 0x2c1   :  { %v11509_v55 = vpop.f32.mrf.mxu1 }
 0x2c2   :  { %1913 = vmatmul.mubr.bf16.gmra.mxu1 %v10375_v49 }
 0x2c3   :  { %8898 = vmatpush3.bf16.msra.mxu1 %v11036_v3  ;;  %v11512_v51 = vpop.f32.mrf.mxu1  ;;  %7943 = vmatprep.mubr.msk.bf16.mxu1 %vm782_vm2, %v10379_v33 }
 0x2c4   :  { %8899 = vmatprep.subr.bf16.mxu1 %v11110_v23 }
 0x2c5   :  { %v11516_v53 = vpop.f32.mrf.mxu1 }
 0x2c7   :  { %8900 = vmatpush3.bf16.msra.mxu1 %v11032_v57  ;;  %v11522_v59 = vpop.f32.mrf.mxu1 }
 0x2c8   :  { %8901 = vmatprep.subr.bf16.mxu1 %v11065_v62 }
 0x2c9   :  { %v11528_v24 = vpop.f32.mrf.mxu1 }
 0x2ca   :  { %1921 = vmatmul.mubr.bf16.gmra.mxu1 %v10381_v29 }
 0x2cb   :  { %8902 = vmatpush3.bf16.msra.mxu1 %v11028_v48  ;;  %v11531_v60 = vpop.f32.mrf.mxu1  ;;  %7944 = vmatprep.mubr.msk.bf16.mxu1 %vm782_vm2, %v10385_v26  ;;  %v8764_v26 = vadd.f32 %v11458_v30, %v11455_v6  ;;  %v8770_v6 = vadd.f32 %v11474_v34, %v11471_v31  ;;  %v8773_v30 = vadd.f32 %v11484_v37, %v11478_v43 }
 0x2cc   :  { %8903 = vmatprep.subr.bf16.mxu1 %v11059_v52  ;;  %v8776_v34 = vadd.f32 %v11493_v46, %v11490_v41  ;;  %v8782_v46 = vadd.f32 %v11512_v51, %v11509_v55  ;;  %v8788_v51 = vadd.f32 %v11531_v60, %v11528_v24 }
 0x2cd   :  { %v11535_v2 = vpop.f32.mrf.mxu1 }
 0x2cf   :  { %8904 = vmatpush3.bf16.msra.mxu1 %v11024_v39  ;;  %v11541_v15 = vpop.f32.mrf.mxu1 }
 0x2d0   :  { %9662 = vmatprep.subr.bf16.mxu1 %v13831_v1 }
 0x2d1   :  { %v11547_v7 = vpop.f32.mrf.mxu1 }
 0x2d2   :  { %1929 = vmatmul.mubr.bf16.gmra.mxu1 %v10387_v14  ;;  %v8767_v14 = vadd.f32 %v11466_v18, %v11461_v16 }
 0x2d3   :  { %v11549_v8 = vpop.f32.mrf.mxu1  ;;  %7945 = vmatprep.mubr.msk.bf16.mxu1 %vm782_vm2, %v10391_v4 }
 0x2d4   :  { %v8794_v24 = vadd.f32 %v11549_v8, %v11547_v7 }
 0x2d5   :  { %v11555_v27 = vpop.f32.mrf.mxu1 }
 0x2d7   :  { %v11560_v10 = vpop.f32.mrf.mxu1 }
 0x2d8   :  { %v8797_v60 = vadd.f32 %v11560_v10, %v11555_v27  ;;  %v10366_v27 = vld [vmem:[%s13849_s25 + $0x1a4] ss:$16 sps:$4 sm:$0xff]  }
 0x2d9   :  { %v11562_v0 = vpop.f32.mrf.mxu1 }
 0x2da   :  { %1937 = vmatmul.mubr.bf16.gmra.mxu1 %v10393_v25 }
 0x2db   :  { %v11564_v61 = vpop.f32.mrf.mxu1  ;;  %7946 = vmatprep.mubr.msk.bf16.mxu1 %vm782_vm2, %v7939_v11  ;;  %v13853_v11 = vmov 0.0  }
 0x2dd   :  { %v8801_v44 = vpop.f32.mrf.mxu1 }
 0x2df   :  { %v8802_v49 = vpop.f32.mrf.mxu1 }
 0x2e1   :  { %v1292_v33 = vpop.f32.mrf.mxu1 }
 0x2e2   :  { %1945 = vmatmul.mubr.bf16.gmra.mxu1 %v7938_v36  ;;  %v1293_v35 = vadd.f32 %v8764_v26, %v1292_v33 }
 0x2e3   :  { %v1294_v29 = vpop.f32.mrf.mxu1 }
 0x2e5   :  { %v1295_v4 = vpop.f32.mrf.mxu1 }
 0x2e6   :  { %v1296_v1 = vadd.f32 %v8767_v14, %v1295_v4 }
 0x2e7   :  { %v1297_v25 = vpop.f32.mrf.mxu1 }
 0x2e8   :  { %v1346_v40 = vpack.c.bf16 %v1296_v1, %v1293_v35 }
 0x2e9   :  { %v1300_v28 = vpop.f32.mrf.mxu1 }
 0x2ea   :  { %9571 = vmatmul.mubr.msk.bf16.vlgmr.msra.gmra.mxu0 %vm1370_vm4, %v1346_v40  ;;  %v1301_v18 = vadd.f32 %v8770_v6, %v1300_v28  ;;  %v8779_v28 = vadd.f32 %v11503_v54, %v11497_v47  ;;  %v8785_v47 = vadd.f32 %v11522_v59, %v11516_v53  ;;  %v8791_v53 = vadd.f32 %v11541_v15, %v11535_v2 }
 0x2eb   :  { %8823 = vmatpush3.bf16.msra.mxu0 %v11055_v42  ;;  %v1302_v12 = vpop.f32.mrf.mxu1  ;;  %9574 = vmatprep.mubr.msk.bf16.mxu0 %vm10755_vm0, %v13853_v11 }
 0x2ec   :  { %8824 = vmatprep.subr.bf16.mxu0 %v11076_v45 }
 0x2ed   :  { %v1303_v16 = vpop.f32.mrf.mxu1 }
 0x2ee   :  { %v1304_v1 = vadd.f32 %v8773_v30, %v1303_v16 }
 0x2ef   :  { %8825 = vmatpush3.bf16.msra.mxu0 %v11051_v32  ;;  %v1305_v40 = vpop.f32.mrf.mxu1 }
 0x2f0   :  { %v1347_v35 = vpack.c.bf16 %v1304_v1, %v1301_v18  ;;  %8826 = vmatprep.subr.bf16.mxu0 %v11086_v56 }
 0x2f1   :  { %v1308_v44 = vpop.f32.mrf.mxu1 }
 0x2f2   :  { %9575 = vmatmul.mubr.msk.bf16.gmra.mxu0 %vm1370_vm4, %v1347_v35  ;;  %v1309_v37 = vadd.f32 %v8776_v34, %v1308_v44 }
 0x2f3   :  { %8827 = vmatpush3.bf16.msra.mxu0 %v11047_v22  ;;  %v1310_v31 = vpop.f32.mrf.mxu1  ;;  %9578 = vmatprep.mubr.msk.bf16.mxu0 %vm10755_vm0, %v13853_v11 }
 0x2f4   :  { %8828 = vmatprep.subr.bf16.mxu0 %v11094_v9 }
 0x2f5   :  { %v1311_v43 = vpop.f32.mrf.mxu1 }
 0x2f6   :  { %v1312_v36 = vadd.f32 %v8779_v28, %v1311_v43  ;;  %v8800_v28 = vadd.f32 %v11564_v61, %v11562_v0  ;;  %v10364_v0 = vld [vmem:[%s13849_s25 + $0x1a0] ss:$16 sps:$4 sm:$0xff]   ;;  %v10372_v61 = vld [vmem:[%s13849_s25 + $0x1c4] ss:$16 sps:$4 sm:$0xff]  }
 0x2f7   :  { %8829 = vmatpush3.bf16.msra.mxu0 %v11043_v13  ;;  %v1313_v49 = vpop.f32.mrf.mxu1 }
 0x2f8   :  { %v1348_v33 = vpack.c.bf16 %v1312_v36, %v1309_v37  ;;  %8830 = vmatprep.subr.bf16.mxu0 %v11102_v17  ;;  %v10370_v36 = vld [vmem:[%s13849_s25 + $0x1c0] ss:$16 sps:$4 sm:$0xff]   ;;  %v10378_v49 = vld [vmem:[%s13849_s25 + $0x1e4] ss:$16 sps:$4 sm:$0xff]  }
 0x2f9   :  { %v1316_v29 = vpop.f32.mrf.mxu1 }
 0x2fa   :  { %9579 = vmatmul.mubr.msk.bf16.gmra.mxu0 %vm1370_vm4, %v1348_v33  ;;  %v1317_v26 = vadd.f32 %v8782_v46, %v1316_v29  ;;  %v10376_v33 = vld [vmem:[%s13849_s25 + $0x1e0] ss:$16 sps:$4 sm:$0xff]   ;;  %v10384_v29 = vld [vmem:[%s13849_s25 + $0x204] ss:$16 sps:$4 sm:$0xff]  }
 0x2fb   :  { %8831 = vmatpush3.bf16.msra.mxu0 %v11036_v3  ;;  %v1318_v41 = vpop.f32.mrf.mxu1  ;;  %9582 = vmatprep.mubr.msk.bf16.mxu0 %vm10755_vm0, %v13853_v11  ;;  %v10390_v46 = vld [vmem:[%s13849_s25 + $0x224] ss:$16 sps:$4 sm:$0xff]  }
 0x2fc   :  { %8832 = vmatprep.subr.bf16.mxu0 %v11110_v23  ;;  %v10382_v41 = vld [vmem:[%s13849_s25 + $0x200] ss:$16 sps:$4 sm:$0xff]  }
 0x2fd   :  { %v1319_v54 = vpop.f32.mrf.mxu1 }
 0x2fe   :  { %v1320_v14 = vadd.f32 %v8785_v47, %v1319_v54 }
 0x2ff   :  { %8833 = vmatpush3.bf16.msra.mxu0 %v11032_v57  ;;  %v1321_v4 = vpop.f32.mrf.mxu1 }
 0x300   :  { %v1349_v25 = vpack.c.bf16 %v1320_v14, %v1317_v26  ;;  %8834 = vmatprep.subr.bf16.mxu0 %v11065_v62  ;;  %v10388_v14 = vld [vmem:[%s13849_s25 + $0x220] ss:$16 sps:$4 sm:$0xff]   ;;  %v10396_v4 = vld [vmem:[%s13849_s25 + $0x244] ss:$16 sps:$4 sm:$0xff]  }
 0x301   :  { %v1324_v12 = vpop.f32.mrf.mxu1 }
 0x302   :  { %9583 = vmatmul.mubr.msk.bf16.gmra.mxu0 %vm1370_vm4, %v1349_v25  ;;  %v1325_v6 = vadd.f32 %v8788_v51, %v1324_v12  ;;  %v7910_v51 = vld [vmem:[%s13849_s25 + $0x260] sm:$0x11] }
 0x303   :  { %8835 = vmatpush3.bf16.msra.mxu0 %v11028_v48  ;;  %v1326_v55 = vpop.f32.mrf.mxu1  ;;  %9586 = vmatprep.mubr.msk.bf16.mxu0 %vm10755_vm0, %v13853_v11 }
 0x304   :  { %8836 = vmatprep.subr.bf16.mxu0 %v11059_v52 }
 0x305   :  { %v1327_v59 = vpop.f32.mrf.mxu1 }
 0x306   :  { %v1328_v30 = vadd.f32 %v8791_v53, %v1327_v59  ;;  %v10394_v59 = vld [vmem:[%s13849_s25 + $0x240] ss:$16 sps:$4 sm:$0xff]  }
 0x307   :  { %8837 = vmatpush3.bf16.msra.mxu0 %v11024_v39  ;;  %v1329_v16 = vpop.f32.mrf.mxu1 }
 0x308   :  { %v1350_v18 = vpack.c.bf16 %v1328_v30, %v1325_v6  ;;  %9630 = vmatprep.subr.bf16.mxu0 %v13853_v11  ;;  %v7937_v6 = vcombine.high %v7910_v51, %v7910_v51 }
 0x309   :  { %v1332_v1 = vpop.f32.mrf.mxu1 }
 0x30a   :  { %9587 = vmatmul.mubr.msk.bf16.gmra.mxu0 %vm1370_vm4, %v1350_v18  ;;  %v1333_v15 = vadd.f32 %v8794_v24, %v1332_v1 }
 0x30b   :  { %v1334_v40 = vpop.f32.mrf.mxu1  ;;  %9590 = vmatprep.mubr.msk.bf16.mxu0 %vm10755_vm0, %v13853_v11 }
 0x30c   :  { %v7936_v40 = vcombine.low %v7910_v51, %v7910_v51 }
 0x30d   :  { %v1335_v2 = vpop.f32.mrf.mxu1 }
 0x30e   :  { %v1336_v35 = vadd.f32 %v8797_v60, %v1335_v2 }
 0x30f   :  { %v1337_v44 = vpop.f32.mrf.mxu1 }
 0x310   :  { %v1351_v31 = vpack.c.bf16 %v1336_v35, %v1333_v15  ;;  %v10401_v15 = vld [vmem:[%s13812_s5 + $0x28] sm:$0xff]  }
 0x311   :  { %v1340_v34 = vpop.f32.mrf.mxu1 }
 0x312   :  { %9591 = vmatmul.mubr.msk.bf16.gmra.mxu0 %vm1370_vm4, %v1351_v31  ;;  %v1341_v37 = vadd.f32 %v8800_v28, %v1340_v34 }
 0x313   :  { %v1342_v43 = vpop.f32.mrf.mxu1  ;;  %9594 = vmatprep.mubr.msk.bf16.mxu0 %vm10755_vm0, %v13853_v11 }
 0x314   :  { %v1352_v10 = vpack.c.bf16 %v1341_v37, %v1341_v37 }
 0x315   :  { %v1343_v7 = vpop.f32.mrf.mxu1 }
 0x317   :  { %v1344_v8 = vpop.f32.mrf.mxu1 }
 0x31a   :  { %9595 = vmatmul.mubr.msk.bf16.gmra.mxu0 %vm1370_vm4, %v1352_v10 }
 0x31b   :  { %1808 = vmatprep.mubr.bf16.mxu0 %v10366_v27 }
 0x322   :  { %1809 = vmatmul.mubr.bf16.vlgmr.msra.gmra.mxu0 %v10364_v0  ;;  %v10402_v0 = vld [vmem:[%s13812_s5 + $0x20] sm:$0xff]  }
 0x323   :  { %1816 = vmatprep.mubr.bf16.mxu0 %v10372_v61  ;;  %9631 = vmatpush3.bf16.msra.mxu0 %v10401_v15 }
 0x324   :  { %9632 = vmatprep.subr.bf16.mxu0 %v13853_v11 }
 0x327   :  { %9633 = vmatpush3.bf16.msra.mxu0 %v10402_v0 }
 0x32a   :  { %1817 = vmatmul.mubr.bf16.gmra.mxu0 %v10370_v36  ;;  %v13863_v36 = vmov 0  }
 0x32b   :  { %1824 = vmatprep.mubr.bf16.mxu0 %v10378_v49  ;;  %2361 = vmatprep.subr.bf16.mxu0 %v13863_v36 }
 0x332   :  { %1825 = vmatmul.mubr.bf16.gmra.mxu0 %v10376_v33 }
 0x333   :  { %1832 = vmatprep.mubr.bf16.mxu0 %v10384_v29 }
 0x33a   :  { %v11655_v47 = vpop.f32.mrf.mxu1  ;;  %1833 = vmatmul.mubr.bf16.gmra.mxu0 %v10382_v41 }
 0x33b   :  { %1840 = vmatprep.mubr.bf16.mxu0 %v10390_v46 }
 0x33c   :  { %v9604_v54 = vpop.f32.mrf.mxu1 }
 0x33e   :  { %v11657_v26 = vpop.f32.mrf.mxu1 }
 0x340   :  { %v9605_v25 = vpop.f32.mrf.mxu1 }
 0x342   :  { %v11665_v12 = vpop.f32.mrf.mxu1  ;;  %1841 = vmatmul.mubr.bf16.gmra.mxu0 %v10388_v14 }
 0x343   :  { %1848 = vmatprep.mubr.bf16.mxu0 %v10396_v4 }
 0x344   :  { %v9608_v55 = vpop.f32.mrf.mxu1 }
 0x346   :  { %v11670_v53 = vpop.f32.mrf.mxu1 }
 0x348   :  { %v9609_v30 = vpop.f32.mrf.mxu1 }
 0x34a   :  { %v11675_v16 = vpop.f32.mrf.mxu1  ;;  %1849 = vmatmul.mubr.bf16.gmra.mxu0 %v10394_v59 }
 0x34b   :  { %13854 = vst [vmem:[#allocation11_spill] sm:$0xff] %v11675_v16  ;;  %1856 = vmatprep.mubr.bf16.mxu0 %v7937_v6 }
 0x34c   :  { %v9612_v18 = vpop.f32.mrf.mxu1 }
 0x34e   :  { %v11677_v1 = vpop.f32.mrf.mxu1 }
 0x34f   :  { %13855 = vst [vmem:[#allocation12_spill] sm:$0xff] %v11677_v1 }
 0x350   :  { %v9613_v24 = vpop.f32.mrf.mxu1 }
 0x352   :  { %v11679_v60 = vpop.f32.mrf.mxu1  ;;  %1857 = vmatmul.mubr.bf16.gmra.mxu0 %v7936_v40 }
 0x353   :  { %13856 = vst [vmem:[#allocation13_spill] sm:$0xff] %v11679_v60  ;;  %9634 = vmatprep.mubr.msk.bf16.mxu0 %vm10755_vm0, %v13853_v11 }
 0x354   :  { %v9616_v2 = vpop.f32.mrf.mxu1 }
 0x356   :  { %v11686_v35 = vpop.f32.mrf.mxu1 }
 0x357   :  { %13857 = vst [vmem:[#allocation14_spill] sm:$0xff] %v11686_v35 }
 0x358   :  { %v9617_v44 = vpop.f32.mrf.mxu1 }
 0x35a   :  { %v11689_v31 = vpop.f32.mrf.mxu1 }
 0x35b   :  { %13858 = vst [vmem:[#allocation15_spill] sm:$0xff] %v11689_v31 }
 0x35c   :  { %v9620_v34 = vpop.f32.mrf.mxu1 }
 0x35e   :  { %v11691_v28 = vpop.f32.mrf.mxu1 }
 0x35f   :  { %13859 = vst [vmem:[#allocation16_spill] sm:$0xff] %v11691_v28 }
 0x360   :  { %v9621_v43 = vpop.f32.mrf.mxu1 }
 0x362   :  { %v11693_v37 = vpop.f32.mrf.mxu1 }
 0x363   :  { %13860 = vst [vmem:[#allocation17_spill] sm:$0xff] %v11693_v37  ;;  %v7984_v37 = vld [vmem:[%s13849_s25 + $0x330] sm:$0x11] }
 0x364   :  { %v9624_v7 = vpop.f32.mrf.mxu1  ;;  %v8010_v28 = vcombine.low %v7984_v37, %v7984_v37 }
 0x365   :  { %v10403_v7 = vld [vmem:[%s13849_s25 + $0x270] ss:$16 sps:$4 sm:$0xff]  }
 0x366   :  { %v11695_v8 = vpop.f32.mrf.mxu1 }
 0x367   :  { %13861 = vst [vmem:[#allocation18_spill] sm:$0xff] %v11695_v8 }
 0x368   :  { %v9625_v27 = vpop.f32.mrf.mxu1 }
 0x369   :  { %v10405_v27 = vld [vmem:[%s13849_s25 + $0x274] ss:$16 sps:$4 sm:$0xff]  }
 0x36a   :  { %v11697_v10 = vpop.f32.mrf.mxu1  ;;  %2305 = vmatprep.mubr.bf16.mxu1 %v10405_v27 }
 0x36b   :  { %13862 = vst [vmem:[#allocation19_spill] sm:$0xff] %v11697_v10  ;;  %2306 = vmatmul.mubr.bf16.vlgmr.msra.gmra.mxu1 %v10403_v7 }
 0x36c   :  { %v9628_v61 = vpop.f32.mrf.mxu1 }
 0x36e   :  { %v1598_v49 = vpop.f32.mrf.mxu1 }
 0x370   :  { %v9629_v33 = vpop.f32.mrf.mxu1 }
 0x371   :  { %v10408_v33 = vld [vmem:[%s13849_s25 + $0x294] ss:$16 sps:$4 sm:$0xff]  }
 0x372   :  { %v11703_v29 = vpop.f32.mrf.mxu1  ;;  %2313 = vmatprep.mubr.bf16.mxu1 %v10408_v33  ;;  %v10420_v33 = vld [vmem:[%s13849_s25 + $0x2d4] ss:$16 sps:$4 sm:$0xff]  }
 0x374   :  { %v1900_v41 = vpop.f32.mrf.mxu1 }
 0x376   :  { %v11705_v46 = vpop.f32.mrf.mxu1 }
 0x378   :  { %v1903_v54 = vpop.f32.mrf.mxu1 }
 0x379   :  { %v10406_v54 = vld [vmem:[%s13849_s25 + $0x290] ss:$16 sps:$4 sm:$0xff]  }
 0x37a   :  { %v11707_v14 = vpop.f32.mrf.mxu1  ;;  %2314 = vmatmul.mubr.bf16.gmra.mxu1 %v10406_v54  ;;  %v10418_v54 = vld [vmem:[%s13849_s25 + $0x2d0] ss:$16 sps:$4 sm:$0xff]  }
 0x37c   :  { %v1908_v4 = vpop.f32.mrf.mxu1 }
 0x37e   :  { %v11709_v25 = vpop.f32.mrf.mxu1 }
 0x380   :  { %v1911_v55 = vpop.f32.mrf.mxu1 }
 0x382   :  { %v11711_v51 = vpop.f32.mrf.mxu1 }
 0x384   :  { %v1916_v59 = vpop.f32.mrf.mxu1 }
 0x386   :  { %v11713_v6 = vpop.f32.mrf.mxu1 }
 0x388   :  { %v1919_v30 = vpop.f32.mrf.mxu1 }
 0x38a   :  { %v11715_v18 = vpop.f32.mrf.mxu1 }
 0x38c   :  { %v1924_v40 = vpop.f32.mrf.mxu1 }
 0x38e   :  { %v11717_v24 = vpop.f32.mrf.mxu1 }
 0x390   :  { %v1927_v2 = vpop.f32.mrf.mxu1 }
 0x391   :  { %v10414_v2 = vld [vmem:[%s13849_s25 + $0x2b4] ss:$16 sps:$4 sm:$0xff]  }
 0x392   :  { %v11719_v15 = vpop.f32.mrf.mxu1  ;;  %2321 = vmatprep.mubr.bf16.mxu1 %v10414_v2  ;;  %v10426_v2 = vld [vmem:[%s13849_s25 + $0x2f4] ss:$16 sps:$4 sm:$0xff]  }
 0x394   :  { %v1932_v44 = vpop.f32.mrf.mxu1 }
 0x396   :  { %v11721_v34 = vpop.f32.mrf.mxu1 }
 0x398   :  { %v1935_v43 = vpop.f32.mrf.mxu1 }
 0x399   :  { %v10412_v43 = vld [vmem:[%s13849_s25 + $0x2b0] ss:$16 sps:$4 sm:$0xff]  }
 0x39a   :  { %v11729_v0 = vpop.f32.mrf.mxu1  ;;  %2322 = vmatmul.mubr.bf16.gmra.mxu1 %v10412_v43  ;;  %v10424_v43 = vld [vmem:[%s13849_s25 + $0x2f0] ss:$16 sps:$4 sm:$0xff]  }
 0x39b   :  { %2329 = vmatprep.mubr.bf16.mxu1 %v10420_v33 }
 0x39c   :  { %v1940_v61 = vpop.f32.mrf.mxu1 }
 0x39e   :  { %v11731_v49 = vpop.f32.mrf.mxu1 }
 0x3a0   :  { %v1943_v41 = vpop.f32.mrf.mxu1 }
 0x3a2   :  { %v11739_v4 = vpop.f32.mrf.mxu1  ;;  %2330 = vmatmul.mubr.bf16.gmra.mxu1 %v10418_v54  ;;  %v10432_v54 = vld [vmem:[%s13849_s25 + $0x314] ss:$16 sps:$4 sm:$0xff]  }
 0x3a3   :  { %2337 = vmatprep.mubr.bf16.mxu1 %v10426_v2 }
 0x3a4   :  { %v1948_v55 = vpop.f32.mrf.mxu1 }
 0x3a6   :  { %v1949_v59 = vpop.f32.mrf.mxu1 }
 0x3a8   :  { %v1950_v30 = vpop.f32.mrf.mxu1 }
 0x3aa   :  { %v11741_v40 = vpop.f32.mrf.mxu0  ;;  %2338 = vmatmul.mubr.bf16.gmra.mxu1 %v10424_v43 }
 0x3ab   :  { %2345 = vmatprep.mubr.bf16.mxu1 %v10432_v54 }
 0x3ac   :  { %v9572_v44 = vpop.f32.mrf.mxu0 }
 0x3ae   :  { %v11749_v7 = vpop.f32.mrf.mxu0 }
 0x3b0   :  { %v9573_v27 = vpop.f32.mrf.mxu0 }
 0x3b2   :  { %v11751_v61 = vpop.f32.mrf.mxu0 }
 0x3b4   :  { %v9576_v41 = vpop.f32.mrf.mxu0 }
 0x3b6   :  { %v11759_v55 = vpop.f32.mrf.mxu0 }
 0x3b8   :  { %v9577_v59 = vpop.f32.mrf.mxu0 }
 0x3ba   :  { %v11761_v30 = vpop.f32.mrf.mxu0 }
 0x3bc   :  { %v9580_v44 = vpop.f32.mrf.mxu0 }
 0x3bd   :  { %v10430_v44 = vld [vmem:[%s13849_s25 + $0x310] ss:$16 sps:$4 sm:$0xff]  }
 0x3be   :  { %v11769_v27 = vpop.f32.mrf.mxu0  ;;  %2346 = vmatmul.mubr.bf16.gmra.mxu1 %v10430_v44 }
 0x3bf   :  { %13864 = vst [vmem:[#allocation20_spill] sm:$0xff] %v11769_v27 }
 0x3c0   :  { %v9581_v33 = vpop.f32.mrf.mxu0 }
 0x3c2   :  { %v11771_v41 = vpop.f32.mrf.mxu0 }
 0x3c3   :  { %13865 = vst [vmem:[#allocation21_spill] sm:$0xff] %v11771_v41 }
 0x3c4   :  { %v9584_v59 = vpop.f32.mrf.mxu0 }
 0x3c5   :  { %v8011_v59 = vcombine.high %v7984_v37, %v7984_v37 }
 0x3c6   :  { %v11779_v10 = vpop.f32.mrf.mxu0 }
 0x3c7   :  { %13866 = vst [vmem:[#allocation22_spill] sm:$0xff] %v11779_v10  ;;  %2353 = vmatprep.mubr.bf16.mxu1 %v8011_v59 }
 0x3c8   :  { %v9585_v2 = vpop.f32.mrf.mxu0  ;;  %2354 = vmatmul.mubr.bf16.gmra.mxu1 %v8010_v28 }
 0x3c9   :  { %9666 = vmatprep.mubr.msk.bf16.mxu1 %vm10755_vm0, %v13853_v11 }
 0x3ca   :  { %v11781_v8 = vpop.f32.mrf.mxu0 }
 0x3cb   :  { %13867 = vst [vmem:[#allocation23_spill] sm:$0xff] %v11781_v8 }
 0x3cc   :  { %v9588_v43 = vpop.f32.mrf.mxu0 }
 0x3ce   :  { %v11783_v33 = vpop.f32.mrf.mxu0 }
 0x3cf   :  { %13868 = vst [vmem:[#allocation24_spill] sm:$0xff] %v11783_v33 }
 0x3d0   :  { %v9589_v31 = vpop.f32.mrf.mxu0 }
 0x3d2   :  { %v11788_v35 = vpop.f32.mrf.mxu0 }
 0x3d3   :  { %13869 = vst [vmem:[#allocation25_spill] sm:$0xff] %v11788_v35 }
 0x3d4   :  { %v9592_v54 = vpop.f32.mrf.mxu0 }
 0x3d6   :  { %v11792_v44 = vpop.f32.mrf.mxu0 }
 0x3d7   :  { %13870 = vst [vmem:[#allocation26_spill] sm:$0xff] %v11792_v44 }
 0x3d8   :  { %v9593_v2 = vpop.f32.mrf.mxu0 }
 0x3da   :  { %v11794_v43 = vpop.f32.mrf.mxu0 }
 0x3dc   :  { %v9596_v33 = vpop.f32.mrf.mxu0 }
 0x3de   :  { %v1477_v8 = vpop.f32.mrf.mxu0 }
 0x3e0   :  { %v9597_v10 = vpop.f32.mrf.mxu0 }
 0x3e2   :  { %v8838_v60 = vpop.f32.mrf.mxu0 }
 0x3e4   :  { %v8839_v41 = vpop.f32.mrf.mxu0 }
 0x3e5   :  { %v8840_v31 = vadd.f32 %v8839_v41, %v8838_v60 }
 0x3e6   :  { %v8841_v37 = vpop.f32.mrf.mxu0 }
 0x3e7   :  { %v1899_v28 = vadd.f32 %v8840_v31, %v11703_v29 }
 0x3e8   :  { %v8842_v59 = vpop.f32.mrf.mxu0 }
 0x3e9   :  { %v8843_v1 = vadd.f32 %v8842_v59, %v8841_v37 }
 0x3ea   :  { %v8844_v35 = vpop.f32.mrf.mxu0 }
 0x3eb   :  { %v1902_v27 = vadd.f32 %v8843_v1, %v11705_v46 }
 0x3ec   :  { %v8845_v54 = vpop.f32.mrf.mxu0 }
 0x3ed   :  { %v1952_v16 = vpack.c.bf16 %v1902_v27, %v1899_v28  ;;  %v8846_v2 = vadd.f32 %v8845_v54, %v8844_v35 }
 0x3ee   :  { %v8847_v44 = vpop.f32.mrf.mxu0 }
 0x3ef   :  { %9635 = vmatmul.mubr.msk.bf16.vlgmr.msra.gmra.mxu0 %vm1370_vm4, %v1952_v16  ;;  %v1907_v29 = vadd.f32 %v8846_v2, %v11707_v14 }
 0x3f0   :  { %2362 = vmatpush1.bf16.msra.mxu0 %v11158_v20  ;;  %v8848_v8 = vpop.f32.mrf.mxu0  ;;  %9638 = vmatprep.mubr.msk.bf16.mxu0 %vm10755_vm0, %v13853_v11 }
 0x3f1   :  { %v8849_v60 = vadd.f32 %v8848_v8, %v8847_v44  ;;  %2363 = vmatprep.subr.bf16.mxu0 %v13863_v36 }
 0x3f2   :  { %v8850_v10 = vpop.f32.mrf.mxu0 }
 0x3f3   :  { %v1910_v1 = vadd.f32 %v8849_v60, %v11709_v25 }
 0x3f4   :  { %2364 = vmatpush1.bf16.msra.mxu0 %v11167_v38  ;;  %v8851_v46 = vpop.f32.mrf.mxu0 }
 0x3f5   :  { %v1953_v35 = vpack.c.bf16 %v1910_v1, %v1907_v29  ;;  %2365 = vmatprep.subr.bf16.mxu0 %v13863_v36  ;;  %v8852_v27 = vadd.f32 %v8851_v46, %v8850_v10 }
 0x3f6   :  { %v8853_v16 = vpop.f32.mrf.mxu0 }
 0x3f7   :  { %9639 = vmatmul.mubr.msk.bf16.gmra.mxu0 %vm1370_vm4, %v1953_v35  ;;  %v1915_v25 = vadd.f32 %v8852_v27, %v11711_v51 }
 0x3f8   :  { %2366 = vmatpush1.bf16.msra.mxu0 %v11180_v50  ;;  %v8854_v41 = vpop.f32.mrf.mxu0  ;;  %9642 = vmatprep.mubr.msk.bf16.mxu0 %vm10755_vm0, %v13853_v11 }
 0x3f9   :  { %v8855_v33 = vadd.f32 %v8854_v41, %v8853_v16  ;;  %2367 = vmatprep.subr.bf16.mxu0 %v13863_v36 }
 0x3fa   :  { %v8856_v14 = vpop.f32.mrf.mxu0 }
 0x3fb   :  { %v1918_v44 = vadd.f32 %v8855_v33, %v11713_v6 }
 0x3fc   :  { %2368 = vmatpush1.bf16.msra.mxu0 %v11188_v58  ;;  %v8857_v37 = vpop.f32.mrf.mxu0 }
 0x3fd   :  { %v1954_v31 = vpack.c.bf16 %v1918_v44, %v1915_v25  ;;  %2369 = vmatprep.subr.bf16.mxu0 %v13863_v36  ;;  %v8858_v28 = vadd.f32 %v8857_v37, %v8856_v14  ;;  %v13871_v25 = vld [vmem:[#allocation10_spill] sm:$0xff] }
 0x3fe   :  { %v8859_v59 = vpop.f32.mrf.mxu0 }
 0x3ff   :  { %9643 = vmatmul.mubr.msk.bf16.gmra.mxu0 %vm1370_vm4, %v1954_v31  ;;  %v1923_v6 = vadd.f32 %v8858_v28, %v11715_v18 }
 0x400   :  { %2370 = vmatpush1.bf16.msra.mxu0 %v11194_v63  ;;  %v8860_v54 = vpop.f32.mrf.mxu0  ;;  %9646 = vmatprep.mubr.msk.bf16.mxu0 %vm10755_vm0, %v13853_v11 }
 0x401   :  { %v8861_v2 = vadd.f32 %v8860_v54, %v8859_v59  ;;  %2371 = vmatprep.subr.bf16.mxu0 %v13863_v36 }
 0x402   :  { %v8862_v51 = vpop.f32.mrf.mxu0 }
 0x403   :  { %v1926_v8 = vadd.f32 %v8861_v2, %v11717_v24 }
 0x404   :  { %2372 = vmatpush1.bf16.msra.mxu0 %v11202_v19  ;;  %v8863_v60 = vpop.f32.mrf.mxu0 }
 0x405   :  { %v1955_v10 = vpack.c.bf16 %v1926_v8, %v1923_v6  ;;  %2373 = vmatprep.subr.bf16.mxu0 %v13863_v36  ;;  %v8864_v1 = vadd.f32 %v8863_v60, %v8862_v51  ;;  %v10411_v60 = vld [vmem:[%s13849_s25 + $0x27c] ss:$16 sps:$4 sm:$0xff]  }
 0x406   :  { %v8865_v29 = vpop.f32.mrf.mxu0 }
 0x407   :  { %9647 = vmatmul.mubr.msk.bf16.gmra.mxu0 %vm1370_vm4, %v1955_v10  ;;  %v1931_v24 = vadd.f32 %v8864_v1, %v11719_v15  ;;  %v13872_v15 = vld [vmem:[#allocation9_spill] sm:$0xff] }
 0x408   :  { %2374 = vmatpush1.bf16.msra.mxu0 %v11107_v21  ;;  %v8866_v46 = vpop.f32.mrf.mxu0  ;;  %9650 = vmatprep.mubr.msk.bf16.mxu0 %vm10755_vm0, %v13853_v11  ;;  %v10423_v1 = vld [vmem:[%s13849_s25 + $0x2b8] ss:$16 sps:$4 sm:$0xff]  }
 0x409   :  { %v8867_v35 = vadd.f32 %v8866_v46, %v8865_v29  ;;  %2375 = vmatprep.subr.bf16.mxu0 %v13863_v36  ;;  %v10421_v29 = vld [vmem:[%s13849_s25 + $0x2bc] ss:$16 sps:$4 sm:$0xff]  }
 0x40a   :  { %v8868_v18 = vpop.f32.mrf.mxu0  ;;  %v10427_v46 = vld [vmem:[%s13849_s25 + $0x2dc] ss:$16 sps:$4 sm:$0xff]  }
 0x40b   :  { %v1934_v16 = vadd.f32 %v8867_v35, %v11721_v34  ;;  %v10429_v35 = vld [vmem:[%s13849_s25 + $0x2d8] ss:$16 sps:$4 sm:$0xff]  }
 0x40c   :  { %2376 = vmatpush1.bf16.msra.mxu0 %v11090_v5  ;;  %v8869_v27 = vpop.f32.mrf.mxu0 }
 0x40d   :  { %v1956_v41 = vpack.c.bf16 %v1934_v16, %v1931_v24  ;;  %2391 = vmatprep.subr.bf16.mxu0 %v13863_v36  ;;  %v8870_v14 = vadd.f32 %v8869_v27, %v8868_v18  ;;  %v10433_v18 = vld [vmem:[%s13849_s25 + $0x2fc] ss:$16 sps:$4 sm:$0xff]   ;;  %v10435_v24 = vld [vmem:[%s13849_s25 + $0x2f8] ss:$16 sps:$4 sm:$0xff]  }
 0x40e   :  { %v8871_v33 = vpop.f32.mrf.mxu0  ;;  %v10436_v16 = vld [vmem:[%s13849_s25 + $0x31c] ss:$16 sps:$4 sm:$0xff]  }
 0x40f   :  { %9651 = vmatmul.mubr.msk.bf16.gmra.mxu0 %vm1370_vm4, %v1956_v41  ;;  %v1939_v31 = vadd.f32 %v8870_v14, %v11729_v0  ;;  %v10409_v0 = vld [vmem:[%s13849_s25 + $0x278] ss:$16 sps:$4 sm:$0xff]  }
 0x410   :  { %2392 = vmatpush2.bf16.msra.mxu0 %v13871_v25  ;;  %v8872_v44 = vpop.f32.mrf.mxu0  ;;  %9654 = vmatprep.mubr.msk.bf16.mxu0 %vm10755_vm0, %v13853_v11  ;;  %v7985_v27 = vld [vmem:[%s13849_s25 + $0x338] sm:$0x11] }
 0x411   :  { %v8873_v37 = vadd.f32 %v8872_v44, %v8871_v33  ;;  %8956 = vmatprep.subr.bf16.mxu0 %v13872_v15  ;;  %v10438_v41 = vld [vmem:[%s13849_s25 + $0x318] ss:$16 sps:$4 sm:$0xff]   ;;  %v8013_v33 = vcombine.high %v7985_v27, %v7985_v27  ;;  %v8012_v14 = vcombine.low %v7985_v27, %v7985_v27 }
 0x412   :  { %v8874_v34 = vpop.f32.mrf.mxu0  ;;  %v10443_v44 = vld [vmem:[%s13812_s5 + $0x38] sm:$0xff]  }
 0x413   :  { %v1942_v59 = vadd.f32 %v8873_v37, %v11731_v49  ;;  %v10415_v49 = vld [vmem:[%s13849_s25 + $0x29c] ss:$16 sps:$4 sm:$0xff]   ;;  %9663 = vmatpush3.bf16.msra.mxu1 %v10443_v44 }
 0x414   :  { %v8875_v28 = vpop.f32.mrf.mxu0  ;;  %9664 = vmatprep.subr.bf16.mxu1 %v13853_v11 }
 0x415   :  { %v1957_v54 = vpack.c.bf16 %v1942_v59, %v1939_v31  ;;  %v8876_v2 = vadd.f32 %v8875_v28, %v8874_v34 }
 0x416   :  { %v8877_v51 = vpop.f32.mrf.mxu0 }
 0x417   :  { %9655 = vmatmul.mubr.msk.bf16.gmra.mxu0 %vm1370_vm4, %v1957_v54  ;;  %v1947_v8 = vadd.f32 %v8876_v2, %v11739_v4  ;;  %v10417_v4 = vld [vmem:[%s13849_s25 + $0x298] ss:$16 sps:$4 sm:$0xff]  }
 0x418   :  { %v8878_v6 = vpop.f32.mrf.mxu0  ;;  %9658 = vmatprep.mubr.msk.bf16.mxu0 %vm10755_vm0, %v13853_v11 }
 0x419   :  { %v1958_v10 = vpack.c.bf16 %v1947_v8, %v1947_v8  ;;  %v10444_v8 = vld [vmem:[%s13812_s5 + $0x30] sm:$0xff]  }
 0x41a   :  { %9665 = vmatpush3.bf16.msra.mxu1 %v10444_v8 }
 0x41b   :  { %2858 = vmatprep.subr.bf16.mxu1 %v13863_v36 }
 0x41f   :  { %9659 = vmatmul.mubr.msk.bf16.gmra.mxu0 %vm1370_vm4, %v1958_v10 }
 0x420   :  { %8014 = vmatprep.mubr.msk.bf16.mxu0 %vm782_vm2, %v10411_v60 }
 0x427   :  { %2394 = vmatmul.mubr.bf16.vlgmr.msra.gmra.mxu0 %v10409_v0 }
 0x428   :  { %8957 = vmatpush3.bf16.msra.mxu0 %v11055_v42  ;;  %8015 = vmatprep.mubr.msk.bf16.mxu0 %vm782_vm2, %v10415_v49 }
 0x429   :  { %8958 = vmatprep.subr.bf16.mxu0 %v11076_v45 }
 0x42b   :  { %v8905_v37 = vpop.f32.mrf.mxu1 }
 0x42c   :  { %8959 = vmatpush3.bf16.msra.mxu0 %v11051_v32 }
 0x42d   :  { %8960 = vmatprep.subr.bf16.mxu0 %v11086_v56  ;;  %v8906_v34 = vpop.f32.mrf.mxu1 }
 0x42e   :  { %v11912_v31 = vadd.f32 %v8906_v34, %v8905_v37 }
 0x42f   :  { %2402 = vmatmul.mubr.bf16.gmra.mxu0 %v10417_v4  ;;  %v11914_v59 = vpop.f32.mrf.mxu1 }
 0x430   :  { %8961 = vmatpush3.bf16.msra.mxu0 %v11047_v22  ;;  %8016 = vmatprep.mubr.msk.bf16.mxu0 %vm782_vm2, %v10421_v29 }
 0x431   :  { %8962 = vmatprep.subr.bf16.mxu0 %v11094_v9  ;;  %v11916_v28 = vpop.f32.mrf.mxu1 }
 0x434   :  { %8963 = vmatpush3.bf16.msra.mxu0 %v11043_v13 }
 0x435   :  { %8964 = vmatprep.subr.bf16.mxu0 %v11102_v17 }
 0x437   :  { %2410 = vmatmul.mubr.bf16.gmra.mxu0 %v10423_v1 }
 0x438   :  { %8965 = vmatpush3.bf16.msra.mxu0 %v11036_v3  ;;  %8017 = vmatprep.mubr.msk.bf16.mxu0 %vm782_vm2, %v10427_v46 }
 0x439   :  { %8966 = vmatprep.subr.bf16.mxu0 %v11110_v23 }
 0x43a   :  { %v8911_v54 = vpop.f32.mrf.mxu1 }
 0x43c   :  { %8967 = vmatpush3.bf16.msra.mxu0 %v11032_v57  ;;  %v8912_v2 = vpop.f32.mrf.mxu1 }
 0x43d   :  { %8968 = vmatprep.subr.bf16.mxu0 %v11065_v62  ;;  %v11918_v51 = vadd.f32 %v8912_v2, %v8911_v54 }
 0x43e   :  { %v11920_v6 = vpop.f32.mrf.mxu1 }
 0x43f   :  { %2418 = vmatmul.mubr.bf16.gmra.mxu0 %v10429_v35 }
 0x440   :  { %8969 = vmatpush3.bf16.msra.mxu0 %v11028_v48  ;;  %8018 = vmatprep.mubr.msk.bf16.mxu0 %vm782_vm2, %v10433_v18  ;;  %v11925_v60 = vpop.f32.mrf.mxu1 }
 0x441   :  { %8970 = vmatprep.subr.bf16.mxu0 %v11059_v52  ;;  %v10462_v52 = vld [vmem:[%s13849_s25 + $0x3a4] ss:$16 sps:$4 sm:$0xff]  }
 0x444   :  { %8971 = vmatpush3.bf16.msra.mxu0 %v11024_v39 }
 0x445   :  { %9694 = vmatprep.subr.bf16.mxu0 %v13853_v11 }
 0x447   :  { %2426 = vmatmul.mubr.bf16.gmra.mxu0 %v10435_v24 }
 0x448   :  { %8019 = vmatprep.mubr.msk.bf16.mxu0 %vm782_vm2, %v10436_v16 }
 0x44f   :  { %2434 = vmatmul.mubr.bf16.gmra.mxu0 %v10438_v41 }
 0x450   :  { %8020 = vmatprep.mubr.msk.bf16.mxu0 %vm782_vm2, %v8013_v33 }
 0x457   :  { %2442 = vmatmul.mubr.bf16.gmra.mxu0 %v8012_v14 }
 0x45a   :  { %v8917_v10 = vpop.f32.mrf.mxu1 }
 0x45c   :  { %v8918_v0 = vpop.f32.mrf.mxu1 }
 0x45d   :  { %v11928_v49 = vadd.f32 %v8918_v0, %v8917_v10 }
 0x45e   :  { %v11930_v4 = vpop.f32.mrf.mxu1 }
 0x460   :  { %v11932_v29 = vpop.f32.mrf.mxu1 }
 0x462   :  { %v8923_v1 = vpop.f32.mrf.mxu1 }
 0x464   :  { %v8924_v46 = vpop.f32.mrf.mxu1 }
 0x465   :  { %v11934_v35 = vadd.f32 %v8924_v46, %v8923_v1 }
 0x466   :  { %v11936_v18 = vpop.f32.mrf.mxu1 }
 0x468   :  { %v11938_v24 = vpop.f32.mrf.mxu1 }
 0x46a   :  { %v8929_v16 = vpop.f32.mrf.mxu1 }
 0x46c   :  { %v8930_v27 = vpop.f32.mrf.mxu1 }
 0x46d   :  { %v11940_v41 = vadd.f32 %v8930_v27, %v8929_v16  ;;  %v10447_v16 = vld [vmem:[%s13849_s25 + $0x344] ss:$16 sps:$4 sm:$0xff]   ;;  %v10445_v27 = vld [vmem:[%s13849_s25 + $0x340] ss:$16 sps:$4 sm:$0xff]  }
 0x46e   :  { %v11942_v33 = vpop.f32.mrf.mxu1  ;;  %2802 = vmatprep.mubr.bf16.mxu0 %v10447_v16 }
 0x46f   :  { %2803 = vmatmul.mubr.bf16.vlgmr.msra.gmra.mxu0 %v10445_v27 }
 0x470   :  { %v11944_v14 = vpop.f32.mrf.mxu1 }
 0x47e   :  { %v8935_v44 = vpop.f32.mrf.mxu1 }
 0x480   :  { %v8936_v37 = vpop.f32.mrf.mxu1 }
 0x481   :  { %v11946_v34 = vadd.f32 %v8936_v37, %v8935_v44  ;;  %v10450_v44 = vld [vmem:[%s13849_s25 + $0x364] ss:$16 sps:$4 sm:$0xff]   ;;  %v10448_v37 = vld [vmem:[%s13849_s25 + $0x360] ss:$16 sps:$4 sm:$0xff]  }
 0x482   :  { %v11948_v54 = vpop.f32.mrf.mxu1  ;;  %2810 = vmatprep.mubr.bf16.mxu0 %v10450_v44  ;;  %v1551_v44 = vadd.f32 %v11657_v26, %v11749_v7  ;;  %v1559_v7 = vadd.f32 %v11670_v53, %v11759_v55  ;;  %v13877_v55 = vld [vmem:[#allocation20_spill] sm:$0xff] }
 0x483   :  { %2811 = vmatmul.mubr.bf16.gmra.mxu0 %v10448_v37 }
 0x484   :  { %v11950_v2 = vpop.f32.mrf.mxu1 }
 0x488   :  { %v8941_v8 = vpop.f32.mrf.mxu1 }
 0x48a   :  { %v8942_v10 = vpop.f32.mrf.mxu1 }
 0x48b   :  { %v11952_v0 = vadd.f32 %v8942_v10, %v8941_v8  ;;  %v10456_v8 = vld [vmem:[%s13849_s25 + $0x384] ss:$16 sps:$4 sm:$0xff]   ;;  %v10454_v10 = vld [vmem:[%s13849_s25 + $0x380] ss:$16 sps:$4 sm:$0xff]  }
 0x48c   :  { %v8944_v1 = vpop.f32.mrf.mxu1  ;;  %2818 = vmatprep.mubr.bf16.mxu0 %v10456_v8 }
 0x48d   :  { %v1548_v1 = vadd.f32 %v11655_v47, %v11741_v40  ;;  %2819 = vmatmul.mubr.bf16.gmra.mxu0 %v10454_v10  ;;  %v10460_v47 = vld [vmem:[%s13849_s25 + $0x3a0] ss:$16 sps:$4 sm:$0xff]   ;;  %v1556_v40 = vadd.f32 %v11665_v12, %v11751_v61 }
 0x48e   :  { %v8945_v46 = vpop.f32.mrf.mxu1  ;;  %2826 = vmatprep.mubr.bf16.mxu0 %v10462_v52  ;;  %v10466_v52 = vld [vmem:[%s13849_s25 + $0x3c0] ss:$16 sps:$4 sm:$0xff]  }
 0x48f   :  { %v13875_v12 = vld [vmem:[#allocation11_spill] sm:$0xff] }
 0x490   :  { %v1564_v61 = vadd.f32 %v13875_v12, %v11761_v30  ;;  %v10472_v30 = vld [vmem:[%s13849_s25 + $0x3e0] ss:$16 sps:$4 sm:$0xff]  }
 0x495   :  { %2827 = vmatmul.mubr.bf16.gmra.mxu0 %v10460_v47  ;;  %v13878_v47 = vld [vmem:[#allocation12_spill] sm:$0xff] }
 0x4af   :  { %v2031_v46 = vpop.f32.mrf.mxu0 }
 0x4b0   :  { %v11974_v16 = vadd.f32 %v2031_v46, %v1548_v1 }
 0x4b1   :  { %v9636_v27 = vpop.f32.mrf.mxu0 }
 0x4b3   :  { %v2034_v37 = vpop.f32.mrf.mxu0 }
 0x4b4   :  { %v11978_v39 = vadd.f32 %v2034_v37, %v1551_v44 }
 0x4b5   :  { %v9637_v48 = vpop.f32.mrf.mxu0 }
 0x4b6   :  { %v10468_v48 = vld [vmem:[%s13849_s25 + $0x3c4] ss:$16 sps:$4 sm:$0xff]  }
 0x4b7   :  { %v2039_v8 = vpop.f32.mrf.mxu0  ;;  %2834 = vmatprep.mubr.bf16.mxu0 %v10468_v48  ;;  %v13880_v48 = vld [vmem:[#allocation21_spill] sm:$0xff] }
 0x4b8   :  { %v11988_v10 = vadd.f32 %v2039_v8, %v1556_v40  ;;  %2835 = vmatmul.mubr.bf16.gmra.mxu0 %v10466_v52  ;;  %v1567_v40 = vadd.f32 %v13878_v47, %v13877_v55  ;;  %v13884_v55 = vld [vmem:[#allocation14_spill] sm:$0xff] }
 0x4b9   :  { %v9640_v26 = vpop.f32.mrf.mxu0 }
 0x4ba   :  { %13873 = vst [vmem:[#allocation10_spill] sm:$0xff] %v11988_v10 }
 0x4bb   :  { %v2042_v1 = vpop.f32.mrf.mxu0 }
 0x4bc   :  { %v11992_v46 = vadd.f32 %v2042_v1, %v1559_v7  ;;  %v10474_v7 = vld [vmem:[%s13849_s25 + $0x3e4] ss:$16 sps:$4 sm:$0xff]  }
 0x4bd   :  { %v9641_v27 = vpop.f32.mrf.mxu0  ;;  %2842 = vmatprep.mubr.bf16.mxu0 %v10474_v7  ;;  %v8058_v7 = vld [vmem:[%s13849_s25 + $0x400] sm:$0x11] }
 0x4be   :  { %13874 = vst [vmem:[#allocation9_spill] sm:$0xff] %v11992_v46  ;;  %v13881_v27 = vld [vmem:[#allocation13_spill] sm:$0xff] }
 0x4bf   :  { %v2047_v44 = vpop.f32.mrf.mxu0  ;;  %v1572_v52 = vadd.f32 %v13881_v27, %v13880_v48  ;;  %v8085_v27 = vcombine.high %v8058_v7, %v8058_v7 }
 0x4c0   :  { %v12002_v37 = vadd.f32 %v2047_v44, %v1564_v61  ;;  %2843 = vmatmul.mubr.bf16.gmra.mxu0 %v10472_v30  ;;  %v8084_v30 = vcombine.low %v8058_v7, %v8058_v7 }
 0x4c1   :  { %v9644_v53 = vpop.f32.mrf.mxu0  ;;  %2850 = vmatprep.mubr.bf16.mxu0 %v8085_v27 }
 0x4c2   :  { %13876 = vst [vmem:[#allocation11_spill] sm:$0xff] %v12002_v37  ;;  %v13883_v53 = vld [vmem:[#allocation22_spill] sm:$0xff]  ;;  %v13887_v37 = vld [vmem:[#allocation15_spill] sm:$0xff] }
 0x4c3   :  { %v2050_v8 = vpop.f32.mrf.mxu0  ;;  %v1575_v47 = vadd.f32 %v13884_v55, %v13883_v53 }
 0x4c4   :  { %v12006_v26 = vadd.f32 %v2050_v8, %v1567_v40 }
 0x4c5   :  { %v9645_v1 = vpop.f32.mrf.mxu0 }
 0x4c6   :  { %13879 = vst [vmem:[#allocation20_spill] sm:$0xff] %v12006_v26  ;;  %v13886_v26 = vld [vmem:[#allocation23_spill] sm:$0xff] }
 0x4c7   :  { %v2055_v12 = vpop.f32.mrf.mxu0  ;;  %v1580_v46 = vadd.f32 %v13887_v37, %v13886_v26  ;;  %v13892_v26 = vld [vmem:[#allocation25_spill] sm:$0xff] }
 0x4c8   :  { %v12016_v61 = vadd.f32 %v2055_v12, %v1572_v52  ;;  %v13889_v12 = vld [vmem:[#allocation24_spill] sm:$0xff]  ;;  %2851 = vmatmul.mubr.bf16.gmra.mxu0 %v8084_v30 }
 0x4c9   :  { %v9648_v44 = vpop.f32.mrf.mxu0  ;;  %9698 = vmatprep.mubr.msk.bf16.mxu0 %vm10755_vm0, %v13853_v11 }
 0x4ca   :  { %13882 = vst [vmem:[#allocation12_spill] sm:$0xff] %v12016_v61  ;;  %v13890_v44 = vld [vmem:[#allocation16_spill] sm:$0xff] }
 0x4cb   :  { %v2058_v40 = vpop.f32.mrf.mxu0  ;;  %v1583_v53 = vadd.f32 %v13890_v44, %v13889_v12  ;;  %v13896_v44 = vld [vmem:[#allocation19_spill] sm:$0xff] }
 0x4cc   :  { %v12020_v8 = vadd.f32 %v2058_v40, %v1575_v47  ;;  %v13893_v40 = vld [vmem:[#allocation17_spill] sm:$0xff] }
 0x4cd   :  { %v9649_v1 = vpop.f32.mrf.mxu0 }
 0x4ce   :  { %13885 = vst [vmem:[#allocation21_spill] sm:$0xff] %v12020_v8  ;;  %v1588_v1 = vadd.f32 %v13893_v40, %v13892_v26 }
 0x4cf   :  { %v2063_v10 = vpop.f32.mrf.mxu0 }
 0x4d0   :  { %v12027_v48 = vadd.f32 %v2063_v10, %v1580_v46 }
 0x4d1   :  { %v9652_v52 = vpop.f32.mrf.mxu0 }
 0x4d2   :  { %13888 = vst [vmem:[#allocation13_spill] sm:$0xff] %v12027_v48  ;;  %v13894_v52 = vld [vmem:[#allocation26_spill] sm:$0xff] }
 0x4d3   :  { %v2066_v55 = vpop.f32.mrf.mxu0  ;;  %v13895_v48 = vld [vmem:[#allocation18_spill] sm:$0xff] }
 0x4d4   :  { %v12031_v47 = vadd.f32 %v2066_v55, %v1583_v53  ;;  %v1591_v8 = vadd.f32 %v13895_v48, %v13894_v52  ;;  %v1596_v53 = vadd.f32 %v13896_v44, %v11794_v43 }
 0x4d5   :  { %v9653_v37 = vpop.f32.mrf.mxu0 }
 0x4d6   :  { %13891 = vst [vmem:[#allocation22_spill] sm:$0xff] %v12031_v47 }
 0x4d7   :  { %v2071_v10 = vpop.f32.mrf.mxu0 }
 0x4d8   :  { %v12037_v46 = vadd.f32 %v2071_v10, %v1588_v1  ;;  %v8910_v10 = vadd.f32 %v11916_v28, %v11914_v59 }
 0x4d9   :  { %v9656_v7 = vpop.f32.mrf.mxu0 }
 0x4db   :  { %v2074_v12 = vpop.f32.mrf.mxu0 }
 0x4dc   :  { %v12041_v27 = vadd.f32 %v2074_v12, %v1591_v8 }
 0x4dd   :  { %v9657_v30 = vpop.f32.mrf.mxu0 }
 0x4df   :  { %v2079_v55 = vpop.f32.mrf.mxu0 }
 0x4e0   :  { %v12045_v47 = vadd.f32 %v2079_v55, %v1596_v53 }
 0x4e1   :  { %v9660_v37 = vpop.f32.mrf.mxu0 }
 0x4e3   :  { %v2082_v61 = vpop.f32.mrf.mxu0 }
 0x4e4   :  { %v8916_v61 = vadd.f32 %v11925_v60, %v11920_v6  ;;  %v8922_v6 = vadd.f32 %v11932_v29, %v11930_v4  ;;  %v8928_v4 = vadd.f32 %v11938_v24, %v11936_v18  ;;  %v8934_v18 = vadd.f32 %v11944_v14, %v11942_v33 }
 0x4e5   :  { %v9661_v26 = vpop.f32.mrf.mxu0  ;;  %v8940_v33 = vadd.f32 %v11950_v2, %v11948_v54  ;;  %v10453_v54 = vld [vmem:[%s13849_s25 + $0x34c] ss:$16 sps:$4 sm:$0xff]  }
 0x4e7   :  { %v2395_v40 = vpop.f32.mrf.mxu0 }
 0x4e8   :  { %v2396_v48 = vadd.f32 %v11912_v31, %v2395_v40 }
 0x4e9   :  { %v2397_v1 = vpop.f32.mrf.mxu0 }
 0x4eb   :  { %v2398_v7 = vpop.f32.mrf.mxu0 }
 0x4ec   :  { %v2399_v8 = vadd.f32 %v8910_v10, %v2398_v7 }
 0x4ed   :  { %v2400_v52 = vpop.f32.mrf.mxu0 }
 0x4ee   :  { %v2449_v12 = vpack.c.bf16 %v2399_v8, %v2396_v48 }
 0x4ef   :  { %v2403_v30 = vpop.f32.mrf.mxu0 }
 0x4f0   :  { %9667 = vmatmul.mubr.msk.bf16.vlgmr.msra.gmra.mxu1 %vm1370_vm4, %v2449_v12  ;;  %v2404_v31 = vadd.f32 %v11918_v51, %v2403_v30 }
 0x4f1   :  { %2859 = vmatpush1.bf16.msra.mxu1 %v11158_v20  ;;  %v2405_v43 = vpop.f32.mrf.mxu0  ;;  %9670 = vmatprep.mubr.msk.bf16.mxu1 %vm10755_vm0, %v13853_v11 }
 0x4f2   :  { %2860 = vmatprep.subr.bf16.mxu1 %v13863_v36 }
 0x4f3   :  { %v2406_v59 = vpop.f32.mrf.mxu0 }
 0x4f4   :  { %v2407_v28 = vadd.f32 %v8916_v61, %v2406_v59 }
 0x4f5   :  { %2861 = vmatpush1.bf16.msra.mxu1 %v11167_v38  ;;  %v2408_v44 = vpop.f32.mrf.mxu0 }
 0x4f6   :  { %v2450_v53 = vpack.c.bf16 %v2407_v28, %v2404_v31  ;;  %2862 = vmatprep.subr.bf16.mxu1 %v13863_v36 }
 0x4f7   :  { %v2411_v55 = vpop.f32.mrf.mxu0 }
 0x4f8   :  { %9671 = vmatmul.mubr.msk.bf16.gmra.mxu1 %vm1370_vm4, %v2450_v53  ;;  %v2412_v60 = vadd.f32 %v11928_v49, %v2411_v55 }
 0x4f9   :  { %2863 = vmatpush1.bf16.msra.mxu1 %v11180_v50  ;;  %v2413_v37 = vpop.f32.mrf.mxu0  ;;  %9674 = vmatprep.mubr.msk.bf16.mxu1 %vm10755_vm0, %v13853_v11 }
 0x4fa   :  { %2864 = vmatprep.subr.bf16.mxu1 %v13863_v36 }
 0x4fb   :  { %v2414_v51 = vpop.f32.mrf.mxu0 }
 0x4fc   :  { %v2415_v26 = vadd.f32 %v8922_v6, %v2414_v51 }
 0x4fd   :  { %2865 = vmatpush1.bf16.msra.mxu1 %v11188_v58  ;;  %v2416_v40 = vpop.f32.mrf.mxu0 }
 0x4fe   :  { %v2451_v1 = vpack.c.bf16 %v2415_v26, %v2412_v60  ;;  %2866 = vmatprep.subr.bf16.mxu1 %v13863_v36  ;;  %v10457_v40 = vld [vmem:[%s13849_s25 + $0x36c] ss:$16 sps:$4 sm:$0xff]  }
 0x4ff   :  { %v2419_v10 = vpop.f32.mrf.mxu0 }
 0x500   :  { %9675 = vmatmul.mubr.msk.bf16.gmra.mxu1 %vm1370_vm4, %v2451_v1  ;;  %v2420_v29 = vadd.f32 %v11934_v35, %v2419_v10  ;;  %v10463_v1 = vld [vmem:[%s13849_s25 + $0x38c] ss:$16 sps:$4 sm:$0xff]   ;;  %v10465_v10 = vld [vmem:[%s13849_s25 + $0x388] ss:$16 sps:$4 sm:$0xff]  }
 0x501   :  { %2867 = vmatpush1.bf16.msra.mxu1 %v11194_v63  ;;  %v2421_v7 = vpop.f32.mrf.mxu0  ;;  %9678 = vmatprep.mubr.msk.bf16.mxu1 %vm10755_vm0, %v13853_v11 }
 0x502   :  { %2868 = vmatprep.subr.bf16.mxu1 %v13863_v36  ;;  %v10469_v7 = vld [vmem:[%s13849_s25 + $0x3ac] ss:$16 sps:$4 sm:$0xff]  }
 0x503   :  { %v2422_v49 = vpop.f32.mrf.mxu0 }
 0x504   :  { %v2423_v48 = vadd.f32 %v8928_v4, %v2422_v49  ;;  %v10471_v4 = vld [vmem:[%s13849_s25 + $0x3a8] ss:$16 sps:$4 sm:$0xff]   ;;  %v10475_v49 = vld [vmem:[%s13849_s25 + $0x3cc] ss:$16 sps:$4 sm:$0xff]  }
 0x505   :  { %2869 = vmatpush1.bf16.msra.mxu1 %v11202_v19  ;;  %v2424_v8 = vpop.f32.mrf.mxu0 }
 0x506   :  { %v2452_v52 = vpack.c.bf16 %v2423_v48, %v2420_v29  ;;  %2870 = vmatprep.subr.bf16.mxu1 %v13863_v36  ;;  %v13897_v29 = vld [vmem:[#allocation7_spill] sm:$0xff]  ;;  %v13898_v48 = vld [vmem:[#allocation8_spill] sm:$0xff] }
 0x507   :  { %v2427_v12 = vpop.f32.mrf.mxu0  ;;  %v10477_v8 = vld [vmem:[%s13849_s25 + $0x3c8] ss:$16 sps:$4 sm:$0xff]  }
 0x508   :  { %9679 = vmatmul.mubr.msk.bf16.gmra.mxu1 %vm1370_vm4, %v2452_v52  ;;  %v2428_v24 = vadd.f32 %v11940_v41, %v2427_v12  ;;  %v13899_v52 = vld [vmem:[#allocation6_spill] sm:$0xff]  ;;  %v10478_v12 = vld [vmem:[%s13849_s25 + $0x3ec] ss:$16 sps:$4 sm:$0xff]  }
 0x509   :  { %2871 = vmatpush1.bf16.msra.mxu1 %v11107_v21  ;;  %v2429_v30 = vpop.f32.mrf.mxu0  ;;  %9682 = vmatprep.mubr.msk.bf16.mxu1 %vm10755_vm0, %v13853_v11 }
 0x50a   :  { %2872 = vmatprep.subr.bf16.mxu1 %v13863_v36  ;;  %v8059_v30 = vld [vmem:[%s13849_s25 + $0x408] sm:$0x11] }
 0x50b   :  { %v2430_v35 = vpop.f32.mrf.mxu0 }
 0x50c   :  { %v2431_v43 = vadd.f32 %v8934_v18, %v2430_v35  ;;  %v10480_v18 = vld [vmem:[%s13849_s25 + $0x3e8] ss:$16 sps:$4 sm:$0xff]   ;;  %v8087_v35 = vcombine.high %v8059_v30, %v8059_v30 }
 0x50d   :  { %2873 = vmatpush1.bf16.msra.mxu1 %v11090_v5  ;;  %v2432_v61 = vpop.f32.mrf.mxu0 }
 0x50e   :  { %v2453_v59 = vpack.c.bf16 %v2431_v43, %v2428_v24  ;;  %2888 = vmatprep.subr.bf16.mxu1 %v13863_v36  ;;  %v8086_v24 = vcombine.low %v8059_v30, %v8059_v30  ;;  %v10485_v43 = vld [vmem:[%s13812_s5 + $0x48] sm:$0xff]  }
 0x50f   :  { %v2435_v31 = vpop.f32.mrf.mxu0  ;;  %9695 = vmatpush3.bf16.msra.mxu0 %v10485_v43 }
 0x510   :  { %9683 = vmatmul.mubr.msk.bf16.gmra.mxu1 %vm1370_vm4, %v2453_v59  ;;  %v2436_v14 = vadd.f32 %v11946_v34, %v2435_v31  ;;  %v10451_v34 = vld [vmem:[%s13849_s25 + $0x348] ss:$16 sps:$4 sm:$0xff]   ;;  %9696 = vmatprep.subr.bf16.mxu0 %v13853_v11 }
 0x511   :  { %2889 = vmatpush2.bf16.msra.mxu1 %v13871_v25  ;;  %v2437_v28 = vpop.f32.mrf.mxu0  ;;  %9686 = vmatprep.mubr.msk.bf16.mxu1 %vm10755_vm0, %v13853_v11 }
 0x512   :  { %9023 = vmatprep.subr.bf16.mxu1 %v13872_v15 }
 0x513   :  { %v2438_v41 = vpop.f32.mrf.mxu0 }
 0x514   :  { %v2439_v44 = vadd.f32 %v8940_v33, %v2438_v41 }
 0x515   :  { %v2440_v53 = vpop.f32.mrf.mxu0 }
 0x516   :  { %v2454_v55 = vpack.c.bf16 %v2439_v44, %v2436_v14 }
 0x517   :  { %v2443_v37 = vpop.f32.mrf.mxu0 }
 0x518   :  { %9687 = vmatmul.mubr.msk.bf16.gmra.mxu1 %vm1370_vm4, %v2454_v55  ;;  %v2444_v51 = vadd.f32 %v11952_v0, %v2443_v37  ;;  %v10459_v0 = vld [vmem:[%s13849_s25 + $0x368] ss:$16 sps:$4 sm:$0xff]   ;;  %v10486_v55 = vld [vmem:[%s13812_s5 + $0x40] sm:$0xff]  }
 0x519   :  { %v2445_v6 = vpop.f32.mrf.mxu0  ;;  %9690 = vmatprep.mubr.msk.bf16.mxu1 %vm10755_vm0, %v13853_v11  ;;  %9697 = vmatpush3.bf16.msra.mxu0 %v10486_v55  ;;  %v10489_v55 = vld [vmem:[%s13849_s25 + $0x414] ss:$16 sps:$4 sm:$0xff]  }
 0x51a   :  { %v2455_v2 = vpack.c.bf16 %v2444_v51, %v2444_v51  ;;  %3355 = vmatprep.subr.bf16.mxu0 %v13863_v36 }
 0x51b   :  { %v2446_v60 = vpop.f32.mrf.mxu0 }
 0x51d   :  { %v2447_v26 = vpop.f32.mrf.mxu0 }
 0x520   :  { %9691 = vmatmul.mubr.msk.bf16.gmra.mxu1 %vm1370_vm4, %v2455_v2 }
 0x521   :  { %8088 = vmatprep.mubr.msk.bf16.mxu1 %vm782_vm2, %v10453_v54 }
 0x528   :  { %2891 = vmatmul.mubr.bf16.vlgmr.msra.gmra.mxu1 %v10451_v34 }
 0x529   :  { %9024 = vmatpush3.bf16.msra.mxu1 %v11055_v42  ;;  %8089 = vmatprep.mubr.msk.bf16.mxu1 %vm782_vm2, %v10457_v40 }
 0x52a   :  { %9025 = vmatprep.subr.bf16.mxu1 %v11076_v45 }
 0x52d   :  { %9026 = vmatpush3.bf16.msra.mxu1 %v11051_v32 }
 0x52e   :  { %9027 = vmatprep.subr.bf16.mxu1 %v11086_v56 }
 0x52f   :  { %v8972_v61 = vpop.f32.mrf.mxu0 }
 0x530   :  { %2899 = vmatmul.mubr.bf16.gmra.mxu1 %v10459_v0 }
 0x531   :  { %9028 = vmatpush3.bf16.msra.mxu1 %v11047_v22  ;;  %8090 = vmatprep.mubr.msk.bf16.mxu1 %vm782_vm2, %v10463_v1  ;;  %v8973_v59 = vpop.f32.mrf.mxu0 }
 0x532   :  { %9029 = vmatprep.subr.bf16.mxu1 %v11094_v9  ;;  %v12169_v31 = vadd.f32 %v8973_v59, %v8972_v61 }
 0x533   :  { %v12171_v28 = vpop.f32.mrf.mxu0 }
 0x535   :  { %9030 = vmatpush3.bf16.msra.mxu1 %v11043_v13  ;;  %v12173_v33 = vpop.f32.mrf.mxu0 }
 0x536   :  { %9031 = vmatprep.subr.bf16.mxu1 %v11102_v17 }
 0x538   :  { %2907 = vmatmul.mubr.bf16.gmra.mxu1 %v10465_v10 }
 0x539   :  { %9032 = vmatpush3.bf16.msra.mxu1 %v11036_v3  ;;  %8091 = vmatprep.mubr.msk.bf16.mxu1 %vm782_vm2, %v10469_v7 }
 0x53a   :  { %9033 = vmatprep.subr.bf16.mxu1 %v11110_v23 }
 0x53d   :  { %9034 = vmatpush3.bf16.msra.mxu1 %v11032_v57 }
 0x53e   :  { %9035 = vmatprep.subr.bf16.mxu1 %v11065_v62 }
 0x540   :  { %2915 = vmatmul.mubr.bf16.gmra.mxu1 %v10471_v4 }
 0x541   :  { %9036 = vmatpush3.bf16.msra.mxu1 %v13897_v29  ;;  %8092 = vmatprep.mubr.msk.bf16.mxu1 %vm782_vm2, %v10475_v49 }
 0x542   :  { %9037 = vmatprep.subr.bf16.mxu1 %v13898_v48 }
 0x543   :  { %v8978_v41 = vpop.f32.mrf.mxu0 }
 0x545   :  { %9038 = vmatpush3.bf16.msra.mxu1 %v13899_v52  ;;  %v8979_v14 = vpop.f32.mrf.mxu0 }
 0x546   :  { %9726 = vmatprep.subr.bf16.mxu1 %v13853_v11  ;;  %v12175_v44 = vadd.f32 %v8979_v14, %v8978_v41 }
 0x547   :  { %v12177_v53 = vpop.f32.mrf.mxu0 }
 0x548   :  { %2923 = vmatmul.mubr.bf16.gmra.mxu1 %v10477_v8 }
 0x549   :  { %8093 = vmatprep.mubr.msk.bf16.mxu1 %vm782_vm2, %v10478_v12  ;;  %v12182_v37 = vpop.f32.mrf.mxu0 }
 0x54d   :  { %v8984_v6 = vpop.f32.mrf.mxu0 }
 0x54f   :  { %v8985_v51 = vpop.f32.mrf.mxu0 }
 0x550   :  { %2931 = vmatmul.mubr.bf16.gmra.mxu1 %v10480_v18  ;;  %v12185_v60 = vadd.f32 %v8985_v51, %v8984_v6  ;;  %v10487_v6 = vld [vmem:[%s13849_s25 + $0x410] ss:$16 sps:$4 sm:$0xff]   ;;  %v10492_v51 = vld [vmem:[%s13849_s25 + $0x434] ss:$16 sps:$4 sm:$0xff]  }
 0x551   :  { %8094 = vmatprep.mubr.msk.bf16.mxu1 %vm782_vm2, %v8087_v35  ;;  %v12187_v26 = vpop.f32.mrf.mxu0 }
 0x553   :  { %v12189_v54 = vpop.f32.mrf.mxu0 }
 0x555   :  { %v8990_v2 = vpop.f32.mrf.mxu0 }
 0x557   :  { %v8991_v34 = vpop.f32.mrf.mxu0 }
 0x558   :  { %2939 = vmatmul.mubr.bf16.gmra.mxu1 %v8086_v24  ;;  %v12191_v40 = vadd.f32 %v8991_v34, %v8990_v2  ;;  %v10490_v2 = vld [vmem:[%s13849_s25 + $0x430] ss:$16 sps:$4 sm:$0xff]   ;;  %v10498_v34 = vld [vmem:[%s13849_s25 + $0x454] ss:$16 sps:$4 sm:$0xff]  }
 0x559   :  { %v12193_v0 = vpop.f32.mrf.mxu0  ;;  %3299 = vmatprep.mubr.bf16.mxu1 %v10489_v55  ;;  %v10502_v55 = vld [vmem:[%s13849_s25 + $0x470] ss:$16 sps:$4 sm:$0xff]  }
 0x55b   :  { %v12195_v1 = vpop.f32.mrf.mxu0 }
 0x560   :  { %3300 = vmatmul.mubr.bf16.vlgmr.msra.gmra.mxu1 %v10487_v6 }
 0x561   :  { %3307 = vmatprep.mubr.bf16.mxu1 %v10492_v51  ;;  %v13902_v51 = vld [vmem:[#allocation10_spill] sm:$0xff] }
 0x568   :  { %3308 = vmatmul.mubr.bf16.gmra.mxu1 %v10490_v2 }
 0x569   :  { %3315 = vmatprep.mubr.bf16.mxu1 %v10498_v34 }
 0x578   :  { %v8996_v10 = vpop.f32.mrf.mxu0 }
 0x57a   :  { %v8997_v7 = vpop.f32.mrf.mxu0 }
 0x57b   :  { %v12197_v4 = vadd.f32 %v8997_v7, %v8996_v10  ;;  %v10496_v10 = vld [vmem:[%s13849_s25 + $0x450] ss:$16 sps:$4 sm:$0xff]  }
 0x57c   :  { %v12199_v49 = vpop.f32.mrf.mxu0  ;;  %3316 = vmatmul.mubr.bf16.gmra.mxu1 %v10496_v10  ;;  %v13904_v10 = vld [vmem:[#allocation9_spill] sm:$0xff] }
 0x57e   :  { %v12201_v8 = vpop.f32.mrf.mxu0 }
 0x580   :  { %v9002_v12 = vpop.f32.mrf.mxu0 }
 0x582   :  { %v9003_v30 = vpop.f32.mrf.mxu0 }
 0x583   :  { %v12203_v18 = vadd.f32 %v9003_v30, %v9002_v12 }
 0x584   :  { %v12205_v35 = vpop.f32.mrf.mxu0 }
 0x586   :  { %v12207_v24 = vpop.f32.mrf.mxu0 }
 0x588   :  { %v9008_v43 = vpop.f32.mrf.mxu0 }
 0x58a   :  { %v9009_v61 = vpop.f32.mrf.mxu0 }
 0x58b   :  { %v12209_v59 = vadd.f32 %v9009_v61, %v9008_v43 }
 0x58c   :  { %v9011_v41 = vpop.f32.mrf.mxu0 }
 0x58d   :  { %v10504_v41 = vld [vmem:[%s13849_s25 + $0x474] ss:$16 sps:$4 sm:$0xff]  }
 0x58e   :  { %v9012_v14 = vpop.f32.mrf.mxu0  ;;  %3323 = vmatprep.mubr.bf16.mxu1 %v10504_v41 }
 0x58f   :  { %3324 = vmatmul.mubr.bf16.gmra.mxu1 %v10502_v55 }
 0x5b0   :  { %v2528_v7 = vpop.f32.mrf.mxu1 }
 0x5b1   :  { %v12230_v12 = vadd.f32 %v2528_v7, %v11974_v16  ;;  %v10510_v7 = vld [vmem:[%s13849_s25 + $0x494] ss:$16 sps:$4 sm:$0xff]  }
 0x5b2   :  { %v9668_v30 = vpop.f32.mrf.mxu1  ;;  %3331 = vmatprep.mubr.bf16.mxu1 %v10510_v7 }
 0x5b3   :  { %13900 = vst [vmem:[#allocation14_spill] sm:$0xff] %v12230_v12 }
 0x5b4   :  { %v2531_v43 = vpop.f32.mrf.mxu1 }
 0x5b5   :  { %v12233_v61 = vadd.f32 %v2531_v43, %v11978_v39  ;;  %v10508_v43 = vld [vmem:[%s13849_s25 + $0x490] ss:$16 sps:$4 sm:$0xff]  }
 0x5b6   :  { %v9669_v14 = vpop.f32.mrf.mxu1  ;;  %3332 = vmatmul.mubr.bf16.gmra.mxu1 %v10508_v43  ;;  %v13910_v43 = vld [vmem:[#allocation12_spill] sm:$0xff] }
 0x5b7   :  { %13901 = vst [vmem:[#allocation23_spill] sm:$0xff] %v12233_v61  ;;  %v13906_v14 = vld [vmem:[#allocation11_spill] sm:$0xff] }
 0x5b8   :  { %v2536_v6 = vpop.f32.mrf.mxu1 }
 0x5b9   :  { %v12242_v16 = vadd.f32 %v2536_v6, %v13902_v51 }
 0x5ba   :  { %v9672_v2 = vpop.f32.mrf.mxu1 }
 0x5bb   :  { %13903 = vst [vmem:[#allocation15_spill] sm:$0xff] %v12242_v16  ;;  %v13908_v2 = vld [vmem:[#allocation20_spill] sm:$0xff]  ;;  %v13913_v16 = vld [vmem:[#allocation13_spill] sm:$0xff] }
 0x5bc   :  { %v2539_v34 = vpop.f32.mrf.mxu1 }
 0x5bd   :  { %v12245_v39 = vadd.f32 %v2539_v34, %v13904_v10  ;;  %v10516_v10 = vld [vmem:[%s13849_s25 + $0x4b4] ss:$16 sps:$4 sm:$0xff]  }
 0x5be   :  { %v9673_v30 = vpop.f32.mrf.mxu1  ;;  %3339 = vmatprep.mubr.bf16.mxu1 %v10516_v10 }
 0x5bf   :  { %13905 = vst [vmem:[#allocation24_spill] sm:$0xff] %v12245_v39  ;;  %v10514_v39 = vld [vmem:[%s13849_s25 + $0x4b0] ss:$16 sps:$4 sm:$0xff]  }
 0x5c0   :  { %v2544_v41 = vpop.f32.mrf.mxu1  ;;  %3340 = vmatmul.mubr.bf16.gmra.mxu1 %v10514_v39 }
 0x5c1   :  { %v12254_v55 = vadd.f32 %v2544_v41, %v13906_v14 }
 0x5c2   :  { %v9676_v6 = vpop.f32.mrf.mxu1 }
 0x5c3   :  { %13907 = vst [vmem:[#allocation16_spill] sm:$0xff] %v12254_v55  ;;  %v13911_v55 = vld [vmem:[#allocation21_spill] sm:$0xff] }
 0x5c4   :  { %v2547_v51 = vpop.f32.mrf.mxu1 }
 0x5c5   :  { %v12257_v34 = vadd.f32 %v2547_v51, %v13908_v2 }
 0x5c6   :  { %v9677_v30 = vpop.f32.mrf.mxu1 }
 0x5c7   :  { %13909 = vst [vmem:[#allocation25_spill] sm:$0xff] %v12257_v34  ;;  %v8132_v30 = vld [vmem:[%s13849_s25 + $0x4d0] sm:$0x11] }
 0x5c8   :  { %v2552_v7 = vpop.f32.mrf.mxu1  ;;  %v8158_v10 = vcombine.low %v8132_v30, %v8132_v30  ;;  %v8159_v12 = vcombine.high %v8132_v30, %v8132_v30 }
 0x5c9   :  { %v12266_v41 = vadd.f32 %v2552_v7, %v13910_v43  ;;  %v13915_v43 = vld [vmem:[#allocation22_spill] sm:$0xff] }
 0x5ca   :  { %v9680_v14 = vpop.f32.mrf.mxu1  ;;  %3347 = vmatprep.mubr.bf16.mxu1 %v8159_v12 }
 0x5cb   :  { %3348 = vmatmul.mubr.bf16.gmra.mxu1 %v8158_v10 }
 0x5cc   :  { %v2555_v6 = vpop.f32.mrf.mxu1  ;;  %9730 = vmatprep.mubr.msk.bf16.mxu1 %vm10755_vm0, %v13853_v11 }
 0x5cd   :  { %v12269_v51 = vadd.f32 %v2555_v6, %v13911_v55 }
 0x5ce   :  { %v9681_v2 = vpop.f32.mrf.mxu1 }
 0x5cf   :  { %13912 = vst [vmem:[#allocation17_spill] sm:$0xff] %v12269_v51 }
 0x5d0   :  { %v2560_v34 = vpop.f32.mrf.mxu1 }
 0x5d1   :  { %v12275_v61 = vadd.f32 %v2560_v34, %v13913_v16 }
 0x5d2   :  { %v9684_v39 = vpop.f32.mrf.mxu1 }
 0x5d3   :  { %13914 = vst [vmem:[#allocation26_spill] sm:$0xff] %v12275_v61 }
 0x5d4   :  { %v2563_v7 = vpop.f32.mrf.mxu1 }
 0x5d5   :  { %v12278_v14 = vadd.f32 %v2563_v7, %v13915_v43 }
 0x5d6   :  { %v9685_v55 = vpop.f32.mrf.mxu1 }
 0x5d7   :  { %13916 = vst [vmem:[#allocation18_spill] sm:$0xff] %v12278_v14  ;;  %v8977_v55 = vadd.f32 %v12173_v33, %v12171_v28 }
 0x5d8   :  { %v2568_v6 = vpop.f32.mrf.mxu1 }
 0x5d9   :  { %v12283_v2 = vadd.f32 %v2568_v6, %v12037_v46 }
 0x5da   :  { %v9688_v51 = vpop.f32.mrf.mxu1 }
 0x5db   :  { %13917 = vst [vmem:[#allocation19_spill] sm:$0xff] %v12283_v2 }
 0x5dc   :  { %v2571_v16 = vpop.f32.mrf.mxu1 }
 0x5dd   :  { %v12286_v34 = vadd.f32 %v2571_v16, %v12041_v27 }
 0x5de   :  { %v9689_v30 = vpop.f32.mrf.mxu1 }
 0x5e0   :  { %v2576_v12 = vpop.f32.mrf.mxu1 }
 0x5e1   :  { %v12289_v10 = vadd.f32 %v2576_v12, %v12045_v47 }
 0x5e2   :  { %v9692_v39 = vpop.f32.mrf.mxu1 }
 0x5e4   :  { %v2579_v7 = vpop.f32.mrf.mxu1 }
 0x5e6   :  { %v9693_v43 = vpop.f32.mrf.mxu1 }
 0x5e8   :  { %v2892_v14 = vpop.f32.mrf.mxu1 }
 0x5e9   :  { %v2893_v51 = vadd.f32 %v12169_v31, %v2892_v14 }
 0x5ea   :  { %v2894_v61 = vpop.f32.mrf.mxu1 }
 0x5eb   :  { %v8983_v61 = vadd.f32 %v12182_v37, %v12177_v53  ;;  %v8989_v53 = vadd.f32 %v12189_v54, %v12187_v26  ;;  %v8995_v26 = vadd.f32 %v12195_v1, %v12193_v0  ;;  %v9001_v0 = vadd.f32 %v12201_v8, %v12199_v49 }
 0x5ec   :  { %v2895_v46 = vpop.f32.mrf.mxu1  ;;  %v9007_v49 = vadd.f32 %v12207_v24, %v12205_v35  ;;  %v10495_v35 = vld [vmem:[%s13849_s25 + $0x41c] ss:$16 sps:$4 sm:$0xff]  }
 0x5ed   :  { %v2896_v6 = vadd.f32 %v8977_v55, %v2895_v46 }
 0x5ee   :  { %v2897_v2 = vpop.f32.mrf.mxu1 }
 0x5ef   :  { %v2946_v27 = vpack.c.bf16 %v2896_v6, %v2893_v51 }
 0x5f0   :  { %v2900_v16 = vpop.f32.mrf.mxu1 }
 0x5f1   :  { %9699 = vmatmul.mubr.msk.bf16.vlgmr.msra.gmra.mxu0 %vm1370_vm4, %v2946_v27  ;;  %v2901_v31 = vadd.f32 %v12175_v44, %v2900_v16 }
 0x5f2   :  { %3356 = vmatpush1.bf16.msra.mxu0 %v11158_v20  ;;  %v2902_v47 = vpop.f32.mrf.mxu1  ;;  %9702 = vmatprep.mubr.msk.bf16.mxu0 %vm10755_vm0, %v13853_v11 }
 0x5f3   :  { %3357 = vmatprep.subr.bf16.mxu0 %v13863_v36 }
 0x5f4   :  { %v2903_v28 = vpop.f32.mrf.mxu1 }
 0x5f5   :  { %v2904_v33 = vadd.f32 %v8983_v61, %v2903_v28 }
 0x5f6   :  { %3358 = vmatpush1.bf16.msra.mxu0 %v11167_v38  ;;  %v2905_v14 = vpop.f32.mrf.mxu1 }
 0x5f7   :  { %v2947_v2 = vpack.c.bf16 %v2904_v33, %v2901_v31  ;;  %3359 = vmatprep.subr.bf16.mxu0 %v13863_v36 }
 0x5f8   :  { %v2908_v30 = vpop.f32.mrf.mxu1 }
 0x5f9   :  { %9703 = vmatmul.mubr.msk.bf16.gmra.mxu0 %vm1370_vm4, %v2947_v2  ;;  %v2909_v37 = vadd.f32 %v12185_v60, %v2908_v30 }
 0x5fa   :  { %3360 = vmatpush1.bf16.msra.mxu0 %v11180_v50  ;;  %v2910_v12 = vpop.f32.mrf.mxu1  ;;  %9706 = vmatprep.mubr.msk.bf16.mxu0 %vm10755_vm0, %v13853_v11 }
 0x5fb   :  { %3361 = vmatprep.subr.bf16.mxu0 %v13863_v36 }
 0x5fc   :  { %v2911_v44 = vpop.f32.mrf.mxu1 }
 0x5fd   :  { %v2912_v39 = vadd.f32 %v8989_v53, %v2911_v44 }
 0x5fe   :  { %3362 = vmatpush1.bf16.msra.mxu0 %v11188_v58  ;;  %v2913_v7 = vpop.f32.mrf.mxu1 }
 0x5ff   :  { %v2948_v43 = vpack.c.bf16 %v2912_v39, %v2909_v37  ;;  %3363 = vmatprep.subr.bf16.mxu0 %v13863_v36 }
 0x600   :  { %v2916_v55 = vpop.f32.mrf.mxu1 }
 0x601   :  { %9707 = vmatmul.mubr.msk.bf16.gmra.mxu0 %vm1370_vm4, %v2948_v43  ;;  %v2917_v54 = vadd.f32 %v12191_v40, %v2916_v55  ;;  %v10499_v43 = vld [vmem:[%s13849_s25 + $0x43c] ss:$16 sps:$4 sm:$0xff]  }
 0x602   :  { %3364 = vmatpush1.bf16.msra.mxu0 %v11194_v63  ;;  %v2918_v46 = vpop.f32.mrf.mxu1  ;;  %9710 = vmatprep.mubr.msk.bf16.mxu0 %vm10755_vm0, %v13853_v11  ;;  %v10505_v55 = vld [vmem:[%s13849_s25 + $0x45c] ss:$16 sps:$4 sm:$0xff]  }
 0x603   :  { %3365 = vmatprep.subr.bf16.mxu0 %v13863_v36  ;;  %v10507_v46 = vld [vmem:[%s13849_s25 + $0x458] ss:$16 sps:$4 sm:$0xff]  }
 0x604   :  { %v2919_v60 = vpop.f32.mrf.mxu1 }
 0x605   :  { %v2920_v51 = vadd.f32 %v8995_v26, %v2919_v60  ;;  %v10511_v26 = vld [vmem:[%s13849_s25 + $0x47c] ss:$16 sps:$4 sm:$0xff]   ;;  %v10513_v60 = vld [vmem:[%s13849_s25 + $0x478] ss:$16 sps:$4 sm:$0xff]  }
 0x606   :  { %3366 = vmatpush1.bf16.msra.mxu0 %v11202_v19  ;;  %v2921_v6 = vpop.f32.mrf.mxu1 }
 0x607   :  { %v2949_v27 = vpack.c.bf16 %v2920_v51, %v2917_v54  ;;  %3367 = vmatprep.subr.bf16.mxu0 %v13863_v36  ;;  %v10517_v54 = vld [vmem:[%s13849_s25 + $0x49c] ss:$16 sps:$4 sm:$0xff]   ;;  %v10519_v51 = vld [vmem:[%s13849_s25 + $0x498] ss:$16 sps:$4 sm:$0xff]  }
 0x608   :  { %v2924_v16 = vpop.f32.mrf.mxu1  ;;  %v10520_v6 = vld [vmem:[%s13849_s25 + $0x4bc] ss:$16 sps:$4 sm:$0xff]  }
 0x609   :  { %9711 = vmatmul.mubr.msk.bf16.gmra.mxu0 %vm1370_vm4, %v2949_v27  ;;  %v2925_v1 = vadd.f32 %v12197_v4, %v2924_v16  ;;  %v8133_v27 = vld [vmem:[%s13849_s25 + $0x4d8] sm:$0x11] }
 0x60a   :  { %3368 = vmatpush1.bf16.msra.mxu0 %v11107_v21  ;;  %v2926_v47 = vpop.f32.mrf.mxu1  ;;  %9714 = vmatprep.mubr.msk.bf16.mxu0 %vm10755_vm0, %v13853_v11  ;;  %v10522_v16 = vld [vmem:[%s13849_s25 + $0x4b8] ss:$16 sps:$4 sm:$0xff]  }
 0x60b   :  { %3369 = vmatprep.subr.bf16.mxu0 %v13863_v36  ;;  %v8161_v47 = vcombine.high %v8133_v27, %v8133_v27 }
 0x60c   :  { %v2927_v40 = vpop.f32.mrf.mxu1 }
 0x60d   :  { %v2928_v61 = vadd.f32 %v9001_v0, %v2927_v40  ;;  %v8160_v0 = vcombine.low %v8133_v27, %v8133_v27  ;;  %v10527_v40 = vld [vmem:[%s13812_s5 + $0x58] sm:$0xff]  }
 0x60e   :  { %3370 = vmatpush1.bf16.msra.mxu0 %v11090_v5  ;;  %v2929_v28 = vpop.f32.mrf.mxu1  ;;  %9727 = vmatpush3.bf16.msra.mxu1 %v10527_v40 }
 0x60f   :  { %v2950_v31 = vpack.c.bf16 %v2928_v61, %v2925_v1  ;;  %3385 = vmatprep.subr.bf16.mxu0 %v13863_v36  ;;  %9728 = vmatprep.subr.bf16.mxu1 %v13853_v11 }
 0x610   :  { %v2932_v33 = vpop.f32.mrf.mxu1 }
 0x611   :  { %9715 = vmatmul.mubr.msk.bf16.gmra.mxu0 %vm1370_vm4, %v2950_v31  ;;  %v2933_v8 = vadd.f32 %v12203_v18, %v2932_v33  ;;  %v10493_v18 = vld [vmem:[%s13849_s25 + $0x418] ss:$16 sps:$4 sm:$0xff]  }
 0x612   :  { %3386 = vmatpush2.bf16.msra.mxu0 %v13871_v25  ;;  %v2934_v14 = vpop.f32.mrf.mxu1  ;;  %9718 = vmatprep.mubr.msk.bf16.mxu0 %vm10755_vm0, %v13853_v11 }
 0x613   :  { %9090 = vmatprep.subr.bf16.mxu0 %v13872_v15 }
 0x614   :  { %v2935_v4 = vpop.f32.mrf.mxu1 }
 0x615   :  { %v2936_v2 = vadd.f32 %v9007_v49, %v2935_v4 }
 0x616   :  { %v2937_v30 = vpop.f32.mrf.mxu1 }
 0x617   :  { %v2951_v12 = vpack.c.bf16 %v2936_v2, %v2933_v8  ;;  %v10528_v2 = vld [vmem:[%s13812_s5 + $0x50] sm:$0xff]  }
 0x618   :  { %v2940_v53 = vpop.f32.mrf.mxu1  ;;  %9729 = vmatpush3.bf16.msra.mxu1 %v10528_v2  ;;  %v10534_v2 = vld [vmem:[%s13849_s25 + $0x504] ss:$16 sps:$4 sm:$0xff]  }
 0x619   :  { %9719 = vmatmul.mubr.msk.bf16.gmra.mxu0 %vm1370_vm4, %v2951_v12  ;;  %v2941_v37 = vadd.f32 %v12209_v59, %v2940_v53  ;;  %v10501_v59 = vld [vmem:[%s13849_s25 + $0x438] ss:$16 sps:$4 sm:$0xff]   ;;  %3852 = vmatprep.subr.bf16.mxu1 %v13863_v36 }
 0x61a   :  { %v2942_v44 = vpop.f32.mrf.mxu1  ;;  %9722 = vmatprep.mubr.msk.bf16.mxu0 %vm10755_vm0, %v13853_v11 }
 0x61b   :  { %v2952_v24 = vpack.c.bf16 %v2941_v37, %v2941_v37 }
 0x61c   :  { %v2943_v39 = vpop.f32.mrf.mxu1 }
 0x61e   :  { %v2944_v7 = vpop.f32.mrf.mxu1 }
 0x620   :  { %v9039_v1 = vpop.f32.mrf.mxu1 }
 0x621   :  { %9723 = vmatmul.mubr.msk.bf16.gmra.mxu0 %vm1370_vm4, %v2952_v24 }
 0x622   :  { %8162 = vmatprep.mubr.msk.bf16.mxu0 %vm782_vm2, %v10495_v35  ;;  %v9040_v61 = vpop.f32.mrf.mxu1 }
 0x623   :  { %v12413_v28 = vadd.f32 %v9040_v61, %v9039_v1 }
 0x624   :  { %v12415_v31 = vpop.f32.mrf.mxu1 }
 0x626   :  { %v12417_v33 = vpop.f32.mrf.mxu1 }
 0x628   :  { %v9045_v14 = vpop.f32.mrf.mxu1 }
 0x629   :  { %3388 = vmatmul.mubr.bf16.vlgmr.msra.gmra.mxu0 %v10493_v18 }
 0x62a   :  { %9091 = vmatpush3.bf16.msra.mxu0 %v11055_v42  ;;  %8163 = vmatprep.mubr.msk.bf16.mxu0 %vm782_vm2, %v10499_v43  ;;  %v9046_v49 = vpop.f32.mrf.mxu1 }
 0x62b   :  { %9092 = vmatprep.subr.bf16.mxu0 %v11076_v45  ;;  %v12419_v4 = vadd.f32 %v9046_v49, %v9045_v14  ;;  %v10531_v14 = vld [vmem:[%s13849_s25 + $0x4e4] ss:$16 sps:$4 sm:$0xff]   ;;  %v10529_v49 = vld [vmem:[%s13849_s25 + $0x4e0] ss:$16 sps:$4 sm:$0xff]  }
 0x62c   :  { %v12421_v8 = vpop.f32.mrf.mxu1 }
 0x62e   :  { %9093 = vmatpush3.bf16.msra.mxu0 %v11051_v32  ;;  %v12426_v30 = vpop.f32.mrf.mxu1 }
 0x62f   :  { %9094 = vmatprep.subr.bf16.mxu0 %v11086_v56 }
 0x631   :  { %3396 = vmatmul.mubr.bf16.gmra.mxu0 %v10501_v59 }
 0x632   :  { %9095 = vmatpush3.bf16.msra.mxu0 %v11047_v22  ;;  %8164 = vmatprep.mubr.msk.bf16.mxu0 %vm782_vm2, %v10505_v55 }
 0x633   :  { %9096 = vmatprep.subr.bf16.mxu0 %v11094_v9 }
 0x636   :  { %9097 = vmatpush3.bf16.msra.mxu0 %v11043_v13 }
 0x637   :  { %9098 = vmatprep.subr.bf16.mxu0 %v11102_v17 }
 0x639   :  { %3404 = vmatmul.mubr.bf16.gmra.mxu0 %v10507_v46 }
 0x63a   :  { %9099 = vmatpush3.bf16.msra.mxu0 %v11036_v3  ;;  %8165 = vmatprep.mubr.msk.bf16.mxu0 %vm782_vm2, %v10511_v26 }
 0x63b   :  { %9100 = vmatprep.subr.bf16.mxu0 %v11110_v23 }
 0x63c   :  { %v9051_v12 = vpop.f32.mrf.mxu1 }
 0x63e   :  { %9101 = vmatpush3.bf16.msra.mxu0 %v11032_v57  ;;  %v9052_v53 = vpop.f32.mrf.mxu1 }
 0x63f   :  { %9102 = vmatprep.subr.bf16.mxu0 %v11065_v62  ;;  %v12429_v44 = vadd.f32 %v9052_v53, %v9051_v12  ;;  %v10532_v12 = vld [vmem:[%s13849_s25 + $0x500] ss:$16 sps:$4 sm:$0xff]   ;;  %v10540_v53 = vld [vmem:[%s13849_s25 + $0x524] ss:$16 sps:$4 sm:$0xff]  }
 0x640   :  { %v12431_v37 = vpop.f32.mrf.mxu1 }
 0x641   :  { %3412 = vmatmul.mubr.bf16.gmra.mxu0 %v10513_v60 }
 0x642   :  { %9103 = vmatpush3.bf16.msra.mxu0 %v13897_v29  ;;  %8166 = vmatprep.mubr.msk.bf16.mxu0 %vm782_vm2, %v10517_v54  ;;  %v12433_v39 = vpop.f32.mrf.mxu1 }
 0x643   :  { %9104 = vmatprep.subr.bf16.mxu0 %v13898_v48 }
 0x646   :  { %9105 = vmatpush3.bf16.msra.mxu0 %v13899_v52 }
 0x647   :  { %9758 = vmatprep.subr.bf16.mxu0 %v13853_v11 }
 0x649   :  { %3420 = vmatmul.mubr.bf16.gmra.mxu0 %v10519_v51 }
 0x64a   :  { %8167 = vmatprep.mubr.msk.bf16.mxu0 %vm782_vm2, %v10520_v6 }
 0x64f   :  { %v9057_v7 = vpop.f32.mrf.mxu1 }
 0x651   :  { %3428 = vmatmul.mubr.bf16.gmra.mxu0 %v10522_v16  ;;  %v9058_v35 = vpop.f32.mrf.mxu1 }
 0x652   :  { %8168 = vmatprep.mubr.msk.bf16.mxu0 %vm782_vm2, %v8161_v47  ;;  %v12435_v24 = vadd.f32 %v9058_v35, %v9057_v7  ;;  %v10538_v7 = vld [vmem:[%s13849_s25 + $0x520] ss:$16 sps:$4 sm:$0xff]  }
 0x653   :  { %v12437_v18 = vpop.f32.mrf.mxu1 }
 0x655   :  { %v12439_v43 = vpop.f32.mrf.mxu1 }
 0x659   :  { %3436 = vmatmul.mubr.bf16.gmra.mxu0 %v8160_v0 }
 0x65a   :  { %3796 = vmatprep.mubr.bf16.mxu0 %v10531_v14  ;;  %v10544_v14 = vld [vmem:[%s13849_s25 + $0x540] ss:$16 sps:$4 sm:$0xff]  }
 0x661   :  { %3797 = vmatmul.mubr.bf16.vlgmr.msra.gmra.mxu0 %v10529_v49 }
 0x662   :  { %3804 = vmatprep.mubr.bf16.mxu0 %v10534_v2  ;;  %v13921_v2 = vld [vmem:[#allocation15_spill] sm:$0xff] }
 0x669   :  { %3805 = vmatmul.mubr.bf16.gmra.mxu0 %v10532_v12 }
 0x66a   :  { %3812 = vmatprep.mubr.bf16.mxu0 %v10540_v53 }
 0x671   :  { %3813 = vmatmul.mubr.bf16.gmra.mxu0 %v10538_v7 }
 0x676   :  { %v9063_v59 = vpop.f32.mrf.mxu1 }
 0x678   :  { %v9064_v55 = vpop.f32.mrf.mxu1 }
 0x679   :  { %v12441_v46 = vadd.f32 %v9064_v55, %v9063_v59  ;;  %v13918_v59 = vld [vmem:[#allocation14_spill] sm:$0xff] }
 0x67a   :  { %v12443_v26 = vpop.f32.mrf.mxu1 }
 0x67c   :  { %v12445_v60 = vpop.f32.mrf.mxu1 }
 0x680   :  { %v9069_v54 = vpop.f32.mrf.mxu1 }
 0x682   :  { %v9070_v51 = vpop.f32.mrf.mxu1 }
 0x683   :  { %v12447_v6 = vadd.f32 %v9070_v51, %v9069_v54 }
 0x684   :  { %v12449_v27 = vpop.f32.mrf.mxu1 }
 0x686   :  { %v12451_v16 = vpop.f32.mrf.mxu1 }
 0x68b   :  { %v9075_v47 = vpop.f32.mrf.mxu1 }
 0x68d   :  { %v9076_v0 = vpop.f32.mrf.mxu1 }
 0x68e   :  { %v12453_v40 = vadd.f32 %v9076_v0, %v9075_v47  ;;  %v13919_v47 = vld [vmem:[#allocation23_spill] sm:$0xff] }
 0x68f   :  { %v9078_v1 = vpop.f32.mrf.mxu1 }
 0x690   :  { %v10546_v1 = vld [vmem:[%s13849_s25 + $0x544] ss:$16 sps:$4 sm:$0xff]  }
 0x691   :  { %v9079_v61 = vpop.f32.mrf.mxu1  ;;  %3820 = vmatprep.mubr.bf16.mxu0 %v10546_v1 }
 0x692   :  { %3821 = vmatmul.mubr.bf16.gmra.mxu0 %v10544_v14 }
 0x6b1   :  { %v3025_v35 = vpop.f32.mrf.mxu0 }
 0x6b2   :  { %v12474_v55 = vadd.f32 %v3025_v35, %v13918_v59  ;;  %v13923_v35 = vld [vmem:[#allocation24_spill] sm:$0xff] }
 0x6b3   :  { %v9700_v54 = vpop.f32.mrf.mxu0 }
 0x6b4   :  { %v10552_v54 = vld [vmem:[%s13849_s25 + $0x564] ss:$16 sps:$4 sm:$0xff]  }
 0x6b5   :  { %v3028_v51 = vpop.f32.mrf.mxu0  ;;  %3828 = vmatprep.mubr.bf16.mxu0 %v10552_v54 }
 0x6b6   :  { %v12477_v0 = vadd.f32 %v3028_v51, %v13919_v47  ;;  %v10550_v47 = vld [vmem:[%s13849_s25 + $0x560] ss:$16 sps:$4 sm:$0xff]  }
 0x6b7   :  { %v9701_v61 = vpop.f32.mrf.mxu0  ;;  %3829 = vmatmul.mubr.bf16.gmra.mxu0 %v10550_v47 }
 0x6b8   :  { %13920 = vst [vmem:[#allocation7_spill] sm:$0xff] %v12477_v0  ;;  %v13925_v61 = vld [vmem:[#allocation16_spill] sm:$0xff] }
 0x6b9   :  { %v3033_v49 = vpop.f32.mrf.mxu0 }
 0x6ba   :  { %v12486_v12 = vadd.f32 %v3033_v49, %v13921_v2 }
 0x6bb   :  { %v9704_v53 = vpop.f32.mrf.mxu0 }
 0x6bc   :  { %13922 = vst [vmem:[#allocation8_spill] sm:$0xff] %v12486_v12  ;;  %v13927_v53 = vld [vmem:[#allocation25_spill] sm:$0xff] }
 0x6bd   :  { %v3036_v7 = vpop.f32.mrf.mxu0 }
 0x6be   :  { %v12489_v59 = vadd.f32 %v3036_v7, %v13923_v35  ;;  %v10558_v35 = vld [vmem:[%s13849_s25 + $0x584] ss:$16 sps:$4 sm:$0xff]  }
 0x6bf   :  { %v9705_v51 = vpop.f32.mrf.mxu0  ;;  %3836 = vmatprep.mubr.bf16.mxu0 %v10558_v35 }
 0x6c0   :  { %13924 = vst [vmem:[#allocation6_spill] sm:$0xff] %v12489_v59  ;;  %v10556_v59 = vld [vmem:[%s13849_s25 + $0x580] ss:$16 sps:$4 sm:$0xff]  }
 0x6c1   :  { %v3041_v1 = vpop.f32.mrf.mxu0  ;;  %3837 = vmatmul.mubr.bf16.gmra.mxu0 %v10556_v59 }
 0x6c2   :  { %v12498_v14 = vadd.f32 %v3041_v1, %v13925_v61 }
 0x6c3   :  { %v9708_v49 = vpop.f32.mrf.mxu0 }
 0x6c4   :  { %13926 = vst [vmem:[#allocation10_spill] sm:$0xff] %v12498_v14  ;;  %v13930_v49 = vld [vmem:[#allocation17_spill] sm:$0xff]  ;;  %v13932_v14 = vld [vmem:[#allocation26_spill] sm:$0xff] }
 0x6c5   :  { %v3044_v2 = vpop.f32.mrf.mxu0 }
 0x6c6   :  { %v12501_v7 = vadd.f32 %v3044_v2, %v13927_v53 }
 0x6c7   :  { %v9709_v51 = vpop.f32.mrf.mxu0 }
 0x6c8   :  { %13928 = vst [vmem:[#allocation9_spill] sm:$0xff] %v12501_v7  ;;  %v8206_v51 = vld [vmem:[%s13849_s25 + $0x5a0] sm:$0x11] }
 0x6c9   :  { %v3049_v54 = vpop.f32.mrf.mxu0  ;;  %v8232_v35 = vcombine.low %v8206_v51, %v8206_v51  ;;  %v8233_v0 = vcombine.high %v8206_v51, %v8206_v51 }
 0x6ca   :  { %v12510_v47 = vadd.f32 %v3049_v54, %v12266_v41  ;;  %v13934_v54 = vld [vmem:[#allocation18_spill] sm:$0xff] }
 0x6cb   :  { %v9712_v1 = vpop.f32.mrf.mxu0  ;;  %3844 = vmatprep.mubr.bf16.mxu0 %v8233_v0 }
 0x6cc   :  { %13929 = vst [vmem:[#allocation11_spill] sm:$0xff] %v12510_v47  ;;  %3845 = vmatmul.mubr.bf16.gmra.mxu0 %v8232_v35 }
 0x6cd   :  { %v3052_v61 = vpop.f32.mrf.mxu0  ;;  %9762 = vmatprep.mubr.msk.bf16.mxu0 %vm10755_vm0, %v13853_v11 }
 0x6ce   :  { %v12513_v2 = vadd.f32 %v3052_v61, %v13930_v49 }
 0x6cf   :  { %v9713_v53 = vpop.f32.mrf.mxu0 }
 0x6d0   :  { %13931 = vst [vmem:[#allocation20_spill] sm:$0xff] %v12513_v2  ;;  %v13936_v53 = vld [vmem:[#allocation19_spill] sm:$0xff] }
 0x6d1   :  { %v3057_v7 = vpop.f32.mrf.mxu0 }
 0x6d2   :  { %v12519_v12 = vadd.f32 %v3057_v7, %v13932_v14 }
 0x6d3   :  { %v9716_v59 = vpop.f32.mrf.mxu0 }
 0x6d4   :  { %13933 = vst [vmem:[#allocation12_spill] sm:$0xff] %v12519_v12 }
 0x6d5   :  { %v3060_v41 = vpop.f32.mrf.mxu0 }
 0x6d6   :  { %v12522_v1 = vadd.f32 %v3060_v41, %v13934_v54 }
 0x6d7   :  { %v9717_v61 = vpop.f32.mrf.mxu0 }
 0x6d8   :  { %13935 = vst [vmem:[#allocation21_spill] sm:$0xff] %v12522_v1  ;;  %v9044_v61 = vadd.f32 %v12417_v33, %v12415_v31 }
 0x6d9   :  { %v3065_v49 = vpop.f32.mrf.mxu0 }
 0x6da   :  { %v12527_v2 = vadd.f32 %v3065_v49, %v13936_v53 }
 0x6db   :  { %v9720_v47 = vpop.f32.mrf.mxu0 }
 0x6dc   :  { %13937 = vst [vmem:[#allocation13_spill] sm:$0xff] %v12527_v2 }
 0x6dd   :  { %v3068_v14 = vpop.f32.mrf.mxu0 }
 0x6de   :  { %v12530_v7 = vadd.f32 %v3068_v14, %v12286_v34 }
 0x6df   :  { %v9721_v51 = vpop.f32.mrf.mxu0 }
 0x6e1   :  { %v3073_v0 = vpop.f32.mrf.mxu0 }
 0x6e2   :  { %v12533_v35 = vadd.f32 %v3073_v0, %v12289_v10 }
 0x6e3   :  { %v9724_v59 = vpop.f32.mrf.mxu0 }
 0x6e5   :  { %v3076_v41 = vpop.f32.mrf.mxu0 }
 0x6e7   :  { %v9725_v54 = vpop.f32.mrf.mxu0 }
 0x6e9   :  { %v3389_v1 = vpop.f32.mrf.mxu0 }
 0x6ea   :  { %v3390_v47 = vadd.f32 %v12413_v28, %v3389_v1 }
 0x6eb   :  { %v3391_v12 = vpop.f32.mrf.mxu0 }
 0x6ec   :  { %v9050_v12 = vadd.f32 %v12426_v30, %v12421_v8  ;;  %v9056_v8 = vadd.f32 %v12433_v39, %v12431_v37  ;;  %v9062_v37 = vadd.f32 %v12439_v43, %v12437_v18  ;;  %v9068_v18 = vadd.f32 %v12445_v60, %v12443_v26 }
 0x6ed   :  { %v3392_v49 = vpop.f32.mrf.mxu0  ;;  %v9074_v26 = vadd.f32 %v12451_v16, %v12449_v27  ;;  %v10537_v27 = vld [vmem:[%s13849_s25 + $0x4ec] ss:$16 sps:$4 sm:$0xff]  }
 0x6ee   :  { %v3393_v53 = vadd.f32 %v9044_v61, %v3392_v49 }
 0x6ef   :  { %v3394_v2 = vpop.f32.mrf.mxu0 }
 0x6f0   :  { %v3443_v34 = vpack.c.bf16 %v3393_v53, %v3390_v47 }
 0x6f1   :  { %v3397_v14 = vpop.f32.mrf.mxu0 }
 0x6f2   :  { %9731 = vmatmul.mubr.msk.bf16.vlgmr.msra.gmra.mxu1 %vm1370_vm4, %v3443_v34  ;;  %v3398_v28 = vadd.f32 %v12419_v4, %v3397_v14 }
 0x6f3   :  { %3853 = vmatpush1.bf16.msra.mxu1 %v11158_v20  ;;  %v3399_v10 = vpop.f32.mrf.mxu0  ;;  %9734 = vmatprep.mubr.msk.bf16.mxu1 %vm10755_vm0, %v13853_v11 }
 0x6f4   :  { %3854 = vmatprep.subr.bf16.mxu1 %v13863_v36 }
 0x6f5   :  { %v3400_v31 = vpop.f32.mrf.mxu0 }
 0x6f6   :  { %v3401_v33 = vadd.f32 %v9050_v12, %v3400_v31 }
 0x6f7   :  { %3855 = vmatpush1.bf16.msra.mxu1 %v11167_v38  ;;  %v3402_v2 = vpop.f32.mrf.mxu0 }
 0x6f8   :  { %v3444_v1 = vpack.c.bf16 %v3401_v33, %v3398_v28  ;;  %3856 = vmatprep.subr.bf16.mxu1 %v13863_v36 }
 0x6f9   :  { %v3405_v51 = vpop.f32.mrf.mxu0 }
 0x6fa   :  { %9735 = vmatmul.mubr.msk.bf16.gmra.mxu1 %vm1370_vm4, %v3444_v1  ;;  %v3406_v30 = vadd.f32 %v12429_v44, %v3405_v51 }
 0x6fb   :  { %3857 = vmatpush1.bf16.msra.mxu1 %v11180_v50  ;;  %v3407_v0 = vpop.f32.mrf.mxu0  ;;  %9738 = vmatprep.mubr.msk.bf16.mxu1 %vm10755_vm0, %v13853_v11 }
 0x6fc   :  { %3858 = vmatprep.subr.bf16.mxu1 %v13863_v36 }
 0x6fd   :  { %v3408_v4 = vpop.f32.mrf.mxu0 }
 0x6fe   :  { %v3409_v59 = vadd.f32 %v9056_v8, %v3408_v4 }
 0x6ff   :  { %3859 = vmatpush1.bf16.msra.mxu1 %v11188_v58  ;;  %v3410_v41 = vpop.f32.mrf.mxu0 }
 0x700   :  { %v3445_v54 = vpack.c.bf16 %v3409_v59, %v3406_v30  ;;  %3860 = vmatprep.subr.bf16.mxu1 %v13863_v36 }
 0x701   :  { %v3413_v61 = vpop.f32.mrf.mxu0 }
 0x702   :  { %9739 = vmatmul.mubr.msk.bf16.gmra.mxu1 %vm1370_vm4, %v3445_v54  ;;  %v3414_v39 = vadd.f32 %v12435_v24, %v3413_v61  ;;  %v10541_v54 = vld [vmem:[%s13849_s25 + $0x50c] ss:$16 sps:$4 sm:$0xff]  }
 0x703   :  { %3861 = vmatpush1.bf16.msra.mxu1 %v11194_v63  ;;  %v3415_v49 = vpop.f32.mrf.mxu0  ;;  %9742 = vmatprep.mubr.msk.bf16.mxu1 %vm10755_vm0, %v13853_v11  ;;  %v10547_v61 = vld [vmem:[%s13849_s25 + $0x52c] ss:$16 sps:$4 sm:$0xff]  }
 0x704   :  { %3862 = vmatprep.subr.bf16.mxu1 %v13863_v36  ;;  %v10549_v49 = vld [vmem:[%s13849_s25 + $0x528] ss:$16 sps:$4 sm:$0xff]  }
 0x705   :  { %v3416_v44 = vpop.f32.mrf.mxu0 }
 0x706   :  { %v3417_v47 = vadd.f32 %v9062_v37, %v3416_v44  ;;  %v10553_v37 = vld [vmem:[%s13849_s25 + $0x54c] ss:$16 sps:$4 sm:$0xff]   ;;  %v10555_v44 = vld [vmem:[%s13849_s25 + $0x548] ss:$16 sps:$4 sm:$0xff]  }
 0x707   :  { %3863 = vmatpush1.bf16.msra.mxu1 %v11202_v19  ;;  %v3418_v53 = vpop.f32.mrf.mxu0 }
 0x708   :  { %v3446_v34 = vpack.c.bf16 %v3417_v47, %v3414_v39  ;;  %3864 = vmatprep.subr.bf16.mxu1 %v13863_v36  ;;  %v10559_v39 = vld [vmem:[%s13849_s25 + $0x56c] ss:$16 sps:$4 sm:$0xff]   ;;  %v10561_v47 = vld [vmem:[%s13849_s25 + $0x568] ss:$16 sps:$4 sm:$0xff]  }
 0x709   :  { %v3421_v14 = vpop.f32.mrf.mxu0  ;;  %v10562_v53 = vld [vmem:[%s13849_s25 + $0x58c] ss:$16 sps:$4 sm:$0xff]  }
 0x70a   :  { %9743 = vmatmul.mubr.msk.bf16.gmra.mxu1 %vm1370_vm4, %v3446_v34  ;;  %v3422_v43 = vadd.f32 %v12441_v46, %v3421_v14  ;;  %v8207_v34 = vld [vmem:[%s13849_s25 + $0x5a8] sm:$0x11] }
 0x70b   :  { %3865 = vmatpush1.bf16.msra.mxu1 %v11107_v21  ;;  %v3423_v10 = vpop.f32.mrf.mxu0  ;;  %9746 = vmatprep.mubr.msk.bf16.mxu1 %vm10755_vm0, %v13853_v11  ;;  %v10564_v14 = vld [vmem:[%s13849_s25 + $0x588] ss:$16 sps:$4 sm:$0xff]  }
 0x70c   :  { %3866 = vmatprep.subr.bf16.mxu1 %v13863_v36  ;;  %v8235_v10 = vcombine.high %v8207_v34, %v8207_v34 }
 0x70d   :  { %v3424_v24 = vpop.f32.mrf.mxu0 }
 0x70e   :  { %v3425_v12 = vadd.f32 %v9068_v18, %v3424_v24  ;;  %v8234_v18 = vcombine.low %v8207_v34, %v8207_v34  ;;  %v10569_v24 = vld [vmem:[%s13812_s5 + $0x68] sm:$0xff]  }
 0x70f   :  { %3867 = vmatpush1.bf16.msra.mxu1 %v11090_v5  ;;  %v3426_v31 = vpop.f32.mrf.mxu0  ;;  %9759 = vmatpush3.bf16.msra.mxu0 %v10569_v24 }
 0x710   :  { %v3447_v28 = vpack.c.bf16 %v3425_v12, %v3422_v43  ;;  %3882 = vmatprep.subr.bf16.mxu1 %v13863_v36  ;;  %9760 = vmatprep.subr.bf16.mxu0 %v13853_v11 }
 0x711   :  { %v3429_v33 = vpop.f32.mrf.mxu0 }
 0x712   :  { %9747 = vmatmul.mubr.msk.bf16.gmra.mxu1 %vm1370_vm4, %v3447_v28  ;;  %v3430_v60 = vadd.f32 %v12447_v6, %v3429_v33  ;;  %v10535_v6 = vld [vmem:[%s13849_s25 + $0x4e8] ss:$16 sps:$4 sm:$0xff]  }
 0x713   :  { %3883 = vmatpush2.bf16.msra.mxu1 %v13871_v25  ;;  %v3431_v2 = vpop.f32.mrf.mxu0  ;;  %9750 = vmatprep.mubr.msk.bf16.mxu1 %vm10755_vm0, %v13853_v11 }
 0x714   :  { %9157 = vmatprep.subr.bf16.mxu1 %v13872_v15 }
 0x715   :  { %v3432_v46 = vpop.f32.mrf.mxu0 }
 0x716   :  { %v3433_v1 = vadd.f32 %v9074_v26, %v3432_v46 }
 0x717   :  { %v3434_v51 = vpop.f32.mrf.mxu0 }
 0x718   :  { %v3448_v0 = vpack.c.bf16 %v3433_v1, %v3430_v60  ;;  %v10570_v1 = vld [vmem:[%s13812_s5 + $0x60] sm:$0xff]  }
 0x719   :  { %v3437_v8 = vpop.f32.mrf.mxu0  ;;  %9761 = vmatpush3.bf16.msra.mxu0 %v10570_v1  ;;  %v10576_v1 = vld [vmem:[%s13849_s25 + $0x5d4] ss:$16 sps:$4 sm:$0xff]  }
 0x71a   :  { %9751 = vmatmul.mubr.msk.bf16.gmra.mxu1 %vm1370_vm4, %v3448_v0  ;;  %v3438_v30 = vadd.f32 %v12453_v40, %v3437_v8  ;;  %v10543_v40 = vld [vmem:[%s13849_s25 + $0x508] ss:$16 sps:$4 sm:$0xff]   ;;  %4349 = vmatprep.subr.bf16.mxu0 %v13863_v36 }
 0x71b   :  { %v3439_v4 = vpop.f32.mrf.mxu0  ;;  %9754 = vmatprep.mubr.msk.bf16.mxu1 %vm10755_vm0, %v13853_v11 }
 0x71c   :  { %v3449_v16 = vpack.c.bf16 %v3438_v30, %v3438_v30 }
 0x71d   :  { %v3440_v59 = vpop.f32.mrf.mxu0 }
 0x71f   :  { %v3441_v41 = vpop.f32.mrf.mxu0 }
 0x721   :  { %v9106_v43 = vpop.f32.mrf.mxu0 }
 0x722   :  { %9755 = vmatmul.mubr.msk.bf16.gmra.mxu1 %vm1370_vm4, %v3449_v16 }
 0x723   :  { %8236 = vmatprep.mubr.msk.bf16.mxu1 %vm782_vm2, %v10537_v27  ;;  %v9107_v12 = vpop.f32.mrf.mxu0 }
 0x724   :  { %v12657_v31 = vadd.f32 %v9107_v12, %v9106_v43 }
 0x725   :  { %v12659_v28 = vpop.f32.mrf.mxu0 }
 0x727   :  { %v12661_v33 = vpop.f32.mrf.mxu0 }
 0x729   :  { %v9112_v2 = vpop.f32.mrf.mxu0 }
 0x72a   :  { %3885 = vmatmul.mubr.bf16.vlgmr.msra.gmra.mxu1 %v10535_v6 }
 0x72b   :  { %9158 = vmatpush3.bf16.msra.mxu1 %v11055_v42  ;;  %8237 = vmatprep.mubr.msk.bf16.mxu1 %vm782_vm2, %v10541_v54  ;;  %v9113_v26 = vpop.f32.mrf.mxu0 }
 0x72c   :  { %9159 = vmatprep.subr.bf16.mxu1 %v11076_v45  ;;  %v12663_v46 = vadd.f32 %v9113_v26, %v9112_v2  ;;  %v10573_v2 = vld [vmem:[%s13849_s25 + $0x5b4] ss:$16 sps:$4 sm:$0xff]   ;;  %v10571_v26 = vld [vmem:[%s13849_s25 + $0x5b0] ss:$16 sps:$4 sm:$0xff]  }
 0x72d   :  { %v12665_v60 = vpop.f32.mrf.mxu0 }
 0x72f   :  { %9160 = vmatpush3.bf16.msra.mxu1 %v11051_v32  ;;  %v12670_v51 = vpop.f32.mrf.mxu0 }
 0x730   :  { %9161 = vmatprep.subr.bf16.mxu1 %v11086_v56 }
 0x731   :  { %v9118_v0 = vpop.f32.mrf.mxu0 }
 0x732   :  { %3893 = vmatmul.mubr.bf16.gmra.mxu1 %v10543_v40 }
 0x733   :  { %9162 = vmatpush3.bf16.msra.mxu1 %v11047_v22  ;;  %8238 = vmatprep.mubr.msk.bf16.mxu1 %vm782_vm2, %v10547_v61  ;;  %v9119_v8 = vpop.f32.mrf.mxu0 }
 0x734   :  { %9163 = vmatprep.subr.bf16.mxu1 %v11094_v9  ;;  %v12673_v4 = vadd.f32 %v9119_v8, %v9118_v0  ;;  %v10574_v0 = vld [vmem:[%s13849_s25 + $0x5d0] ss:$16 sps:$4 sm:$0xff]   ;;  %v10582_v8 = vld [vmem:[%s13849_s25 + $0x5f4] ss:$16 sps:$4 sm:$0xff]  }
 0x735   :  { %v12675_v30 = vpop.f32.mrf.mxu0 }
 0x737   :  { %9164 = vmatpush3.bf16.msra.mxu1 %v11043_v13  ;;  %v12677_v59 = vpop.f32.mrf.mxu0 }
 0x738   :  { %9165 = vmatprep.subr.bf16.mxu1 %v11102_v17 }
 0x73a   :  { %3901 = vmatmul.mubr.bf16.gmra.mxu1 %v10549_v49 }
 0x73b   :  { %9166 = vmatpush3.bf16.msra.mxu1 %v11036_v3  ;;  %8239 = vmatprep.mubr.msk.bf16.mxu1 %vm782_vm2, %v10553_v37 }
 0x73c   :  { %9167 = vmatprep.subr.bf16.mxu1 %v11110_v23 }
 0x73f   :  { %9168 = vmatpush3.bf16.msra.mxu1 %v11032_v57 }
 0x740   :  { %9169 = vmatprep.subr.bf16.mxu1 %v11065_v62 }
 0x742   :  { %3909 = vmatmul.mubr.bf16.gmra.mxu1 %v10555_v44 }
 0x743   :  { %9170 = vmatpush3.bf16.msra.mxu1 %v13897_v29  ;;  %8240 = vmatprep.mubr.msk.bf16.mxu1 %vm782_vm2, %v10559_v39 }
 0x744   :  { %9171 = vmatprep.subr.bf16.mxu1 %v13898_v48 }
 0x747   :  { %9172 = vmatpush3.bf16.msra.mxu1 %v13899_v52 }
 0x748   :  { %9790 = vmatprep.subr.bf16.mxu1 %v13853_v11 }
 0x74a   :  { %3917 = vmatmul.mubr.bf16.gmra.mxu1 %v10561_v47 }
 0x74b   :  { %8241 = vmatprep.mubr.msk.bf16.mxu1 %vm782_vm2, %v10562_v53 }
 0x752   :  { %3925 = vmatmul.mubr.bf16.gmra.mxu1 %v10564_v14  ;;  %v9124_v41 = vpop.f32.mrf.mxu0 }
 0x753   :  { %8242 = vmatprep.mubr.msk.bf16.mxu1 %vm782_vm2, %v8235_v10 }
 0x754   :  { %v9125_v27 = vpop.f32.mrf.mxu0 }
 0x755   :  { %v12679_v16 = vadd.f32 %v9125_v27, %v9124_v41  ;;  %v10580_v41 = vld [vmem:[%s13849_s25 + $0x5f0] ss:$16 sps:$4 sm:$0xff]  }
 0x756   :  { %v12681_v6 = vpop.f32.mrf.mxu0 }
 0x758   :  { %v12683_v54 = vpop.f32.mrf.mxu0 }
 0x75a   :  { %3933 = vmatmul.mubr.bf16.gmra.mxu1 %v8234_v18 }
 0x75b   :  { %4293 = vmatprep.mubr.bf16.mxu1 %v10573_v2 }
 0x762   :  { %4294 = vmatmul.mubr.bf16.vlgmr.msra.gmra.mxu1 %v10571_v26  ;;  %v13940_v26 = vld [vmem:[#allocation8_spill] sm:$0xff] }
 0x763   :  { %4301 = vmatprep.mubr.bf16.mxu1 %v10576_v1 }
 0x76a   :  { %4302 = vmatmul.mubr.bf16.gmra.mxu1 %v10574_v0 }
 0x76b   :  { %4309 = vmatprep.mubr.bf16.mxu1 %v10582_v8  ;;  %v13942_v8 = vld [vmem:[#allocation6_spill] sm:$0xff] }
 0x772   :  { %4310 = vmatmul.mubr.bf16.gmra.mxu1 %v10580_v41 }
 0x777   :  { %v9130_v40 = vpop.f32.mrf.mxu0 }
 0x779   :  { %v9131_v61 = vpop.f32.mrf.mxu0 }
 0x77a   :  { %v12685_v49 = vadd.f32 %v9131_v61, %v9130_v40 }
 0x77b   :  { %v12687_v37 = vpop.f32.mrf.mxu0 }
 0x77d   :  { %v12689_v44 = vpop.f32.mrf.mxu0 }
 0x781   :  { %v9136_v39 = vpop.f32.mrf.mxu0 }
 0x783   :  { %v9137_v47 = vpop.f32.mrf.mxu0 }
 0x784   :  { %v12691_v53 = vadd.f32 %v9137_v47, %v9136_v39  ;;  %v13938_v47 = vld [vmem:[#allocation7_spill] sm:$0xff] }
 0x785   :  { %v12693_v34 = vpop.f32.mrf.mxu0 }
 0x787   :  { %v12695_v14 = vpop.f32.mrf.mxu0 }
 0x78c   :  { %v9142_v10 = vpop.f32.mrf.mxu0 }
 0x78e   :  { %v9143_v18 = vpop.f32.mrf.mxu0 }
 0x78f   :  { %v12697_v24 = vadd.f32 %v9143_v18, %v9142_v10  ;;  %v10588_v18 = vld [vmem:[%s13849_s25 + $0x614] ss:$16 sps:$4 sm:$0xff]  }
 0x790   :  { %v9145_v43 = vpop.f32.mrf.mxu0  ;;  %4317 = vmatprep.mubr.bf16.mxu1 %v10588_v18  ;;  %v13944_v18 = vld [vmem:[#allocation10_spill] sm:$0xff] }
 0x792   :  { %v9146_v12 = vpop.f32.mrf.mxu0 }
 0x793   :  { %v10586_v12 = vld [vmem:[%s13849_s25 + $0x610] ss:$16 sps:$4 sm:$0xff]  }
 0x794   :  { %4318 = vmatmul.mubr.bf16.gmra.mxu1 %v10586_v12 }
 0x7b2   :  { %v3522_v27 = vpop.f32.mrf.mxu1 }
 0x7b3   :  { %v12718_v40 = vadd.f32 %v3522_v27, %v12474_v55  ;;  %v10594_v27 = vld [vmem:[%s13849_s25 + $0x634] ss:$16 sps:$4 sm:$0xff]  }
 0x7b4   :  { %v9732_v61 = vpop.f32.mrf.mxu1  ;;  %4325 = vmatprep.mubr.bf16.mxu1 %v10594_v27 }
 0x7b6   :  { %v3525_v39 = vpop.f32.mrf.mxu1 }
 0x7b7   :  { %v12721_v10 = vadd.f32 %v3525_v39, %v13938_v47  ;;  %v10592_v39 = vld [vmem:[%s13849_s25 + $0x630] ss:$16 sps:$4 sm:$0xff]  }
 0x7b8   :  { %v9733_v43 = vpop.f32.mrf.mxu1  ;;  %4326 = vmatmul.mubr.bf16.gmra.mxu1 %v10592_v39  ;;  %v13948_v39 = vld [vmem:[#allocation11_spill] sm:$0xff] }
 0x7b9   :  { %13939 = vst [vmem:[#allocation22_spill] sm:$0xff] %v12721_v10 }
 0x7ba   :  { %v3530_v2 = vpop.f32.mrf.mxu1 }
 0x7bb   :  { %v12730_v55 = vadd.f32 %v3530_v2, %v13940_v26  ;;  %v13946_v26 = vld [vmem:[#allocation9_spill] sm:$0xff] }
 0x7bc   :  { %v9736_v1 = vpop.f32.mrf.mxu1 }
 0x7bd   :  { %13941 = vst [vmem:[#allocation14_spill] sm:$0xff] %v12730_v55 }
 0x7be   :  { %v3533_v0 = vpop.f32.mrf.mxu1 }
 0x7bf   :  { %v12733_v41 = vadd.f32 %v3533_v0, %v13942_v8  ;;  %v10600_v0 = vld [vmem:[%s13849_s25 + $0x654] ss:$16 sps:$4 sm:$0xff]  }
 0x7c0   :  { %v9737_v61 = vpop.f32.mrf.mxu1  ;;  %4333 = vmatprep.mubr.bf16.mxu1 %v10600_v0 }
 0x7c1   :  { %13943 = vst [vmem:[#allocation23_spill] sm:$0xff] %v12733_v41  ;;  %v10598_v61 = vld [vmem:[%s13849_s25 + $0x650] ss:$16 sps:$4 sm:$0xff]  }
 0x7c2   :  { %v3538_v47 = vpop.f32.mrf.mxu1  ;;  %4334 = vmatmul.mubr.bf16.gmra.mxu1 %v10598_v61  ;;  %v13952_v41 = vld [vmem:[#allocation12_spill] sm:$0xff] }
 0x7c3   :  { %v12742_v43 = vadd.f32 %v3538_v47, %v13944_v18 }
 0x7c4   :  { %v9740_v12 = vpop.f32.mrf.mxu1 }
 0x7c5   :  { %13945 = vst [vmem:[#allocation15_spill] sm:$0xff] %v12742_v43  ;;  %v13950_v43 = vld [vmem:[#allocation20_spill] sm:$0xff] }
 0x7c6   :  { %v3541_v2 = vpop.f32.mrf.mxu1 }
 0x7c7   :  { %v12745_v1 = vadd.f32 %v3541_v2, %v13946_v26 }
 0x7c8   :  { %v9741_v8 = vpop.f32.mrf.mxu1 }
 0x7c9   :  { %13947 = vst [vmem:[#allocation24_spill] sm:$0xff] %v12745_v1  ;;  %v8280_v8 = vld [vmem:[%s13849_s25 + $0x670] sm:$0x11] }
 0x7ca   :  { %v3546_v27 = vpop.f32.mrf.mxu1  ;;  %v8306_v0 = vcombine.low %v8280_v8, %v8280_v8  ;;  %v8307_v10 = vcombine.high %v8280_v8, %v8280_v8 }
 0x7cb   :  { %v12754_v47 = vadd.f32 %v3546_v27, %v13948_v39  ;;  %v13954_v39 = vld [vmem:[#allocation21_spill] sm:$0xff] }
 0x7cc   :  { %v9744_v18 = vpop.f32.mrf.mxu1  ;;  %4341 = vmatprep.mubr.bf16.mxu1 %v8307_v10 }
 0x7cd   :  { %13949 = vst [vmem:[#allocation16_spill] sm:$0xff] %v12754_v47  ;;  %4342 = vmatmul.mubr.bf16.gmra.mxu1 %v8306_v0 }
 0x7ce   :  { %v3549_v12 = vpop.f32.mrf.mxu1  ;;  %9794 = vmatprep.mubr.msk.bf16.mxu1 %vm10755_vm0, %v13853_v11 }
 0x7cf   :  { %v12757_v2 = vadd.f32 %v3549_v12, %v13950_v43 }
 0x7d0   :  { %v9745_v26 = vpop.f32.mrf.mxu1 }
 0x7d1   :  { %13951 = vst [vmem:[#allocation25_spill] sm:$0xff] %v12757_v2  ;;  %v13956_v26 = vld [vmem:[#allocation13_spill] sm:$0xff] }
 0x7d2   :  { %v3554_v1 = vpop.f32.mrf.mxu1 }
 0x7d3   :  { %v12763_v55 = vadd.f32 %v3554_v1, %v13952_v41 }
 0x7d4   :  { %v9748_v61 = vpop.f32.mrf.mxu1 }
 0x7d5   :  { %13953 = vst [vmem:[#allocation17_spill] sm:$0xff] %v12763_v55 }
 0x7d6   :  { %v3557_v27 = vpop.f32.mrf.mxu1 }
 0x7d7   :  { %v12766_v18 = vadd.f32 %v3557_v27, %v13954_v39 }
 0x7d8   :  { %v9749_v43 = vpop.f32.mrf.mxu1 }
 0x7d9   :  { %13955 = vst [vmem:[#allocation26_spill] sm:$0xff] %v12766_v18  ;;  %v9111_v43 = vadd.f32 %v12661_v33, %v12659_v28 }
 0x7da   :  { %v3562_v12 = vpop.f32.mrf.mxu1 }
 0x7db   :  { %v12771_v2 = vadd.f32 %v3562_v12, %v13956_v26 }
 0x7dc   :  { %v9752_v47 = vpop.f32.mrf.mxu1 }
 0x7dd   :  { %13957 = vst [vmem:[#allocation18_spill] sm:$0xff] %v12771_v2 }
 0x7de   :  { %v3565_v41 = vpop.f32.mrf.mxu1 }
 0x7df   :  { %v12774_v1 = vadd.f32 %v3565_v41, %v12530_v7 }
 0x7e0   :  { %v9753_v8 = vpop.f32.mrf.mxu1 }
 0x7e2   :  { %v3570_v10 = vpop.f32.mrf.mxu1 }
 0x7e3   :  { %v12777_v0 = vadd.f32 %v3570_v10, %v12533_v35 }
 0x7e4   :  { %v9756_v61 = vpop.f32.mrf.mxu1 }
 0x7e6   :  { %v3573_v27 = vpop.f32.mrf.mxu1 }
 0x7e8   :  { %v9757_v39 = vpop.f32.mrf.mxu1 }
 0x7ea   :  { %v3886_v18 = vpop.f32.mrf.mxu1 }
 0x7eb   :  { %v3887_v47 = vadd.f32 %v12657_v31, %v3886_v18 }
 0x7ec   :  { %v3888_v55 = vpop.f32.mrf.mxu1 }
 0x7ed   :  { %v9117_v55 = vadd.f32 %v12670_v51, %v12665_v60  ;;  %v9123_v60 = vadd.f32 %v12677_v59, %v12675_v30  ;;  %v9129_v30 = vadd.f32 %v12683_v54, %v12681_v6  ;;  %v9135_v6 = vadd.f32 %v12689_v44, %v12687_v37 }
 0x7ee   :  { %v3889_v12 = vpop.f32.mrf.mxu1  ;;  %v9141_v37 = vadd.f32 %v12695_v14, %v12693_v34  ;;  %v10583_v14 = vld [vmem:[%s13849_s25 + $0x5dc] ss:$16 sps:$4 sm:$0xff]  }
 0x7ef   :  { %v3890_v26 = vadd.f32 %v9111_v43, %v3889_v12 }
 0x7f0   :  { %v3891_v2 = vpop.f32.mrf.mxu1 }
 0x7f1   :  { %v3940_v7 = vpack.c.bf16 %v3890_v26, %v3887_v47 }
 0x7f2   :  { %v3894_v41 = vpop.f32.mrf.mxu1 }
 0x7f3   :  { %9763 = vmatmul.mubr.msk.bf16.vlgmr.msra.gmra.mxu0 %vm1370_vm4, %v3940_v7  ;;  %v3895_v31 = vadd.f32 %v12663_v46, %v3894_v41 }
 0x7f4   :  { %4350 = vmatpush1.bf16.msra.mxu0 %v11158_v20  ;;  %v3896_v35 = vpop.f32.mrf.mxu1  ;;  %9766 = vmatprep.mubr.msk.bf16.mxu0 %vm10755_vm0, %v13853_v11 }
 0x7f5   :  { %4351 = vmatprep.subr.bf16.mxu0 %v13863_v36 }
 0x7f6   :  { %v3897_v28 = vpop.f32.mrf.mxu1 }
 0x7f7   :  { %v3898_v33 = vadd.f32 %v9117_v55, %v3897_v28 }
 0x7f8   :  { %4352 = vmatpush1.bf16.msra.mxu0 %v11167_v38  ;;  %v3899_v2 = vpop.f32.mrf.mxu1 }
 0x7f9   :  { %v3941_v18 = vpack.c.bf16 %v3898_v33, %v3895_v31  ;;  %4353 = vmatprep.subr.bf16.mxu0 %v13863_v36 }
 0x7fa   :  { %v3902_v8 = vpop.f32.mrf.mxu1 }
 0x7fb   :  { %9767 = vmatmul.mubr.msk.bf16.gmra.mxu0 %vm1370_vm4, %v3941_v18  ;;  %v3903_v51 = vadd.f32 %v12673_v4, %v3902_v8 }
 0x7fc   :  { %4354 = vmatpush1.bf16.msra.mxu0 %v11180_v50  ;;  %v3904_v10 = vpop.f32.mrf.mxu1  ;;  %9770 = vmatprep.mubr.msk.bf16.mxu0 %vm10755_vm0, %v13853_v11 }
 0x7fd   :  { %4355 = vmatprep.subr.bf16.mxu0 %v13863_v36 }
 0x7fe   :  { %v3905_v46 = vpop.f32.mrf.mxu1 }
 0x7ff   :  { %v3906_v61 = vadd.f32 %v9123_v60, %v3905_v46 }
 0x800   :  { %4356 = vmatpush1.bf16.msra.mxu0 %v11188_v58  ;;  %v3907_v27 = vpop.f32.mrf.mxu1 }
 0x801   :  { %v3942_v39 = vpack.c.bf16 %v3906_v61, %v3903_v51  ;;  %4357 = vmatprep.subr.bf16.mxu0 %v13863_v36 }
 0x802   :  { %v3910_v43 = vpop.f32.mrf.mxu1 }
 0x803   :  { %9771 = vmatmul.mubr.msk.bf16.gmra.mxu0 %vm1370_vm4, %v3942_v39  ;;  %v3911_v59 = vadd.f32 %v12679_v16, %v3910_v43  ;;  %v10589_v39 = vld [vmem:[%s13849_s25 + $0x5fc] ss:$16 sps:$4 sm:$0xff]  }
 0x804   :  { %4358 = vmatpush1.bf16.msra.mxu0 %v11194_v63  ;;  %v3912_v12 = vpop.f32.mrf.mxu1  ;;  %9774 = vmatprep.mubr.msk.bf16.mxu0 %vm10755_vm0, %v13853_v11 }
 0x805   :  { %4359 = vmatprep.subr.bf16.mxu0 %v13863_v36 }
 0x806   :  { %v3913_v4 = vpop.f32.mrf.mxu1 }
 0x807   :  { %v3914_v47 = vadd.f32 %v9129_v30, %v3913_v4 }
 0x808   :  { %4360 = vmatpush1.bf16.msra.mxu0 %v11202_v19  ;;  %v3915_v26 = vpop.f32.mrf.mxu1 }
 0x809   :  { %v3943_v7 = vpack.c.bf16 %v3914_v47, %v3911_v59  ;;  %4361 = vmatprep.subr.bf16.mxu0 %v13863_v36  ;;  %v10612_v47 = vld [vmem:[%s13812_s5 + $0x70] sm:$0xff]  }
 0x80a   :  { %v3918_v41 = vpop.f32.mrf.mxu1 }
 0x80b   :  { %9775 = vmatmul.mubr.msk.bf16.gmra.mxu0 %vm1370_vm4, %v3943_v7  ;;  %v3919_v54 = vadd.f32 %v12685_v49, %v3918_v41 }
 0x80c   :  { %4362 = vmatpush1.bf16.msra.mxu0 %v11107_v21  ;;  %v3920_v35 = vpop.f32.mrf.mxu1  ;;  %9778 = vmatprep.mubr.msk.bf16.mxu0 %vm10755_vm0, %v13853_v11 }
 0x80d   :  { %4363 = vmatprep.subr.bf16.mxu0 %v13863_v36 }
 0x80e   :  { %v3921_v16 = vpop.f32.mrf.mxu1 }
 0x80f   :  { %v3922_v55 = vadd.f32 %v9135_v6, %v3921_v16 }
 0x810   :  { %4364 = vmatpush1.bf16.msra.mxu0 %v11090_v5  ;;  %v3923_v28 = vpop.f32.mrf.mxu1 }
 0x811   :  { %v3944_v31 = vpack.c.bf16 %v3922_v55, %v3919_v54  ;;  %4379 = vmatprep.subr.bf16.mxu0 %v13863_v36 }
 0x812   :  { %v3926_v33 = vpop.f32.mrf.mxu1 }
 0x813   :  { %9779 = vmatmul.mubr.msk.bf16.gmra.mxu0 %vm1370_vm4, %v3944_v31  ;;  %v3927_v44 = vadd.f32 %v12691_v53, %v3926_v33  ;;  %v10577_v53 = vld [vmem:[%s13849_s25 + $0x5b8] ss:$16 sps:$4 sm:$0xff]  }
 0x814   :  { %4380 = vmatpush2.bf16.msra.mxu0 %v13871_v25  ;;  %v3928_v2 = vpop.f32.mrf.mxu1  ;;  %9782 = vmatprep.mubr.msk.bf16.mxu0 %vm10755_vm0, %v13853_v11 }
 0x815   :  { %9224 = vmatprep.subr.bf16.mxu0 %v13872_v15  ;;  %v10579_v15 = vld [vmem:[%s13849_s25 + $0x5bc] ss:$16 sps:$4 sm:$0xff]  }
 0x816   :  { %v3929_v49 = vpop.f32.mrf.mxu1 }
 0x817   :  { %v3930_v18 = vadd.f32 %v9141_v37, %v3929_v49 }
 0x818   :  { %v3931_v8 = vpop.f32.mrf.mxu1 }
 0x819   :  { %v3945_v10 = vpack.c.bf16 %v3930_v18, %v3927_v44 }
 0x81a   :  { %v3934_v60 = vpop.f32.mrf.mxu1 }
 0x81b   :  { %9783 = vmatmul.mubr.msk.bf16.gmra.mxu0 %vm1370_vm4, %v3945_v10  ;;  %v3935_v51 = vadd.f32 %v12697_v24, %v3934_v60  ;;  %v10585_v24 = vld [vmem:[%s13849_s25 + $0x5d8] ss:$16 sps:$4 sm:$0xff]  }
 0x81c   :  { %v3936_v46 = vpop.f32.mrf.mxu1  ;;  %9786 = vmatprep.mubr.msk.bf16.mxu0 %vm10755_vm0, %v13853_v11 }
 0x81d   :  { %v3946_v34 = vpack.c.bf16 %v3935_v51, %v3935_v51 }
 0x81e   :  { %v3937_v61 = vpop.f32.mrf.mxu1 }
 0x820   :  { %v3938_v27 = vpop.f32.mrf.mxu1 }
 0x823   :  { %9787 = vmatmul.mubr.msk.bf16.gmra.mxu0 %vm1370_vm4, %v3946_v34 }
 0x824   :  { %8310 = vmatprep.mubr.msk.bf16.mxu0 %vm782_vm2, %v10579_v15 }
 0x82b   :  { %4382 = vmatmul.mubr.bf16.vlgmr.msra.gmra.mxu0 %v10577_v53 }
 0x82c   :  { %9225 = vmatpush3.bf16.msra.mxu0 %v11055_v42  ;;  %8311 = vmatprep.mubr.msk.bf16.mxu0 %vm782_vm2, %v10583_v14  ;;  %v10591_v42 = vld [vmem:[%s13849_s25 + $0x5f8] ss:$16 sps:$4 sm:$0xff]   ;;  %v10615_v14 = vld [vmem:[%s13849_s25 + $0x684] ss:$16 sps:$4 sm:$0xff]  }
 0x82d   :  { %9226 = vmatprep.subr.bf16.mxu0 %v11076_v45  ;;  %v10606_v45 = vld [vmem:[%s13849_s25 + $0x658] ss:$16 sps:$4 sm:$0xff]  }
 0x830   :  { %9227 = vmatpush3.bf16.msra.mxu0 %v11051_v32  ;;  %v10595_v32 = vld [vmem:[%s13849_s25 + $0x61c] ss:$16 sps:$4 sm:$0xff]  }
 0x831   :  { %9228 = vmatprep.subr.bf16.mxu0 %v11086_v56 }
 0x833   :  { %4390 = vmatmul.mubr.bf16.gmra.mxu0 %v10585_v24  ;;  %v10613_v24 = vld [vmem:[%s13849_s25 + $0x680] ss:$16 sps:$4 sm:$0xff]  }
 0x834   :  { %9229 = vmatpush3.bf16.msra.mxu0 %v11047_v22  ;;  %8312 = vmatprep.mubr.msk.bf16.mxu0 %vm782_vm2, %v10589_v39  ;;  %v10597_v22 = vld [vmem:[%s13849_s25 + $0x618] ss:$16 sps:$4 sm:$0xff]   ;;  %v10618_v39 = vld [vmem:[%s13849_s25 + $0x6a4] ss:$16 sps:$4 sm:$0xff]  }
 0x835   :  { %9230 = vmatprep.subr.bf16.mxu0 %v11094_v9 }
 0x838   :  { %9231 = vmatpush3.bf16.msra.mxu0 %v11043_v13  ;;  %v10601_v13 = vld [vmem:[%s13849_s25 + $0x63c] ss:$16 sps:$4 sm:$0xff]  }
 0x839   :  { %9232 = vmatprep.subr.bf16.mxu0 %v11102_v17  ;;  %v10611_v17 = vld [vmem:[%s13812_s5 + $0x78] sm:$0xff]  }
 0x83a   :  { %9791 = vmatpush3.bf16.msra.mxu1 %v10611_v17 }
 0x83b   :  { %4398 = vmatmul.mubr.bf16.gmra.mxu0 %v10591_v42  ;;  %9792 = vmatprep.subr.bf16.mxu1 %v13853_v11  ;;  %v10616_v42 = vld [vmem:[%s13849_s25 + $0x6a0] ss:$16 sps:$4 sm:$0xff]  }
 0x83c   :  { %9233 = vmatpush3.bf16.msra.mxu0 %v11036_v3  ;;  %8313 = vmatprep.mubr.msk.bf16.mxu0 %vm782_vm2, %v10595_v32  ;;  %v10603_v3 = vld [vmem:[%s13849_s25 + $0x638] ss:$16 sps:$4 sm:$0xff]   ;;  %v10624_v32 = vld [vmem:[%s13849_s25 + $0x6c4] ss:$16 sps:$4 sm:$0xff]  }
 0x83d   :  { %9234 = vmatprep.subr.bf16.mxu0 %v11110_v23  ;;  %v9173_v23 = vpop.f32.mrf.mxu1 }
 0x83e   :  { %9793 = vmatpush3.bf16.msra.mxu1 %v10612_v47 }
 0x83f   :  { %4846 = vmatprep.subr.bf16.mxu1 %v13863_v36 }
 0x840   :  { %9235 = vmatpush3.bf16.msra.mxu0 %v11032_v57  ;;  %v10604_v57 = vld [vmem:[%s13849_s25 + $0x65c] ss:$16 sps:$4 sm:$0xff]  }
 0x841   :  { %9236 = vmatprep.subr.bf16.mxu0 %v11065_v62  ;;  %v8281_v62 = vld [vmem:[%s13849_s25 + $0x678] sm:$0x11] }
 0x842   :  { %v8309_v56 = vcombine.high %v8281_v62, %v8281_v62  ;;  %v8308_v9 = vcombine.low %v8281_v62, %v8281_v62 }
 0x843   :  { %4406 = vmatmul.mubr.bf16.gmra.mxu0 %v10597_v22  ;;  %v10622_v22 = vld [vmem:[%s13849_s25 + $0x6c0] ss:$16 sps:$4 sm:$0xff]  }
 0x844   :  { %9237 = vmatpush3.bf16.msra.mxu0 %v13897_v29  ;;  %8314 = vmatprep.mubr.msk.bf16.mxu0 %vm782_vm2, %v10601_v13  ;;  %v9174_v29 = vpop.f32.mrf.mxu1 }
 0x845   :  { %9238 = vmatprep.subr.bf16.mxu0 %v13898_v48  ;;  %v12901_v48 = vadd.f32 %v9174_v29, %v9173_v23 }
 0x848   :  { %9239 = vmatpush3.bf16.msra.mxu0 %v13899_v52  ;;  %v12903_v52 = vpop.f32.mrf.mxu1 }
 0x849   :  { %9822 = vmatprep.subr.bf16.mxu0 %v13853_v11 }
 0x84a   :  { %v12905_v43 = vpop.f32.mrf.mxu1 }
 0x84b   :  { %4414 = vmatmul.mubr.bf16.gmra.mxu0 %v10603_v3 }
 0x84c   :  { %8315 = vmatprep.mubr.msk.bf16.mxu0 %vm782_vm2, %v10604_v57  ;;  %v9179_v12 = vpop.f32.mrf.mxu1  ;;  %v10630_v57 = vld [vmem:[%s13849_s25 + $0x6e4] ss:$16 sps:$4 sm:$0xff]  }
 0x84e   :  { %v9180_v30 = vpop.f32.mrf.mxu1 }
 0x84f   :  { %v12907_v4 = vadd.f32 %v9180_v30, %v9179_v12  ;;  %v13959_v12 = vld [vmem:[#allocation14_spill] sm:$0xff] }
 0x850   :  { %v12909_v59 = vpop.f32.mrf.mxu1  ;;  %v10636_v30 = vld [vmem:[%s13849_s25 + $0x704] ss:$16 sps:$4 sm:$0xff]  }
 0x852   :  { %v12914_v26 = vpop.f32.mrf.mxu1 }
 0x853   :  { %4422 = vmatmul.mubr.bf16.gmra.mxu0 %v10606_v45 }
 0x854   :  { %8316 = vmatprep.mubr.msk.bf16.mxu0 %vm782_vm2, %v8309_v56  ;;  %v9185_v7 = vpop.f32.mrf.mxu1  ;;  %v10628_v56 = vld [vmem:[%s13849_s25 + $0x6e0] ss:$16 sps:$4 sm:$0xff]  }
 0x856   :  { %v9186_v41 = vpop.f32.mrf.mxu1 }
 0x857   :  { %v12917_v35 = vadd.f32 %v9186_v41, %v9185_v7  ;;  %v10634_v41 = vld [vmem:[%s13849_s25 + $0x700] ss:$16 sps:$4 sm:$0xff]  }
 0x858   :  { %v12919_v6 = vpop.f32.mrf.mxu1 }
 0x85a   :  { %v12921_v16 = vpop.f32.mrf.mxu1 }
 0x85b   :  { %4430 = vmatmul.mubr.bf16.gmra.mxu0 %v8308_v9  ;;  %v13958_v9 = vld [vmem:[#allocation22_spill] sm:$0xff] }
 0x85c   :  { %v9191_v54 = vpop.f32.mrf.mxu1  ;;  %4790 = vmatprep.mubr.bf16.mxu0 %v10615_v14  ;;  %v13962_v14 = vld [vmem:[#allocation24_spill] sm:$0xff] }
 0x85e   :  { %v9192_v55 = vpop.f32.mrf.mxu1 }
 0x85f   :  { %v12923_v28 = vadd.f32 %v9192_v55, %v9191_v54  ;;  %v13960_v54 = vld [vmem:[#allocation23_spill] sm:$0xff] }
 0x860   :  { %v12925_v31 = vpop.f32.mrf.mxu1 }
 0x862   :  { %v12927_v33 = vpop.f32.mrf.mxu1 }
 0x863   :  { %4791 = vmatmul.mubr.bf16.vlgmr.msra.gmra.mxu0 %v10613_v24 }
 0x864   :  { %4798 = vmatprep.mubr.bf16.mxu0 %v10618_v39 }
 0x86b   :  { %4799 = vmatmul.mubr.bf16.gmra.mxu0 %v10616_v42 }
 0x86c   :  { %4806 = vmatprep.mubr.bf16.mxu0 %v10624_v32  ;;  %v13963_v32 = vld [vmem:[#allocation16_spill] sm:$0xff] }
 0x873   :  { %4807 = vmatmul.mubr.bf16.gmra.mxu0 %v10622_v22 }
 0x874   :  { %4814 = vmatprep.mubr.bf16.mxu0 %v10630_v57 }
 0x878   :  { %v9197_v2 = vpop.f32.mrf.mxu1 }
 0x87a   :  { %v9198_v37 = vpop.f32.mrf.mxu1 }
 0x87b   :  { %v12929_v49 = vadd.f32 %v9198_v37, %v9197_v2  ;;  %4815 = vmatmul.mubr.bf16.gmra.mxu0 %v10628_v56 }
 0x87c   :  { %v12931_v44 = vpop.f32.mrf.mxu1  ;;  %4822 = vmatprep.mubr.bf16.mxu0 %v10636_v30 }
 0x87e   :  { %v12933_v18 = vpop.f32.mrf.mxu1 }
 0x882   :  { %v9203_v8 = vpop.f32.mrf.mxu1 }
 0x883   :  { %4823 = vmatmul.mubr.bf16.gmra.mxu0 %v10634_v41 }
 0x884   :  { %v9204_v10 = vpop.f32.mrf.mxu1 }
 0x885   :  { %v12935_v60 = vadd.f32 %v9204_v10, %v9203_v8  ;;  %v13961_v8 = vld [vmem:[#allocation15_spill] sm:$0xff] }
 0x886   :  { %v12937_v46 = vpop.f32.mrf.mxu1 }
 0x888   :  { %v12939_v51 = vpop.f32.mrf.mxu1 }
 0x88d   :  { %v9209_v61 = vpop.f32.mrf.mxu1 }
 0x88f   :  { %v9210_v27 = vpop.f32.mrf.mxu1 }
 0x890   :  { %v12941_v15 = vadd.f32 %v9210_v27, %v9209_v61  ;;  %v10642_v61 = vld [vmem:[%s13849_s25 + $0x724] ss:$16 sps:$4 sm:$0xff]  }
 0x891   :  { %v9212_v34 = vpop.f32.mrf.mxu1  ;;  %4830 = vmatprep.mubr.bf16.mxu0 %v10642_v61  ;;  %v13967_v61 = vld [vmem:[#allocation18_spill] sm:$0xff] }
 0x893   :  { %v9213_v53 = vpop.f32.mrf.mxu1 }
 0x894   :  { %v10640_v53 = vld [vmem:[%s13849_s25 + $0x720] ss:$16 sps:$4 sm:$0xff]  }
 0x895   :  { %4831 = vmatmul.mubr.bf16.gmra.mxu0 %v10640_v53 }
 0x8b3   :  { %v4019_v13 = vpop.f32.mrf.mxu0 }
 0x8b4   :  { %v12962_v3 = vadd.f32 %v4019_v13, %v12718_v40 }
 0x8b5   :  { %v9764_v62 = vpop.f32.mrf.mxu0 }
 0x8b6   :  { %v13964_v62 = vld [vmem:[#allocation25_spill] sm:$0xff] }
 0x8b7   :  { %v4022_v45 = vpop.f32.mrf.mxu0 }
 0x8b8   :  { %v12971_v17 = vadd.f32 %v4022_v45, %v13958_v9 }
 0x8b9   :  { %v9765_v23 = vpop.f32.mrf.mxu0 }
 0x8ba   :  { %v8354_v23 = vld [vmem:[%s13849_s25 + $0x740] sm:$0x11] }
 0x8bb   :  { %v4027_v29 = vpop.f32.mrf.mxu0  ;;  %v8380_v30 = vcombine.low %v8354_v23, %v8354_v23 }
 0x8bc   :  { %v12974_v40 = vadd.f32 %v4027_v29, %v13959_v12  ;;  %v13965_v29 = vld [vmem:[#allocation17_spill] sm:$0xff] }
 0x8bd   :  { %v9768_v47 = vpop.f32.mrf.mxu0 }
 0x8be   :  { %v8381_v47 = vcombine.high %v8354_v23, %v8354_v23  ;;  %v9178_v23 = vadd.f32 %v12905_v43, %v12903_v52 }
 0x8bf   :  { %v4030_v7 = vpop.f32.mrf.mxu0 }
 0x8c0   :  { %v12983_v55 = vadd.f32 %v4030_v7, %v13960_v54  ;;  %4838 = vmatprep.mubr.bf16.mxu0 %v8381_v47  ;;  %v13966_v54 = vld [vmem:[#allocation26_spill] sm:$0xff] }
 0x8c1   :  { %v9769_v2 = vpop.f32.mrf.mxu0  ;;  %4839 = vmatmul.mubr.bf16.gmra.mxu0 %v8380_v30 }
 0x8c2   :  { %9826 = vmatprep.mubr.msk.bf16.mxu0 %vm10755_vm0, %v13853_v11 }
 0x8c3   :  { %v4035_v37 = vpop.f32.mrf.mxu0 }
 0x8c4   :  { %v12986_v10 = vadd.f32 %v4035_v37, %v13961_v8 }
 0x8c5   :  { %v9772_v27 = vpop.f32.mrf.mxu0 }
 0x8c7   :  { %v4038_v34 = vpop.f32.mrf.mxu0 }
 0x8c8   :  { %v12995_v24 = vadd.f32 %v4038_v34, %v13962_v14 }
 0x8c9   :  { %v9773_v39 = vpop.f32.mrf.mxu0 }
 0x8cb   :  { %v4043_v42 = vpop.f32.mrf.mxu0 }
 0x8cc   :  { %v12998_v22 = vadd.f32 %v4043_v42, %v13963_v32 }
 0x8cd   :  { %v9776_v13 = vpop.f32.mrf.mxu0 }
 0x8cf   :  { %v4046_v57 = vpop.f32.mrf.mxu0 }
 0x8d0   :  { %v13001_v45 = vadd.f32 %v4046_v57, %v13964_v62 }
 0x8d1   :  { %v9777_v56 = vpop.f32.mrf.mxu0 }
 0x8d3   :  { %v4051_v9 = vpop.f32.mrf.mxu0 }
 0x8d4   :  { %v13007_v12 = vadd.f32 %v4051_v9, %v13965_v29 }
 0x8d5   :  { %v9780_v7 = vpop.f32.mrf.mxu0 }
 0x8d7   :  { %v4054_v41 = vpop.f32.mrf.mxu0 }
 0x8d8   :  { %v13010_v2 = vadd.f32 %v4054_v41, %v13966_v54  ;;  %v9184_v54 = vadd.f32 %v12914_v26, %v12909_v59  ;;  %v9190_v59 = vadd.f32 %v12921_v16, %v12919_v6  ;;  %v9196_v6 = vadd.f32 %v12927_v33, %v12925_v31 }
 0x8d9   :  { %v9781_v37 = vpop.f32.mrf.mxu0  ;;  %v9202_v31 = vadd.f32 %v12933_v18, %v12931_v44  ;;  %v9208_v44 = vadd.f32 %v12939_v51, %v12937_v46  ;;  %v10621_v46 = vld [vmem:[%s13849_s25 + $0x68c] ss:$16 sps:$4 sm:$0xff]  }
 0x8db   :  { %v4059_v8 = vpop.f32.mrf.mxu0 }
 0x8dc   :  { %v13015_v27 = vadd.f32 %v4059_v8, %v13967_v61 }
 0x8dd   :  { %v9784_v34 = vpop.f32.mrf.mxu0 }
 0x8df   :  { %v4062_v53 = vpop.f32.mrf.mxu0 }
 0x8e0   :  { %v13018_v14 = vadd.f32 %v4062_v53, %v12774_v1 }
 0x8e1   :  { %v9785_v39 = vpop.f32.mrf.mxu0 }
 0x8e3   :  { %v4067_v42 = vpop.f32.mrf.mxu0 }
 0x8e4   :  { %v13021_v32 = vadd.f32 %v4067_v42, %v12777_v0 }
 0x8e5   :  { %v9788_v13 = vpop.f32.mrf.mxu0 }
 0x8e7   :  { %v4070_v57 = vpop.f32.mrf.mxu0 }
 0x8e9   :  { %v9789_v62 = vpop.f32.mrf.mxu0 }
 0x8eb   :  { %v4383_v56 = vpop.f32.mrf.mxu0 }
 0x8ec   :  { %v4384_v30 = vadd.f32 %v12901_v48, %v4383_v56 }
 0x8ed   :  { %v4385_v9 = vpop.f32.mrf.mxu0 }
 0x8ef   :  { %v4386_v29 = vpop.f32.mrf.mxu0 }
 0x8f0   :  { %v4387_v47 = vadd.f32 %v9178_v23, %v4386_v29 }
 0x8f1   :  { %v4388_v7 = vpop.f32.mrf.mxu0 }
 0x8f2   :  { %v4437_v1 = vpack.c.bf16 %v4387_v47, %v4384_v30 }
 0x8f3   :  { %v4391_v41 = vpop.f32.mrf.mxu0 }
 0x8f4   :  { %9795 = vmatmul.mubr.msk.bf16.vlgmr.msra.gmra.mxu1 %vm1370_vm4, %v4437_v1  ;;  %v4392_v48 = vadd.f32 %v12907_v4, %v4391_v41  ;;  %v10625_v1 = vld [vmem:[%s13849_s25 + $0x6ac] ss:$16 sps:$4 sm:$0xff]  }
 0x8f5   :  { %4847 = vmatpush1.bf16.msra.mxu1 %v11158_v20  ;;  %v4393_v0 = vpop.f32.mrf.mxu0  ;;  %9798 = vmatprep.mubr.msk.bf16.mxu1 %vm10755_vm0, %v13853_v11  ;;  %v10631_v41 = vld [vmem:[%s13849_s25 + $0x6cc] ss:$16 sps:$4 sm:$0xff]  }
 0x8f6   :  { %4848 = vmatprep.subr.bf16.mxu1 %v13863_v36  ;;  %v10633_v0 = vld [vmem:[%s13849_s25 + $0x6c8] ss:$16 sps:$4 sm:$0xff]  }
 0x8f7   :  { %v4394_v52 = vpop.f32.mrf.mxu0 }
 0x8f8   :  { %v4395_v43 = vadd.f32 %v9184_v54, %v4394_v52  ;;  %v10637_v54 = vld [vmem:[%s13849_s25 + $0x6ec] ss:$16 sps:$4 sm:$0xff]   ;;  %v10639_v52 = vld [vmem:[%s13849_s25 + $0x6e8] ss:$16 sps:$4 sm:$0xff]  }
 0x8f9   :  { %4849 = vmatpush1.bf16.msra.mxu1 %v11167_v38  ;;  %v4396_v37 = vpop.f32.mrf.mxu0 }
 0x8fa   :  { %v4438_v8 = vpack.c.bf16 %v4395_v43, %v4392_v48  ;;  %4850 = vmatprep.subr.bf16.mxu1 %v13863_v36  ;;  %v10643_v48 = vld [vmem:[%s13849_s25 + $0x70c] ss:$16 sps:$4 sm:$0xff]   ;;  %v10645_v43 = vld [vmem:[%s13849_s25 + $0x708] ss:$16 sps:$4 sm:$0xff]  }
 0x8fb   :  { %v4399_v20 = vpop.f32.mrf.mxu0  ;;  %v10646_v37 = vld [vmem:[%s13849_s25 + $0x72c] ss:$16 sps:$4 sm:$0xff]  }
 0x8fc   :  { %9799 = vmatmul.mubr.msk.bf16.gmra.mxu1 %vm1370_vm4, %v4438_v8  ;;  %v4400_v38 = vadd.f32 %v12917_v35, %v4399_v20  ;;  %v8355_v8 = vld [vmem:[%s13849_s25 + $0x748] sm:$0x11] }
 0x8fd   :  { %4851 = vmatpush1.bf16.msra.mxu1 %v11180_v50  ;;  %v4401_v61 = vpop.f32.mrf.mxu0  ;;  %9802 = vmatprep.mubr.msk.bf16.mxu1 %vm10755_vm0, %v13853_v11  ;;  %v10648_v20 = vld [vmem:[%s13849_s25 + $0x728] ss:$16 sps:$4 sm:$0xff]  }
 0x8fe   :  { %4852 = vmatprep.subr.bf16.mxu1 %v13863_v36  ;;  %v8383_v61 = vcombine.high %v8355_v8, %v8355_v8 }
 0x8ff   :  { %v4402_v4 = vpop.f32.mrf.mxu0 }
 0x900   :  { %v4403_v26 = vadd.f32 %v9190_v59, %v4402_v4  ;;  %v8382_v59 = vcombine.low %v8355_v8, %v8355_v8  ;;  %v10653_v4 = vld [vmem:[%s13812_s5 + $0x88] sm:$0xff]  }
 0x901   :  { %4853 = vmatpush1.bf16.msra.mxu1 %v11188_v58  ;;  %v4404_v34 = vpop.f32.mrf.mxu0  ;;  %9823 = vmatpush3.bf16.msra.mxu0 %v10653_v4 }
 0x902   :  { %v4439_v53 = vpack.c.bf16 %v4403_v26, %v4400_v38  ;;  %4854 = vmatprep.subr.bf16.mxu1 %v13863_v36  ;;  %9824 = vmatprep.subr.bf16.mxu0 %v13853_v11 }
 0x903   :  { %v4407_v50 = vpop.f32.mrf.mxu0 }
 0x904   :  { %9803 = vmatmul.mubr.msk.bf16.gmra.mxu1 %vm1370_vm4, %v4439_v53  ;;  %v4408_v58 = vadd.f32 %v12923_v28, %v4407_v50 }
 0x905   :  { %4855 = vmatpush1.bf16.msra.mxu1 %v11194_v63  ;;  %v4409_v39 = vpop.f32.mrf.mxu0  ;;  %9806 = vmatprep.mubr.msk.bf16.mxu1 %vm10755_vm0, %v13853_v11 }
 0x906   :  { %4856 = vmatprep.subr.bf16.mxu1 %v13863_v36 }
 0x907   :  { %v4410_v35 = vpop.f32.mrf.mxu0 }
 0x908   :  { %v4411_v16 = vadd.f32 %v9196_v6, %v4410_v35 }
 0x909   :  { %4857 = vmatpush1.bf16.msra.mxu1 %v11202_v19  ;;  %v4412_v42 = vpop.f32.mrf.mxu0 }
 0x90a   :  { %v4440_v13 = vpack.c.bf16 %v4411_v16, %v4408_v58  ;;  %4858 = vmatprep.subr.bf16.mxu1 %v13863_v36  ;;  %v10654_v42 = vld [vmem:[%s13812_s5 + $0x80] sm:$0xff]  }
 0x90b   :  { %v4415_v63 = vpop.f32.mrf.mxu0  ;;  %9825 = vmatpush3.bf16.msra.mxu0 %v10654_v42 }
 0x90c   :  { %9807 = vmatmul.mubr.msk.bf16.gmra.mxu1 %vm1370_vm4, %v4440_v13  ;;  %v4416_v19 = vadd.f32 %v12929_v49, %v4415_v63 }
 0x90d   :  { %4859 = vmatpush1.bf16.msra.mxu1 %v11107_v21  ;;  %v4417_v57 = vpop.f32.mrf.mxu0  ;;  %9810 = vmatprep.mubr.msk.bf16.mxu1 %vm10755_vm0, %v13853_v11 }
 0x90e   :  { %4860 = vmatprep.subr.bf16.mxu1 %v13863_v36 }
 0x90f   :  { %v4418_v28 = vpop.f32.mrf.mxu0 }
 0x910   :  { %v4419_v33 = vadd.f32 %v9202_v31, %v4418_v28 }
 0x911   :  { %4861 = vmatpush1.bf16.msra.mxu1 %v11090_v5  ;;  %v4420_v62 = vpop.f32.mrf.mxu0 }
 0x912   :  { %v4441_v56 = vpack.c.bf16 %v4419_v33, %v4416_v19  ;;  %4876 = vmatprep.subr.bf16.mxu1 %v13863_v36 }
 0x913   :  { %v4423_v21 = vpop.f32.mrf.mxu0 }
 0x914   :  { %9811 = vmatmul.mubr.msk.bf16.gmra.mxu1 %vm1370_vm4, %v4441_v56  ;;  %v4424_v18 = vadd.f32 %v12935_v60, %v4423_v21  ;;  %v10619_v60 = vld [vmem:[%s13849_s25 + $0x688] ss:$16 sps:$4 sm:$0xff]  }
 0x915   :  { %4877 = vmatpush2.bf16.msra.mxu1 %v13871_v25  ;;  %v4425_v9 = vpop.f32.mrf.mxu0  ;;  %9814 = vmatprep.mubr.msk.bf16.mxu1 %vm10755_vm0, %v13853_v11 }
 0x917   :  { %v4426_v49 = vpop.f32.mrf.mxu0 }
 0x918   :  { %v4427_v5 = vadd.f32 %v9208_v44, %v4426_v49 }
 0x919   :  { %v4428_v23 = vpop.f32.mrf.mxu0 }
 0x91a   :  { %v4442_v29 = vpack.c.bf16 %v4427_v5, %v4424_v18 }
 0x91b   :  { %v4431_v30 = vpop.f32.mrf.mxu0 }
 0x91c   :  { %9815 = vmatmul.mubr.msk.bf16.gmra.mxu1 %vm1370_vm4, %v4442_v29  ;;  %v4432_v25 = vadd.f32 %v12941_v15, %v4431_v30  ;;  %v10627_v15 = vld [vmem:[%s13849_s25 + $0x6a8] ss:$16 sps:$4 sm:$0xff]  }
 0x91d   :  { %v4433_v36 = vpop.f32.mrf.mxu0  ;;  %9818 = vmatprep.mubr.msk.bf16.mxu1 %vm10755_vm0, %v13853_v11 }
 0x91e   :  { %v4443_v51 = vpack.c.bf16 %v4432_v25, %v4432_v25 }
 0x91f   :  { %v4434_v47 = vpop.f32.mrf.mxu0 }
 0x921   :  { %v4435_v7 = vpop.f32.mrf.mxu0 }
 0x923   :  { %v9240_v38 = vpop.f32.mrf.mxu0 }
 0x924   :  { %9819 = vmatmul.mubr.msk.bf16.gmra.mxu1 %vm1370_vm4, %v4443_v51 }
 0x925   :  { %8384 = vmatprep.mubr.msk.bf16.mxu1 %vm782_vm2, %v10621_v46  ;;  %v9241_v26 = vpop.f32.mrf.mxu0 }
 0x926   :  { %v13128_v34 = vadd.f32 %v9241_v26, %v9240_v38 }
 0x927   :  { %v13130_v53 = vpop.f32.mrf.mxu0 }
 0x929   :  { %v13132_v50 = vpop.f32.mrf.mxu0 }
 0x92b   :  { %v9246_v39 = vpop.f32.mrf.mxu0 }
 0x92c   :  { %4879 = vmatmul.mubr.bf16.vlgmr.msra.gmra.mxu1 %v10619_v60 }
 0x92d   :  { %8385 = vmatprep.mubr.msk.bf16.mxu1 %vm782_vm2, %v10625_v1  ;;  %v9247_v6 = vpop.f32.mrf.mxu0 }
 0x92e   :  { %v13134_v35 = vadd.f32 %v9247_v6, %v9246_v39 }
 0x92f   :  { %v13136_v58 = vpop.f32.mrf.mxu0 }
 0x931   :  { %v13138_v16 = vpop.f32.mrf.mxu0 }
 0x933   :  { %v9252_v13 = vpop.f32.mrf.mxu0 }
 0x934   :  { %4887 = vmatmul.mubr.bf16.gmra.mxu1 %v10627_v15 }
 0x935   :  { %8386 = vmatprep.mubr.msk.bf16.mxu1 %vm782_vm2, %v10631_v41  ;;  %v9253_v63 = vpop.f32.mrf.mxu0 }
 0x936   :  { %v13143_v57 = vadd.f32 %v9253_v63, %v9252_v13 }
 0x937   :  { %v13145_v31 = vpop.f32.mrf.mxu0 }
 0x939   :  { %v13147_v28 = vpop.f32.mrf.mxu0 }
 0x93b   :  { %v9258_v19 = vpop.f32.mrf.mxu0 }
 0x93c   :  { %4895 = vmatmul.mubr.bf16.gmra.mxu1 %v10633_v0 }
 0x93d   :  { %8387 = vmatprep.mubr.msk.bf16.mxu1 %vm782_vm2, %v10637_v54  ;;  %v9259_v33 = vpop.f32.mrf.mxu0 }
 0x93e   :  { %v13149_v62 = vadd.f32 %v9259_v33, %v9258_v19 }
 0x93f   :  { %v13151_v56 = vpop.f32.mrf.mxu0 }
 0x941   :  { %v13153_v21 = vpop.f32.mrf.mxu0 }
 0x943   :  { %v9264_v9 = vpop.f32.mrf.mxu0 }
 0x944   :  { %4903 = vmatmul.mubr.bf16.gmra.mxu1 %v10639_v52 }
 0x945   :  { %8388 = vmatprep.mubr.msk.bf16.mxu1 %vm782_vm2, %v10643_v48  ;;  %v9265_v44 = vpop.f32.mrf.mxu0 }
 0x946   :  { %v13155_v49 = vadd.f32 %v9265_v44, %v9264_v9 }
 0x947   :  { %v13157_v18 = vpop.f32.mrf.mxu0 }
 0x949   :  { %v13159_v5 = vpop.f32.mrf.mxu0 }
 0x94c   :  { %4911 = vmatmul.mubr.bf16.gmra.mxu1 %v10645_v43 }
 0x94d   :  { %8389 = vmatprep.mubr.msk.bf16.mxu1 %vm782_vm2, %v10646_v37 }
 0x954   :  { %4919 = vmatmul.mubr.bf16.gmra.mxu1 %v10648_v20 }
 0x955   :  { %8390 = vmatprep.mubr.msk.bf16.mxu1 %vm782_vm2, %v8383_v61  ;;  %v9270_v23 = vpop.f32.mrf.mxu0 }
 0x957   :  { %v9271_v29 = vpop.f32.mrf.mxu0 }
 0x958   :  { %v13161_v30 = vadd.f32 %v9271_v29, %v9270_v23 }
 0x959   :  { %v13163_v36 = vpop.f32.mrf.mxu0 }
 0x95b   :  { %v13165_v25 = vpop.f32.mrf.mxu0 }
 0x95c   :  { %4927 = vmatmul.mubr.bf16.gmra.mxu1 %v8382_v59 }
 0x981   :  { %v9276_v47 = vpop.f32.mrf.mxu0 }
 0x983   :  { %v9277_v7 = vpop.f32.mrf.mxu0 }
 0x984   :  { %v13167_v46 = vadd.f32 %v9277_v7, %v9276_v47 }
 0x985   :  { %v9279_v51 = vpop.f32.mrf.mxu0 }
 0x987   :  { %v9280_v60 = vpop.f32.mrf.mxu0 }
 0x9b4   :  { %v4516_v1 = vpop.f32.mrf.mxu1 }
 0x9b5   :  { %v13170_v15 = vadd.f32 %v4516_v1, %v12962_v3 }
 0x9b6   :  { %v9796_v41 = vpop.f32.mrf.mxu1 }
 0x9b8   :  { %v4519_v0 = vpop.f32.mrf.mxu1 }
 0x9b9   :  { %v13173_v54 = vadd.f32 %v4519_v0, %v12971_v17  ;;  %v9245_v0 = vadd.f32 %v13132_v50, %v13130_v53 }
 0x9ba   :  { %v9797_v52 = vpop.f32.mrf.mxu1 }
 0x9bc   :  { %v4524_v48 = vpop.f32.mrf.mxu1 }
 0x9bd   :  { %v13176_v43 = vadd.f32 %v4524_v48, %v12974_v40 }
 0x9be   :  { %v9800_v37 = vpop.f32.mrf.mxu1 }
 0x9c0   :  { %v4527_v8 = vpop.f32.mrf.mxu1 }
 0x9c1   :  { %v13179_v20 = vadd.f32 %v4527_v8, %v12983_v55 }
 0x9c2   :  { %v9801_v61 = vpop.f32.mrf.mxu1 }
 0x9c4   :  { %v4532_v59 = vpop.f32.mrf.mxu1 }
 0x9c5   :  { %v13182_v3 = vadd.f32 %v4532_v59, %v12986_v10 }
 0x9c6   :  { %v9804_v4 = vpop.f32.mrf.mxu1 }
 0x9c8   :  { %v4535_v38 = vpop.f32.mrf.mxu1 }
 0x9c9   :  { %v13185_v17 = vadd.f32 %v4535_v38, %v12995_v24 }
 0x9ca   :  { %v9805_v26 = vpop.f32.mrf.mxu1 }
 0x9cc   :  { %v4540_v39 = vpop.f32.mrf.mxu1 }
 0x9cd   :  { %v13188_v40 = vadd.f32 %v4540_v39, %v12998_v22  ;;  %v9257_v39 = vadd.f32 %v13147_v28, %v13145_v31 }
 0x9ce   :  { %v9808_v6 = vpop.f32.mrf.mxu1 }
 0x9d0   :  { %v4543_v42 = vpop.f32.mrf.mxu1 }
 0x9d1   :  { %v13191_v55 = vadd.f32 %v4543_v42, %v13001_v45 }
 0x9d2   :  { %v9809_v13 = vpop.f32.mrf.mxu1 }
 0x9d4   :  { %v4548_v63 = vpop.f32.mrf.mxu1 }
 0x9d5   :  { %v13194_v10 = vadd.f32 %v4548_v63, %v13007_v12 }
 0x9d6   :  { %v9812_v19 = vpop.f32.mrf.mxu1 }
 0x9d7   :  { %v9263_v19 = vadd.f32 %v13153_v21, %v13151_v56 }
 0x9d8   :  { %v4551_v33 = vpop.f32.mrf.mxu1 }
 0x9d9   :  { %v13197_v24 = vadd.f32 %v4551_v33, %v13010_v2 }
 0x9da   :  { %v9813_v9 = vpop.f32.mrf.mxu1 }
 0x9dc   :  { %v4556_v44 = vpop.f32.mrf.mxu1 }
 0x9dd   :  { %v13200_v22 = vadd.f32 %v4556_v44, %v13015_v27 }
 0x9de   :  { %v9816_v23 = vpop.f32.mrf.mxu1 }
 0x9e0   :  { %v4559_v29 = vpop.f32.mrf.mxu1 }
 0x9e1   :  { %v13203_v45 = vadd.f32 %v4559_v29, %v13018_v14  ;;  %v9269_v29 = vadd.f32 %v13159_v5, %v13157_v18 }
 0x9e2   :  { %v9817_v47 = vpop.f32.mrf.mxu1 }
 0x9e4   :  { %v4564_v7 = vpop.f32.mrf.mxu1 }
 0x9e5   :  { %v13206_v12 = vadd.f32 %v4564_v7, %v13021_v32  ;;  %v9251_v32 = vadd.f32 %v13138_v16, %v13136_v58 }
 0x9e6   :  { %v9820_v51 = vpop.f32.mrf.mxu1 }
 0x9e8   :  { %v4567_v60 = vpop.f32.mrf.mxu1 }
 0x9ea   :  { %v9821_v1 = vpop.f32.mrf.mxu1 }
 0x9eb   :  { %v9275_v1 = vadd.f32 %v13165_v25, %v13163_v36  ;;  %v10656_v36 = vld [vmem:[%s13968_s28 + $0x10] sm:$0xff]  }
 0x9ec   :  { %v4880_v2 = vpop.f32.mrf.mxu1 }
 0x9ed   :  { %v4881_v52 = vadd.f32 %v13128_v34, %v4880_v2 }
 0x9ee   :  { %v4882_v41 = vpop.f32.mrf.mxu1 }
 0x9f0   :  { %v4883_v27 = vpop.f32.mrf.mxu1 }
 0x9f1   :  { %v4884_v48 = vadd.f32 %v9245_v0, %v4883_v27 }
 0x9f2   :  { %v4885_v37 = vpop.f32.mrf.mxu1 }
 0x9f3   :  { %v4934_v14 = vpack.c.bf16 %v4884_v48, %v4881_v52 }
 0x9f4   :  { %v4888_v8 = vpop.f32.mrf.mxu1 }
 0x9f5   :  { %9827 = vmatmul.mubr.msk.bf16.vlgmr.msra.gmra.mxu0 %vm1370_vm4, %v4934_v14  ;;  %v4889_v4 = vadd.f32 %v13134_v35, %v4888_v8  ;;  %v13258_v8 = vld [vmem:[%s13813_s6] ss:$0 sm:$0xff] }
 0x9f6   :  { %v4890_v61 = vpop.f32.mrf.mxu1  ;;  %9830 = vmatprep.mubr.msk.bf16.mxu0 %vm10755_vm0, %v13853_v11 }
 0x9f8   :  { %v4891_v59 = vpop.f32.mrf.mxu1 }
 0x9f9   :  { %v4892_v53 = vadd.f32 %v9251_v32, %v4891_v59 }
 0x9fa   :  { %v4893_v50 = vpop.f32.mrf.mxu1 }
 0x9fb   :  { %v4935_v38 = vpack.c.bf16 %v4892_v53, %v4889_v4 }
 0x9fc   :  { %v4896_v34 = vpop.f32.mrf.mxu1 }
 0x9fd   :  { %9831 = vmatmul.mubr.msk.bf16.gmra.mxu0 %vm1370_vm4, %v4935_v38  ;;  %v4897_v42 = vadd.f32 %v13143_v57, %v4896_v34 }
 0x9fe   :  { %v4898_v26 = vpop.f32.mrf.mxu1  ;;  %9834 = vmatprep.mubr.msk.bf16.mxu0 %vm10755_vm0, %v13853_v11 }
 0xa00   :  { %v4899_v6 = vpop.f32.mrf.mxu1 }
 0xa01   :  { %v4900_v58 = vadd.f32 %v9257_v39, %v4899_v6 }
 0xa02   :  { %v4901_v16 = vpop.f32.mrf.mxu1 }
 0xa03   :  { %v4936_v13 = vpack.c.bf16 %v4900_v58, %v4897_v42 }
 0xa04   :  { %v4904_v35 = vpop.f32.mrf.mxu1 }
 0xa05   :  { %9835 = vmatmul.mubr.msk.bf16.gmra.mxu0 %vm1370_vm4, %v4936_v13  ;;  %v4905_v9 = vadd.f32 %v13149_v62, %v4904_v35 }
 0xa06   :  { %v4906_v63 = vpop.f32.mrf.mxu1  ;;  %9838 = vmatprep.mubr.msk.bf16.mxu0 %vm10755_vm0, %v13853_v11 }
 0xa08   :  { %v4907_v33 = vpop.f32.mrf.mxu1 }
 0xa09   :  { %v4908_v31 = vadd.f32 %v9263_v19, %v4907_v33 }
 0xa0a   :  { %v4909_v28 = vpop.f32.mrf.mxu1 }
 0xa0b   :  { %v4937_v44 = vpack.c.bf16 %v4908_v31, %v4905_v9 }
 0xa0c   :  { %v4912_v57 = vpop.f32.mrf.mxu1 }
 0xa0d   :  { %9839 = vmatmul.mubr.msk.bf16.gmra.mxu0 %vm1370_vm4, %v4937_v44  ;;  %v4913_v7 = vadd.f32 %v13155_v49, %v4912_v57 }
 0xa0e   :  { %v4914_v23 = vpop.f32.mrf.mxu1  ;;  %9842 = vmatprep.mubr.msk.bf16.mxu0 %vm10755_vm0, %v13853_v11 }
 0xa10   :  { %v4915_v47 = vpop.f32.mrf.mxu1 }
 0xa11   :  { %v4916_v56 = vadd.f32 %v9269_v29, %v4915_v47 }
 0xa12   :  { %v4917_v21 = vpop.f32.mrf.mxu1 }
 0xa13   :  { %v4938_v51 = vpack.c.bf16 %v4916_v56, %v4913_v7 }
 0xa14   :  { %v4920_v62 = vpop.f32.mrf.mxu1 }
 0xa15   :  { %9843 = vmatmul.mubr.msk.bf16.gmra.mxu0 %vm1370_vm4, %v4938_v51  ;;  %v4921_v41 = vadd.f32 %v13161_v30, %v4920_v62  ;;  %v10655_v30 = vld [vmem:[%s13968_s28] sm:$0xff]  }
 0xa16   :  { %v4922_v60 = vpop.f32.mrf.mxu1  ;;  %9846 = vmatprep.mubr.msk.bf16.mxu0 %vm10755_vm0, %v13853_v11  ;;  %9868 = vmatprep.mubr.msk.bf16.mxu1 %vm5134_vm5, %v10655_v30 }
 0xa18   :  { %v4923_v2 = vpop.f32.mrf.mxu1 }
 0xa19   :  { %v4924_v18 = vadd.f32 %v9275_v1, %v4923_v2 }
 0xa1a   :  { %v4925_v5 = vpop.f32.mrf.mxu1 }
 0xa1b   :  { %v4939_v0 = vpack.c.bf16 %v4924_v18, %v4921_v41 }
 0xa1c   :  { %v4928_v49 = vpop.f32.mrf.mxu1 }
 0xa1d   :  { %9847 = vmatmul.mubr.msk.bf16.gmra.mxu0 %vm1370_vm4, %v4939_v0  ;;  %v4929_v52 = vadd.f32 %v13167_v46, %v4928_v49 }
 0xa1e   :  { %v4930_v27 = vpop.f32.mrf.mxu1  ;;  %9850 = vmatprep.mubr.msk.bf16.mxu0 %vm10755_vm0, %v13853_v11 }
 0xa1f   :  { %v4940_v14 = vpack.c.bf16 %v4929_v52, %v4929_v52 }
 0xa20   :  { %v4931_v48 = vpop.f32.mrf.mxu1 }
 0xa22   :  { %v4932_v37 = vpop.f32.mrf.mxu1 }
 0xa25   :  { %9851 = vmatmul.mubr.msk.bf16.gmra.mxu0 %vm1370_vm4, %v4940_v14 }
 0xa26   :  { %9886 = vmatprep.mubr.msk.bf16.mxu0 %vm5134_vm5, %v10656_v36 }
 0xab5   :  { %v5013_v25 = vpop.f32.mrf.mxu0 }
 0xab6   :  { %v5067_v46 = vadd.f32 %v5013_v25, %v13170_v15 }
 0xab7   :  { %v9828_v61 = vpop.f32.mrf.mxu0 }
 0xab8   :  { %v5087_v59 = vadd.f32 %v13258_v8, %v5067_v46 }
 0xab9   :  { %v5016_v32 = vpop.f32.mrf.mxu0 }
 0xaba   :  { %v5068_v4 = vadd.f32 %v5016_v32, %v13173_v54  ;;  %v5100_v34 = vmax.f32 %v5087_v59, 0.0 }
 0xabb   :  { %v9829_v53 = vpop.f32.mrf.mxu0 }
 0xabc   :  { %v5088_v50 = vadd.f32 %v13258_v8, %v5068_v4 }
 0xabd   :  { %v5021_v38 = vpop.f32.mrf.mxu0 }
 0xabe   :  { %v5101_v26 = vmax.f32 %v5088_v50, 0.0  ;;  %v5069_v39 = vadd.f32 %v5021_v38, %v13176_v43 }
 0xabf   :  { %v9832_v15 = vpop.f32.mrf.mxu0 }
 0xac0   :  { %v13264_v6 = vpack.c.bf16 %v5101_v26, %v5100_v34  ;;  %v5089_v58 = vadd.f32 %v13258_v8, %v5069_v39 }
 0xac1   :  { %v5024_v42 = vpop.f32.mrf.mxu0 }
 0xac2   :  { %v5070_v16 = vadd.f32 %v5024_v42, %v13179_v20  ;;  %v5102_v63 = vmax.f32 %v5089_v58, 0.0  ;;  %v10658_v58 = vld [vmem:[%s13968_s28 + $0x18] sm:$0xff]  }
 0xac3   :  { %v9833_v13 = vpop.f32.mrf.mxu0 }
 0xac4   :  { %v5090_v35 = vadd.f32 %v13258_v8, %v5070_v16  ;;  %v10660_v16 = vld [vmem:[%s13814_s7 + $0x10] sm:$0xff]   ;;  %v10661_v13 = vld [vmem:[%s13814_s7 + $0x8] sm:$0xff]  }
 0xac5   :  { %v5029_v54 = vpop.f32.mrf.mxu0 }
 0xac6   :  { %v5103_v19 = vmax.f32 %v5090_v35, 0.0  ;;  %v5071_v33 = vadd.f32 %v5029_v54, %v13182_v3  ;;  %v10662_v35 = vld [vmem:[%s13814_s7] sm:$0xff]   ;;  %v10663_v54 = vld [vmem:[%s13814_s7 + $0x28] sm:$0xff]  }
 0xac7   :  { %v9836_v9 = vpop.f32.mrf.mxu0 }
 0xac8   :  { %v13270_v31 = vpack.c.bf16 %v5103_v19, %v5102_v63  ;;  %v5091_v28 = vadd.f32 %v13258_v8, %v5071_v33 }
 0xac9   :  { %v5032_v43 = vpop.f32.mrf.mxu0 }
 0xaca   :  { %v5072_v44 = vadd.f32 %v5032_v43, %v13185_v17  ;;  %v5104_v29 = vmax.f32 %v5091_v28, 0.0 }
 0xacb   :  { %v9837_v57 = vpop.f32.mrf.mxu0 }
 0xacc   :  { %v5092_v23 = vadd.f32 %v13258_v8, %v5072_v44 }
 0xacd   :  { %v5037_v20 = vpop.f32.mrf.mxu0 }
 0xace   :  { %v5105_v47 = vmax.f32 %v5092_v23, 0.0  ;;  %v5073_v7 = vadd.f32 %v5037_v20, %v13188_v40 }
 0xacf   :  { %v9840_v56 = vpop.f32.mrf.mxu0 }
 0xad0   :  { %v13276_v21 = vpack.c.bf16 %v5105_v47, %v5104_v29  ;;  %v5093_v51 = vadd.f32 %v13258_v8, %v5073_v7  ;;  %v10664_v7 = vld [vmem:[%s13814_s7 + $0x20] sm:$0xff]  }
 0xad1   :  { %v5040_v3 = vpop.f32.mrf.mxu0  ;;  %v10665_v56 = vld [vmem:[%s13968_s28 + $0x20] sm:$0xff]  }
 0xad2   :  { %v5074_v62 = vadd.f32 %v5040_v3, %v13191_v55  ;;  %v5106_v2 = vmax.f32 %v5093_v51, 0.0  ;;  %v10667_v3 = vld [vmem:[%s13814_s7 + $0x38] sm:$0xff]   ;;  %v10666_v51 = vld [vmem:[%s13968_s28 + $0x28] sm:$0xff]  }
 0xad3   :  { %v9841_v60 = vpop.f32.mrf.mxu0 }
 0xad4   :  { %v5094_v1 = vadd.f32 %v13258_v8, %v5074_v62  ;;  %v10668_v62 = vld [vmem:[%s13814_s7 + $0x30] sm:$0xff]  }
 0xad5   :  { %v5045_v17 = vpop.f32.mrf.mxu0 }
 0xad6   :  { %v5107_v41 = vmax.f32 %v5094_v1, 0.0  ;;  %v5075_v18 = vadd.f32 %v5045_v17, %v13194_v10 }
 0xad7   :  { %v9844_v5 = vpop.f32.mrf.mxu0 }
 0xad8   :  { %v13282_v0 = vpack.c.bf16 %v5107_v41, %v5106_v2  ;;  %v5095_v49 = vadd.f32 %v13258_v8, %v5075_v18 }
 0xad9   :  { %v5048_v40 = vpop.f32.mrf.mxu0 }
 0xada   :  { %v5076_v27 = vadd.f32 %v5048_v40, %v13197_v24  ;;  %v5108_v37 = vmax.f32 %v5095_v49, 0.0 }
 0xadb   :  { %v9845_v52 = vpop.f32.mrf.mxu0 }
 0xadc   :  { %v5096_v48 = vadd.f32 %v13258_v8, %v5076_v27 }
 0xadd   :  { %v5053_v55 = vpop.f32.mrf.mxu0 }
 0xade   :  { %v5109_v14 = vmax.f32 %v5096_v48, 0.0  ;;  %v5077_v30 = vadd.f32 %v5053_v55, %v13200_v22 }
 0xadf   :  { %v9848_v36 = vpop.f32.mrf.mxu0 }
 0xae0   :  { %v13288_v25 = vpack.c.bf16 %v5109_v14, %v5108_v37  ;;  %v5097_v46 = vadd.f32 %v13258_v8, %v5077_v30  ;;  %v10669_v30 = vld [vmem:[%s13968_s28 + $0x30] sm:$0xff]  }
 0xae1   :  { %v5056_v10 = vpop.f32.mrf.mxu0 }
 0xae2   :  { %v5078_v61 = vadd.f32 %v5056_v10, %v13203_v45  ;;  %v5110_v4 = vmax.f32 %v5097_v46, 0.0  ;;  %v10671_v10 = vld [vmem:[%s13814_s7 + $0x48] sm:$0xff]   ;;  %v10670_v46 = vld [vmem:[%s13968_s28 + $0x38] sm:$0xff]  }
 0xae3   :  { %v9849_v32 = vpop.f32.mrf.mxu0 }
 0xae4   :  { %v5098_v59 = vadd.f32 %v13258_v8, %v5078_v61  ;;  %v10672_v61 = vld [vmem:[%s13814_s7 + $0x40] sm:$0xff]  }
 0xae5   :  { %v5061_v24 = vpop.f32.mrf.mxu0 }
 0xae6   :  { %v5111_v53 = vmax.f32 %v5098_v59, 0.0  ;;  %v5079_v50 = vadd.f32 %v5061_v24, %v13206_v12  ;;  %v10659_v12 = vld [vmem:[%s13814_s7 + $0x18] sm:$0xff]  }
 0xae7   :  { %v9852_v38 = vpop.f32.mrf.mxu0 }
 0xae8   :  { %v13294_v34 = vpack.c.bf16 %v5111_v53, %v5110_v4  ;;  %v5099_v22 = vadd.f32 %v13258_v8, %v5079_v50  ;;  %v10657_v8 = vld [vmem:[%s13968_s28 + $0x8] sm:$0xff]  }
 0xae9   :  { %v5064_v26 = vpop.f32.mrf.mxu0 }
 0xaea   :  { %v5112_v39 = vmax.f32 %v5099_v22, 0.0 }
 0xaeb   :  { %v9853_v15 = vpop.f32.mrf.mxu0 }
 0xaec   :  { %v13297_v42 = vpack.c.bf16 %v5112_v39, %v5112_v39 }
 0xaee   :  { %10238 = vmatprep.subr.msk.bf16.mxu1 %vm5141_vm6, %v13297_v42  ;;  %10239 = vmatprep.subr.msk.bf16.mxu0 %vm5141_vm6, %v13297_v42  ;;  %v13305_v45 = vsel %vm5141_vm6, %v13297_v42, 0 }
 0xaef   :  { %9855 = vmatpush3.bf16.msra.mxu1 %v13305_v45  ;;  %9873 = vmatpush3.bf16.msra.mxu0 %v13305_v45 }
 0xaf0   :  { %9856 = vmatprep.subr.bf16.mxu1 %v13294_v34  ;;  %9874 = vmatprep.subr.bf16.mxu0 %v13294_v34 }
 0xaf3   :  { %9857 = vmatpush3.bf16.msra.mxu1 %v13294_v34  ;;  %9875 = vmatpush3.bf16.msra.mxu0 %v13294_v34 }
 0xaf4   :  { %9858 = vmatprep.subr.bf16.mxu1 %v13288_v25  ;;  %9876 = vmatprep.subr.bf16.mxu0 %v13288_v25 }
 0xaf7   :  { %9859 = vmatpush3.bf16.msra.mxu1 %v13288_v25  ;;  %9877 = vmatpush3.bf16.msra.mxu0 %v13288_v25 }
 0xaf8   :  { %9860 = vmatprep.subr.bf16.mxu1 %v13282_v0  ;;  %9878 = vmatprep.subr.bf16.mxu0 %v13282_v0 }
 0xafb   :  { %9861 = vmatpush3.bf16.msra.mxu1 %v13282_v0  ;;  %9879 = vmatpush3.bf16.msra.mxu0 %v13282_v0 }
 0xafc   :  { %9862 = vmatprep.subr.bf16.mxu1 %v13276_v21  ;;  %9880 = vmatprep.subr.bf16.mxu0 %v13276_v21 }
 0xaff   :  { %9863 = vmatpush3.bf16.msra.mxu1 %v13276_v21  ;;  %9881 = vmatpush3.bf16.msra.mxu0 %v13276_v21 }
 0xb00   :  { %9864 = vmatprep.subr.bf16.mxu1 %v13270_v31  ;;  %9882 = vmatprep.subr.bf16.mxu0 %v13270_v31 }
 0xb03   :  { %9865 = vmatpush3.bf16.msra.mxu1 %v13270_v31  ;;  %9883 = vmatpush3.bf16.msra.mxu0 %v13270_v31 }
 0xb04   :  { %9866 = vmatprep.subr.bf16.mxu1 %v13264_v6  ;;  %9884 = vmatprep.subr.bf16.mxu0 %v13264_v6 }
 0xb07   :  { %9867 = vmatpush3.bf16.msra.mxu1 %v13264_v6  ;;  %9885 = vmatpush3.bf16.msra.mxu0 %v13264_v6 }
 0xb08   :  { %9890 = vmatprep.subr.bf16.mxu1 %v10659_v12  ;;  %9898 = vmatprep.subr.bf16.mxu0 %v10661_v13 }
 0xb0a   :  { %9869 = vmatmul.mubr.msk.bf16.vlgmr.msra.gmra.mxu1 %vm5134_vm5, %v10657_v8  ;;  %9887 = vmatmul.mubr.msk.bf16.vlgmr.msra.gmra.mxu0 %vm5134_vm5, %v10658_v58 }
 0xb0b   :  { %9891 = vmatpush3.bf16.msra.mxu1 %v10659_v12  ;;  %9899 = vmatpush3.bf16.msra.mxu0 %v10661_v13  ;;  %v10673_v13 = vld [vmem:[%s13968_s28 + $0x40] sm:$0xff]  }
 0xb0c   :  { %9892 = vmatprep.subr.bf16.mxu1 %v10660_v16  ;;  %9900 = vmatprep.subr.bf16.mxu0 %v10662_v35 }
 0xb0f   :  { %9893 = vmatpush3.bf16.msra.mxu1 %v10660_v16  ;;  %9901 = vmatpush3.bf16.msra.mxu0 %v10662_v35 }
 0xb10   :  { %10240 = vmatprep.subr.msk.bf16.mxu1 %vm5141_vm6, %v13297_v42  ;;  %9924 = vmatprep.subr.bf16.mxu0 %v10663_v54 }
 0xbca   :  { %v9870_v63 = vpop.f32.mrf.mxu1  ;;  %v9888_v19 = vpop.f32.mrf.mxu0 }
 0xbcc   :  { %v5179_v33 = vpop.f32.mrf.mxu1  ;;  %v5255_v9 = vpop.f32.mrf.mxu0 }
 0xbce   :  { %v9871_v43 = vpop.f32.mrf.mxu1  ;;  %v9889_v28 = vpop.f32.mrf.mxu0 }
 0xbcf   :  { %v5195_v44 = vpack.c.bf16 %v9871_v43, %v9870_v63  ;;  %v5271_v47 = vpack.c.bf16 %v9889_v28, %v9888_v19  ;;  %v10674_v63 = vld [vmem:[%s13968_s28 + $0x48] sm:$0xff]   ;;  %v10676_v19 = vld [vmem:[%s13814_s7 + $0x50] sm:$0xff]  }
 0xbd0   :  { %v5182_v57 = vpop.f32.mrf.mxu1  ;;  %v5258_v23 = vpop.f32.mrf.mxu0 }
 0xbd1   :  { %v5194_v20 = vpack.c.bf16 %v5182_v57, %v5179_v33  ;;  %v5270_v29 = vpack.c.bf16 %v5258_v23, %v5255_v9 }
 0xbd3   :  { %9894 = vmatprep.mubr.msk.bf16.mxu1 %vm1370_vm4, %v5270_v29  ;;  %9902 = vmatprep.mubr.msk.bf16.mxu0 %vm1370_vm4, %v5194_v20 }
 0xbd4   :  { %9895 = vmatmul.mubr.msk.bf16.vlgmr.msra.gmra.mxu1 %vm1370_vm4, %v5271_v47  ;;  %9903 = vmatmul.mubr.msk.bf16.vlgmr.msra.gmra.mxu0 %vm1370_vm4, %v5195_v44 }
 0xbd5   :  { %9907 = vmatpush3.bf16.msra.mxu1 %v13305_v45  ;;  %9925 = vmatpush3.bf16.msra.mxu0 %v10663_v54  ;;  %v10675_v54 = vld [vmem:[%s13814_s7 + $0x58] sm:$0xff]  }
 0xbd6   :  { %9908 = vmatprep.subr.bf16.mxu1 %v13294_v34  ;;  %9926 = vmatprep.subr.bf16.mxu0 %v10664_v7 }
 0xbd7   :  { %9920 = vmatprep.mubr.msk.bf16.mxu1 %vm5134_vm5, %v10665_v56 }
 0xbd9   :  { %9909 = vmatpush3.bf16.msra.mxu1 %v13294_v34  ;;  %9927 = vmatpush3.bf16.msra.mxu0 %v10664_v7 }
 0xbda   :  { %9910 = vmatprep.subr.bf16.mxu1 %v13288_v25  ;;  %10241 = vmatprep.subr.msk.bf16.mxu0 %vm5141_vm6, %v13297_v42 }
 0xbdd   :  { %9911 = vmatpush3.bf16.msra.mxu1 %v13288_v25 }
 0xbde   :  { %9912 = vmatprep.subr.bf16.mxu1 %v13282_v0 }
 0xbe1   :  { %9913 = vmatpush3.bf16.msra.mxu1 %v13282_v0 }
 0xbe2   :  { %9914 = vmatprep.subr.bf16.mxu1 %v13276_v21 }
 0xbe5   :  { %9915 = vmatpush3.bf16.msra.mxu1 %v13276_v21 }
 0xbe6   :  { %9916 = vmatprep.subr.bf16.mxu1 %v13270_v31 }
 0xbe9   :  { %9917 = vmatpush3.bf16.msra.mxu1 %v13270_v31 }
 0xbea   :  { %9918 = vmatprep.subr.bf16.mxu1 %v13264_v6 }
 0xbed   :  { %9919 = vmatpush3.bf16.msra.mxu1 %v13264_v6 }
 0xbee   :  { %9950 = vmatprep.subr.bf16.mxu1 %v10667_v3 }
 0xbf0   :  { %9921 = vmatmul.mubr.msk.bf16.vlgmr.msra.gmra.mxu1 %vm5134_vm5, %v10666_v51  ;;  %v10677_v51 = vld [vmem:[%s13968_s28 + $0x50] sm:$0xff]  }
 0xbf1   :  { %9951 = vmatpush3.bf16.msra.mxu1 %v10667_v3 }
 0xbf2   :  { %9952 = vmatprep.subr.bf16.mxu1 %v10668_v62 }
 0xbf5   :  { %9953 = vmatpush3.bf16.msra.mxu1 %v10668_v62 }
 0xbf6   :  { %10242 = vmatprep.subr.msk.bf16.mxu1 %vm5141_vm6, %v13297_v42 }
 0xc94   :  { %v9896_v60 = vpop.f32.mrf.mxu1  ;;  %v9904_v1 = vpop.f32.mrf.mxu0 }
 0xc95   :  { %v5405_v17 = vadd.f32 %v9904_v1, %v9896_v60  ;;  %v10679_v60 = vld [vmem:[%s13814_s7 + $0x68] sm:$0xff]   ;;  %v10678_v1 = vld [vmem:[%s13968_s28 + $0x58] sm:$0xff]  }
 0xc96   :  { %v5329_v2 = vpop.f32.mrf.mxu1  ;;  %v5396_v41 = vpop.f32.mrf.mxu0 }
 0xc97   :  { %v5397_v18 = vadd.f32 %v5396_v41, %v5329_v2 }
 0xc98   :  { %v9897_v5 = vpop.f32.mrf.mxu1  ;;  %v9905_v40 = vpop.f32.mrf.mxu0 }
 0xc99   :  { %v5408_v49 = vadd.f32 %v9905_v40, %v9897_v5 }
 0xc9a   :  { %v5332_v27 = vpop.f32.mrf.mxu1  ;;  %v5399_v32 = vpop.f32.mrf.mxu0 }
 0xc9b   :  { %v5400_v38 = vadd.f32 %v5399_v32, %v5332_v27  ;;  %v10684_v32 = vld [vmem:[%s13814_s7 + $0x70] sm:$0xff]  }
 0xcb0   :  { %v9922_v52 = vpop.f32.mrf.mxu1 }
 0xcb2   :  { %v5466_v48 = vpop.f32.mrf.mxu1 }
 0xcb4   :  { %v9923_v55 = vpop.f32.mrf.mxu1 }
 0xcb5   :  { %v5482_v36 = vpack.c.bf16 %v9923_v55, %v9922_v52 }
 0xcb6   :  { %v5469_v37 = vpop.f32.mrf.mxu1 }
 0xcb7   :  { %v5481_v14 = vpack.c.bf16 %v5469_v37, %v5466_v48 }
 0xcb9   :  { %9928 = vmatprep.mubr.msk.bf16.mxu0 %vm1370_vm4, %v5481_v14 }
 0xcba   :  { %9929 = vmatmul.mubr.msk.bf16.vlgmr.msra.gmra.mxu0 %vm1370_vm4, %v5482_v36  ;;  %v10681_v36 = vld [vmem:[%s13968_s28 + $0x60] sm:$0xff]  }
 0xcbb   :  { %9933 = vmatpush3.bf16.msra.mxu0 %v13305_v45  ;;  %9946 = vmatprep.mubr.msk.bf16.mxu0 %vm5134_vm5, %v10669_v30 }
 0xcbc   :  { %9934 = vmatprep.subr.bf16.mxu0 %v13294_v34 }
 0xcbf   :  { %9935 = vmatpush3.bf16.msra.mxu0 %v13294_v34 }
 0xcc0   :  { %9936 = vmatprep.subr.bf16.mxu0 %v13288_v25 }
 0xcc3   :  { %9937 = vmatpush3.bf16.msra.mxu0 %v13288_v25 }
 0xcc4   :  { %9938 = vmatprep.subr.bf16.mxu0 %v13282_v0 }
 0xcc7   :  { %9939 = vmatpush3.bf16.msra.mxu0 %v13282_v0 }
 0xcc8   :  { %9940 = vmatprep.subr.bf16.mxu0 %v13276_v21 }
 0xccb   :  { %9941 = vmatpush3.bf16.msra.mxu0 %v13276_v21 }
 0xccc   :  { %9942 = vmatprep.subr.bf16.mxu0 %v13270_v31 }
 0xccf   :  { %9943 = vmatpush3.bf16.msra.mxu0 %v13270_v31 }
 0xcd0   :  { %9944 = vmatprep.subr.bf16.mxu0 %v13264_v6 }
 0xcd3   :  { %9945 = vmatpush3.bf16.msra.mxu0 %v13264_v6 }
 0xcd4   :  { %9976 = vmatprep.subr.bf16.mxu0 %v10671_v10 }
 0xcd6   :  { %9947 = vmatmul.mubr.msk.bf16.vlgmr.msra.gmra.mxu0 %vm5134_vm5, %v10670_v46  ;;  %v10683_v46 = vld [vmem:[%s13814_s7 + $0x78] sm:$0xff]  }
 0xcd7   :  { %9977 = vmatpush3.bf16.msra.mxu0 %v10671_v10 }
 0xcd8   :  { %9978 = vmatprep.subr.bf16.mxu0 %v10672_v61 }
 0xcdb   :  { %9979 = vmatpush3.bf16.msra.mxu0 %v10672_v61  ;;  %v10682_v61 = vld [vmem:[%s13968_s28 + $0x68] sm:$0xff]  }
 0xcdc   :  { %10243 = vmatprep.subr.msk.bf16.mxu0 %vm5141_vm6, %v13297_v42 }
 0xd7a   :  { %v9930_v59 = vpop.f32.mrf.mxu0 }
 0xd7b   :  { %v5557_v24 = vadd.f32 %v9930_v59, %v5405_v17  ;;  %v10680_v17 = vld [vmem:[%s13814_s7 + $0x60] sm:$0xff]  }
 0xd7c   :  { %v5540_v4 = vpop.f32.mrf.mxu0 }
 0xd7d   :  { %v5555_v53 = vadd.f32 %v5540_v4, %v5397_v18 }
 0xd7e   :  { %v9931_v50 = vpop.f32.mrf.mxu0 }
 0xd7f   :  { %v5558_v22 = vadd.f32 %v9931_v50, %v5408_v49 }
 0xd80   :  { %v5543_v26 = vpop.f32.mrf.mxu0 }
 0xd81   :  { %v5556_v39 = vadd.f32 %v5543_v26, %v5400_v38 }
 0xd96   :  { %v9948_v15 = vpop.f32.mrf.mxu0 }
 0xd98   :  { %v5614_v12 = vpop.f32.mrf.mxu0 }
 0xd9a   :  { %v9949_v8 = vpop.f32.mrf.mxu0 }
 0xd9b   :  { %v5630_v35 = vpack.c.bf16 %v9949_v8, %v9948_v15 }
 0xd9c   :  { %v5617_v58 = vpop.f32.mrf.mxu0 }
 0xd9d   :  { %v5629_v16 = vpack.c.bf16 %v5617_v58, %v5614_v12 }
 0xd9f   :  { %9954 = vmatprep.mubr.msk.bf16.mxu1 %vm1370_vm4, %v5629_v16  ;;  %v10685_v16 = vld [vmem:[%s13968_s28 + $0x70] sm:$0xff]  }
 0xda0   :  { %9955 = vmatmul.mubr.msk.bf16.vlgmr.msra.gmra.mxu1 %vm1370_vm4, %v5630_v35 }
 0xda1   :  { %9959 = vmatpush3.bf16.msra.mxu1 %v13305_v45  ;;  %9972 = vmatprep.mubr.msk.bf16.mxu1 %vm5134_vm5, %v10673_v13 }
 0xda2   :  { %9960 = vmatprep.subr.bf16.mxu1 %v13294_v34 }
 0xda5   :  { %9961 = vmatpush3.bf16.msra.mxu1 %v13294_v34 }
 0xda6   :  { %9962 = vmatprep.subr.bf16.mxu1 %v13288_v25 }
 0xda9   :  { %9963 = vmatpush3.bf16.msra.mxu1 %v13288_v25 }
 0xdaa   :  { %9964 = vmatprep.subr.bf16.mxu1 %v13282_v0 }
 0xdad   :  { %9965 = vmatpush3.bf16.msra.mxu1 %v13282_v0 }
 0xdae   :  { %9966 = vmatprep.subr.bf16.mxu1 %v13276_v21 }
 0xdb1   :  { %9967 = vmatpush3.bf16.msra.mxu1 %v13276_v21 }
 0xdb2   :  { %9968 = vmatprep.subr.bf16.mxu1 %v13270_v31 }
 0xdb5   :  { %9969 = vmatpush3.bf16.msra.mxu1 %v13270_v31 }
 0xdb6   :  { %9970 = vmatprep.subr.bf16.mxu1 %v13264_v6 }
 0xdb9   :  { %9971 = vmatpush3.bf16.msra.mxu1 %v13264_v6 }
 0xdba   :  { %10002 = vmatprep.subr.bf16.mxu1 %v10675_v54 }
 0xdbc   :  { %9973 = vmatmul.mubr.msk.bf16.vlgmr.msra.gmra.mxu1 %vm5134_vm5, %v10674_v63 }
 0xdbd   :  { %10003 = vmatpush3.bf16.msra.mxu1 %v10675_v54 }
 0xdbe   :  { %10004 = vmatprep.subr.bf16.mxu1 %v10676_v19 }
 0xdc1   :  { %10005 = vmatpush3.bf16.msra.mxu1 %v10676_v19 }
 0xdc2   :  { %10244 = vmatprep.subr.msk.bf16.mxu1 %vm5141_vm6, %v13297_v42 }
 0xe60   :  { %v9956_v33 = vpop.f32.mrf.mxu1 }
 0xe61   :  { %v5705_v9 = vadd.f32 %v9956_v33, %v5557_v24 }
 0xe62   :  { %v5688_v43 = vpop.f32.mrf.mxu1 }
 0xe63   :  { %v5703_v28 = vadd.f32 %v5688_v43, %v5555_v53 }
 0xe64   :  { %v9957_v44 = vpop.f32.mrf.mxu1 }
 0xe65   :  { %v5706_v57 = vadd.f32 %v9957_v44, %v5558_v22 }
 0xe66   :  { %v5691_v23 = vpop.f32.mrf.mxu1 }
 0xe67   :  { %v5704_v20 = vadd.f32 %v5691_v23, %v5556_v39 }
 0xe7c   :  { %v9974_v29 = vpop.f32.mrf.mxu1 }
 0xe7e   :  { %v5762_v47 = vpop.f32.mrf.mxu1 }
 0xe80   :  { %v9975_v7 = vpop.f32.mrf.mxu1 }
 0xe81   :  { %v5778_v62 = vpack.c.bf16 %v9975_v7, %v9974_v29 }
 0xe82   :  { %v5765_v56 = vpop.f32.mrf.mxu1 }
 0xe83   :  { %v5777_v3 = vpack.c.bf16 %v5765_v56, %v5762_v47  ;;  %v10687_v47 = vld [vmem:[%s13968_s28 + $0x80] sm:$0xff]  }
 0xe85   :  { %9980 = vmatprep.mubr.msk.bf16.mxu0 %vm1370_vm4, %v5777_v3 }
 0xe86   :  { %9981 = vmatmul.mubr.msk.bf16.vlgmr.msra.gmra.mxu0 %vm1370_vm4, %v5778_v62 }
 0xe87   :  { %9985 = vmatpush3.bf16.msra.mxu0 %v13305_v45  ;;  %9998 = vmatprep.mubr.msk.bf16.mxu0 %vm5134_vm5, %v10677_v51 }
 0xe88   :  { %9986 = vmatprep.subr.bf16.mxu0 %v13294_v34 }
 0xe8b   :  { %9987 = vmatpush3.bf16.msra.mxu0 %v13294_v34 }
 0xe8c   :  { %9988 = vmatprep.subr.bf16.mxu0 %v13288_v25 }
 0xe8f   :  { %9989 = vmatpush3.bf16.msra.mxu0 %v13288_v25 }
 0xe90   :  { %9990 = vmatprep.subr.bf16.mxu0 %v13282_v0 }
 0xe93   :  { %9991 = vmatpush3.bf16.msra.mxu0 %v13282_v0 }
 0xe94   :  { %9992 = vmatprep.subr.bf16.mxu0 %v13276_v21 }
 0xe97   :  { %9993 = vmatpush3.bf16.msra.mxu0 %v13276_v21 }
 0xe98   :  { %9994 = vmatprep.subr.bf16.mxu0 %v13270_v31 }
 0xe9b   :  { %9995 = vmatpush3.bf16.msra.mxu0 %v13270_v31 }
 0xe9c   :  { %9996 = vmatprep.subr.bf16.mxu0 %v13264_v6 }
 0xe9f   :  { %9997 = vmatpush3.bf16.msra.mxu0 %v13264_v6 }
 0xea0   :  { %10028 = vmatprep.subr.bf16.mxu0 %v10679_v60 }
 0xea2   :  { %9999 = vmatmul.mubr.msk.bf16.vlgmr.msra.gmra.mxu0 %vm5134_vm5, %v10678_v1 }
 0xea3   :  { %10029 = vmatpush3.bf16.msra.mxu0 %v10679_v60 }
 0xea4   :  { %10030 = vmatprep.subr.bf16.mxu0 %v10680_v17 }
 0xea7   :  { %10031 = vmatpush3.bf16.msra.mxu0 %v10680_v17 }
 0xea8   :  { %10245 = vmatprep.subr.msk.bf16.mxu0 %vm5141_vm6, %v13297_v42 }
 0xf46   :  { %v9982_v2 = vpop.f32.mrf.mxu0 }
 0xf47   :  { %v5853_v41 = vadd.f32 %v9982_v2, %v5705_v9 }
 0xf48   :  { %v5836_v18 = vpop.f32.mrf.mxu0 }
 0xf49   :  { %v5851_v5 = vadd.f32 %v5836_v18, %v5703_v28 }
 0xf4a   :  { %v9983_v40 = vpop.f32.mrf.mxu0 }
 0xf4b   :  { %v5854_v49 = vadd.f32 %v9983_v40, %v5706_v57  ;;  %v10692_v40 = vld [vmem:[%s13816_s9 + $0x38] sm:$0xff]  }
 0xf4c   :  { %v5839_v27 = vpop.f32.mrf.mxu0 }
 0xf4d   :  { %v5852_v52 = vadd.f32 %v5839_v27, %v5704_v20  ;;  %v10694_v27 = vld [vmem:[%s13816_s9 + $0x30] sm:$0xff]  }
 0xf62   :  { %v10000_v48 = vpop.f32.mrf.mxu0 }
 0xf64   :  { %v5910_v55 = vpop.f32.mrf.mxu0 }
 0xf66   :  { %v10001_v37 = vpop.f32.mrf.mxu0 }
 0xf67   :  { %v5926_v10 = vpack.c.bf16 %v10001_v37, %v10000_v48  ;;  %v8541_v48 = vld [vmem:[%s13815_s8] ss:$0 sm:$0xff] }
 0xf68   :  { %v5913_v14 = vpop.f32.mrf.mxu0 }
 0xf69   :  { %v5925_v30 = vpack.c.bf16 %v5913_v14, %v5910_v55 }
 0xf6b   :  { %10006 = vmatprep.mubr.msk.bf16.mxu1 %vm1370_vm4, %v5925_v30 }
 0xf6c   :  { %10007 = vmatmul.mubr.msk.bf16.vlgmr.msra.gmra.mxu1 %vm1370_vm4, %v5926_v10 }
 0xf6d   :  { %10011 = vmatpush3.bf16.msra.mxu1 %v13305_v45  ;;  %10024 = vmatprep.mubr.msk.bf16.mxu1 %vm5134_vm5, %v10681_v36 }
 0xf6e   :  { %10012 = vmatprep.subr.bf16.mxu1 %v13294_v34 }
 0xf71   :  { %10013 = vmatpush3.bf16.msra.mxu1 %v13294_v34 }
 0xf72   :  { %10014 = vmatprep.subr.bf16.mxu1 %v13288_v25 }
 0xf75   :  { %10015 = vmatpush3.bf16.msra.mxu1 %v13288_v25 }
 0xf76   :  { %10016 = vmatprep.subr.bf16.mxu1 %v13282_v0 }
 0xf79   :  { %10017 = vmatpush3.bf16.msra.mxu1 %v13282_v0 }
 0xf7a   :  { %10018 = vmatprep.subr.bf16.mxu1 %v13276_v21 }
 0xf7d   :  { %10019 = vmatpush3.bf16.msra.mxu1 %v13276_v21 }
 0xf7e   :  { %10020 = vmatprep.subr.bf16.mxu1 %v13270_v31 }
 0xf81   :  { %10021 = vmatpush3.bf16.msra.mxu1 %v13270_v31 }
 0xf82   :  { %10022 = vmatprep.subr.bf16.mxu1 %v13264_v6 }
 0xf85   :  { %10023 = vmatpush3.bf16.msra.mxu1 %v13264_v6 }
 0xf86   :  { %10054 = vmatprep.subr.bf16.mxu1 %v10683_v46 }
 0xf88   :  { %10025 = vmatmul.mubr.msk.bf16.vlgmr.msra.gmra.mxu1 %vm5134_vm5, %v10682_v61 }
 0xf89   :  { %10055 = vmatpush3.bf16.msra.mxu1 %v10683_v46 }
 0xf8a   :  { %10056 = vmatprep.subr.bf16.mxu1 %v10684_v32 }
 0xf8d   :  { %10057 = vmatpush3.bf16.msra.mxu1 %v10684_v32 }
 0xf8e   :  { %10246 = vmatprep.subr.msk.bf16.mxu1 %vm5141_vm6, %v13297_v42  ;;  %v10686_v42 = vld [vmem:[%s13968_s28 + $0x78] sm:$0xff]  }
0x102c   :  { %v10008_v59 = vpop.f32.mrf.mxu1 }
0x102d   :  { %v6001_v24 = vadd.f32 %v10008_v59, %v5853_v41 }
0x102e   :  { %v5984_v4 = vpop.f32.mrf.mxu1 }
0x102f   :  { %v5999_v53 = vadd.f32 %v5984_v4, %v5851_v5  ;;  %v10691_v5 = vld [vmem:[%s13816_s9 + $0x18] sm:$0xff]  }
0x1030   :  { %v10009_v50 = vpop.f32.mrf.mxu1 }
0x1031   :  { %v6002_v38 = vadd.f32 %v10009_v50, %v5854_v49  ;;  %v10693_v49 = vld [vmem:[%s13816_s9 + $0x10] sm:$0xff]  }
0x1032   :  { %v5987_v22 = vpop.f32.mrf.mxu1 }
0x1033   :  { %v6000_v26 = vadd.f32 %v5987_v22, %v5852_v52  ;;  %v10695_v22 = vld [vmem:[%s13816_s9 + $0x8] sm:$0xff]  }
0x1048   :  { %v10026_v39 = vpop.f32.mrf.mxu1 }
0x104a   :  { %v6058_v15 = vpop.f32.mrf.mxu1 }
0x104c   :  { %v10027_v12 = vpop.f32.mrf.mxu1 }
0x104d   :  { %v6074_v13 = vpack.c.bf16 %v10027_v12, %v10026_v39 }
0x104e   :  { %v6061_v8 = vpop.f32.mrf.mxu1 }
0x104f   :  { %v6073_v58 = vpack.c.bf16 %v6061_v8, %v6058_v15  ;;  %v10696_v15 = vld [vmem:[%s13816_s9 + $0x58] sm:$0xff]  }
0x1051   :  { %10032 = vmatprep.mubr.msk.bf16.mxu0 %vm1370_vm4, %v6073_v58  ;;  %v10697_v58 = vld [vmem:[%s13816_s9] sm:$0xff]  }
0x1052   :  { %10033 = vmatmul.mubr.msk.bf16.vlgmr.msra.gmra.mxu0 %vm1370_vm4, %v6074_v13 }
0x1053   :  { %10037 = vmatpush3.bf16.msra.mxu0 %v13305_v45  ;;  %10050 = vmatprep.mubr.msk.bf16.mxu0 %vm5134_vm5, %v10685_v16  ;;  %v10698_v16 = vld [vmem:[%s13816_s9 + $0x50] sm:$0xff]  }
0x1054   :  { %10038 = vmatprep.subr.bf16.mxu0 %v13294_v34 }
0x1057   :  { %10039 = vmatpush3.bf16.msra.mxu0 %v13294_v34 }
0x1058   :  { %10040 = vmatprep.subr.bf16.mxu0 %v13288_v25 }
0x105b   :  { %10041 = vmatpush3.bf16.msra.mxu0 %v13288_v25 }
0x105c   :  { %10042 = vmatprep.subr.bf16.mxu0 %v13282_v0 }
0x105f   :  { %10043 = vmatpush3.bf16.msra.mxu0 %v13282_v0 }
0x1060   :  { %10044 = vmatprep.subr.bf16.mxu0 %v13276_v21 }
0x1063   :  { %10045 = vmatpush3.bf16.msra.mxu0 %v13276_v21 }
0x1064   :  { %10046 = vmatprep.subr.bf16.mxu0 %v13270_v31 }
0x1067   :  { %10047 = vmatpush3.bf16.msra.mxu0 %v13270_v31 }
0x1068   :  { %10048 = vmatprep.subr.bf16.mxu0 %v13264_v6 }
0x106b   :  { %10049 = vmatpush3.bf16.msra.mxu0 %v13264_v6 }
0x106e   :  { %10051 = vmatmul.mubr.msk.bf16.vlgmr.msra.gmra.mxu0 %vm5134_vm5, %v10686_v42 }
0x1112   :  { %v10034_v35 = vpop.f32.mrf.mxu0 }
0x1113   :  { %v6149_v54 = vadd.f32 %v10034_v35, %v6001_v24  ;;  %v10699_v35 = vld [vmem:[%s13816_s9 + $0x28] sm:$0xff]  }
0x1114   :  { %v6132_v63 = vpop.f32.mrf.mxu0 }
0x1115   :  { %v6147_v19 = vadd.f32 %v6132_v63, %v5999_v53 }
0x1116   :  { %v10035_v33 = vpop.f32.mrf.mxu0 }
0x1117   :  { %v6150_v9 = vadd.f32 %v10035_v33, %v6002_v38  ;;  %v10701_v33 = vld [vmem:[%s13816_s9 + $0x20] sm:$0xff]  }
0x1118   :  { %v6135_v43 = vpop.f32.mrf.mxu0 }
0x1119   :  { %v6148_v28 = vadd.f32 %v6135_v43, %v6000_v26 }
0x112e   :  { %v10052_v44 = vpop.f32.mrf.mxu0 }
0x1130   :  { %v6206_v57 = vpop.f32.mrf.mxu0 }
0x1132   :  { %v10053_v23 = vpop.f32.mrf.mxu0 }
0x1133   :  { %v6222_v7 = vpack.c.bf16 %v10053_v23, %v10052_v44  ;;  %v10703_v44 = vld [vmem:[%s13816_s9 + $0x48] sm:$0xff]  }
0x1134   :  { %v6209_v20 = vpop.f32.mrf.mxu0 }
0x1135   :  { %v6221_v29 = vpack.c.bf16 %v6209_v20, %v6206_v57  ;;  %v10704_v57 = vld [vmem:[%s13816_s9 + $0x98] sm:$0xff]  }
0x1137   :  { %10058 = vmatprep.mubr.msk.bf16.mxu1 %vm1370_vm4, %v6221_v29  ;;  %v10705_v29 = vld [vmem:[%s13816_s9 + $0x40] sm:$0xff]  }
0x1138   :  { %10059 = vmatmul.mubr.msk.bf16.vlgmr.msra.gmra.mxu1 %vm1370_vm4, %v6222_v7 }
0x1139   :  { %10063 = vmatpush3.bf16.msra.mxu1 %v13305_v45  ;;  %10076 = vmatprep.mubr.msk.bf16.mxu1 %vm5134_vm5, %v10687_v47  ;;  %v10706_v47 = vld [vmem:[%s13816_s9 + $0x90] sm:$0xff]  }
0x113a   :  { %10064 = vmatprep.subr.bf16.mxu1 %v13294_v34 }
0x113d   :  { %10065 = vmatpush3.bf16.msra.mxu1 %v13294_v34  ;;  %v10688_v34 = vld [vmem:[%s13968_s28 + $0x88] sm:$0xff]  }
0x113e   :  { %10066 = vmatprep.subr.bf16.mxu1 %v13288_v25 }
0x1141   :  { %10067 = vmatpush3.bf16.msra.mxu1 %v13288_v25 }
0x1142   :  { %10068 = vmatprep.subr.bf16.mxu1 %v13282_v0 }
0x1145   :  { %10069 = vmatpush3.bf16.msra.mxu1 %v13282_v0 }
0x1146   :  { %10070 = vmatprep.subr.bf16.mxu1 %v13276_v21 }
0x1149   :  { %10071 = vmatpush3.bf16.msra.mxu1 %v13276_v21  ;;  %v10689_v21 = vld [vmem:[%s13814_s7 + $0x88] sm:$0xff]  }
0x114a   :  { %10072 = vmatprep.subr.bf16.mxu1 %v13270_v31  ;;  %10080 = vmatprep.subr.bf16.mxu0 %v10689_v21 }
0x114b   :  { %10081 = vmatpush3.bf16.msra.mxu0 %v10689_v21  ;;  %v10707_v21 = vld [vmem:[%s13816_s9 + $0x68] sm:$0xff]  }
0x114d   :  { %10073 = vmatpush3.bf16.msra.mxu1 %v13270_v31  ;;  %v10690_v31 = vld [vmem:[%s13814_s7 + $0x80] sm:$0xff]  }
0x114e   :  { %10074 = vmatprep.subr.bf16.mxu1 %v13264_v6  ;;  %10082 = vmatprep.subr.bf16.mxu0 %v10690_v31 }
0x114f   :  { %10083 = vmatpush3.bf16.msra.mxu0 %v10690_v31  ;;  %v10708_v31 = vld [vmem:[%s13816_s9 + $0xb8] sm:$0xff]  }
0x1150   :  { %10088 = vmatprep.subr.bf16.mxu0 %v13853_v11 }
0x1151   :  { %10075 = vmatpush3.bf16.msra.mxu1 %v13264_v6 }
0x1152   :  { %10112 = vmatprep.subr.bf16.mxu1 %v13853_v11 }
0x1154   :  { %10077 = vmatmul.mubr.msk.bf16.vlgmr.msra.gmra.mxu1 %vm5134_vm5, %v10688_v34 }
0x1155   :  { %10116 = vmatprep.mubr.msk.bf16.mxu1 %vm10755_vm0, %v13853_v11  ;;  %10113 = vmatpush3.bf16.msra.mxu1 %v10692_v40  ;;  %v10716_v40 = vld [vmem:[%s13816_s9 + $0xf8] sm:$0xff]  }
0x1156   :  { %10114 = vmatprep.subr.bf16.mxu1 %v13853_v11 }
0x1159   :  { %10115 = vmatpush3.bf16.msra.mxu1 %v10694_v27 }
0x115a   :  { %10128 = vmatprep.subr.bf16.mxu1 %v13853_v11 }
0x11f8   :  { %v10060_v6 = vpop.f32.mrf.mxu1 }
0x11f9   :  { %v6297_v0 = vadd.f32 %v10060_v6, %v6149_v54  ;;  %v10700_v54 = vld [vmem:[%s13816_s9 + $0x78] sm:$0xff]  }
0x11fa   :  { %v6280_v25 = vpop.f32.mrf.mxu1 }
0x11fb   :  { %v6295_v45 = vadd.f32 %v6280_v25, %v6147_v19  ;;  %v10709_v25 = vld [vmem:[%s13816_s9 + $0x60] sm:$0xff]  }
0x11fc   :  { %v10061_v56 = vpop.f32.mrf.mxu1 }
0x11fd   :  { %v6298_v3 = vadd.f32 %v10061_v56, %v6150_v9  ;;  %v10702_v9 = vld [vmem:[%s13816_s9 + $0x70] sm:$0xff]  }
0x11fe   :  { %v6283_v51 = vpop.f32.mrf.mxu1 }
0x11ff   :  { %v6296_v62 = vadd.f32 %v6283_v51, %v6148_v28  ;;  %v10711_v51 = vld [vmem:[%s13816_s9 + $0x88] sm:$0xff]  }
0x1214   :  { %v10078_v60 = vpop.f32.mrf.mxu1 }
0x1216   :  { %v6354_v1 = vpop.f32.mrf.mxu1 }
0x1218   :  { %v10079_v17 = vpop.f32.mrf.mxu1 }
0x1219   :  { %v6370_v18 = vpack.c.bf16 %v10079_v17, %v10078_v60  ;;  %v10713_v17 = vld [vmem:[%s13816_s9 + $0x80] sm:$0xff]  }
0x121a   :  { %v6357_v2 = vpop.f32.mrf.mxu1 }
0x121b   :  { %v6369_v41 = vpack.c.bf16 %v6357_v2, %v6354_v1  ;;  %v10714_v2 = vld [vmem:[%s13816_s9 + $0xd0] sm:$0xff]  }
0x121d   :  { %10084 = vmatprep.mubr.msk.bf16.mxu0 %vm1370_vm4, %v6369_v41 }
0x121e   :  { %10085 = vmatmul.mubr.msk.bf16.vlgmr.msra.gmra.mxu0 %vm1370_vm4, %v6370_v18 }
0x121f   :  { %10092 = vmatprep.mubr.msk.bf16.mxu0 %vm10755_vm0, %v13853_v11  ;;  %10089 = vmatpush3.bf16.msra.mxu0 %v10691_v5  ;;  %v10715_v5 = vld [vmem:[%s13816_s9 + $0xa8] sm:$0xff]  }
0x1220   :  { %10090 = vmatprep.subr.bf16.mxu0 %v13853_v11 }
0x1223   :  { %10091 = vmatpush3.bf16.msra.mxu0 %v10693_v49 }
0x1224   :  { %10096 = vmatprep.subr.bf16.mxu0 %v13853_v11 }
0x12de   :  { %v10086_v52 = vpop.f32.mrf.mxu0 }
0x12df   :  { %v6445_v55 = vadd.f32 %v10086_v52, %v6297_v0  ;;  %v10717_v52 = vld [vmem:[%s13816_s9 + $0xa0] sm:$0xff]  }
0x12e0   :  { %v6428_v37 = vpop.f32.mrf.mxu0 }
0x12e1   :  { %v6456_v14 = vadd.f32 %v8541_v48, %v6445_v55  ;;  %v6443_v30 = vadd.f32 %v6428_v37, %v6295_v45  ;;  %v10710_v45 = vld [vmem:[%s13816_s9 + $0xb0] sm:$0xff]  }
0x12e2   :  { %v10087_v36 = vpop.f32.mrf.mxu0 }
0x12e3   :  { %v6460_v10 = vmax.f32 %v6456_v14, 0.0  ;;  %v6454_v46 = vadd.f32 %v8541_v48, %v6443_v30  ;;  %v6446_v61 = vadd.f32 %v10087_v36, %v6298_v3  ;;  %v10719_v14 = vld [vmem:[%s13816_s9 + $0xc8] sm:$0xff]  }
0x12e4   :  { %v6431_v32 = vpop.f32.mrf.mxu0 }
0x12e5   :  { %6464 = vst.msk [vmem:[#allocation2 + $0x10] sm:$0xff] %vm1370_vm4, %v6460_v10  ;;  %v6458_v59 = vmax.f32 %v6454_v46, 0.0  ;;  %v6457_v24 = vadd.f32 %v8541_v48, %v6446_v61  ;;  %v6444_v4 = vadd.f32 %v6431_v32, %v6296_v62  ;;  %v10712_v62 = vld [vmem:[%s13816_s9 + $0xd8] sm:$0xff]   ;;  %v10720_v10 = vld [vmem:[%s13816_s9 + $0xc0] sm:$0xff]   ;;  %v10721_v61 = vld [vmem:[%s13816_s9 + $0xe8] sm:$0xff]  }
0x12e7   :  { %6462 = vst.msk [vmem:[#allocation2] sm:$0xff] %vm1370_vm4, %v6458_v59  ;;  %v6461_v53 = vmax.f32 %v6457_v24, 0.0  ;;  %v6455_v50 = vadd.f32 %v8541_v48, %v6444_v4  ;;  %v10718_v48 = vld [vmem:[%s13816_s9 + $0xf0] sm:$0xff]   ;;  %v10722_v59 = vld [vmem:[%s13816_s9 + $0xe0] sm:$0xff]  }
0x12e9   :  { %6465 = vst.msk [vmem:[#allocation2 + $0x18] sm:$0xff] %vm1370_vm4, %v6461_v53  ;;  %v6459_v38 = vmax.f32 %v6455_v50, 0.0  ;;  %v10723_v53 = vld [vmem:[%s13818_s11] sm:$0xff]  }
0x12eb   :  { %6463 = vst.msk [vmem:[#allocation2 + $0x8] sm:$0xff] %vm1370_vm4, %v6459_v38 }
0x12ec   :  { %v7030_v34 = vld [vmem:[#allocation2 + $0x12] sm:$0x3]  ;;  %v7156_v3 = vld [vmem:[#allocation2 + $0x16] sm:$0x3]  ;;  %v6967_v41 = vld [vmem:[#allocation2 + $0x10] sm:$0x3] }
0x12ed   :  { %v7031_v0 = vpack.c.bf16 %v7030_v34, %v7030_v34  ;;  %v7157_v1 = vpack.c.bf16 %v7156_v3, %v7156_v3  ;;  %v6968_v49 = vpack.c.bf16 %v6967_v41, %v6967_v41  ;;  %v7093_v55 = vld [vmem:[#allocation2 + $0x14] sm:$0x3] }
0x12ee   :  { %v6472_v26 = vld [vmem:[#allocation2 + $0x2] sm:$0x3]  ;;  %v6652_v39 = vld [vmem:[#allocation2 + $0x6] sm:$0x3]  ;;  %v6466_v13 = vld [vmem:[#allocation2] sm:$0x3]  ;;  %v7094_v30 = vpack.c.bf16 %v7093_v55, %v7093_v55 }
0x12ef   :  { %v6473_v12 = vpack.c.bf16 %v6472_v26, %v6472_v26  ;;  %v6653_v8 = vpack.c.bf16 %v6652_v39, %v6652_v39  ;;  %v6467_v63 = vpack.c.bf16 %v6466_v13, %v6466_v13  ;;  %v6589_v43 = vld [vmem:[#allocation2 + $0x4] sm:$0x3] }
0x12f0   :  { %v6590_v23 = vpack.c.bf16 %v6589_v43, %v6589_v43  ;;  %v7282_v18 = vld [vmem:[#allocation2 + $0x1a] sm:$0x3]  ;;  %v7408_v37 = vld [vmem:[#allocation2 + $0x1e] sm:$0x3]  ;;  %v7219_v46 = vld [vmem:[#allocation2 + $0x18] sm:$0x3] }
0x12f1   :  { %10093 = vmatmul.mubr.msk.bf16.vlgmr.msra.gmra.mxu0 %vm1370_vm4, %v6473_v12  ;;  %10117 = vmatmul.mubr.msk.bf16.vlgmr.msra.gmra.mxu1 %vm1370_vm4, %v6653_v8  ;;  %v7283_v27 = vpack.c.bf16 %v7282_v18, %v7282_v18  ;;  %v7409_v36 = vpack.c.bf16 %v7408_v37, %v7408_v37  ;;  %v7220_v32 = vpack.c.bf16 %v7219_v46, %v7219_v46  ;;  %v7345_v24 = vld [vmem:[#allocation2 + $0x1c] sm:$0x3] }
0x12f2   :  { %10097 = vmatpush3.bf16.msra.mxu0 %v10695_v22  ;;  %10129 = vmatpush3.bf16.msra.mxu1 %v10696_v15  ;;  %v6778_v42 = vld [vmem:[#allocation2 + $0xa] sm:$0x3]  ;;  %v6904_v28 = vld [vmem:[#allocation2 + $0xe] sm:$0x3]  ;;  %v6715_v7 = vld [vmem:[#allocation2 + $0x8] sm:$0x3]  ;;  %v7346_v4 = vpack.c.bf16 %v7345_v24, %v7345_v24 }
0x12f3   :  { %10098 = vmatprep.subr.bf16.mxu0 %v13853_v11  ;;  %10130 = vmatprep.subr.bf16.mxu1 %v13853_v11  ;;  %v6779_v19 = vpack.c.bf16 %v6778_v42, %v6778_v42  ;;  %v6905_v20 = vpack.c.bf16 %v6904_v28, %v6904_v28  ;;  %v6716_v6 = vpack.c.bf16 %v6715_v7, %v6715_v7  ;;  %v6841_v56 = vld [vmem:[#allocation2 + $0xc] sm:$0x3] }
0x12f4   :  { %10100 = vmatprep.mubr.msk.bf16.mxu0 %vm10755_vm0, %v13853_v11  ;;  %10132 = vmatprep.mubr.msk.bf16.mxu1 %vm10755_vm0, %v13853_v11  ;;  %v6842_v60 = vpack.c.bf16 %v6841_v56, %v6841_v56 }
0x12f6   :  { %10099 = vmatpush3.bf16.msra.mxu0 %v10697_v58  ;;  %10131 = vmatpush3.bf16.msra.mxu1 %v10698_v16 }
0x12f7   :  { %10104 = vmatprep.subr.bf16.mxu0 %v13853_v11  ;;  %10144 = vmatprep.subr.bf16.mxu1 %v13853_v11 }
0x12f9   :  { %10101 = vmatmul.mubr.msk.bf16.vlgmr.msra.gmra.mxu0 %vm1370_vm4, %v6467_v63  ;;  %10133 = vmatmul.mubr.msk.bf16.vlgmr.msra.gmra.mxu1 %vm1370_vm4, %v6779_v19 }
0x12fa   :  { %10105 = vmatpush3.bf16.msra.mxu0 %v10699_v35  ;;  %10145 = vmatpush3.bf16.msra.mxu1 %v10700_v54 }
0x12fb   :  { %10106 = vmatprep.subr.bf16.mxu0 %v13853_v11  ;;  %10146 = vmatprep.subr.bf16.mxu1 %v13853_v11 }
0x12fc   :  { %10108 = vmatprep.mubr.msk.bf16.mxu0 %vm10755_vm0, %v13853_v11  ;;  %10148 = vmatprep.mubr.msk.bf16.mxu1 %vm10755_vm0, %v13853_v11 }
0x12fe   :  { %10107 = vmatpush3.bf16.msra.mxu0 %v10701_v33  ;;  %10147 = vmatpush3.bf16.msra.mxu1 %v10702_v9 }
0x12ff   :  { %10120 = vmatprep.subr.bf16.mxu0 %v13853_v11  ;;  %10160 = vmatprep.subr.bf16.mxu1 %v13853_v11 }
0x1301   :  { %10109 = vmatmul.mubr.msk.bf16.vlgmr.msra.gmra.mxu0 %vm1370_vm4, %v6590_v23  ;;  %10149 = vmatmul.mubr.msk.bf16.vlgmr.msra.gmra.mxu1 %vm1370_vm4, %v6905_v20 }
0x1302   :  { %10121 = vmatpush3.bf16.msra.mxu0 %v10703_v44  ;;  %10161 = vmatpush3.bf16.msra.mxu1 %v10704_v57 }
0x1303   :  { %10122 = vmatprep.subr.bf16.mxu0 %v13853_v11  ;;  %10162 = vmatprep.subr.bf16.mxu1 %v13853_v11 }
0x1304   :  { %10124 = vmatprep.mubr.msk.bf16.mxu0 %vm10755_vm0, %v13853_v11  ;;  %10164 = vmatprep.mubr.msk.bf16.mxu1 %vm10755_vm0, %v13853_v11 }
0x1306   :  { %10123 = vmatpush3.bf16.msra.mxu0 %v10705_v29  ;;  %10163 = vmatpush3.bf16.msra.mxu1 %v10706_v47 }
0x1307   :  { %10136 = vmatprep.subr.bf16.mxu0 %v13853_v11  ;;  %10176 = vmatprep.subr.bf16.mxu1 %v13853_v11 }
0x1309   :  { %10125 = vmatmul.mubr.msk.bf16.vlgmr.msra.gmra.mxu0 %vm1370_vm4, %v6716_v6  ;;  %10165 = vmatmul.mubr.msk.bf16.vlgmr.msra.gmra.mxu1 %vm1370_vm4, %v7031_v0 }
0x130a   :  { %10137 = vmatpush3.bf16.msra.mxu0 %v10707_v21  ;;  %10177 = vmatpush3.bf16.msra.mxu1 %v10708_v31 }
0x130b   :  { %10138 = vmatprep.subr.bf16.mxu0 %v13853_v11  ;;  %10178 = vmatprep.subr.bf16.mxu1 %v13853_v11 }
0x130c   :  { %10140 = vmatprep.mubr.msk.bf16.mxu0 %vm10755_vm0, %v13853_v11  ;;  %10180 = vmatprep.mubr.msk.bf16.mxu1 %vm10755_vm0, %v13853_v11 }
0x130e   :  { %10139 = vmatpush3.bf16.msra.mxu0 %v10709_v25  ;;  %10179 = vmatpush3.bf16.msra.mxu1 %v10710_v45 }
0x130f   :  { %10152 = vmatprep.subr.bf16.mxu0 %v13853_v11  ;;  %10192 = vmatprep.subr.bf16.mxu1 %v13853_v11 }
0x1311   :  { %10141 = vmatmul.mubr.msk.bf16.vlgmr.msra.gmra.mxu0 %vm1370_vm4, %v6842_v60  ;;  %10181 = vmatmul.mubr.msk.bf16.vlgmr.msra.gmra.mxu1 %vm1370_vm4, %v7157_v1 }
0x1312   :  { %10153 = vmatpush3.bf16.msra.mxu0 %v10711_v51  ;;  %10193 = vmatpush3.bf16.msra.mxu1 %v10712_v62 }
0x1313   :  { %10154 = vmatprep.subr.bf16.mxu0 %v13853_v11  ;;  %10194 = vmatprep.subr.bf16.mxu1 %v13853_v11 }
0x1314   :  { %10156 = vmatprep.mubr.msk.bf16.mxu0 %vm10755_vm0, %v13853_v11  ;;  %10196 = vmatprep.mubr.msk.bf16.mxu1 %vm10755_vm0, %v13853_v11 }
0x1316   :  { %10155 = vmatpush3.bf16.msra.mxu0 %v10713_v17  ;;  %10195 = vmatpush3.bf16.msra.mxu1 %v10714_v2 }
0x1317   :  { %10168 = vmatprep.subr.bf16.mxu0 %v13853_v11  ;;  %10208 = vmatprep.subr.bf16.mxu1 %v13853_v11 }
0x1319   :  { %10157 = vmatmul.mubr.msk.bf16.vlgmr.msra.gmra.mxu0 %vm1370_vm4, %v6968_v49  ;;  %10197 = vmatmul.mubr.msk.bf16.vlgmr.msra.gmra.mxu1 %vm1370_vm4, %v7283_v27 }
0x131a   :  { %10169 = vmatpush3.bf16.msra.mxu0 %v10715_v5  ;;  %10209 = vmatpush3.bf16.msra.mxu1 %v10716_v40 }
0x131b   :  { %10170 = vmatprep.subr.bf16.mxu0 %v13853_v11  ;;  %10210 = vmatprep.subr.bf16.mxu1 %v13853_v11 }
0x131c   :  { %10172 = vmatprep.mubr.msk.bf16.mxu0 %vm10755_vm0, %v13853_v11  ;;  %10212 = vmatprep.mubr.msk.bf16.mxu1 %vm10755_vm0, %v13853_v11 }
0x131e   :  { %10171 = vmatpush3.bf16.msra.mxu0 %v10717_v52  ;;  %10211 = vmatpush3.bf16.msra.mxu1 %v10718_v48 }
0x131f   :  { %10184 = vmatprep.subr.bf16.mxu0 %v13853_v11  ;;  %10222 = vmatprep.subr.bf16.mxu1 %v13853_v11 }
0x1321   :  { %10173 = vmatmul.mubr.msk.bf16.vlgmr.msra.gmra.mxu0 %vm1370_vm4, %v7094_v30  ;;  %10213 = vmatmul.mubr.msk.bf16.vlgmr.msra.gmra.mxu1 %vm1370_vm4, %v7409_v36 }
0x1322   :  { %10185 = vmatpush3.bf16.msra.mxu0 %v10719_v14  ;;  %10188 = vmatprep.mubr.msk.bf16.mxu0 %vm10755_vm0, %v13853_v11 }
0x1323   :  { %10186 = vmatprep.subr.bf16.mxu0 %v13853_v11  ;;  %10226 = vmatprep.mubr.msk.bf16.mxu1 %vm10755_vm0, %v13853_v11 }
0x1326   :  { %10187 = vmatpush3.bf16.msra.mxu0 %v10720_v10 }
0x1327   :  { %10200 = vmatprep.subr.bf16.mxu0 %v13853_v11 }
0x1329   :  { %10189 = vmatmul.mubr.msk.bf16.vlgmr.msra.gmra.mxu0 %vm1370_vm4, %v7220_v32 }
0x132a   :  { %10201 = vmatpush3.bf16.msra.mxu0 %v10721_v61  ;;  %10204 = vmatprep.mubr.msk.bf16.mxu0 %vm10755_vm0, %v13853_v11 }
0x132b   :  { %10202 = vmatprep.subr.bf16.mxu0 %v13853_v11 }
0x132e   :  { %10203 = vmatpush3.bf16.msra.mxu0 %v10722_v59 }
0x132f   :  { %10216 = vmatprep.subr.bf16.mxu0 %v13853_v11 }
0x1331   :  { %10205 = vmatmul.mubr.msk.bf16.vlgmr.msra.gmra.mxu0 %vm1370_vm4, %v7346_v4 }
0x1332   :  { %10218 = vmatprep.mubr.msk.bf16.mxu0 %vm10755_vm0, %v13853_v11  ;;  %10217 = vmatpush3.bf16.msra.mxu0 %v10723_v53 }
0x1333   :  { %10230 = vmatprep.subr.bf16.mxu0 %v13853_v11 }
0x13b1   :  { %v6528_v50 = vpop.f32.mrf.mxu0  ;;  %v6708_v38 = vpop.f32.mrf.mxu1 }
0x13b3   :  { %v10094_v22 = vpop.f32.mrf.mxu0  ;;  %v10118_v26 = vpop.f32.mrf.mxu1 }
0x13b5   :  { %v6531_v39 = vpop.f32.mrf.mxu0  ;;  %v6711_v15 = vpop.f32.mrf.mxu1 }
0x13b7   :  { %v10095_v12 = vpop.f32.mrf.mxu0  ;;  %v10119_v8 = vpop.f32.mrf.mxu1 }
0x13b9   :  { %v6583_v58 = vpop.f32.mrf.mxu0  ;;  %v6834_v16 = vpop.f32.mrf.mxu1 }
0x13ba   :  { %v6584_v21 = vadd.f32 %v6583_v58, %v6528_v50 }
0x13bb   :  { %v10102_v13 = vpop.f32.mrf.mxu0  ;;  %v10134_v42 = vpop.f32.mrf.mxu1 }
0x13bd   :  { %v6586_v35 = vpop.f32.mrf.mxu0  ;;  %v6837_v54 = vpop.f32.mrf.mxu1 }
0x13be   :  { %v8650_v35 = vld [vmem:[%s13817_s10] ss:$0 sm:$0xff] }
0x13bf   :  { %v10103_v63 = vpop.f32.mrf.mxu0  ;;  %v10135_v19 = vpop.f32.mrf.mxu1 }
0x13c1   :  { %v6645_v33 = vpop.f32.mrf.mxu0  ;;  %v6960_v9 = vpop.f32.mrf.mxu1 }
0x13c2   :  { %v6651_v0 = vadd.f32 %v6645_v33, %v6584_v21 }
0x13c3   :  { %v10110_v43 = vpop.f32.mrf.mxu0  ;;  %v10150_v28 = vpop.f32.mrf.mxu1 }
0x13c4   :  { %v6714_v51 = vadd.f32 %v6708_v38, %v6651_v0  ;;  %v10727_v0 = vld [vmem:[%s13822_s15] sm:$0xff]  }
0x13c5   :  { %v6648_v44 = vpop.f32.mrf.mxu0  ;;  %v6963_v57 = vpop.f32.mrf.mxu1 }
0x13c6   :  { %v10724_v44 = vld [vmem:[%s13820_s13 + $0x8] sm:$0xff]   ;;  %v10725_v57 = vld [vmem:[%s13820_s13] sm:$0xff]  }
0x13c7   :  { %v10111_v23 = vpop.f32.mrf.mxu0  ;;  %v10151_v20 = vpop.f32.mrf.mxu1  ;;  %10223 = vmatpush3.bf16.msra.mxu1 %v10724_v44 }
0x13c8   :  { %10224 = vmatprep.subr.bf16.mxu1 %v13853_v11  ;;  %v8651_v23 = vld [vmem:[%s13819_s12] ss:$0 sm:$0xff] }
0x13c9   :  { %v6771_v29 = vpop.f32.mrf.mxu0  ;;  %v7086_v47 = vpop.f32.mrf.mxu1 }
0x13ca   :  { %v6777_v1 = vadd.f32 %v6771_v29, %v6714_v51 }
0x13cb   :  { %v10126_v7 = vpop.f32.mrf.mxu0  ;;  %v10166_v34 = vpop.f32.mrf.mxu1  ;;  %10225 = vmatpush3.bf16.msra.mxu1 %v10725_v57 }
0x13cc   :  { %v6840_v5 = vadd.f32 %v6834_v16, %v6777_v1 }
0x13cd   :  { %v6774_v31 = vpop.f32.mrf.mxu0  ;;  %v7089_v6 = vpop.f32.mrf.mxu1 }
0x13ce   :  { %v10726_v6 = vld [vmem:[%s13822_s15 + $0x8] sm:$0xff]  }
0x13cf   :  { %v10127_v25 = vpop.f32.mrf.mxu0  ;;  %v10167_v45 = vpop.f32.mrf.mxu1 }
0x13d0   :  { %v8654_v25 = vld [vmem:[%s13821_s14] ss:$0 sm:$0xff]  ;;  %s10757_s14 = smov [#allocation3]  }
0x13d1   :  { %v6897_v56 = vpop.f32.mrf.mxu0  ;;  %v7212_v3 = vpop.f32.mrf.mxu1  ;;  %s7706_s15 = sshll.u32 %s10757_s14, 4  ;;  %s7707_s15 = int_to_ptr.vmem [resolvable:$true] %s7706_s15 }
0x13d2   :  { %v6903_v27 = vadd.f32 %v6897_v56, %v6840_v5  ;;  %p10737_p1 = scmp.lt.s32.totalorder %s7707_s15, %s7707_s15 }
0x13d3   :  { %v10142_v62 = vpop.f32.mrf.mxu0  ;;  %v10182_v60 = vpop.f32.mrf.mxu1 }
0x13d4   :  { %v6966_v14 = vadd.f32 %v6960_v9, %v6903_v27 }
0x13d5   :  { %v6900_v17 = vpop.f32.mrf.mxu0  ;;  %v7215_v2 = vpop.f32.mrf.mxu1 }
0x13d6   :  { %v7677_v17 = vlaneseq  ;;  %v8658_v2 = vld [vmem:[%s13823_s16] ss:$0 sm:$0xff]  ;;  %s10732_s16 = scalar_lea.vmem %s7707_s15, 32 }
0x13d7   :  { %v10143_v41 = vpop.f32.mrf.mxu0  ;;  %v10183_v18 = vpop.f32.mrf.mxu1  ;;  %p10733_p0 = scmp.ne.s32.totalorder %s7707_s15, %s10732_s16  ;;  %p10738_p2 = scmp.lt.s32.totalorder %s10732_s16, %s10732_s16 }
0x13d9   :  { %v7023_v40 = vpop.f32.mrf.mxu0  ;;  %v7338_v49 = vpop.f32.mrf.mxu1  ;;  %p10739_p3 = por %p10738_p2, %p10737_p1 }
0x13da   :  { %v7029_v10 = vadd.f32 %v7023_v40, %v6966_v14 }
0x13db   :  { %v10158_v52 = vpop.f32.mrf.mxu0  ;;  %v10198_v48 = vpop.f32.mrf.mxu1  ;;  %p10740_p4 = pnand %p10739_p3, %p10733_p0 }
0x13dc   :  { %v7092_v24 = vadd.f32 %v7086_v47, %v7029_v10 }
0x13dd   :  { %v7026_v55 = vpop.f32.mrf.mxu0  ;;  %v7341_v37 = vpop.f32.mrf.mxu1 }
0x13df   :  { %v10159_v30 = vpop.f32.mrf.mxu0  ;;  %v10199_v36 = vpop.f32.mrf.mxu1 }
0x13e1   :  { %v7149_v46 = vpop.f32.mrf.mxu0  ;;  %v7464_v61 = vpop.f32.mrf.mxu1 }
0x13e2   :  { %v7155_v50 = vadd.f32 %v7149_v46, %v7092_v24 }
0x13e3   :  { %v10174_v32 = vpop.f32.mrf.mxu0  ;;  %v10214_v59 = vpop.f32.mrf.mxu1 }
0x13e4   :  { %v7218_v39 = vadd.f32 %v7212_v3, %v7155_v50 }
0x13e5   :  { %v7152_v4 = vpop.f32.mrf.mxu0  ;;  %v7467_v53 = vpop.f32.mrf.mxu1 }
0x13e7   :  { %v10175_v38 = vpop.f32.mrf.mxu0  ;;  %v10215_v22 = vpop.f32.mrf.mxu1 }
0x13e9   :  { %v7275_v26 = vpop.f32.mrf.mxu0 }
0x13ea   :  { %v7281_v12 = vadd.f32 %v7275_v26, %v7218_v39 }
0x13eb   :  { %v10190_v15 = vpop.f32.mrf.mxu0 }
0x13ec   :  { %v7344_v16 = vadd.f32 %v7338_v49, %v7281_v12 }
0x13ed   :  { %v7278_v8 = vpop.f32.mrf.mxu0 }
0x13ef   :  { %v10191_v58 = vpop.f32.mrf.mxu0 }
0x13f1   :  { %v7401_v13 = vpop.f32.mrf.mxu0 }
0x13f2   :  { %v7407_v42 = vadd.f32 %v7401_v13, %v7344_v16 }
0x13f3   :  { %v10206_v54 = vpop.f32.mrf.mxu0 }
0x13f4   :  { %v7470_v63 = vadd.f32 %v7464_v61, %v7407_v42 }
0x13f5   :  { %v7404_v19 = vpop.f32.mrf.mxu0 }
0x13f6   :  { %v7478_v33 = vadd.f32 %v8650_v35, %v7470_v63 }
0x13f7   :  { %v10207_v9 = vpop.f32.mrf.mxu0 }
0x13f8   :  { %v7479_v43 = vmax.f32 %v7478_v33, 0.0 }
0x13fa   :  { %v7482_v28 = vpack.c.bf16 %v7479_v43, %v7479_v43  ;;  %7481 = vst.msk [vmem:[#allocation3] sm:$0x3] %vm7480_vm7, %v7479_v43 }
0x13fc   :  { %10219 = vmatmul.mubr.msk.bf16.vlgmr.msra.gmra.mxu0 %vm247_vm1, %v7482_v28 }
0x13fd   :  { %10234 = vmatprep.mubr.msk.bf16.mxu0 %vm10755_vm0, %v13853_v11  ;;  %10231 = vmatpush3.bf16.msra.mxu0 %v10726_v6 }
0x13fe   :  { %10232 = vmatprep.subr.bf16.mxu0 %v13853_v11  ;;  %v7678_v11 = vand.u32 127, %v7677_v17 }
0x1400   :  { %vm7679_vm8 = vcmp.lt.s32.totalorder %v7678_v11, 10 }
0x1401   :  { %10233 = vmatpush3.bf16.msra.mxu0 %v10727_v0 }
0x14bc   :  { %v7535_v20 = vpop.f32.mrf.mxu0 }
0x14bd   :  { %v7536_v29 = vadd.f32 %v8651_v23, %v7535_v20 }
0x14be   :  { %v10220_v47 = vpop.f32.mrf.mxu0 }
0x14bf   :  { %v7541_v7 = vmax.f32 %v7536_v29, 0.0 }
0x14c0   :  { %v7538_v34 = vpop.f32.mrf.mxu0 }
0x14c1   :  { %v7542_v21 = vpack.c.bf16 %v7541_v7, %v7541_v7 }
0x14c2   :  { %v10221_v31 = vpop.f32.mrf.mxu0 }
0x14c3   :  { %10227 = vmatmul.mubr.msk.bf16.vlgmr.msra.gmra.mxu1 %vm1370_vm4, %v7542_v21 }
0x1583   :  { %v7603_v45 = vpop.f32.mrf.mxu1 }
0x1584   :  { %v7604_v56 = vadd.f32 %v8654_v25, %v7603_v45 }
0x1585   :  { %v10228_v3 = vpop.f32.mrf.mxu1 }
0x1586   :  { %v7609_v51 = vmax.f32 %v7604_v56, 0.0 }
0x1587   :  { %v7606_v62 = vpop.f32.mrf.mxu1 }
0x1588   :  { %v7610_v60 = vpack.c.bf16 %v7609_v51, %v7609_v51 }
0x1589   :  { %v10229_v1 = vpop.f32.mrf.mxu1 }
0x158a   :  { %10235 = vmatmul.mubr.msk.bf16.vlgmr.msra.gmra.mxu0 %vm1370_vm4, %v7610_v60 }
0x164a   :  { %v7671_v41 = vpop.f32.mrf.mxu0 }
0x164b   :  { %v7672_v18 = vadd.f32 %v8658_v2, %v7671_v41 }
0x164c   :  { %v10236_v5 = vpop.f32.mrf.mxu0 }
0x164d   :  { %v7680_v40 = vsel %vm7679_vm8, %v7672_v18, -1e+30 }
0x164e   :  { %v7674_v49 = vpop.f32.mrf.mxu0  ;;  %v7682_v27 = vsel %vm7681_vm9, %v7680_v40, -inf }
0x164f   :  { %7683 = vmax.xlane.f32.xlu0 %v7682_v27 }
0x1650   :  { %v10237_v52 = vpop.f32.mrf.mxu0 }
0x16d8   :  { %v7684_v48 = vpop.xlane.xlu0 %7683 }
0x16d9   :  { %v7685_v55 = vsub.f32 %v7680_v40, %v7684_v48 }
0x16db   :  { %v7686_v37 = vmul.f32 1.442695, %v7685_v55 }
0x16dd   :  { %10728 = vpow2.f32 %v7686_v37 }
0x16ea   :  { %v10729_v14 = vpop.eup %10728 }
0x16eb   :  { %v7688_v30 = vsel %vm7679_vm8, %v10729_v14, 0.0 }
0x16ec   :  { %v7689_v36 = vsel %vm7681_vm9, %v7688_v30, 0.0 }
0x16ed   :  { %7690 = vadd.xlane.f32.xlu0 %v7689_v36 }
0x16ee   :  { %10743 = shalt.err (!%p10740_p4)
}
0x16ef   :  { %7709 = dma.vmem_to_hbm [thread:$0]  %s7707_s15, 32, %s13825_s18, [#allocation4]  }
0x1776   :  { %v7691_v10 = vpop.xlane.xlu0 %7690 }
0x1777   :  { %10730 = vlog2.f32 %v7691_v10 }
0x1784   :  { %v10731_v46 = vpop.eup %10730 }
0x1785   :  { %v7693_v61 = vmul.f32 0.6931472, %v10731_v46 }
0x1787   :  { %v7694_v32 = vadd.f32 %v7693_v61, %v7684_v48 }
0x1789   :  { %v7695_v59 = vsub.f32 %v7680_v40, %v7694_v32 }
0x178b   :  { %v7696_v24 = vsel %vm7679_vm8, %v7695_v59, 0.0 }
0x178c   :  { %7697 = vst [vmem:[%s13824_s17] sm:$0x3] %v7696_v24 }
0x178d   :  { %10752 = dma.done.wait [#allocation4], 32  }
0x178e   :  { %10753 = vsyncadd [#allocation4], 4294967264 }
0x178f   :  { %7715 = vsyncpa [#allocation4], 1 }

</bundles_post_ra>
